<compile_context>
chip_gen: v7x
topology: tpu7x:2x2x1
jax: 0.10.0
libtpu: 0.0.40
codegen_flags: <defaults>
</compile_context>

<pallas_src>
import jax
import jax.numpy as jnp
from jax.experimental import pallas as pl
from jax.experimental.pallas import tpu as pltpu


def _round_up(x, m):
    return (x + m - 1) // m * m


def _mlp_kernel(feat_ref, s2_ref, phase_ref,
                w1f_ref, w1sc_ref, b1_ref,
                w2_ref, b2_ref, w3_ref, b3_ref,
                out_ref):
    feat = feat_ref[...]                                       # (T, C) f32

    # Exact hi/lo bf16 split so the PE phase matmul runs on the native bf16 MXU
    # path while staying numerically equivalent to the f32 product (S2 entries
    # are powers of two -> the per-column products are exact scalings).
    f_hi = feat.astype(jnp.bfloat16)
    f_lo = (feat - f_hi.astype(jnp.float32)).astype(jnp.bfloat16)

    # arg[:, :cpe]  = pe          (-> sin(pe))
    # arg[:, cpe:]  = pe + pi/2   (-> sin == cos(pe))
    s2 = s2_ref[...]
    arg = (jnp.dot(f_hi, s2, preferred_element_type=jnp.float32)
           + jnp.dot(f_lo, s2, preferred_element_type=jnp.float32)
           + phase_ref[...])                                   # (T, 2*cpe) f32
    sincos = jnp.sin(arg)                                      # [sin(pe) | cos(pe)]

    # Layer 1: feat slab + merged sin/cos slab (no lane concat anywhere).
    h1 = (jnp.dot(f_hi, w1f_ref[...], preferred_element_type=jnp.float32)
          + jnp.dot(sincos.astype(jnp.bfloat16), w1sc_ref[...],
                    preferred_element_type=jnp.float32)
          + b1_ref[...])
    h1 = jnp.maximum(h1, 0.0)                                  # ReLU

    h2 = jnp.dot(h1.astype(jnp.bfloat16), w2_ref[...],
                 preferred_element_type=jnp.float32) + b2_ref[...]
    h2 = jnp.maximum(h2, 0.0)                                  # ReLU

    logits = jnp.dot(h2.astype(jnp.bfloat16), w3_ref[...],
                     preferred_element_type=jnp.float32) + b3_ref[...]
    # sigmoid(x) = 0.5 * (tanh(x/2) + 1): keeps the op entirely on the EUP slot.
    out_ref[...] = 0.5 * (jnp.tanh(0.5 * logits) + 1.0)


def prepare_params(params, feape=6):
    """One-time layout / dtype prep. Call once, reuse across invocations."""
    w1, b1, w2, b2, w3, b3 = params
    in_mlpC, featureC = w1.shape
    C = in_mlpC // (2 * feape + 1)
    cpe = C * feape
    assert in_mlpC == C + 2 * cpe, "w1 must have in_features = C + 2*C*feape"

    w1f = jnp.asarray(w1[:C], jnp.bfloat16)          # (C, featureC)       feat slab
    w1sc = jnp.asarray(w1[C:], jnp.bfloat16)         # (2*cpe, featureC)   [sin|cos]

    # Frequency matrix S[c, c*feape + f] = 2**f (matches torch reshape ordering),
    # duplicated for the sin / cos halves.  Powers of two -> exact in bf16.
    freq = 2.0 ** jnp.arange(feape, dtype=jnp.float32)
    S = (jnp.eye(C, dtype=jnp.float32)[:, :, None] * freq).reshape(C, cpe)
    S2 = jnp.concatenate([S, S], axis=1).astype(jnp.bfloat16)        # (C, 2*cpe)
    phase = jnp.concatenate([jnp.zeros((1, cpe), jnp.float32),
                             jnp.full((1, cpe), jnp.pi / 2, jnp.float32)],
                            axis=1)                                   # (1, 2*cpe)

    b1p = jnp.asarray(b1, jnp.float32).reshape(1, featureC)
    b2p = jnp.asarray(b2, jnp.float32).reshape(1, featureC)
    b3p = jnp.asarray(b3, jnp.float32).reshape(1, 3)
    w2b = jnp.asarray(w2, jnp.bfloat16)
    w3b = jnp.asarray(w3, jnp.bfloat16)
    return (S2, phase, w1f, w1sc, b1p, w2b, b2p, w3b, b3p)


def mlp_render_fea_noview_prepared(features, prepped, *, tile_n=2048):
    """Hot-path entry: features (N, C) + params from prepare_params()."""
    S2, phase, w1f, w1sc, b1, w2b, b2, w3b, b3 = prepped
    N, C = features.shape
    two_cpe = S2.shape[1]
    featureC = w1f.shape[1]

    feats = jnp.asarray(features, jnp.float32)

    # Tile: big for pipeline amortization, but clamp so there are >= 2 grid steps
    # whenever N allows (keeps both v7x TensorCores busy); rows multiple of 8.
    tile = min(_round_up(int(tile_n), 8),
               _round_up(max(pl.cdiv(N, 2), 8), 8))
    n_tiles = pl.cdiv(N, tile)

    full = lambda i: (0, 0)

    flops_row = 2 * (2 * C * two_cpe              # PE phase matmul (hi + lo)
                     + C * featureC               # layer-1 feat slab
                     + two_cpe * featureC         # layer-1 sincos slab
                     + featureC * featureC        # layer 2
                     + featureC * 3)              # layer 3
    transc_row = two_cpe + 3                      # sin + tanh(sigmoid)
    bytes_accessed = (N * C * 4 + N * 3 * 4                              # I/O
                      + (C * two_cpe + C * featureC + two_cpe * featureC
                         + featureC * featureC + featureC * 3) * 2       # bf16 W
                      + (2 * featureC + 3 + two_cpe) * 4)                # biases

    out = pl.pallas_call(
        _mlp_kernel,
        out_shape=jax.ShapeDtypeStruct((N, 3), jnp.float32),
        grid_spec=pl.GridSpec(
            grid=(n_tiles,),
            in_specs=[
                pl.BlockSpec((tile, C),            lambda i: (i, 0)),  # features
                pl.BlockSpec((C, two_cpe),         full),              # S2
                pl.BlockSpec((1, two_cpe),         full),              # phase
                pl.BlockSpec((C, featureC),        full),              # w1 feat slab
                pl.BlockSpec((two_cpe, featureC),  full),              # w1 [sin|cos]
                pl.BlockSpec((1, featureC),        full),              # b1
                pl.BlockSpec((featureC, featureC), full),              # w2
                pl.BlockSpec((1, featureC),        full),              # b2
                pl.BlockSpec((featureC, 3),        full),              # w3
                pl.BlockSpec((1, 3),               full),              # b3
            ],
            out_specs=pl.BlockSpec((tile, 3), lambda i: (i, 0)),
        ),
        compiler_params=pltpu.CompilerParams(
            dimension_semantics=("parallel",),
            vmem_limit_bytes=48 * 1024 * 1024),
        cost_estimate=pl.CostEstimate(
            flops=int(N * flops_row),
            transcendentals=int(N * transc_row),
            bytes_accessed=int(bytes_accessed)),
    )(feats, S2, phase, w1f, w1sc, b1, w2b, b2, w3b, b3)
    return out


def mlp_render_fea_noview(pts, viewdirs, features, params, *, feape=6, tile_n=2048):
    """Convenience wrapper matching MLPRender_Fea_noview.forward.

    pts / viewdirs are accepted (like the PyTorch module) but unused by the forward.
    For hot loops, call prepare_params() once and use mlp_render_fea_noview_prepared.
    """
    del pts, viewdirs  # unused, exactly like the PyTorch module
    prepped = prepare_params(params, feape=feape)
    return mlp_render_fea_noview_prepared(features, prepped, tile_n=tile_n)


def _init_params(key, in_mlpC, featureC):
    """Deterministic init mirroring torch.nn.Linear (uniform +-1/sqrt(fan_in)),
    with the last-layer bias zeroed as in the module's __init__."""
    ks = jax.random.split(key, 6)

    def lin(kw, kb, fan_in, fan_out, zero_bias=False):
        bound = 1.0 / jnp.sqrt(fan_in)
        w = jax.random.uniform(kw, (fan_in, fan_out), jnp.float32, -bound, bound)
        if zero_bias:
            b = jnp.zeros((1, fan_out), jnp.float32)
        else:
            b = jax.random.uniform(kb, (1, fan_out), jnp.float32, -bound, bound)
        return w, b

    w1, b1 = lin(ks[0], ks[1], in_mlpC, featureC)
    w2, b2 = lin(ks[2], ks[3], featureC, featureC)
    w3, b3 = lin(ks[4], ks[5], featureC, 3, zero_bias=True)
    return (w1, b1, w2, b2, w3, b3)


def _reference(features, params, feape):
    """Pure-JAX f32 reference reproducing the PyTorch forward semantics."""
    w1, b1, w2, b2, w3, b3 = params
    N, C = features.shape
    freq = 2.0 ** jnp.arange(feape, dtype=jnp.float32)
    pe = (features[:, :, None] * freq).reshape(N, C * feape)
    mlp_in = jnp.concatenate([features, jnp.sin(pe), jnp.cos(pe)], axis=-1)
    h1 = jnp.maximum(mlp_in @ w1 + b1, 0.0)
    h2 = jnp.maximum(h1 @ w2 + b2, 0.0)
    return jax.nn.sigmoid(h2 @ w3 + b3)


if __name__ == "__main__":
    key = jax.random.PRNGKey(0)
    k_feat, k_pts, k_dirs, k_params = jax.random.split(key, 4)

    # Small shapes; N deliberately not a multiple of the tile so the ragged
    # last block (no explicit pad) and multi-step grid are exercised.
    N, inChanel, feape, featureC = 1000, 4, 6, 128
    in_mlpC = 2 * feape * inChanel + inChanel  # 52

    features = jax.random.normal(k_feat, (N, inChanel), jnp.float32)
    pts = jax.random.normal(k_pts, (N, 3), jnp.float32)        # unused by forward
    viewdirs = jax.random.normal(k_dirs, (N, 3), jnp.float32)  # unused by forward
    params = _init_params(k_params, in_mlpC, featureC)

    # Hot-path usage: prepare once, call with prepared params.
    prepped = prepare_params(params, feape=feape)
    rgb = mlp_render_fea_noview_prepared(features, prepped, tile_n=256)
    rgb = jax.block_until_ready(rgb)

    ref = _reference(features, params, feape)
    assert rgb.shape == (N, 3)
    # bf16 matmul operands with f32 accumulation -> relaxed tolerance vs f32 reference.
    assert jnp.max(jnp.abs(rgb - ref)) < 3e-2, "mismatch vs reference"

    # Also exercise the module-signature convenience wrapper once.
    rgb2 = jax.block_until_ready(
        mlp_render_fea_noview(pts, viewdirs, features, params, feape=feape))
    assert jnp.max(jnp.abs(rgb2 - ref)) < 3e-2, "mismatch vs reference (wrapper)"

    print("KERNEL_OK")
</pallas_src>

<mosaic_0001>
module attributes {stable_mosaic.version = 11 : i64} {
  func.func @_mlp_kernel(%arg0: i32, %arg1: memref<256x4xf32, #tpu.memory_space<vmem>>, %arg2: memref<4x48xbf16, #tpu.memory_space<vmem>>, %arg3: memref<1x48xf32, #tpu.memory_space<vmem>>, %arg4: memref<4x128xbf16, #tpu.memory_space<vmem>>, %arg5: memref<48x128xbf16, #tpu.memory_space<vmem>>, %arg6: memref<1x128xf32, #tpu.memory_space<vmem>>, %arg7: memref<128x128xbf16, #tpu.memory_space<vmem>>, %arg8: memref<1x128xf32, #tpu.memory_space<vmem>>, %arg9: memref<128x3xbf16, #tpu.memory_space<vmem>>, %arg10: memref<1x3xf32, #tpu.memory_space<vmem>>, %arg11: memref<256x3xf32, #tpu.memory_space<vmem>>) attributes {dimension_semantics = [#tpu.dimension_semantics<parallel>], iteration_bounds = array<i64: 4>, scalar_prefetch = 0 : i64, scratch_operands = 0 : i64, tpu.core_type = #tpu.core_type<tc>, window_params = [{transform_indices = @transform_0, window_bounds = array<i64: 256, 4>}, {pipeline_mode = #tpu.pipeline_mode<synchronous>, transform_indices = @transform_1, window_bounds = array<i64: 4, 48>}, {pipeline_mode = #tpu.pipeline_mode<synchronous>, transform_indices = @transform_2, window_bounds = array<i64: 1, 48>}, {pipeline_mode = #tpu.pipeline_mode<synchronous>, transform_indices = @transform_3, window_bounds = array<i64: 4, 128>}, {pipeline_mode = #tpu.pipeline_mode<synchronous>, transform_indices = @transform_4, window_bounds = array<i64: 48, 128>}, {pipeline_mode = #tpu.pipeline_mode<synchronous>, transform_indices = @transform_5, window_bounds = array<i64: 1, 128>}, {pipeline_mode = #tpu.pipeline_mode<synchronous>, transform_indices = @transform_6, window_bounds = array<i64: 128, 128>}, {pipeline_mode = #tpu.pipeline_mode<synchronous>, transform_indices = @transform_7, window_bounds = array<i64: 1, 128>}, {pipeline_mode = #tpu.pipeline_mode<synchronous>, transform_indices = @transform_8, window_bounds = array<i64: 128, 3>}, {pipeline_mode = #tpu.pipeline_mode<synchronous>, transform_indices = @transform_9, window_bounds = array<i64: 1, 3>}, {transform_indices = @transform_10, window_bounds = array<i64: 256, 3>}]} {
    %c0 = arith.constant 0 : index
    %c0_0 = arith.constant 0 : index
    %0 = vector.load %arg1[%c0, %c0_0] : memref<256x4xf32, #tpu.memory_space<vmem>>, vector<256x4xf32>
    %1 = arith.truncf %0 : vector<256x4xf32> to vector<256x4xbf16>
    %2 = arith.extf %1 : vector<256x4xbf16> to vector<256x4xf32>
    %3 = arith.subf %0, %2 : vector<256x4xf32>
    %4 = arith.truncf %3 : vector<256x4xf32> to vector<256x4xbf16>
    %c0_1 = arith.constant 0 : index
    %c0_2 = arith.constant 0 : index
    %5 = vector.load %arg2[%c0_1, %c0_2] : memref<4x48xbf16, #tpu.memory_space<vmem>>, vector<4x48xbf16>
    %cst = arith.constant dense<0.000000e+00> : vector<256x48xf32>
    %6 = tpu.matmul %1, %5, %cst {dimension_numbers = #tpu.dot_dimension_numbers<[1], [0], [0], [1], [0, 0, 1, 1], [], []>} : vector<256x4xbf16>, vector<4x48xbf16>, vector<256x48xf32> -> vector<256x48xf32>
    %cst_3 = arith.constant dense<0.000000e+00> : vector<256x48xf32>
    %7 = tpu.matmul %4, %5, %cst_3 {dimension_numbers = #tpu.dot_dimension_numbers<[1], [0], [0], [1], [0, 0, 1, 1], [], []>} : vector<256x4xbf16>, vector<4x48xbf16>, vector<256x48xf32> -> vector<256x48xf32>
    %8 = arith.addf %6, %7 : vector<256x48xf32>
    %c0_4 = arith.constant 0 : index
    %c0_5 = arith.constant 0 : index
    %9 = vector.load %arg3[%c0_4, %c0_5] : memref<1x48xf32, #tpu.memory_space<vmem>>, vector<1x48xf32>
    %10 = vector.broadcast %9 : vector<1x48xf32> to vector<256x48xf32>
    %11 = arith.addf %8, %10 : vector<256x48xf32>
    %12 = math.sin %11 : vector<256x48xf32>
    %c0_6 = arith.constant 0 : index
    %c0_7 = arith.constant 0 : index
    %13 = vector.load %arg4[%c0_6, %c0_7] : memref<4x128xbf16, #tpu.memory_space<vmem>>, vector<4x128xbf16>
    %cst_8 = arith.constant dense<0.000000e+00> : vector<256x128xf32>
    %14 = tpu.matmul %1, %13, %cst_8 {dimension_numbers = #tpu.dot_dimension_numbers<[1], [0], [0], [1], [0, 0, 1, 1], [], []>} : vector<256x4xbf16>, vector<4x128xbf16>, vector<256x128xf32> -> vector<256x128xf32>
    %15 = arith.truncf %12 : vector<256x48xf32> to vector<256x48xbf16>
    %c0_9 = arith.constant 0 : index
    %c0_10 = arith.constant 0 : index
    %16 = vector.load %arg5[%c0_9, %c0_10] : memref<48x128xbf16, #tpu.memory_space<vmem>>, vector<48x128xbf16>
    %cst_11 = arith.constant dense<0.000000e+00> : vector<256x128xf32>
    %17 = tpu.matmul %15, %16, %cst_11 {dimension_numbers = #tpu.dot_dimension_numbers<[1], [0], [0], [1], [0, 0, 1, 1], [], []>} : vector<256x48xbf16>, vector<48x128xbf16>, vector<256x128xf32> -> vector<256x128xf32>
    %18 = arith.addf %14, %17 : vector<256x128xf32>
    %c0_12 = arith.constant 0 : index
    %c0_13 = arith.constant 0 : index
    %19 = vector.load %arg6[%c0_12, %c0_13] : memref<1x128xf32, #tpu.memory_space<vmem>>, vector<1x128xf32>
    %20 = vector.broadcast %19 : vector<1x128xf32> to vector<256x128xf32>
    %21 = arith.addf %18, %20 : vector<256x128xf32>
    %cst_14 = arith.constant 0.000000e+00 : f32
    %22 = vector.broadcast %cst_14 : f32 to vector<256x128xf32>
    %23 = arith.maximumf %21, %22 : vector<256x128xf32>
    %24 = arith.truncf %23 : vector<256x128xf32> to vector<256x128xbf16>
    %c0_15 = arith.constant 0 : index
    %c0_16 = arith.constant 0 : index
    %25 = vector.load %arg7[%c0_15, %c0_16] : memref<128x128xbf16, #tpu.memory_space<vmem>>, vector<128x128xbf16>
    %cst_17 = arith.constant dense<0.000000e+00> : vector<256x128xf32>
    %26 = tpu.matmul %24, %25, %cst_17 {dimension_numbers = #tpu.dot_dimension_numbers<[1], [0], [0], [1], [0, 0, 1, 1], [], []>} : vector<256x128xbf16>, vector<128x128xbf16>, vector<256x128xf32> -> vector<256x128xf32>
    %c0_18 = arith.constant 0 : index
    %c0_19 = arith.constant 0 : index
    %27 = vector.load %arg8[%c0_18, %c0_19] : memref<1x128xf32, #tpu.memory_space<vmem>>, vector<1x128xf32>
    %28 = vector.broadcast %27 : vector<1x128xf32> to vector<256x128xf32>
    %29 = arith.addf %26, %28 : vector<256x128xf32>
    %cst_20 = arith.constant 0.000000e+00 : f32
    %30 = vector.broadcast %cst_20 : f32 to vector<256x128xf32>
    %31 = arith.maximumf %29, %30 : vector<256x128xf32>
    %32 = arith.truncf %31 : vector<256x128xf32> to vector<256x128xbf16>
    %c0_21 = arith.constant 0 : index
    %c0_22 = arith.constant 0 : index
    %33 = vector.load %arg9[%c0_21, %c0_22] : memref<128x3xbf16, #tpu.memory_space<vmem>>, vector<128x3xbf16>
    %cst_23 = arith.constant dense<0.000000e+00> : vector<256x3xf32>
    %34 = tpu.matmul %32, %33, %cst_23 {dimension_numbers = #tpu.dot_dimension_numbers<[1], [0], [0], [1], [0, 0, 1, 1], [], []>} : vector<256x128xbf16>, vector<128x3xbf16>, vector<256x3xf32> -> vector<256x3xf32>
    %c0_24 = arith.constant 0 : index
    %c0_25 = arith.constant 0 : index
    %35 = vector.load %arg10[%c0_24, %c0_25] : memref<1x3xf32, #tpu.memory_space<vmem>>, vector<1x3xf32>
    %36 = vector.broadcast %35 : vector<1x3xf32> to vector<256x3xf32>
    %37 = arith.addf %34, %36 : vector<256x3xf32>
    %cst_26 = arith.constant 5.000000e-01 : f32
    %38 = vector.broadcast %cst_26 : f32 to vector<256x3xf32>
    %39 = arith.mulf %38, %37 : vector<256x3xf32>
    %40 = math.tanh %39 : vector<256x3xf32>
    %cst_27 = arith.constant 1.000000e+00 : f32
    %41 = vector.broadcast %cst_27 : f32 to vector<256x3xf32>
    %42 = arith.addf %40, %41 : vector<256x3xf32>
    %cst_28 = arith.constant 5.000000e-01 : f32
    %43 = vector.broadcast %cst_28 : f32 to vector<256x3xf32>
    %44 = arith.mulf %43, %42 : vector<256x3xf32>
    %c0_29 = arith.constant 0 : index
    %c0_30 = arith.constant 0 : index
    %45 = vector.load %arg11[%c0_29, %c0_30] : memref<256x3xf32, #tpu.memory_space<vmem>>, vector<256x3xf32>
    tpu.vector_store %arg11[%c0_29, %c0_30], %44 {strides = array<i32>} : memref<256x3xf32, #tpu.memory_space<vmem>>, vector<256x3xf32>,
    return
  }
  func.func @transform_0(%arg0: i32) -> (i32, i32) {
    %c0_i32 = arith.constant 0 : i32
    %c0_i32_0 = arith.constant 0 : i32
    return %arg0, %c0_i32 : i32, i32
  }
  func.func @transform_1(%arg0: i32) -> (i32, i32) {
    %c0_i32 = arith.constant 0 : i32
    %c0_i32_0 = arith.constant 0 : i32
    %c0_i32_1 = arith.constant 0 : i32
    return %c0_i32, %c0_i32_0 : i32, i32
  }
  func.func @transform_2(%arg0: i32) -> (i32, i32) {
    %c0_i32 = arith.constant 0 : i32
    %c0_i32_0 = arith.constant 0 : i32
    %c0_i32_1 = arith.constant 0 : i32
    return %c0_i32, %c0_i32_0 : i32, i32
  }
  func.func @transform_3(%arg0: i32) -> (i32, i32) {
    %c0_i32 = arith.constant 0 : i32
    %c0_i32_0 = arith.constant 0 : i32
    %c0_i32_1 = arith.constant 0 : i32
    return %c0_i32, %c0_i32_0 : i32, i32
  }
  func.func @transform_4(%arg0: i32) -> (i32, i32) {
    %c0_i32 = arith.constant 0 : i32
    %c0_i32_0 = arith.constant 0 : i32
    %c0_i32_1 = arith.constant 0 : i32
    return %c0_i32, %c0_i32_0 : i32, i32
  }
  func.func @transform_5(%arg0: i32) -> (i32, i32) {
    %c0_i32 = arith.constant 0 : i32
    %c0_i32_0 = arith.constant 0 : i32
    %c0_i32_1 = arith.constant 0 : i32
    return %c0_i32, %c0_i32_0 : i32, i32
  }
  func.func @transform_6(%arg0: i32) -> (i32, i32) {
    %c0_i32 = arith.constant 0 : i32
    %c0_i32_0 = arith.constant 0 : i32
    %c0_i32_1 = arith.constant 0 : i32
    return %c0_i32, %c0_i32_0 : i32, i32
  }
  func.func @transform_7(%arg0: i32) -> (i32, i32) {
    %c0_i32 = arith.constant 0 : i32
    %c0_i32_0 = arith.constant 0 : i32
    %c0_i32_1 = arith.constant 0 : i32
    return %c0_i32, %c0_i32_0 : i32, i32
  }
  func.func @transform_8(%arg0: i32) -> (i32, i32) {
    %c0_i32 = arith.constant 0 : i32
    %c0_i32_0 = arith.constant 0 : i32
    %c0_i32_1 = arith.constant 0 : i32
    return %c0_i32, %c0_i32_0 : i32, i32
  }
  func.func @transform_9(%arg0: i32) -> (i32, i32) {
    %c0_i32 = arith.constant 0 : i32
    %c0_i32_0 = arith.constant 0 : i32
    %c0_i32_1 = arith.constant 0 : i32
    return %c0_i32, %c0_i32_0 : i32, i32
  }
  func.func @transform_10(%arg0: i32) -> (i32, i32) {
    %c0_i32 = arith.constant 0 : i32
    %c0_i32_0 = arith.constant 0 : i32
    return %arg0, %c0_i32 : i32, i32
  }
}

</mosaic_0001>

<bundles_post_ra>
// kernel: tpu_custom_call.1
= control target key start
LH: loop header
LB: loop body
LE: loop exit
PB: predicated region body
PF: predicated region fallthrough
CT: control target
= control target key end

     0   :  { %s7064_s13 = smov 0   ;;  %s7066_s14 = smov 0   ;;  %s10730_s0 = inlined_call_operand.vmem [shape: f32[1000,4], index: 0, kind: input, shape index: {}]   ;;  %s10731_s1 = inlined_call_operand.vmem [shape: bf16[4,48], index: 1, kind: input, shape index: {}]   ;;  %s10732_s2 = inlined_call_operand.vmem [shape: f32[1,48], index: 2, kind: input, shape index: {}]   ;;  %s10733_s3 = inlined_call_operand.vmem [shape: bf16[4,128], index: 3, kind: input, shape index: {}]   ;;  %s10734_s4 = inlined_call_operand.vmem [shape: bf16[48,128], index: 4, kind: input, shape index: {}]   ;;  %s10735_s5 = inlined_call_operand.vmem [shape: f32[1,128], index: 5, kind: input, shape index: {}]   ;;  %s10736_s6 = inlined_call_operand.vmem [shape: bf16[128,128], index: 6, kind: input, shape index: {}]   ;;  %s10737_s7 = inlined_call_operand.vmem [shape: f32[1,128], index: 7, kind: input, shape index: {}]   ;;  %s10738_s8 = inlined_call_operand.vmem [shape: bf16[128,3], index: 8, kind: input, shape index: {}]   ;;  %s10739_s9 = inlined_call_operand.vmem [shape: f32[1,3], index: 9, kind: input, shape index: {}]   ;;  %s10740_s10 = inlined_call_operand.vmem [shape: f32[1000,3], index: 10, kind: output, shape index: {}]  }
   0x1   :  { %s7068_s15 = smov 0  }
   0x2 LB: > { %s7077_s16 = sadd.s32 4294967295, %s6969_s15   ;;  %s7079_s17 = sadd.s32 1, %s6969_s15   ;;  %s6969_s15 = sphi %s7068_s15, %s11258_s15   ;;  %s6965_s14 = sphi %s7066_s14, %s11257_s14   ;;  %s6961_s13 = sphi %s7064_s13, %s11256_s13  }
   0x3   : > { %s239_s18 = ssub.s32 %s6969_s15, %s7079_s17  ;;  %s242_s19 = sadd.s32 1, %s6965_s14 }
   0x4   : > { %p240_p0 = scmp.eq.s32.totalorder %s239_s18, 0  ;;  %p252_p1 = scmp.ne.s32.totalorder %s6965_s14, %s6961_s13 }
   0x5   : > { %p253_p2 = scmp.eq.s32.totalorder %s7077_s16, 3  ;;  %p5818_p3 = scmp.ge.s32.totalorder %s6969_s15, 1 }
   0x6   : > { %s7087_s20 = scalar_select %p240_p0, %s6965_s14, %s242_s19  }
   0x7   : > { %p7089_p4 = por %p253_p2, %p252_p1  ;;  %p321_p5 = scmp.lt.s32.totalorder %s6969_s15, 5 }
   0x9   : > { %p322_p6 = pnand %p5818_p3, %p321_p5 }
   0xb   : > { %325 = sbr.rel (%p322_p6) target bundleno = 1925 (0x785), region = 60 }
  0x12   : > { %v510_v0 = vld [vmem:[%s10731_s1] sm:$0x3]  ;;  %vm10879_vm0 = vcmask 1041408   ;;  %s7097_s24 = sshll.u32 %s7077_s16, 5  ;;  %vm10878_vm1 = vcmask 31744   ;;  %s359_s18 = sand.u32 1, %s6961_s13  }
  0x13   : > { %6475 = vmatprep.subr.msk.bf16.mxu0 %vm10879_vm0, %v510_v0  ;;  %v562_v1 = vsel %vm10879_vm0, %v510_v0, 0  ;;  %p367_p7 = scmp.lt.s32.totalorder %s7097_s24, 124  ;;  %s5819_s19 = sshll.u32 %s359_s18, 8 }
  0x14   : > { %6176 = vmatpush3.bf16.msra.mxu0 %v562_v1  ;;  %s10504_s13 = scalar_lea.vmem [#allocation2], %s5819_s19   ;;  %s5484_s22 = ssub.s32 (%p7089_p4), 125, %s7097_s24 }
  0x15   : > { %s368_s25 = scalar_select %p367_p7, %s7097_s24, 124  ;;  %6476 = vmatprep.subr.msk.bf16.mxu0 %vm10879_vm0, %v510_v0 }
  0x16   : > { %s6054_s23 = sshll.u32 (%p7089_p4), %s7077_s16, 8  ;;  %p5485_p8 = scmp.lt.s32.totalorder (%p7089_p4), %s5484_s22, 32 }
  0x17   : > { %s5821_s26 = sshll.u32 %s368_s25, 3  ;;  %s10598_s27 = scalar_lea.vmem (%p7089_p4), %s10740_s10, %s6054_s23  }
  0x18   : > { %s7107_s29 = scalar_lea.vmem %s10730_s0, %s5821_s26 }
  0x19   : > { %v382_v2 = vld [vmem:[%s7107_s29] sm:$0xff]  ;;  %v383_v3 = vld [vmem:[%s7107_s29 + $0x8] sm:$0xff]  ;;  %v384_v4 = vld [vmem:[%s7107_s29 + $0x10] sm:$0xff] }
  0x1a   : > { %v7112_v5 = vpack.c.bf16 %v383_v3, %v382_v2  ;;  %v385_v6 = vld [vmem:[%s7107_s29 + $0x18] sm:$0xff]  ;;  %v386_v7 = vld [vmem:[%s7107_s29 + $0x20] sm:$0xff]  ;;  %v387_v8 = vld [vmem:[%s7107_s29 + $0x28] sm:$0xff] }
  0x1b   : > { %v7117_v9 = vpack.c.bf16 %v385_v6, %v384_v4  ;;  %v7119_v10 = vpack.c.bf16 %v387_v8, %v386_v7  ;;  %v388_v11 = vld [vmem:[%s7107_s29 + $0x30] sm:$0xff]  ;;  %v389_v12 = vld [vmem:[%s7107_s29 + $0x38] sm:$0xff]  ;;  %v390_v20 = vld [vmem:[%s7107_s29 + $0x40] sm:$0xff] }
  0x1c   : > { %10882 = vst [vmem:[#allocation3_spill] sm:$0xff] %v7112_v5  ;;  %v430_v13 = vunpack.c.l.bf16 %v7112_v5  ;;  %v431_v14 = vunpack.c.h.bf16 %v7112_v5  ;;  %v7125_v15 = vpack.c.bf16 %v389_v12, %v388_v11  ;;  %v391_v21 = vld [vmem:[%s7107_s29 + $0x48] sm:$0xff]  ;;  %v392_v32 = vld [vmem:[%s7107_s29 + $0x50] sm:$0xff]  ;;  %v393_v33 = vld [vmem:[%s7107_s29 + $0x58] sm:$0xff] }
  0x1d   : > { %10883 = vst [vmem:[#allocation4_spill] sm:$0xff] %v7117_v9  ;;  %10884 = vst [vmem:[#allocation5_spill] sm:$0xff] %v7119_v10  ;;  %v432_v16 = vunpack.c.l.bf16 %v7117_v9  ;;  %v433_v17 = vunpack.c.h.bf16 %v7117_v9  ;;  %v434_v18 = vunpack.c.l.bf16 %v7119_v10  ;;  %v435_v19 = vunpack.c.h.bf16 %v7119_v10  ;;  %v394_v36 = vld [vmem:[%s7107_s29 + $0x60] sm:$0xff]  ;;  %v395_v37 = vld [vmem:[%s7107_s29 + $0x68] sm:$0xff] }
  0x1e   : > { %10885 = vst [vmem:[#allocation6_spill] sm:$0xff] %v7125_v15  ;;  %v462_v22 = vsub.f32 %v382_v2, %v430_v13  ;;  %v463_v23 = vsub.f32 %v383_v3, %v431_v14  ;;  %v436_v24 = vunpack.c.l.bf16 %v7125_v15  ;;  %v437_v25 = vunpack.c.h.bf16 %v7125_v15  ;;  %v396_v46 = vld [vmem:[%s7107_s29 + $0x70] sm:$0xff]  ;;  %v397_v47 = vld [vmem:[%s7107_s29 + $0x78] sm:$0xff]  ;;  %v398_v51 = vld [vmem:[%s7107_s29 + $0x80] sm:$0xff] }
  0x1f   : > { %v464_v26 = vsub.f32 %v384_v4, %v432_v16  ;;  %v465_v27 = vsub.f32 %v385_v6, %v433_v17  ;;  %v466_v28 = vsub.f32 %v386_v7, %v434_v18  ;;  %v467_v29 = vsub.f32 %v387_v8, %v435_v19  ;;  %v399_v52 = vld [vmem:[%s7107_s29 + $0x88] sm:$0xff]  ;;  %v400_v4 = vld [vmem:[%s7107_s29 + $0x90] sm:$0xff]  ;;  %v401_v6 = vld [vmem:[%s7107_s29 + $0x98] sm:$0xff] }
  0x20   : > { %v494_v30 = vpack.c.bf16 %v463_v23, %v462_v22  ;;  %v7135_v31 = vpack.c.bf16 %v391_v21, %v390_v20  ;;  %v468_v40 = vsub.f32 %v388_v11, %v436_v24  ;;  %v469_v41 = vsub.f32 %v389_v12, %v437_v25  ;;  %v402_v7 = vld [vmem:[%s7107_s29 + $0xa0] sm:$0xff]  ;;  %v403_v8 = vld [vmem:[%s7107_s29 + $0xa8] sm:$0xff]  ;;  %v404_v24 = vld [vmem:[%s7107_s29 + $0xb0] sm:$0xff] }
  0x21   : > { %v495_v34 = vpack.c.bf16 %v465_v27, %v464_v26  ;;  %v496_v35 = vpack.c.bf16 %v467_v29, %v466_v28  ;;  %v7145_v42 = vpack.c.bf16 %v393_v33, %v392_v32  ;;  %v7148_v45 = vpack.c.bf16 %v395_v37, %v394_v36  ;;  %v405_v25 = vld [vmem:[%s7107_s29 + $0xb8] sm:$0xff]  ;;  %v406_v26 = vld [vmem:[%s7107_s29 + $0xc0] sm:$0xff]  ;;  %v407_v27 = vld [vmem:[%s7107_s29 + $0xc8] sm:$0xff] }
  0x22   : > { %10886 = vst [vmem:[#allocation7_spill] sm:$0xff] %v7135_v31  ;;  %6177 = vmatprep.mubr.msk.bf16.mxu0 %vm10878_vm1, %v494_v30  ;;  %v438_v38 = vunpack.c.l.bf16 %v7135_v31  ;;  %v439_v39 = vunpack.c.h.bf16 %v7135_v31  ;;  %v497_v48 = vpack.c.bf16 %v469_v41, %v468_v40  ;;  %v7159_v58 = vpack.c.bf16 %v397_v47, %v396_v46  ;;  %v408_v41 = vld [vmem:[%s7107_s29 + $0xd0] sm:$0xff] }
  0x23   : > { %6178 = vmatmul.mubr.msk.bf16.vlgmr.msra.gmra.mrb[0].mxu0 %vm10878_vm1, %v495_v34  ;;  %10887 = vst [vmem:[#allocation8_spill] sm:$0xff] %v7145_v42  ;;  %10888 = vst [vmem:[#allocation9_spill] sm:$0xff] %v7148_v45  ;;  %v440_v49 = vunpack.c.l.bf16 %v7145_v42  ;;  %v441_v50 = vunpack.c.h.bf16 %v7145_v42  ;;  %v442_v54 = vunpack.c.l.bf16 %v7148_v45  ;;  %v443_v55 = vunpack.c.h.bf16 %v7148_v45 }
  0x24   : > { %6210 = vmatpush3.bf16.msra.mxu0 %v562_v1  ;;  %6181 = vmatprep.mubr.msk.bf16.mxu0 %vm10878_vm1, %v496_v35  ;;  %v470_v43 = vsub.f32 %v390_v20, %v438_v38  ;;  %v471_v44 = vsub.f32 %v391_v21, %v439_v39  ;;  %10889 = vst [vmem:[#allocation10_spill] sm:$0xff] %v7159_v58  ;;  %v444_v63 = vunpack.c.l.bf16 %v7159_v58  ;;  %v445_v0 = vunpack.c.h.bf16 %v7159_v58 }
  0x25   : > { %v472_v56 = vsub.f32 %v392_v32, %v440_v49  ;;  %v473_v57 = vsub.f32 %v393_v33, %v441_v50  ;;  %v474_v59 = vsub.f32 %v394_v36, %v442_v54  ;;  %v475_v60 = vsub.f32 %v395_v37, %v443_v55 }
  0x26   : > { %v498_v53 = vpack.c.bf16 %v471_v44, %v470_v43  ;;  %v7162_v61 = vpack.c.bf16 %v399_v52, %v398_v51  ;;  %v476_v11 = vsub.f32 %v396_v46, %v444_v63  ;;  %v477_v12 = vsub.f32 %v397_v47, %v445_v0  ;;  %v409_v43 = vld [vmem:[%s7107_s29 + $0xd8] sm:$0xff]  ;;  %v410_v44 = vld [vmem:[%s7107_s29 + $0xe0] sm:$0xff]  ;;  %v411_v46 = vld [vmem:[%s7107_s29 + $0xe8] sm:$0xff] }
  0x27   : > { %v499_v62 = vpack.c.bf16 %v473_v57, %v472_v56  ;;  %v500_v1 = vpack.c.bf16 %v475_v60, %v474_v59  ;;  %v7173_v13 = vpack.c.bf16 %v401_v6, %v400_v4  ;;  %v7176_v17 = vpack.c.bf16 %v403_v8, %v402_v7  ;;  %v412_v60 = vld [vmem:[%s7107_s29 + $0xf0] sm:$0xff] }
  0x28   : > { %10890 = vst [vmem:[#allocation11_spill] sm:$0xff] %v7162_v61  ;;  %v446_v2 = vunpack.c.l.bf16 %v7162_v61  ;;  %v447_v3 = vunpack.c.h.bf16 %v7162_v61  ;;  %v501_v18 = vpack.c.bf16 %v477_v12, %v476_v11  ;;  %v7187_v30 = vpack.c.bf16 %v405_v25, %v404_v24 }
  0x29   : > { %10891 = vst [vmem:[#allocation12_spill] sm:$0xff] %v7173_v13  ;;  %10892 = vst [vmem:[#allocation13_spill] sm:$0xff] %v7176_v17  ;;  %v448_v19 = vunpack.c.l.bf16 %v7173_v13  ;;  %v449_v20 = vunpack.c.h.bf16 %v7173_v13  ;;  %v450_v22 = vunpack.c.l.bf16 %v7176_v17  ;;  %v451_v23 = vunpack.c.h.bf16 %v7176_v17 }
  0x2a   : > { %v478_v14 = vsub.f32 %v398_v51, %v446_v2  ;;  %v479_v16 = vsub.f32 %v399_v52, %v447_v3  ;;  %10893 = vst [vmem:[#allocation14_spill] sm:$0xff] %v7187_v30  ;;  %v7190_v34 = vpack.c.bf16 %v407_v27, %v406_v26  ;;  %v452_v36 = vunpack.c.l.bf16 %v7187_v30 }
  0x2b   : > { %6182 = vmatmul.mubr.msk.bf16.gmra.mrb[4].mxu0 %vm10878_vm1, %v497_v48  ;;  %v480_v28 = vsub.f32 %v400_v4, %v448_v19  ;;  %v481_v29 = vsub.f32 %v401_v6, %v449_v20  ;;  %v482_v32 = vsub.f32 %v402_v7, %v450_v22  ;;  %v483_v33 = vsub.f32 %v403_v8, %v451_v23 }
  0x2c   : > { %6185 = vmatprep.mubr.msk.bf16.mxu0 %vm10878_vm1, %v498_v53  ;;  %v502_v21 = vpack.c.bf16 %v479_v16, %v478_v14  ;;  %10894 = vst [vmem:[#allocation15_spill] sm:$0xff] %v7190_v34  ;;  %v453_v37 = vunpack.c.h.bf16 %v7187_v30  ;;  %v454_v39 = vunpack.c.l.bf16 %v7190_v34  ;;  %v455_v40 = vunpack.c.h.bf16 %v7190_v34  ;;  %v7256_v16 = vld [vmem:[%s10732_s2] ss:$0 sm:$0xff] }
  0x2d   : > { %v503_v35 = vpack.c.bf16 %v481_v29, %v480_v28  ;;  %v504_v38 = vpack.c.bf16 %v483_v33, %v482_v32  ;;  %v484_v47 = vsub.f32 %v404_v24, %v452_v36  ;;  %v7201_v49 = vpack.c.bf16 %v409_v43, %v408_v41 }
  0x2e   : > { %v485_v48 = vsub.f32 %v405_v25, %v453_v37  ;;  %v486_v50 = vsub.f32 %v406_v26, %v454_v39  ;;  %v487_v51 = vsub.f32 %v407_v27, %v455_v40  ;;  %v7204_v52 = vpack.c.bf16 %v411_v46, %v410_v44 }
  0x2f   : > { %10895 = vst [vmem:[#allocation16_spill] sm:$0xff] %v7201_v49  ;;  %v456_v54 = vunpack.c.l.bf16 %v7201_v49  ;;  %v457_v55 = vunpack.c.h.bf16 %v7201_v49 }
  0x30   : > { %10896 = vst [vmem:[#allocation17_spill] sm:$0xff] %v7204_v52  ;;  %v505_v53 = vpack.c.bf16 %v485_v48, %v484_v47  ;;  %v506_v56 = vpack.c.bf16 %v487_v51, %v486_v50  ;;  %v458_v57 = vunpack.c.l.bf16 %v7204_v52  ;;  %v459_v59 = vunpack.c.h.bf16 %v7204_v52 }
  0x31   : > { %v488_v63 = vsub.f32 %v408_v41, %v456_v54  ;;  %v489_v0 = vsub.f32 %v409_v43, %v457_v55 }
  0x32   : > { %v490_v2 = vsub.f32 %v410_v44, %v458_v57  ;;  %v491_v3 = vsub.f32 %v411_v46, %v459_v59 }
  0x33   : > { %6186 = vmatmul.mubr.msk.bf16.gmra.mrb[8].mxu0 %vm10878_vm1, %v499_v62  ;;  %v413_v62 = vld [vmem:[%s7107_s29 + $0xf8] sm:$0xff]  ;;  %v507_v4 = vpack.c.bf16 %v489_v0, %v488_v63 }
  0x34   : > { %6189 = vmatprep.mubr.msk.bf16.mxu0 %vm10878_vm1, %v500_v1  ;;  %v7213_v1 = vpack.c.bf16 %v413_v62, %v412_v60  ;;  %v508_v8 = vpack.c.bf16 %v491_v3, %v490_v2  ;;  %v10748_v2 = vmov 683565275  }
  0x36   : > { %10897 = vst [vmem:[#allocation18_spill] sm:$0xff] %v7213_v1  ;;  %v460_v6 = vunpack.c.l.bf16 %v7213_v1  ;;  %v461_v7 = vunpack.c.h.bf16 %v7213_v1 }
  0x38   : > { %v492_v11 = vsub.f32 %v412_v60, %v460_v6  ;;  %v493_v12 = vsub.f32 %v413_v62, %v461_v7  ;;  %v10744_v7 = vmov 2475754826  }
  0x3a   : > { %v509_v14 = vpack.c.bf16 %v493_v12, %v492_v11  ;;  %v10746_v11 = vmov 2131351028  }
  0x3b   : > { %6190 = vmatmul.mubr.msk.bf16.gmra.mrb[12].mxu0 %vm10878_vm1, %v501_v18 }
  0x3c   : > { %6193 = vmatprep.mubr.msk.bf16.mxu0 %vm10878_vm1, %v502_v21 }
  0x43   : > { %6194 = vmatmul.mubr.msk.bf16.gmra.mrb[16].mxu0 %vm10878_vm1, %v503_v35 }
  0x44   : > { %6197 = vmatprep.mubr.msk.bf16.mxu0 %vm10878_vm1, %v504_v38 }
  0x4b   : > { %6198 = vmatmul.mubr.msk.bf16.gmra.mrb[20].mxu0 %vm10878_vm1, %v505_v53 }
  0x4c   : > { %6201 = vmatprep.mubr.msk.bf16.mxu0 %vm10878_vm1, %v506_v56 }
  0x53   : > { %6202 = vmatmul.mubr.msk.bf16.gmra.mrb[24].mxu0 %vm10878_vm1, %v507_v4 }
  0x54   : > { %6205 = vmatprep.mubr.msk.bf16.mxu0 %vm10878_vm1, %v508_v8 }
  0x5b   : > { %6206 = vmatmul.mubr.msk.bf16.gmra.mrb[28].mxu0 %vm10878_vm1, %v509_v14  ;;  %v10761_v14 = vmov 2102212464  }
  0x5c   : > { %6211 = vmatprep.mubr.msk.bf16.mxu0 %vm10878_vm1, %v7112_v5 }
  0x63   : > { %6212 = vmatmul.mubr.msk.bf16.vlgmr.msra.gmra.mrb[0].mxu0 %vm10878_vm1, %v7117_v9 }
  0x64   : > { %6215 = vmatprep.mubr.msk.bf16.mxu0 %vm10878_vm1, %v7119_v10 }
  0x6b   : > { %6216 = vmatmul.mubr.msk.bf16.gmra.mrb[4].mxu0 %vm10878_vm1, %v7125_v15 }
  0x6c   : > { %6219 = vmatprep.mubr.msk.bf16.mxu0 %vm10878_vm1, %v7135_v31 }
  0x73   : > { %6220 = vmatmul.mubr.msk.bf16.gmra.mrb[8].mxu0 %vm10878_vm1, %v7145_v42 }
  0x74   : > { %6223 = vmatprep.mubr.msk.bf16.mxu0 %vm10878_vm1, %v7148_v45 }
  0x7b   : > { %6224 = vmatmul.mubr.msk.bf16.gmra.mrb[12].mxu0 %vm10878_vm1, %v7159_v58 }
  0x7c   : > { %6227 = vmatprep.mubr.msk.bf16.mxu0 %vm10878_vm1, %v7162_v61 }
  0x83   : > { %6228 = vmatmul.mubr.msk.bf16.gmra.mrb[16].mxu0 %vm10878_vm1, %v7173_v13 }
  0x84   : > { %6231 = vmatprep.mubr.msk.bf16.mxu0 %vm10878_vm1, %v7176_v17 }
  0x8b   : > { %6232 = vmatmul.mubr.msk.bf16.gmra.mrb[20].mxu0 %vm10878_vm1, %v7187_v30 }
  0x8c   : > { %6235 = vmatprep.mubr.msk.bf16.mxu0 %vm10878_vm1, %v7190_v34  ;;  %v10907_v34 = vmov 920167782  }
  0x93   : > { %6236 = vmatmul.mubr.msk.bf16.gmra.mrb[24].mxu0 %vm10878_vm1, %v7201_v49  ;;  %v10906_v49 = vmov 1326507024  }
  0x94   : > { %6239 = vmatprep.mubr.msk.bf16.mxu0 %vm10878_vm1, %v7204_v52 }
  0x9b   : > { %6240 = vmatmul.mubr.msk.bf16.gmra.mrb[28].mxu0 %vm10878_vm1, %v7213_v1 }
 0x136   : > { %v6213_v18 = vpop.f32.mrb[0].mxu0 }
 0x137   : > { %v7259_v19 = vadd.f32 %v6213_v18, %v7256_v16  ;;  %v807_v20 = vpop.f32.mrb[1].mxu0 }
 0x138   : > { %v7262_v21 = vadd.f32 %v7256_v16, %v807_v20  ;;  %v6214_v22 = vpop.f32.mrb[2].mxu0  ;;  %v10755_v20 = vmov 920167782  }
 0x139   : > { %10898 = vst [vmem:[#allocation19_spill] sm:$0xff] %v7259_v19  ;;  %v10742_v23 = vand.u32 2147483647, %v7259_v19  ;;  %v1184_v24 = vand.u32 2139095040, %v7259_v19  ;;  %v7267_v25 = vadd.f32 %v6214_v22, %v7256_v16  ;;  %v810_v26 = vpop.f32.mrb[3].mxu0 }
 0x13a   : > { %10899 = vst [vmem:[#allocation20_spill] sm:$0xff] %v7262_v21  ;;  %v10741_v27 = vand.u32 2147483647, %v7262_v21  ;;  %v976_v28 = vand.u32 2139095040, %v7262_v21  ;;  %v7279_v43 = vadd.f32 %v7256_v16, %v810_v26 }
 0x13b   : > { %10900 = vst [vmem:[#allocation21_spill] sm:$0xff] %v7267_v25  ;;  %v1185_v29 = vshrl.u32 %v1184_v24, 23  ;;  %v1188_v32 = vand.u32 8388607, %v10742_v23  ;;  %v1288_v36 = vand.u32 2139095040, %v7267_v25 }
 0x13c   : > { %v977_v33 = vshrl.u32 %v976_v28, 23  ;;  %v980_v35 = vand.u32 8388607, %v10741_v27  ;;  %10901 = vst [vmem:[#allocation22_spill] sm:$0xff] %v7279_v43  ;;  %v1080_v63 = vand.u32 2139095040, %v7279_v43 }
 0x13d   : > { %v5863_v37 = vadd.s32 4294967169, %v1185_v29  ;;  %v1289_v39 = vshrl.u32 %v1288_v36, 23  ;;  %v1189_v46 = vor.u32 8388608, %v1188_v32 }
 0x13e   : > { %v5855_v38 = vadd.s32 4294967169, %v977_v33  ;;  %v7276_v40 = vpop.f32.mrb[4].mxu0  ;;  %v981_v47 = vor.u32 8388608, %v980_v35  ;;  %v10750_v35 = vmov 1326507024  }
 0x13f   : > { %v1191_v41 = vadd.s32 1, %v5863_v37  ;;  %v7281_v44 = vpop.f32.mrb[5].mxu0  ;;  %v5867_v50 = vadd.s32 4294967169, %v1289_v39  ;;  %v7287_v59 = vshll.u32 %v1189_v46, 8 }
 0x140   : > { %v983_v48 = vadd.s32 1, %v5855_v38  ;;  %v7283_v51 = vpop.f32.mrb[6].mxu0  ;;  %v7289_v60 = vshll.u32 %v981_v47, 8 }
 0x141   : > { %vm1192_vm2 = vcmp.gt.s32.totalorder %v1191_v41, 0  ;;  %v7285_v53 = vpop.f32.mrb[7].mxu0  ;;  %v7291_v62 = vadd.s32 1, %v5867_v50 }
 0x142   : > { %v1193_v54 = vsel %vm1192_vm2, %v1191_v41, 0  ;;  %vm984_vm3 = vcmp.gt.s32.totalorder %v983_v48, 0 }
 0x143   : > { %v1194_v55 = vshrl.u32 %v1193_v54, 5  ;;  %v1195_v56 = vand.u32 31, %v1193_v54  ;;  %v985_v57 = vsel %vm984_vm3, %v983_v48, 0  ;;  %vm1296_vm8 = vcmp.gt.s32.totalorder %v7291_v62, 0 }
 0x144   : > { %v7295_v4 = vshrl.u32 %v985_v57, 5  ;;  %v987_v6 = vand.u32 31, %v985_v57 }
 0x145   : > { %v1196_v0 = vsub.s32 32, %v1195_v56  ;;  %v1198_v3 = vshll.u32 %v10748_v2, %v1195_v56  ;;  %v1201_v8 = vshll.u32 %v10744_v7, %v1195_v56  ;;  %v1204_v12 = vshll.u32 %v10746_v11, %v1195_v56 }
 0x146   : > { %v1207_v18 = vshll.u32 %v10761_v14, %v1195_v56  ;;  %v1210_v22 = vshll.u32 %v10755_v20, %v1195_v56  ;;  %vm1213_vm4 = vcmp.lt.s32.totalorder %v1194_v55, 1  ;;  %v7304_v29 = vpop.f32.mrb[8].mxu0  ;;  %vm1214_vm5 = vcmp.lt.s32.totalorder %v1194_v55, 2 }
 0x147   : > { %v1199_v24 = vshrl.u32 %v10744_v7, %v1196_v0  ;;  %v1202_v26 = vshrl.u32 %v10746_v11, %v1196_v0  ;;  %v1205_v28 = vshrl.u32 %v10761_v14, %v1196_v0  ;;  %v1197_v32 = vshrl.u32 %v10748_v2, %v1196_v0 }
 0x148   : > { %v1208_v33 = vshrl.u32 %v10755_v20, %v1196_v0  ;;  %v1211_v36 = vshrl.u32 %v10750_v35, %v1196_v0  ;;  %v988_v41 = vsub.s32 32, %v987_v6  ;;  %vm1215_vm6 = vcmp.lt.s32.totalorder %v1194_v55, 3 }
 0x149   : > { %v1200_v37 = vor.u32 %v1199_v24, %v1198_v3  ;;  %v1203_v38 = vor.u32 %v1202_v26, %v1201_v8  ;;  %v1206_v39 = vor.u32 %v1205_v28, %v1204_v12  ;;  %vm1216_vm7 = vcmp.lt.s32.totalorder %v1194_v55, 4 }
 0x14a   : > { %v1209_v46 = vor.u32 %v1208_v33, %v1207_v18  ;;  %v1212_v47 = vor.u32 %v1211_v36, %v1210_v22  ;;  %v990_v0 = vshll.u32 %v10748_v2, %v987_v6  ;;  %v991_v12 = vshrl.u32 %v10744_v7, %v988_v41 }
 0x14b   : > { %v1217_v48 = vsel %vm1213_vm4, %v1197_v32, %v1200_v37  ;;  %v1218_v50 = vsel %vm1216_vm7, %v1206_v39, 2102212464  ;;  %v1221_v54 = vsel %vm1213_vm4, %v1200_v37, %v1203_v38  ;;  %v1225_v56 = vsel %vm1213_vm4, %v1203_v38, %v1206_v39 }
 0x14c   : > { %v1219_v57 = vsel %vm1215_vm6, %v1203_v38, %v1218_v50  ;;  %v1222_v27 = vsel %vm1216_vm7, %v1209_v46, 920167782  ;;  %v1226_v23 = vsel %vm1216_vm7, %v1212_v47, 1326507024  ;;  %v993_v18 = vshll.u32 %v10744_v7, %v987_v6 }
 0x14d   : > { %v1223_v3 = vsel %vm1215_vm6, %v1206_v39, %v1222_v27  ;;  %v1227_v8 = vsel %vm1215_vm6, %v1209_v46, %v1226_v23  ;;  %v1220_v22 = vsel %vm1214_vm5, %v1217_v48, %v1219_v57  ;;  %v994_v28 = vshrl.u32 %v10746_v11, %v988_v41 }
 0x14e   : > { %v1224_v24 = vsel %vm1214_vm5, %v1221_v54, %v1223_v3  ;;  %v1228_v26 = vsel %vm1214_vm5, %v1225_v56, %v1227_v8  ;;  %v992_v23 = vor.u32 %v991_v12, %v990_v0  ;;  %v996_v38 = vshll.u32 %v10746_v11, %v987_v6 }
 0x14f   : > { %v7320_v32 = vmul.u32.u64.low %v7287_v59, %v1228_v26  ;;  %v7321_v33 = vmul.u32.u64.high %v7287_v59, %v1228_v26, %v7320_v32  ;;  %v7324_v36 = vmul.u32.u64.low %v7287_v59, %v1224_v24  ;;  %v7325_v27 = vmul.u32.u64.high %v7287_v59, %v1224_v24, %v7324_v36 }
 0x150   : > { %v995_v37 = vor.u32 %v994_v28, %v993_v18  ;;  %v997_v39 = vshrl.u32 %v10761_v14, %v988_v41  ;;  %v999_v55 = vshll.u32 %v10761_v14, %v987_v6  ;;  %v1000_v46 = vshrl.u32 %v10755_v20, %v988_v41 }
 0x151   : > { %v1003_v47 = vshrl.u32 %v10750_v35, %v988_v41  ;;  %v1081_v48 = vshrl.u32 %v1080_v63, 23  ;;  %v1236_v50 = vmul.u32 %v7287_v59, %v1220_v22  ;;  %v1002_v56 = vshll.u32 %v10755_v20, %v987_v6 }
 0x152   : > { %v998_v54 = vor.u32 %v997_v39, %v996_v38  ;;  %vm1238_vm9 = vc.u32 %v7321_v33, %v7324_v36  ;;  %v1239_v57 = vadd.s32 1, %v7325_v27  ;;  %v1001_v0 = vor.u32 %v1000_v46, %v999_v55 }
 0x153   : > { %vm1005_vm10 = vcmp.lt.s32.totalorder %v7295_v4, 1  ;;  %v1004_v3 = vor.u32 %v1003_v47, %v1002_v56  ;;  %vm1006_vm11 = vcmp.lt.s32.totalorder %v7295_v4, 2  ;;  %vm1008_vm12 = vcmp.lt.s32.totalorder %v7295_v4, 4 }
 0x154   : > { %v1013_v59 = vsel %vm1005_vm10, %v992_v23, %v995_v37  ;;  %v1240_v63 = vsel %vm1238_vm9, %v1239_v57, %v7325_v27  ;;  %vm1007_vm13 = vcmp.lt.s32.totalorder %v7295_v4, 3  ;;  %v1014_v6 = vsel %vm1008_vm12, %v1001_v0, 920167782 }
 0x155   : > { %v1017_v8 = vsel %vm1005_vm10, %v995_v37, %v998_v54  ;;  %v1241_v12 = vadd.s32 %v1240_v63, %v1236_v50  ;;  %v1010_v18 = vsel %vm1008_vm12, %v998_v54, 2102212464  ;;  %v1015_v22 = vsel %vm1007_vm13, %v998_v54, %v1014_v6 }
 0x156   : > { %v1018_v24 = vsel %vm1008_vm12, %v1004_v3, 1326507024  ;;  %v989_v26 = vshrl.u32 %v10748_v2, %v988_v41  ;;  %v1016_v28 = vsel %vm1006_vm11, %v1013_v59, %v1015_v22  ;;  %v1297_v27 = vsel %vm1296_vm8, %v7291_v62, 0  ;;  %v7372_v59 = vpop.f32.mrb[9].mxu0 }
 0x157   : > { %v1019_v32 = vsel %vm1007_vm13, %v1001_v0, %v1018_v24  ;;  %v1242_v38 = vadd.s32 536870912, %v1241_v12  ;;  %v7357_v55 = vmul.u32.u64.low %v7289_v60, %v1016_v28  ;;  %v7358_v46 = vmul.u32.u64.high %v7289_v60, %v1016_v28, %v7357_v55 }
 0x158   : > { %v1020_v39 = vsel %vm1006_vm11, %v1017_v8, %v1019_v32  ;;  %v1009_v41 = vsel %vm1005_vm10, %v989_v26, %v992_v23  ;;  %v1011_v47 = vsel %vm1007_vm13, %v995_v37, %v1010_v18  ;;  %v10743_v62 = vand.u32 2147483647, %v7267_v25 }
 0x159   : > { %v7364_v50 = vmul.u32.u64.low %v7289_v60, %v1020_v39  ;;  %v7365_v54 = vmul.u32.u64.high %v7289_v60, %v1020_v39, %v7364_v50  ;;  %v7367_v56 = vshrl.u32 %v1242_v38, 30  ;;  %v1299_v57 = vand.u32 31, %v1297_v27 }
 0x15a   : > { %v1012_v0 = vsel %vm1006_vm11, %v1009_v41, %v1011_v47  ;;  %v1031_v23 = vadd.s32 1, %v7358_v46  ;;  %v5859_v37 = vadd.s32 4294967169, %v1081_v48  ;;  %v1292_v6 = vand.u32 8388607, %v10743_v62 }
 0x15b   : > { %v1300_v3 = vsub.s32 32, %v1299_v57  ;;  %v1244_v63 = vshll.u32 %v7367_v56, 30  ;;  %vm1030_vm14 = vc.u32 %v7365_v54, %v7357_v55  ;;  %v1028_v8 = vmul.u32 %v7289_v60, %v1012_v0 }
 0x15c   : > { %v1302_v18 = vshll.u32 %v10748_v2, %v1299_v57  ;;  %v1298_v24 = vshrl.u32 %v1297_v27, 5  ;;  %v1305_v26 = vshll.u32 %v10744_v7, %v1299_v57  ;;  %v1308_v28 = vshll.u32 %v10746_v11, %v1299_v57 }
 0x15d   : > { %v1303_v4 = vshrl.u32 %v10744_v7, %v1300_v3  ;;  %v1306_v22 = vshrl.u32 %v10746_v11, %v1300_v3  ;;  %v1309_v48 = vshrl.u32 %v10761_v14, %v1300_v3  ;;  %v7387_v32 = vsub.s32 %v1241_v12, %v1244_v63 }
 0x15e   : > { %v1032_v38 = vsel %vm1030_vm14, %v1031_v23, %v7358_v46  ;;  %v1087_v41 = vadd.s32 1, %v5859_v37  ;;  %v1311_v50 = vshll.u32 %v10761_v14, %v1299_v57  ;;  %v1312_v0 = vshrl.u32 %v10755_v20, %v1300_v3 }
 0x15f   : > { %v1304_v39 = vor.u32 %v1303_v4, %v1302_v18  ;;  %v1307_v60 = vor.u32 %v1306_v22, %v1305_v26  ;;  %v1310_v47 = vor.u32 %v1309_v48, %v1308_v28  ;;  %v1293_v62 = vor.u32 8388608, %v1292_v6 }
 0x160   : > { %v1314_v27 = vshll.u32 %v10755_v20, %v1299_v57  ;;  %v1315_v7 = vshrl.u32 %v10750_v35, %v1300_v3  ;;  %v1033_v11 = vadd.s32 %v1032_v38, %v1028_v8  ;;  %v1313_v2 = vor.u32 %v1312_v0, %v1311_v50 }
 0x161   : > { %vm1317_vm15 = vcmp.lt.s32.totalorder %v1298_v24, 1  ;;  %vm1319_vm2 = vcmp.lt.s32.totalorder %v1298_v24, 3  ;;  %v1247_v12 = vsub.s32 0, %v7387_v32  ;;  %vm1320_vm3 = vcmp.lt.s32.totalorder %v1298_v24, 4 }
 0x162   : > { %v1316_v46 = vor.u32 %v1315_v7, %v1314_v27  ;;  %vm1088_vm4 = vcmp.gt.s32.totalorder %v1087_v41, 0  ;;  %v1325_v63 = vsel %vm1317_vm15, %v1304_v39, %v1307_v60  ;;  %v1326_v23 = vsel %vm1320_vm3, %v1313_v2, 920167782 }
 0x163   : > { %v1329_v37 = vsel %vm1317_vm15, %v1307_v60, %v1310_v47  ;;  %v1089_v18 = vsel %vm1088_vm4, %v1087_v41, 0  ;;  %v1327_v6 = vsel %vm1319_vm2, %v1310_v47, %v1326_v23  ;;  %v1333_v4 = vshll.u32 %v1293_v62, 8 }
 0x164   : > { %v1330_v57 = vsel %vm1320_vm3, %v1316_v46, 1326507024  ;;  %v1034_v22 = vadd.s32 536870912, %v1033_v11  ;;  %vm1318_vm5 = vcmp.lt.s32.totalorder %v1298_v24, 2  ;;  %v1322_v8 = vsel %vm1320_vm3, %v1310_v47, 2102212464 }
 0x165   : > { %v1331_v26 = vsel %vm1319_vm2, %v1313_v2, %v1330_v57  ;;  %v10902_v28 = vmov 683565275   ;;  %v1328_v7 = vsel %vm1318_vm5, %v1325_v63, %v1327_v6  ;;  %v1091_v50 = vand.u32 31, %v1089_v18 }
 0x166   : > { %v1301_v48 = vshrl.u32 %v10902_v28, %v1300_v3  ;;  %v1332_v38 = vsel %vm1318_vm5, %v1329_v37, %v1331_v26  ;;  %v5864_v0 = vmin.u32 %v1247_v12, %v7387_v32  ;;  %v1323_v41 = vsel %vm1319_vm2, %v1307_v60, %v1322_v8  ;;  %v7417_v60 = vpop.f32.mrb[10].mxu0 }
 0x167   : > { %v7403_v35 = vmul.u32.u64.low %v1333_v4, %v1332_v38  ;;  %v7404_v23 = vmul.u32.u64.high %v1333_v4, %v1332_v38, %v7403_v35  ;;  %v7406_v62 = vshrl.u32 %v1034_v22, 30  ;;  %v1092_v2 = vsub.s32 32, %v1091_v50 }
 0x168   : > { %v1321_v27 = vsel %vm1317_vm15, %v1301_v48, %v1304_v39  ;;  %v7408_v46 = vmul.u32.u64.low %v1333_v4, %v1328_v7  ;;  %v7409_v47 = vmul.u32.u64.high %v1333_v4, %v1328_v7, %v7408_v46  ;;  %v1249_v63 = vclz %v5864_v0 }
 0x169   : > { %10903 = vst [vmem:[#allocation23_spill] sm:$0xff] %v7406_v62  ;;  %v1324_v3 = vsel %vm1318_vm5, %v1321_v27, %v1323_v41  ;;  %v10758_v12 = vand.u32 2147483647, %v7279_v43  ;;  %v1036_v24 = vshll.u32 %v7406_v62, 30  ;;  %v10904_v37 = vmov 2475754826  }
 0x16a   : > { %vm1342_vm6 = vc.u32 %v7404_v23, %v7408_v46  ;;  %v1343_v39 = vadd.s32 1, %v7409_v47  ;;  %v1340_v35 = vmul.u32 %v1333_v4, %v1324_v3  ;;  %v1095_v6 = vshrl.u32 %v10904_v37, %v1092_v2 }
 0x16b   : > { %v10905_v22 = vmov 2131351028   ;;  %v1101_v26 = vshrl.u32 %v10761_v14, %v1092_v2  ;;  %v1104_v48 = vshrl.u32 %v10755_v20, %v1092_v2  ;;  %v5865_v7 = vadd.s32 4294967294, %v1249_v63 }
 0x16c   : > { %v1344_v57 = vsel %vm1342_vm6, %v1343_v39, %v7409_v47  ;;  %v1098_v8 = vshrl.u32 %v10905_v22, %v1092_v2  ;;  %v1084_v0 = vand.u32 8388607, %v10758_v12  ;;  %v1094_v27 = vshll.u32 %v10902_v28, %v1091_v50 }
 0x16d   : > { %v1345_v38 = vadd.s32 %v1344_v57, %v1340_v35  ;;  %v7427_v41 = vsub.s32 %v1033_v11, %v1036_v24  ;;  %v1097_v4 = vshll.u32 %v10904_v37, %v1091_v50  ;;  %v1100_v3 = vshll.u32 %v10905_v22, %v1091_v50 }
 0x16e   : > { %v1103_v47 = vshll.u32 %v10761_v14, %v1091_v50  ;;  %v1090_v1 = vshrl.u32 %v1089_v18, 5  ;;  %v1096_v52 = vor.u32 %v1095_v6, %v1094_v27  ;;  %v1107_v20 = vshrl.u32 %v10906_v49, %v1092_v2 }
 0x16f   : > { %v1346_v39 = vadd.s32 536870912, %v1345_v38  ;;  %v1099_v63 = vor.u32 %v1098_v8, %v1097_v4  ;;  %v1102_v35 = vor.u32 %v1101_v26, %v1100_v3  ;;  %v1106_v12 = vshll.u32 %v10907_v34, %v1091_v50 }
 0x170   : > { %v1105_v57 = vor.u32 %v1104_v48, %v1103_v47  ;;  %v1085_v11 = vor.u32 8388608, %v1084_v0  ;;  %vm5866_vm7 = vcmp.lt.s32.totalorder %v5865_v7, 0  ;;  %v1039_v17 = vsub.s32 0, %v7427_v41 }
 0x171   : > { %v7434_v30 = vshrl.u32 %v1346_v39, 30  ;;  %v1108_v24 = vor.u32 %v1107_v20, %v1106_v12  ;;  %vm1109_vm8 = vcmp.lt.s32.totalorder %v1090_v1, 1  ;;  %vm1112_vm9 = vcmp.lt.s32.totalorder %v1090_v1, 4 }
 0x172   : > { %v7439_v18 = vadd.f32 %v7276_v40, %v7256_v16  ;;  %v1114_v8 = vsel %vm1112_vm9, %v1102_v35, 2102212464  ;;  %v1117_v26 = vsel %vm1109_vm8, %v1096_v52, %v1099_v63  ;;  %v1118_v48 = vsel %vm1112_vm9, %v1105_v57, 920167782 }
 0x173   : > { %v1348_v6 = vshll.u32 %v7434_v30, 30  ;;  %v1252_v50 = vsel %vm5866_vm7, 0, %v5865_v7  ;;  %v1093_v27 = vshrl.u32 %v10902_v28, %v1092_v2  ;;  %vm1111_vm10 = vcmp.lt.s32.totalorder %v1090_v1, 3 }
 0x174   : > { %10908 = vst [vmem:[#allocation24_spill] sm:$0xff] %v7439_v18  ;;  %v1125_v0 = vshll.u32 %v1085_v11, 8  ;;  %vm1110_vm11 = vcmp.lt.s32.totalorder %v1090_v1, 2  ;;  %v1119_v20 = vsel %vm1111_vm10, %v1102_v35, %v1118_v48  ;;  %v1121_v12 = vsel %vm1109_vm8, %v1099_v63, %v1102_v35  ;;  %v7470_v1 = vpop.f32.mrb[11].mxu0 }
 0x175   : > { %v1122_v4 = vsel %vm1112_vm9, %v1108_v24, 1326507024  ;;  %v5856_v3 = vmin.u32 %v1039_v17, %v7427_v41  ;;  %v1113_v40 = vsel %vm1109_vm8, %v1093_v27, %v1096_v52  ;;  %v1115_v47 = vsel %vm1111_vm10, %v1099_v63, %v1114_v8 }
 0x176   : > { %v1120_v39 = vsel %vm1110_vm11, %v1117_v26, %v1119_v20  ;;  %v7448_v14 = vsub.s32 %v1345_v38, %v1348_v6  ;;  %v1123_v13 = vsel %vm1111_vm10, %v1105_v57, %v1122_v4  ;;  %v1257_v11 = vsub.s32 4294967266, %v1252_v50 }
 0x177   : > { %v7450_v7 = vmul.u32.u64.low %v1125_v0, %v1120_v39  ;;  %v7451_v61 = vmul.u32.u64.high %v1125_v0, %v1120_v39, %v7450_v7  ;;  %v1124_v2 = vsel %vm1110_vm11, %v1121_v12, %v1123_v13  ;;  %v1253_v24 = vsub.s32 32, %v1252_v50 }
 0x178   : > { %v7455_v48 = vmul.u32.u64.low %v1125_v0, %v1124_v2  ;;  %v7456_v35 = vmul.u32.u64.high %v1125_v0, %v1124_v2, %v7455_v48  ;;  %v1041_v17 = vclz %v5856_v3  ;;  %v1116_v52 = vsel %vm1110_vm11, %v1113_v40, %v1115_v47 }
 0x179   : > { %v1600_v63 = vand.u32 2139095040, %v7439_v18  ;;  %v1351_v38 = vsub.s32 0, %v7448_v14  ;;  %v1135_v57 = vadd.s32 1, %v7451_v61  ;;  %v7464_v6 = vadd.f32 %v7256_v16, %v7281_v44 }
 0x17a   : > { %v1237_v13 = vadd.s32 %v7324_v36, %v7321_v33  ;;  %v1258_v26 = vadd.s32 127, %v1257_v11  ;;  %v1132_v27 = vmul.u32 %v1125_v0, %v1116_v52  ;;  %vm1134_vm12 = vc.u32 %v7456_v35, %v7450_v7 }
 0x17b   : > { %10909 = vst [vmem:[#allocation25_spill] sm:$0xff] %v7464_v6  ;;  %v1601_v8 = vshrl.u32 %v1600_v63, 23  ;;  %v5857_v12 = vadd.s32 4294967294, %v1041_v17  ;;  %v1136_v4 = vsel %vm1134_vm12, %v1135_v57, %v7451_v61  ;;  %v5868_v40 = vmin.u32 %v1351_v38, %v7448_v14 }
 0x17c   : > { %v1255_v20 = vshrl.u32 %v1237_v13, %v1253_v24  ;;  %v1137_v44 = vadd.s32 %v1136_v4, %v1132_v27  ;;  %v1392_v47 = vand.u32 2139095040, %v7464_v6  ;;  %v1254_v33 = vshll.u32 %v7387_v32, %v1252_v50 }
 0x17d   : > { %v5879_v3 = vadd.s32 4294967169, %v1601_v8  ;;  %v1259_v39 = vshll.u32 %v1258_v26, 23  ;;  %vm5858_vm13 = vcmp.lt.s32.totalorder %v5857_v12, 0  ;;  %v10765_v11 = vand.u32 2147483647, %v7439_v18 }
 0x17e   : > { %v1138_v0 = vadd.s32 536870912, %v1137_v44  ;;  %v1256_v2 = vor.u32 %v1255_v20, %v1254_v33  ;;  %v1353_v48 = vclz %v5868_v40  ;;  %v1393_v17 = vshrl.u32 %v1392_v47, 23 }
 0x17f   : > { %v1607_v36 = vadd.s32 1, %v5879_v3  ;;  %v1260_v63 = vor.u32 4788187, %v1259_v39  ;;  %v7482_v32 = vadd.s32 %v7357_v55, %v7365_v54  ;;  %v7484_v57 = vsel %vm5858_vm13, 0, %v5857_v12 }
 0x180   : > { %v7477_v24 = vshrl.u32 %v1138_v0, 30  ;;  %v1263_v50 = vcvt.s32.f32 %v1256_v2  ;;  %v1604_v13 = vand.u32 8388607, %v10765_v11  ;;  %v5869_v26 = vadd.s32 4294967294, %v1353_v48 }
 0x181   : > { %vm1608_vm14 = vcmp.gt.s32.totalorder %v1607_v36, 0  ;;  %v5871_v4 = vadd.s32 4294967169, %v1393_v17  ;;  %v10911_v12 = vmov 2102212464   ;;  %v1261_v17 = vand.u32 2147483647, %v1260_v63 }
 0x182   : > { %10910 = vst [vmem:[#allocation26_spill] sm:$0xff] %v7477_v24  ;;  %v1609_v61 = vsel %vm1608_vm14, %v1607_v36, 0  ;;  %v1140_v27 = vshll.u32 %v7477_v24, 30  ;;  %v1045_v11 = vsub.s32 32, %v7484_v57  ;;  %vm1183_vm15 = vcmp.lt.s32.totalorder %v7259_v19, 0 }
 0x183   : > { %v1611_v52 = vand.u32 31, %v1609_v61  ;;  %v1610_v20 = vshrl.u32 %v1609_v61, 5  ;;  %v1605_v45 = vor.u32 8388608, %v1604_v13  ;;  %v1399_v31 = vadd.s32 1, %v5871_v4 }
 0x184   : > { %vm5870_vm3 = vcmp.lt.s32.totalorder %v5869_v26, 0  ;;  %v10916_v24 = vand.u32 2147483647, %v7259_v19  ;;  %vm1287_vm14 = vcmp.lt.s32.totalorder %v7267_v25, 0 }
 0x185   : > { %v1612_v8 = vsub.s32 32, %v1611_v52  ;;  %v1614_v3 = vshll.u32 %v10902_v28, %v1611_v52  ;;  %v1617_v47 = vshll.u32 %v10904_v37, %v1611_v52  ;;  %v1620_v54 = vshll.u32 %v10905_v22, %v1611_v52 }
 0x186   : > { %v1623_v36 = vshll.u32 %v10911_v12, %v1611_v52  ;;  %v1626_v48 = vshll.u32 %v10907_v34, %v1611_v52  ;;  %vm1629_vm2 = vcmp.lt.s32.totalorder %v1610_v20, 1  ;;  %vm1632_vm4 = vcmp.lt.s32.totalorder %v1610_v20, 4 }
 0x187   : > { %v1615_v40 = vshrl.u32 %v10904_v37, %v1612_v8  ;;  %v1618_v55 = vshrl.u32 %v10905_v22, %v1612_v8  ;;  %v1621_v33 = vshrl.u32 %v10911_v12, %v1612_v8  ;;  %v1624_v39 = vshrl.u32 %v10907_v34, %v1612_v8 }
 0x188   : > { %v1627_v61 = vshrl.u32 %v10906_v49, %v1612_v8  ;;  %v7503_v52 = vsub.s32 %v1137_v44, %v1140_v27  ;;  %vm1631_vm5 = vcmp.lt.s32.totalorder %v1610_v20, 3  ;;  %vm1630_vm6 = vcmp.lt.s32.totalorder %v1610_v20, 2 }
 0x189   : > { %v1616_v0 = vor.u32 %v1615_v40, %v1614_v3  ;;  %v1619_v2 = vor.u32 %v1618_v55, %v1617_v47  ;;  %v1622_v38 = vor.u32 %v1621_v33, %v1620_v54  ;;  %v1625_v58 = vor.u32 %v1624_v39, %v1623_v36 }
 0x18a   : > { %v1628_v42 = vor.u32 %v1627_v61, %v1626_v48  ;;  %v1613_v55 = vshrl.u32 %v10902_v28, %v1612_v8  ;;  %v1645_v36 = vshll.u32 %v1605_v45, 8  ;;  %vm1400_vm7 = vcmp.gt.s32.totalorder %v1399_v31, 0 }
 0x18b   : > { %v1637_v3 = vsel %vm1629_vm2, %v1616_v0, %v1619_v2  ;;  %v1634_v63 = vsel %vm1632_vm4, %v1622_v38, 2102212464  ;;  %v1638_v47 = vsel %vm1632_vm4, %v1625_v58, 920167782  ;;  %v1641_v13 = vsel %vm1629_vm2, %v1619_v2, %v1622_v38 }
 0x18c   : > { %v1639_v54 = vsel %vm1631_vm5, %v1622_v38, %v1638_v47  ;;  %v1642_v4 = vsel %vm1632_vm4, %v1628_v42, 1326507024  ;;  %v1049_v39 = vsub.s32 4294967266, %v7484_v57  ;;  %v1633_v48 = vsel %vm1629_vm2, %v1613_v55, %v1616_v0 }
 0x18d   : > { %v1640_v33 = vsel %vm1630_vm6, %v1637_v3, %v1639_v54  ;;  %v1635_v44 = vsel %vm1631_vm5, %v1619_v2, %v1634_v63  ;;  %v1643_v27 = vsel %vm1631_vm5, %v1625_v58, %v1642_v4  ;;  %v7510_v61 = vmul.f32 %v1263_v50, %v1261_v17 }
 0x18e   : > { %v1644_v40 = vsel %vm1630_vm6, %v1641_v13, %v1643_v27  ;;  %v7513_v8 = vmul.u32.u64.low %v1645_v36, %v1640_v33  ;;  %v7514_v15 = vmul.u32.u64.high %v1645_v36, %v1640_v33, %v7513_v8  ;;  %v7518_v38 = vsel %vm5870_vm3, 0, %v5869_v26 }
 0x18f   : > { %v1143_v42 = vsub.s32 0, %v7503_v52  ;;  %v10912_v45 = vand.u32 2147483647, %v7464_v6  ;;  %v1401_v47 = vsel %vm1400_vm7, %v1399_v31, 0  ;;  %v1636_v0 = vsel %vm1630_vm6, %v1633_v48, %v1635_v44 }
 0x190   : > { %v7524_v58 = vmul.u32.u64.low %v1645_v36, %v1644_v40  ;;  %v7525_v50 = vmul.u32.u64.high %v1645_v36, %v1644_v40, %v7524_v58  ;;  %v1403_v2 = vand.u32 31, %v1401_v47  ;;  %v10913_v17 = vsub.s32 4, %v7367_v56 }
 0x191   : > { %v1396_v3 = vand.u32 8388607, %v10912_v45  ;;  %v7535_v26 = vshrl.u32 %v7482_v32, %v1045_v11  ;;  %v7537_v55 = vadd.s32 127, %v1049_v39  ;;  %v7541_v31 = vadd.s32 %v7408_v46, %v7404_v23 }
 0x192   : > { %v7532_v63 = vsel %vm1183_vm15, %v10913_v17, %v7367_v56  ;;  %v1361_v40 = vsub.s32 4294967266, %v7518_v38  ;;  %v1655_v54 = vadd.s32 1, %v7514_v15  ;;  %v1404_v13 = vsub.s32 32, %v1403_v2 }
 0x193   : > { %v5860_v33 = vmin.u32 %v1143_v42, %v7503_v52  ;;  %v1652_v56 = vmul.u32 %v1645_v36, %v1636_v0  ;;  %v1397_v4 = vor.u32 8388608, %v1396_v3  ;;  %v1402_v48 = vshrl.u32 %v1401_v47, 5  ;;  %v7558_v47 = vpop.f32.mrb[12].mxu0 }
 0x194   : > { %vm1654_vm8 = vc.u32 %v7525_v50, %v7513_v8  ;;  %v1406_v11 = vshll.u32 %v10902_v28, %v1403_v2  ;;  %v1407_v23 = vshrl.u32 %v10904_v37, %v1404_v13  ;;  %v1409_v46 = vshll.u32 %v10904_v37, %v1403_v2  ;;  %10914 = vst [vmem:[#allocation27_spill] sm:$0xff] %v7558_v47 }
 0x195   : > { %v1656_v32 = vsel %vm1654_vm8, %v1655_v54, %v7514_v15  ;;  %v1410_v39 = vshrl.u32 %v10905_v22, %v1404_v13  ;;  %v1412_v44 = vshll.u32 %v10905_v22, %v1403_v2  ;;  %v1415_v27 = vshll.u32 %v10911_v12, %v1403_v2 }
 0x196   : > { %v1657_v36 = vadd.s32 %v1656_v32, %v1652_v56  ;;  %v1408_v42 = vor.u32 %v1407_v23, %v1406_v11  ;;  %v1413_v45 = vshrl.u32 %v10911_v12, %v1404_v13  ;;  %v1416_v3 = vshrl.u32 %v10907_v34, %v1404_v13 }
 0x197   : > { %v1411_v0 = vor.u32 %v1410_v39, %v1409_v46  ;;  %v1418_v58 = vshll.u32 %v10907_v34, %v1403_v2  ;;  %v1419_v17 = vshrl.u32 %v10906_v49, %v1404_v13  ;;  %v7564_v15 = vadd.f32 %v7283_v51, %v7256_v16 }
 0x198   : > { %v1357_v54 = vsub.s32 32, %v7518_v38  ;;  %v1658_v20 = vadd.s32 536870912, %v1657_v36  ;;  %v1414_v56 = vor.u32 %v1413_v45, %v1412_v44  ;;  %v1417_v11 = vor.u32 %v1416_v3, %v1415_v27 }
 0x199   : > { %10915 = vst [vmem:[#allocation28_spill] sm:$0xff] %v7564_v15  ;;  %v1362_v23 = vadd.s32 127, %v1361_v40  ;;  %v1145_v32 = vclz %v5860_v33  ;;  %v1420_v10 = vor.u32 %v1419_v17, %v1418_v58  ;;  %vm1421_vm9 = vcmp.lt.s32.totalorder %v1402_v48, 1 }
 0x19a   : > { %v7567_v9 = vshrl.u32 %v1658_v20, 30  ;;  %vm1424_vm10 = vcmp.lt.s32.totalorder %v1402_v48, 4  ;;  %v1429_v2 = vsel %vm1421_vm9, %v1408_v42, %v1411_v0  ;;  %v1437_v46 = vshll.u32 %v1397_v4, 8 }
 0x19b   : > { %v1405_v39 = vshrl.u32 %v10902_v28, %v1404_v13  ;;  %vm1423_vm11 = vcmp.lt.s32.totalorder %v1402_v48, 3  ;;  %v1426_v51 = vsel %vm1424_vm10, %v1414_v56, 2102212464  ;;  %v1430_v5 = vsel %vm1424_vm10, %v1417_v11, 920167782 }
 0x19c   : > { %vm7573_vm12 = vcmp.le.f32.partialorder %v10916_v24, 0.7853982  ;;  %v1660_v40 = vshll.u32 %v7567_v9, 30  ;;  %vm1422_vm13 = vcmp.lt.s32.totalorder %v1402_v48, 2  ;;  %v1431_v20 = vsel %vm1423_vm11, %v1414_v56, %v1430_v5 }
 0x19d   : > { %v1433_v33 = vsel %vm1421_vm9, %v1411_v0, %v1414_v56  ;;  %v5861_v4 = vadd.s32 4294967294, %v1145_v32  ;;  %v1432_v13 = vsel %vm1422_vm13, %v1429_v2, %v1431_v20  ;;  %v1434_v27 = vsel %vm1424_vm10, %v1420_v10, 1326507024 }
 0x19e   : > { %v1704_v45 = vand.u32 2139095040, %v7564_v15  ;;  %v7583_v3 = vsub.s32 %v1657_v36, %v1660_v40  ;;  %v1425_v24 = vsel %vm1421_vm9, %v1405_v39, %v1408_v42  ;;  %v1427_v58 = vsel %vm1423_vm11, %v1411_v0, %v1426_v51 }
 0x19f   : > { %v1435_v17 = vsel %vm1423_vm11, %v1417_v11, %v1434_v27  ;;  %v1051_v5 = vshll.u32 %v7537_v55, 23  ;;  %v7590_v62 = vmul.u32.u64.low %v1437_v46, %v1432_v13  ;;  %v7591_v47 = vmul.u32.u64.high %v1437_v46, %v1432_v13, %v7590_v62 }
 0x1a0   : > { %v1436_v56 = vsel %vm1422_vm13, %v1433_v33, %v1435_v17  ;;  %v1046_v10 = vshll.u32 %v7427_v41, %v7484_v57  ;;  %v1663_v36 = vsub.s32 0, %v7583_v3  ;;  %v10919_v42 = vand.u32 2147483647, %v7267_v25 }
 0x1a1   : > { %v7597_v32 = vmul.u32.u64.low %v1437_v46, %v1436_v56  ;;  %v7598_v2 = vmul.u32.u64.high %v1437_v46, %v1436_v56, %v7597_v32  ;;  %v1363_v55 = vshll.u32 %v1362_v23, 23  ;;  %vm5862_vm3 = vcmp.lt.s32.totalorder %v5861_v4, 0 }
 0x1a2   : > { %vm7602_vm2 = vcmp.le.f32.partialorder %v10919_v42, 0.7853982  ;;  %v1428_v11 = vsel %vm1422_vm13, %v1425_v24, %v1427_v58  ;;  %v1705_v39 = vshrl.u32 %v1704_v45, 23  ;;  %v10922_v51 = vxor.u32 2147483648, %v7510_v61 }
 0x1a3   : > { %v1048_v57 = vor.u32 %v7535_v26, %v1046_v10  ;;  %v1359_v40 = vshrl.u32 %v7541_v31, %v1357_v54  ;;  %v1371_v20 = vsub.s32 4, %v7434_v30  ;;  %v1052_v33 = vor.u32 4788187, %v1051_v5 }
 0x1a4   : > { %v1266_v41 = vsel %vm1183_vm15, %v10922_v51, %v7510_v61  ;;  %v5880_v13 = vmin.u32 %v1663_v36, %v7583_v3  ;;  %v1447_v23 = vadd.s32 1, %v7591_v47  ;;  %v5883_v48 = vadd.s32 4294967169, %v1705_v39 }
 0x1a5   : > { %v1358_v27 = vshll.u32 %v7448_v14, %v7518_v38  ;;  %v1148_v45 = vsel %vm5862_vm3, 0, %v5861_v4  ;;  %v1444_v24 = vmul.u32 %v1437_v46, %v1428_v11  ;;  %vm1446_vm15 = vc.u32 %v7598_v2, %v7590_v62  ;;  %v7631_v46 = vpop.f32.mrb[13].mxu0 }
 0x1a6   : > { %v1270_v61 = vsel %vm7573_vm12, 0, %v7532_v63  ;;  %v1364_v26 = vor.u32 4788187, %v1363_v55  ;;  %v1448_v31 = vsel %vm1446_vm15, %v1447_v23, %v7591_v47  ;;  %v1711_v54 = vadd.s32 1, %v5883_v48 }
 0x1a7   : > { %v1269_v58 = vsel %vm7573_vm12, %v7259_v19, %v1266_v41  ;;  %v1360_v17 = vor.u32 %v1359_v40, %v1358_v27  ;;  %v1372_v14 = vsel %vm1287_vm14, %v1371_v20, %v7434_v30  ;;  %v1449_v38 = vadd.s32 %v1448_v31, %v1444_v24 }
 0x1a8   : > { %v1153_v4 = vsub.s32 4294967266, %v1148_v45  ;;  %v1665_v5 = vclz %v5880_v13  ;;  %vm1712_vm4 = vcmp.gt.s32.totalorder %v1711_v54, 0  ;;  %v7635_v63 = vadd.f32 %v7256_v16, %v7285_v53 }
 0x1a9   : > { %v1053_v47 = vand.u32 2147483647, %v1052_v33  ;;  %v1055_v56 = vcvt.s32.f32 %v1048_v57  ;;  %v1450_v10 = vadd.s32 536870912, %v1449_v38  ;;  %v1713_v44 = vsel %vm1712_vm4, %v1711_v54, 0 }
 0x1aa   : > { %10923 = vst [vmem:[#allocation29_spill] sm:$0xff] %v7635_v63  ;;  %6719 = vcosq.f32 %v1269_v58  ;;  %v1365_v36 = vand.u32 2147483647, %v1364_v26  ;;  %v1149_v32 = vsub.s32 32, %v1148_v45  ;;  %v1715_v42 = vand.u32 31, %v1713_v44 }
 0x1ab   : > { %v1367_v55 = vcvt.s32.f32 %v1360_v17  ;;  %v1374_v30 = vsel %vm7602_vm2, 0, %v1372_v14  ;;  %v1133_v11 = vadd.s32 %v7450_v7, %v7456_v35  ;;  %v10778_v39 = vand.u32 2147483647, %v7564_v15 }
 0x1ac   : > { %v1154_v51 = vadd.s32 127, %v1153_v4  ;;  %v5881_v16 = vadd.s32 4294967294, %v1665_v5  ;;  %v1716_v53 = vsub.s32 32, %v1715_v42  ;;  %v1496_v41 = vand.u32 2139095040, %v7635_v63 }
 0x1ad   : > { %6721 = vsinq.f32 %v1269_v58  ;;  %v7643_v57 = vadd.s32 3, %v1270_v61  ;;  %v7645_v40 = vmul.f32 %v1055_v56, %v1053_v47  ;;  %v7647_v20 = vshrl.u32 %v1450_v10, 30 }
 0x1ae   : > { %v7649_v33 = vmul.f32 %v1367_v55, %v1365_v36  ;;  %v7651_v13 = vadd.s32 3, %v1374_v30  ;;  %v1150_v7 = vshll.u32 %v7503_v52, %v1148_v45  ;;  %v1151_v35 = vshrl.u32 %v1133_v11, %v1149_v32 }
 0x1af   : > { %10924 = vst [vmem:[#allocation30_spill] sm:$0xff] %v7643_v57  ;;  %v1708_v23 = vand.u32 8388607, %v10778_v39  ;;  %v1719_v48 = vshrl.u32 %v10904_v37, %v1716_v53  ;;  %v1722_v27 = vshrl.u32 %v10905_v22, %v1716_v53  ;;  %v1725_v24 = vshrl.u32 %v10911_v12, %v1716_v53 }
 0x1b0   : > { %10925 = vst [vmem:[#allocation31_spill] sm:$0xff] %v7651_v13  ;;  %v1155_v61 = vshll.u32 %v1154_v51, 23  ;;  %vm5882_vm5 = vcmp.lt.s32.totalorder %v5881_v16, 0  ;;  %v7659_v26 = vshrl.u32 %v1713_v44, 5  ;;  %v1497_v31 = vshrl.u32 %v1496_v41, 23 }
 0x1b1   : > { %v1452_v54 = vshll.u32 %v7647_v20, 30  ;;  %v1718_v58 = vshll.u32 %v10902_v28, %v1715_v42  ;;  %v1721_v52 = vshll.u32 %v10904_v37, %v1715_v42  ;;  %v1724_v45 = vshll.u32 %v10905_v22, %v1715_v42 }
 0x1b2   : > { %v1727_v17 = vshll.u32 %v10911_v12, %v1715_v42  ;;  %v1728_v14 = vshrl.u32 %v10907_v34, %v1716_v53  ;;  %v1730_v4 = vshll.u32 %v10907_v34, %v1715_v42  ;;  %v1731_v5 = vshrl.u32 %v10906_v49, %v1716_v53 }
 0x1b3   : > { %v1369_v47 = vxor.u32 2147483648, %v7649_v33  ;;  %v1720_v56 = vor.u32 %v1719_v48, %v1718_v58  ;;  %v1723_v10 = vor.u32 %v1722_v27, %v1721_v52  ;;  %v1726_v44 = vor.u32 %v1725_v24, %v1724_v45 }
 0x1b4   : > { %v7670_v36 = vpop.eup %6719  ;;  %v7672_v32 = vor.u32 %v1151_v35, %v1150_v7  ;;  %v1729_v55 = vor.u32 %v1728_v14, %v1727_v17  ;;  %v1732_v30 = vor.u32 %v1731_v5, %v1730_v4  ;;  %v5875_v11 = vadd.s32 4294967169, %v1497_v31 }
 0x1b5   : > { %10926 = vst [vmem:[#allocation32_spill] sm:$0xff] %v7670_v36  ;;  %v7674_v51 = vor.u32 4788187, %v1155_v61  ;;  %v7677_v41 = vsel %vm5882_vm5, 0, %v5881_v16  ;;  %v7679_v42 = vsub.s32 %v1449_v38, %v1452_v54  ;;  %vm1736_vm6 = vcmp.lt.s32.totalorder %v7659_v26, 4 }
 0x1b6   : > { %v1709_v39 = vor.u32 8388608, %v1708_v23  ;;  %vm1733_vm7 = vcmp.lt.s32.totalorder %v7659_v26, 1  ;;  %vm1735_vm8 = vcmp.lt.s32.totalorder %v7659_v26, 3  ;;  %v1742_v7 = vsel %vm1736_vm6, %v1729_v55, 920167782 }
 0x1b7   : > { %v7686_v35 = vpop.eup %6721  ;;  %v1741_v48 = vsel %vm1733_vm7, %v1720_v56, %v1723_v10  ;;  %v1743_v16 = vsel %vm1735_vm8, %v1726_v44, %v1742_v7  ;;  %v1745_v38 = vsel %vm1733_vm7, %v1723_v10, %v1726_v44  ;;  %v10779_v23 = vand.u32 2147483647, %v7635_v63 }
 0x1b8   : > { %10927 = vst [vmem:[#allocation33_spill] sm:$0xff] %v7686_v35  ;;  %v1673_v27 = vsub.s32 4294967266, %v7677_v41  ;;  %v1717_v24 = vshrl.u32 %v10902_v28, %v1716_v53  ;;  %v1746_v61 = vsel %vm1736_vm6, %v1732_v30, 1326507024  ;;  %v1503_v31 = vadd.s32 1, %v5875_v11  ;;  %v7723_v30 = vpop.f32.mrb[14].mxu0 }
 0x1b9   : > { %v1455_v54 = vsub.s32 0, %v7679_v42  ;;  %vm1734_vm9 = vcmp.lt.s32.totalorder %v7659_v26, 2  ;;  %v1738_v58 = vsel %vm1736_vm6, %v1726_v44, 2102212464  ;;  %v1747_v52 = vsel %vm1735_vm8, %v1729_v55, %v1746_v61  ;;  %v7717_v44 = vld [vmem:[%s10732_s2] ss:$0 sm:$0xff] }
 0x1ba   : > { %v1744_v45 = vsel %vm1734_vm9, %v1741_v48, %v1743_v16  ;;  %v1748_v53 = vsel %vm1734_vm9, %v1745_v38, %v1747_v52  ;;  %v1749_v17 = vshll.u32 %v1709_v39, 8  ;;  %vm1504_vm10 = vcmp.gt.s32.totalorder %v1503_v31, 0 }
 0x1bb   : > { %v1669_v14 = vsub.s32 32, %v7677_v41  ;;  %v1737_v4 = vsel %vm1733_vm7, %v1717_v24, %v1720_v56  ;;  %v1500_v5 = vand.u32 8388607, %v10779_v23  ;;  %v7721_v55 = vadd.f32 %v7717_v44, %v7304_v29 }
 0x1bc   : > { %v1739_v39 = vsel %vm1735_vm8, %v1723_v10, %v1738_v58  ;;  %v7727_v11 = vmul.u32.u64.low %v1749_v17, %v1748_v53  ;;  %v7728_v7 = vmul.u32.u64.high %v1749_v17, %v1748_v53, %v7727_v11  ;;  %v1505_v56 = vsel %vm1504_vm10, %v1503_v31, 0 }
 0x1bd   : > { %10928 = vst [vmem:[#allocation34_spill] sm:$0xff] %v7721_v55  ;;  %v1674_v48 = vadd.s32 127, %v1673_v27  ;;  %v5872_v16 = vmin.u32 %v1455_v54, %v7679_v42  ;;  %v7731_v38 = vmul.u32.u64.low %v1749_v17, %v1744_v45  ;;  %v7732_v24 = vmul.u32.u64.high %v1749_v17, %v1744_v45, %v7731_v38 }
 0x1be   : > { %v1370_v29 = vsel %vm1287_vm14, %v1369_v47, %v7649_v33  ;;  %v1653_v10 = vadd.s32 %v7513_v8, %v7525_v50  ;;  %v1507_v58 = vand.u32 31, %v1505_v56  ;;  %v1157_v52 = vand.u32 2147483647, %v7674_v51 }
 0x1bf   : > { %v1159_v27 = vcvt.s32.f32 %v7672_v32  ;;  %v1740_v31 = vsel %vm1734_vm9, %v1737_v4, %v1739_v39  ;;  %v2016_v54 = vand.u32 2139095040, %v7721_v55  ;;  %v1670_v45 = vshll.u32 %v7583_v3, %v7677_v41 }
 0x1c0   : > { %vm1758_vm11 = vc.u32 %v7728_v7, %v7731_v38  ;;  %v1501_v33 = vor.u32 8388608, %v1500_v5  ;;  %v1508_v47 = vsub.s32 32, %v1507_v58  ;;  %v1671_v53 = vshrl.u32 %v1653_v10, %v1669_v14 }
 0x1c1   : > { %v1675_v8 = vshll.u32 %v1674_v48, 23  ;;  %v1457_v50 = vclz %v5872_v16  ;;  %v1759_v51 = vadd.s32 1, %v7732_v24  ;;  %v1756_v11 = vmul.u32 %v1749_v17, %v1740_v31 }
 0x1c2   : > { %v1506_v32 = vshrl.u32 %v1505_v56, 5  ;;  %v1511_v26 = vshrl.u32 %v10904_v37, %v1508_v47  ;;  %v1514_v4 = vshrl.u32 %v10905_v22, %v1508_v47  ;;  %v1510_v3 = vshll.u32 %v10902_v28, %v1507_v58 }
 0x1c3   : > { %v1760_v39 = vsel %vm1758_vm11, %v1759_v51, %v7732_v24  ;;  %v1513_v41 = vshll.u32 %v10904_v37, %v1507_v58  ;;  %v1517_v5 = vshrl.u32 %v10911_v12, %v1508_v47  ;;  %v1516_v14 = vshll.u32 %v10905_v22, %v1507_v58 }
 0x1c4   : > { %v1761_v23 = vadd.s32 %v1760_v39, %v1756_v11  ;;  %v1519_v48 = vshll.u32 %v10911_v12, %v1507_v58  ;;  %v1520_v17 = vshrl.u32 %v10907_v34, %v1508_v47  ;;  %v1512_v56 = vor.u32 %v1511_v26, %v1510_v3 }
 0x1c5   : > { %v1515_v16 = vor.u32 %v1514_v4, %v1513_v41  ;;  %v1522_v10 = vshll.u32 %v10907_v34, %v1507_v58  ;;  %v1523_v31 = vshrl.u32 %v10906_v49, %v1508_v47  ;;  %v7765_v24 = vsel %vm7602_vm2, %v7267_v25, %v1370_v29 }
 0x1c6   : > { %v1762_v51 = vadd.s32 536870912, %v1761_v23  ;;  %v1518_v61 = vor.u32 %v1517_v5, %v1516_v14  ;;  %v1521_v11 = vor.u32 %v1520_v17, %v1519_v48  ;;  %v7767_v39 = vmul.f32 %v1159_v27, %v1157_v52 }
 0x1c7   : > { %v1672_v13 = vor.u32 %v1671_v53, %v1670_v45  ;;  %v1676_v19 = vor.u32 4788187, %v1675_v8  ;;  %v1524_v36 = vor.u32 %v1523_v31, %v1522_v10  ;;  %v5873_v35 = vadd.s32 4294967294, %v1457_v50 }
 0x1c8   : > { %v7769_v26 = vshrl.u32 %v1762_v51, 30  ;;  %vm1525_vm12 = vcmp.lt.s32.totalorder %v1506_v32, 1  ;;  %vm1528_vm13 = vcmp.lt.s32.totalorder %v1506_v32, 4  ;;  %v1541_v3 = vshll.u32 %v1501_v33, 8 }
 0x1c9   : > { %v1533_v58 = vsel %vm1525_vm12, %v1512_v56, %v1515_v16  ;;  %v1534_v4 = vsel %vm1528_vm13, %v1521_v11, 920167782  ;;  %v2017_v0 = vshrl.u32 %v2016_v54, 23  ;;  %v1509_v41 = vshrl.u32 %v10902_v28, %v1508_v47 }
 0x1ca   : > { %v1764_v29 = vshll.u32 %v7769_v26, 30  ;;  %vm1527_vm14 = vcmp.lt.s32.totalorder %v1506_v32, 3  ;;  %v1530_v52 = vsel %vm1528_vm13, %v1518_v61, 2102212464  ;;  %vm1526_vm2 = vcmp.lt.s32.totalorder %v1506_v32, 2 }
 0x1cb   : > { %v1535_v27 = vsel %vm1527_vm14, %v1518_v61, %v1534_v4  ;;  %v1537_v45 = vsel %vm1525_vm12, %v1515_v16, %v1518_v61  ;;  %v1538_v53 = vsel %vm1528_vm13, %v1524_v36, 1326507024  ;;  %vm975_vm3 = vcmp.lt.s32.totalorder %v7262_v21, 0 }
 0x1cc   : > { %vm5874_vm15 = vcmp.lt.s32.totalorder %v5873_v35, 0  ;;  %v7776_v8 = vsub.s32 %v1761_v23, %v1764_v29  ;;  %v1529_v50 = vsel %vm1525_vm12, %v1509_v41, %v1512_v56  ;;  %v1536_v54 = vsel %vm1526_vm2, %v1533_v58, %v1535_v27 }
 0x1cd   : > { %vm1079_vm4 = vcmp.lt.s32.totalorder %v7279_v43, 0  ;;  %v1531_v33 = vsel %vm1527_vm14, %v1515_v16, %v1530_v52  ;;  %v1539_v47 = vsel %vm1527_vm14, %v1521_v11, %v1538_v53  ;;  %v1677_v48 = vand.u32 2147483647, %v1676_v19 }
 0x1ce   : > { %v7781_v5 = vmul.u32.u64.low %v1541_v3, %v1536_v54  ;;  %v7782_v14 = vmul.u32.u64.high %v1541_v3, %v1536_v54, %v7781_v5  ;;  %v1683_v36 = vsub.s32 4, %v7567_v9  ;;  %v1540_v61 = vsel %vm1526_vm2, %v1537_v45, %v1539_v47 }
 0x1cf   : > { %v5895_v17 = vadd.s32 4294967169, %v2017_v0  ;;  %v1679_v23 = vcvt.s32.f32 %v1672_v13  ;;  %v7787_v10 = vmul.u32.u64.low %v1541_v3, %v1540_v61  ;;  %v7788_v31 = vmul.u32.u64.high %v1541_v3, %v1540_v61, %v7787_v10 }
 0x1d0   : > { %v10784_v56 = vand.u32 2147483647, %v7721_v55  ;;  %v7792_v51 = vsel %vm5874_vm15, 0, %v5873_v35  ;;  %v1767_v16 = vsub.s32 0, %v7776_v8  ;;  %v1532_v11 = vsel %vm1526_vm2, %v1529_v50, %v1531_v33 }
 0x1d1   : > { %v2023_v58 = vadd.s32 1, %v5895_v17  ;;  %6723 = vcosq.f32 %v7765_v24  ;;  %v1161_v19 = vxor.u32 2147483648, %v7767_v39  ;;  %vm1599_vm5 = vcmp.lt.s32.totalorder %v7439_v18, 0  ;;  %v7845_v17 = vpop.f32.mrb[15].mxu0 }
 0x1d2   : > { %v1551_v13 = vadd.s32 1, %v7782_v14  ;;  %v7800_v4 = vmul.f32 %v1679_v23, %v1677_v48  ;;  %v7805_v35 = vsel %vm1599_vm5, %v1683_v36, %v7567_v9  ;;  %v7809_v32 = vadd.f32 %v7717_v44, %v7372_v59 }
 0x1d3   : > { %vm2024_vm6 = vcmp.gt.s32.totalorder %v2023_v58, 0  ;;  %v1465_v0 = vsub.s32 4294967266, %v7792_v51  ;;  %v1548_v29 = vmul.u32 %v1541_v3, %v1532_v11  ;;  %vm1550_vm7 = vc.u32 %v7788_v31, %v7781_v5 }
 0x1d4   : > { %10929 = vst [vmem:[#allocation35_spill] sm:$0xff] %v7809_v32  ;;  %v2025_v41 = vsel %vm2024_vm6, %v2023_v58, 0  ;;  %v5884_v52 = vmin.u32 %v1767_v16, %v7776_v8  ;;  %v1552_v27 = vsel %vm1550_vm7, %v1551_v13, %v7782_v14  ;;  %v2020_v9 = vand.u32 8388607, %v10784_v56 }
 0x1d5   : > { %v2027_v45 = vand.u32 31, %v2025_v41  ;;  %v10930_v53 = vxor.u32 2147483648, %v7645_v40  ;;  %6725 = vsinq.f32 %v7765_v24  ;;  %v10932_v3 = vand.u32 2147483647, %v7439_v18 }
 0x1d6   : > { %v1553_v54 = vadd.s32 %v1552_v27, %v1548_v29  ;;  %v7835_v33 = vsel %vm1079_vm4, %v1161_v19, %v7767_v39  ;;  %v1808_v14 = vand.u32 2139095040, %v7809_v32  ;;  %v1445_v48 = vadd.s32 %v7590_v62, %v7598_v2 }
 0x1d7   : > { %v7823_v59 = vsel %vm975_vm3, %v10930_v53, %v7645_v40  ;;  %vm7828_vm8 = vcmp.le.f32.partialorder %v10932_v3, 0.7853982  ;;  %10935 = vst [vmem:[#allocation37_spill] sm:$0xff] %v7835_v33  ;;  %v2028_v40 = vsub.s32 32, %v2027_v45  ;;  %v1461_v39 = vsub.s32 32, %v7792_v51 }
 0x1d8   : > { %10931 = vst [vmem:[#allocation36_spill] sm:$0xff] %v7823_v59  ;;  %v1554_v61 = vadd.s32 536870912, %v1553_v54  ;;  %v1466_v23 = vadd.s32 127, %v1465_v0  ;;  %v1769_v10 = vclz %v5884_v52  ;;  %v2021_v16 = vor.u32 8388608, %v2020_v9 }
 0x1d9   : > { %v2031_v58 = vshrl.u32 %v10904_v37, %v2028_v40  ;;  %v2034_v19 = vshrl.u32 %v10905_v22, %v2028_v40  ;;  %v2037_v13 = vshrl.u32 %v10911_v12, %v2028_v40  ;;  %v2030_v62 = vshll.u32 %v10902_v28, %v2027_v45 }
 0x1da   : > { %v7848_v11 = vshrl.u32 %v1554_v61, 30  ;;  %v2033_v2 = vshll.u32 %v10904_v37, %v2027_v45  ;;  %v2040_v29 = vshrl.u32 %v10907_v34, %v2028_v40  ;;  %v1809_v27 = vshrl.u32 %v1808_v14, 23 }
 0x1db   : > { %v7856_v53 = vpop.eup %6723  ;;  %v2026_v52 = vshrl.u32 %v2025_v41, 5  ;;  %v2036_v9 = vshll.u32 %v10905_v22, %v2027_v45  ;;  %v2039_v3 = vshll.u32 %v10911_v12, %v2027_v45  ;;  %v1462_v61 = vshll.u32 %v7679_v42, %v7792_v51 }
 0x1dc   : > { %10936 = vst [vmem:[#allocation38_spill] sm:$0xff] %v7856_v53  ;;  %v1556_v0 = vshll.u32 %v7848_v11, 30  ;;  %v2032_v56 = vor.u32 %v2031_v58, %v2030_v62  ;;  %v2035_v36 = vor.u32 %v2034_v19, %v2033_v2  ;;  %v2042_v47 = vshll.u32 %v10907_v34, %v2027_v45 }
 0x1dd   : > { %vm1391_vm9 = vcmp.lt.s32.totalorder %v7464_v6, 0  ;;  %v2038_v14 = vor.u32 %v2037_v13, %v2036_v9  ;;  %v2041_v25 = vor.u32 %v2040_v29, %v2039_v3  ;;  %v2043_v53 = vshrl.u32 %v10906_v49, %v2028_v40 }
 0x1de   : > { %v7865_v24 = vsub.s32 %v1553_v54, %v1556_v0  ;;  %v1463_v41 = vshrl.u32 %v1445_v48, %v1461_v39  ;;  %v1467_v57 = vshll.u32 %v1466_v23, 23  ;;  %v5885_v33 = vadd.s32 4294967294, %v1769_v10 }
 0x1df   : > { %v2061_v43 = vshll.u32 %v2021_v16, 8  ;;  %v7868_v59 = vpop.eup %6725  ;;  %v2044_v51 = vor.u32 %v2043_v53, %v2042_v47  ;;  %vm2045_vm10 = vcmp.lt.s32.totalorder %v2026_v52, 1  ;;  %v5887_v58 = vadd.s32 4294967169, %v1809_v27 }
 0x1e0   : > { %10937 = vst [vmem:[#allocation39_spill] sm:$0xff] %v7868_v59  ;;  %v1559_v42 = vsub.s32 0, %v7865_v24  ;;  %v10938_v45 = vand.u32 2147483647, %v7464_v6  ;;  %v2029_v19 = vshrl.u32 %v10902_v28, %v2028_v40  ;;  %vm2047_vm12 = vcmp.lt.s32.totalorder %v2026_v52, 3 }
 0x1e1   : > { %vm2048_vm13 = vcmp.lt.s32.totalorder %v2026_v52, 4  ;;  %v2053_v48 = vsel %vm2045_vm10, %v2032_v56, %v2035_v36  ;;  %v2057_v16 = vsel %vm2045_vm10, %v2035_v36, %v2038_v14  ;;  %vm5886_vm14 = vcmp.lt.s32.totalorder %v5885_v33, 0 }
 0x1e2   : > { %vm7873_vm11 = vcmp.le.f32.partialorder %v10938_v45, 0.7853982  ;;  %v5876_v39 = vmin.u32 %v1559_v42, %v7865_v24  ;;  %v2050_v23 = vsel %vm2048_vm13, %v2038_v14, 2102212464  ;;  %v2054_v10 = vsel %vm2048_vm13, %v2041_v25, 920167782 }
 0x1e3   : > { %vm2046_vm2 = vcmp.lt.s32.totalorder %v2026_v52, 2  ;;  %v2055_v47 = vsel %vm2047_vm12, %v2038_v14, %v2054_v10  ;;  %v2058_v13 = vsel %vm2048_vm13, %v2044_v51, 1326507024  ;;  %v2049_v62 = vsel %vm2045_vm10, %v2029_v19, %v2032_v56 }
 0x1e4   : > { %v2051_v2 = vsel %vm2047_vm12, %v2035_v36, %v2050_v23  ;;  %v2056_v29 = vsel %vm2046_vm2, %v2053_v48, %v2055_v47  ;;  %v2059_v27 = vsel %vm2047_vm12, %v2041_v25, %v2058_v13  ;;  %v1561_v53 = vclz %v5876_v39 }
 0x1e5   : > { %v2060_v40 = vsel %vm2046_vm2, %v2057_v16, %v2059_v27  ;;  %v7881_v0 = vmul.u32.u64.low %v2061_v43, %v2056_v29  ;;  %v7882_v9 = vmul.u32.u64.high %v2061_v43, %v2056_v29, %v7881_v0  ;;  %v1468_v3 = vor.u32 4788187, %v1467_v57 }
 0x1e6   : > { %v7885_v42 = vmul.u32.u64.low %v2061_v43, %v2060_v40  ;;  %v7886_v45 = vmul.u32.u64.high %v2061_v43, %v2060_v40, %v7885_v42  ;;  %v10791_v59 = vand.u32 2147483647, %v7809_v32  ;;  %v10941_v56 = vxor.u32 2147483648, %v7800_v4  ;;  %v7936_v40 = vpop.f32.mrb[16].mxu0 }
 0x1e7   : > { %v10942_v25 = vsel %vm7828_vm8, 0, %v7805_v35  ;;  %v10944_v57 = vsub.s32 4, %v7647_v20  ;;  %v1815_v19 = vadd.s32 1, %v5887_v58  ;;  %v1464_v48 = vor.u32 %v1463_v41, %v1462_v61 }
 0x1e8   : > { %v1682_v36 = vsel %vm1599_vm5, %v10941_v56, %v7800_v4  ;;  %v7898_v14 = vadd.s32 3, %v10942_v25  ;;  %v1772_v39 = vsel %vm5886_vm14, 0, %v5885_v33  ;;  %v2052_v23 = vsel %vm2046_vm2, %v2049_v62, %v2051_v2 }
 0x1e9   : > { %v1476_v51 = vsel %vm1391_vm9, %v10944_v57, %v7647_v20  ;;  %v7909_v4 = vadd.f32 %v7717_v44, %v7417_v60  ;;  %v5877_v10 = vadd.s32 4294967294, %v1561_v53  ;;  %v2071_v35 = vadd.s32 1, %v7882_v9 }
 0x1ea   : > { %10943 = vst [vmem:[#allocation40_spill] sm:$0xff] %v7898_v14  ;;  %vm1816_vm15 = vcmp.gt.s32.totalorder %v1815_v19, 0  ;;  %v7914_v16 = vadd.f32 %v7717_v44, %v7470_v1  ;;  %v7919_v20 = vsel %vm7828_vm8, %v7439_v18, %v1682_v36  ;;  %v1469_v33 = vand.u32 2147483647, %v1468_v3 }
 0x1eb   : > { %10945 = vst [vmem:[#allocation41_spill] sm:$0xff] %v7909_v4  ;;  %v1478_v52 = vsel %vm7873_vm11, 0, %v1476_v51  ;;  %v1812_v60 = vand.u32 8388607, %v10791_v59  ;;  %v1773_v61 = vsub.s32 32, %v1772_v39  ;;  %v2068_v41 = vmul.u32 %v2061_v43, %v2052_v23 }
 0x1ec   : > { %10946 = vst [vmem:[#allocation42_spill] sm:$0xff] %v7914_v16  ;;  %vm2070_vm5 = vc.u32 %v7886_v45, %v7881_v0  ;;  %v1817_v58 = vsel %vm1816_vm15, %v1815_v19, 0  ;;  %v1471_v1 = vcvt.s32.f32 %v1464_v48  ;;  %v1777_v47 = vsub.s32 4294967266, %v1772_v39 }
 0x1ed   : > { %v2072_v13 = vsel %vm2070_vm5, %v2071_v35, %v7882_v9  ;;  %v2120_v50 = vand.u32 2139095040, %v7909_v4  ;;  %v1757_v62 = vadd.s32 %v7731_v38, %v7728_v7  ;;  %vm5878_vm6 = vcmp.lt.s32.totalorder %v5877_v10, 0 }
 0x1ee   : > { %v2073_v2 = vadd.s32 %v2072_v13, %v2068_v41  ;;  %v1819_v29 = vand.u32 31, %v1817_v58  ;;  %6727 = vcosq.f32 %v7919_v20  ;;  %v7932_v27 = vmul.f32 %v1471_v1, %v1469_v33 }
 0x1ef   : > { %v7934_v43 = vadd.s32 3, %v1478_v52  ;;  %v1813_v53 = vor.u32 8388608, %v1812_v60  ;;  %v1774_v3 = vshll.u32 %v7776_v8, %v1772_v39  ;;  %v1775_v9 = vshrl.u32 %v1757_v62, %v1773_v61 }
 0x1f0   : > { %v2074_v42 = vadd.s32 536870912, %v2073_v2  ;;  %v1820_v56 = vsub.s32 32, %v1819_v29  ;;  %v1778_v36 = vadd.s32 127, %v1777_v47  ;;  %v7939_v25 = vsel %vm5878_vm6, 0, %v5877_v10 }
 0x1f1   : > { %10947 = vst [vmem:[#allocation43_spill] sm:$0xff] %v7934_v43  ;;  %v1822_v7 = vshll.u32 %v10902_v28, %v1819_v29  ;;  %v2121_v38 = vshrl.u32 %v2120_v50, 23  ;;  %v1825_v19 = vshll.u32 %v10904_v37, %v1819_v29  ;;  %v1818_v23 = vshrl.u32 %v1817_v58, 5 }
 0x1f2   : > { %v7942_v57 = vshrl.u32 %v2074_v42, 30  ;;  %v1823_v51 = vshrl.u32 %v10904_v37, %v1820_v56  ;;  %v1826_v48 = vshrl.u32 %v10905_v22, %v1820_v56  ;;  %v1829_v8 = vshrl.u32 %v10911_v12, %v1820_v56 }
 0x1f3   : > { %v1831_v39 = vshll.u32 %v10911_v12, %v1819_v29  ;;  %v1832_v35 = vshrl.u32 %v10907_v34, %v1820_v56  ;;  %v1828_v60 = vshll.u32 %v10905_v22, %v1819_v29  ;;  %v1779_v61 = vshll.u32 %v1778_v36, 23 }
 0x1f4   : > { %v2076_v10 = vshll.u32 %v7942_v57, 30  ;;  %v1824_v33 = vor.u32 %v1823_v51, %v1822_v7  ;;  %v1827_v52 = vor.u32 %v1826_v48, %v1825_v19  ;;  %v1834_v1 = vshll.u32 %v10907_v34, %v1819_v29 }
 0x1f5   : > { %v1833_v41 = vor.u32 %v1832_v35, %v1831_v39  ;;  %v1835_v47 = vshrl.u32 %v10906_v49, %v1820_v56  ;;  %v1473_v58 = vxor.u32 2147483648, %v7932_v27  ;;  %v1830_v50 = vor.u32 %v1829_v8, %v1828_v60 }
 0x1f6   : > { %v7955_v13 = vsub.s32 %v2073_v2, %v2076_v10  ;;  %v1853_v62 = vshll.u32 %v1813_v53, 8  ;;  %v1776_v42 = vor.u32 %v1775_v9, %v1774_v3  ;;  %v1569_v59 = vsub.s32 4294967266, %v7939_v25 }
 0x1f7   : > { %v1836_v18 = vor.u32 %v1835_v47, %v1834_v1  ;;  %vm1837_vm7 = vcmp.lt.s32.totalorder %v1818_v23, 1  ;;  %vm1840_vm8 = vcmp.lt.s32.totalorder %v1818_v23, 4  ;;  %v5899_v51 = vadd.s32 4294967169, %v2121_v38 }
 0x1f8   : > { %v2079_v7 = vsub.s32 0, %v7955_v13  ;;  %v1845_v36 = vsel %vm1837_vm7, %v1824_v33, %v1827_v52  ;;  %v7960_v29 = vpop.eup %6727  ;;  %v1780_v19 = vor.u32 4788187, %v1779_v61  ;;  %vm1838_vm10 = vcmp.lt.s32.totalorder %v1818_v23, 2 }
 0x1f9   : > { %10948 = vst [vmem:[#allocation44_spill] sm:$0xff] %v7960_v29  ;;  %vm1839_vm12 = vcmp.lt.s32.totalorder %v1818_v23, 3  ;;  %v1846_v2 = vsel %vm1840_vm8, %v1833_v41, 920167782  ;;  %v1821_v48 = vshrl.u32 %v10902_v28, %v1820_v56  ;;  %v1842_v53 = vsel %vm1840_vm8, %v1830_v50, 2102212464 }
 0x1fa   : > { %v1847_v3 = vsel %vm1839_vm12, %v1830_v50, %v1846_v2  ;;  %v1849_v9 = vsel %vm1837_vm7, %v1827_v52, %v1830_v50  ;;  %v1565_v8 = vsub.s32 32, %v7939_v25  ;;  %v1570_v39 = vadd.s32 127, %v1569_v59 }
 0x1fb   : > { %v1848_v35 = vsel %vm1838_vm10, %v1845_v36, %v1847_v3  ;;  %v1850_v10 = vsel %vm1840_vm8, %v1836_v18, 1326507024  ;;  %v5896_v38 = vmin.u32 %v2079_v7, %v7955_v13  ;;  %v1841_v60 = vsel %vm1837_vm7, %v1821_v48, %v1824_v33 }
 0x1fc   : > { %v1851_v61 = vsel %vm1839_vm12, %v1833_v41, %v1850_v10  ;;  %v2127_v1 = vadd.s32 1, %v5899_v51  ;;  %v1843_v47 = vsel %vm1839_vm12, %v1827_v52, %v1842_v53  ;;  %v1549_v50 = vadd.s32 %v7781_v5, %v7788_v31 }
 0x1fd   : > { %v1852_v29 = vsel %vm1838_vm10, %v1849_v9, %v1851_v61  ;;  %v7969_v56 = vmul.u32.u64.low %v1853_v62, %v1848_v35  ;;  %v7970_v14 = vmul.u32.u64.high %v1853_v62, %v1848_v35, %v7969_v56  ;;  %v1474_v18 = vsel %vm1391_vm9, %v1473_v58, %v7932_v27 }
 0x1fe   : > { %v7975_v59 = vmul.u32.u64.low %v1853_v62, %v1852_v29  ;;  %v7976_v2 = vmul.u32.u64.high %v1853_v62, %v1852_v29, %v7975_v59  ;;  %vm2128_vm13 = vcmp.gt.s32.totalorder %v2127_v1, 0  ;;  %v1781_v33 = vand.u32 2147483647, %v1780_v19 }
 0x1ff   : > { %v10794_v52 = vand.u32 2147483647, %v7909_v4  ;;  %v2129_v41 = vsel %vm2128_vm13, %v2127_v1, 0  ;;  %v1567_v7 = vshrl.u32 %v1549_v50, %v1565_v8  ;;  %v2081_v36 = vclz %v5896_v38 }
 0x200   : > { %v1844_v51 = vsel %vm1838_vm10, %v1841_v60, %v1843_v47  ;;  %v2131_v48 = vand.u32 31, %v2129_v41  ;;  %6729 = vsinq.f32 %v7919_v20  ;;  %v1783_v5 = vcvt.s32.f32 %v1776_v42 }
 0x201   : > { %v1571_v31 = vshll.u32 %v1570_v39, 23  ;;  %v1863_v29 = vadd.s32 1, %v7970_v14  ;;  %v7988_v53 = vsel %vm7873_vm11, %v7464_v6, %v1474_v18  ;;  %v1787_v27 = vsub.s32 4, %v7769_v26  ;;  %v8001_v39 = vpop.f32.mrb[17].mxu0 }
 0x202   : > { %v1566_v58 = vshll.u32 %v7865_v24, %v7939_v25  ;;  %v7994_v19 = vmul.f32 %v1783_v5, %v1781_v33  ;;  %v1860_v3 = vmul.u32 %v1853_v62, %v1844_v51  ;;  %vm1862_vm9 = vc.u32 %v7976_v2, %v7969_v56  ;;  %10949 = vst [vmem:[#allocation45_spill] sm:$0xff] %v8001_v39 }
 0x203   : > { %v2132_v20 = vsub.s32 32, %v2131_v48  ;;  %v5897_v9 = vadd.s32 4294967294, %v2081_v36  ;;  %v1864_v54 = vsel %vm1862_vm9, %v1863_v29, %v7970_v14  ;;  %v2124_v8 = vand.u32 8388607, %v10794_v52 }
 0x204   : > { %v1568_v42 = vor.u32 %v1567_v7, %v1566_v58  ;;  %v1572_v35 = vor.u32 4788187, %v1571_v31  ;;  %v1865_v24 = vadd.s32 %v1864_v54, %v1860_v3  ;;  %v2130_v62 = vshrl.u32 %v2129_v41, 5 }
 0x205   : > { %v2135_v25 = vshrl.u32 %v10904_v37, %v2132_v20  ;;  %v2138_v10 = vshrl.u32 %v10905_v22, %v2132_v20  ;;  %v2134_v38 = vshll.u32 %v10902_v28, %v2131_v48  ;;  %v2137_v60 = vshll.u32 %v10904_v37, %v2131_v48 }
 0x206   : > { %v2141_v61 = vshrl.u32 %v10911_v12, %v2132_v20  ;;  %v1866_v1 = vadd.s32 536870912, %v1865_v24  ;;  %v2140_v14 = vshll.u32 %v10905_v22, %v2131_v48  ;;  %v2143_v47 = vshll.u32 %v10911_v12, %v2131_v48 }
 0x207   : > { %v2144_v50 = vshrl.u32 %v10907_v34, %v2132_v20  ;;  %v1785_v59 = vxor.u32 2147483648, %v7994_v19  ;;  %vm5898_vm11 = vcmp.lt.s32.totalorder %v5897_v9, 0  ;;  %v2136_v18 = vor.u32 %v2135_v25, %v2134_v38 }
 0x208   : > { %v2139_v33 = vor.u32 %v2138_v10, %v2137_v60  ;;  %v2142_v7 = vor.u32 %v2141_v61, %v2140_v14  ;;  %v2146_v36 = vshll.u32 %v10907_v34, %v2131_v48  ;;  %v2147_v51 = vshrl.u32 %v10906_v49, %v2132_v20 }
 0x209   : > { %v2145_v41 = vor.u32 %v2144_v50, %v2143_v47  ;;  %vm1703_vm14 = vcmp.lt.s32.totalorder %v7564_v15, 0  ;;  %v1575_v5 = vcvt.s32.f32 %v1568_v42  ;;  %v8015_v31 = vshrl.u32 %v1866_v1, 30 }
 0x20a   : > { %v2125_v29 = vor.u32 8388608, %v2124_v8  ;;  %v1912_v58 = vand.u32 2139095040, %v7914_v16  ;;  %v8018_v3 = vpop.eup %6729  ;;  %vm1495_vm2 = vcmp.lt.s32.totalorder %v7635_v63, 0  ;;  %v1573_v54 = vand.u32 2147483647, %v1572_v35 }
 0x20b   : > { %10950 = vst [vmem:[#allocation46_spill] sm:$0xff] %v8018_v3  ;;  %v2148_v25 = vor.u32 %v2147_v51, %v2146_v36  ;;  %vm2149_vm15 = vcmp.lt.s32.totalorder %v2130_v62, 1  ;;  %vm2152_vm5 = vcmp.lt.s32.totalorder %v2130_v62, 4  ;;  %v8022_v48 = vsel %vm5898_vm11, 0, %v5897_v9 }
 0x20c   : > { %vm2151_vm6 = vcmp.lt.s32.totalorder %v2130_v62, 3  ;;  %v2157_v10 = vsel %vm2149_vm15, %v2136_v18, %v2139_v33  ;;  %v2158_v42 = vsel %vm2152_vm5, %v2145_v41, 920167782  ;;  %v2133_v8 = vshrl.u32 %v10902_v28, %v2132_v20 }
 0x20d   : > { %vm2150_vm7 = vcmp.lt.s32.totalorder %v2130_v62, 2  ;;  %v2154_v38 = vsel %vm2152_vm5, %v2142_v7, 2102212464  ;;  %v2159_v60 = vsel %vm2151_vm6, %v2142_v7, %v2158_v42  ;;  %v1868_v35 = vshll.u32 %v8015_v31, 30  ;;  %v10958_v62 = vld [vmem:[#allocation27_spill] sm:$0xff] }
 0x20e   : > { %v2160_v61 = vsel %vm2150_vm7, %v2157_v10, %v2159_v60  ;;  %v2165_v1 = vshll.u32 %v2125_v29, 8  ;;  %v1913_v14 = vshrl.u32 %v1912_v58, 23  ;;  %v10951_v9 = vand.u32 2147483647, %v7564_v15 }
 0x20f   : > { %v10954_v50 = vand.u32 2147483647, %v7635_v63  ;;  %v2089_v36 = vsub.s32 4294967266, %v8022_v48  ;;  %v2153_v51 = vsel %vm2149_vm15, %v2133_v8, %v2136_v18  ;;  %v2161_v10 = vsel %vm2149_vm15, %v2139_v33, %v2142_v7 }
 0x210   : > { %vm8033_vm8 = vcmp.le.f32.partialorder %v10951_v9, 0.7853982  ;;  %v2162_v29 = vsel %vm2152_vm5, %v2148_v25, 1326507024  ;;  %vm2015_vm12 = vcmp.lt.s32.totalorder %v7721_v55, 0  ;;  %v2155_v58 = vsel %vm2151_vm6, %v2139_v33, %v2154_v38 }
 0x211   : > { %vm8039_vm10 = vcmp.le.f32.partialorder %v10954_v50, 0.7853982  ;;  %v2163_v42 = vsel %vm2151_vm6, %v2145_v41, %v2162_v29  ;;  %v8050_v60 = vmul.u32.u64.low %v2165_v1, %v2160_v61  ;;  %v8051_v9 = vmul.u32.u64.high %v2165_v1, %v2160_v61, %v8050_v60 }
 0x212   : > { %6731 = vcosq.f32 %v7988_v53  ;;  %v1576_v50 = vmul.f32 %v1575_v5, %v1573_v54  ;;  %v2164_v52 = vsel %vm2150_vm7, %v2161_v10, %v2163_v42  ;;  %v10795_v18 = vand.u32 2147483647, %v7914_v16 }
 0x213   : > { %v8057_v7 = vsub.s32 %v1865_v24, %v1868_v35  ;;  %v8059_v25 = vmul.u32.u64.low %v2165_v1, %v2164_v52  ;;  %v8060_v8 = vmul.u32.u64.high %v2165_v1, %v2164_v52, %v8059_v25  ;;  %v5891_v23 = vadd.s32 4294967169, %v1913_v14 }
 0x214   : > { %6733 = vsinq.f32 %v7988_v53  ;;  %v8068_v33 = vsel %vm1703_vm14, %v1787_v27, %v7769_v26  ;;  %v2090_v41 = vadd.s32 127, %v2089_v36  ;;  %v2156_v5 = vsel %vm2150_vm7, %v2153_v51, %v2155_v58 }
 0x215   : > { %v1786_v24 = vsel %vm1703_vm14, %v1785_v59, %v7994_v19  ;;  %v10957_v52 = vsub.s32 4, %v7848_v11  ;;  %v2175_v54 = vadd.s32 1, %v8051_v9  ;;  %v1919_v38 = vadd.s32 1, %v5891_v23  ;;  %v8089_v19 = vpop.f32.mrb[18].mxu0 }
 0x216   : > { %v1577_v35 = vxor.u32 2147483648, %v1576_v50  ;;  %v2099_v26 = vsub.s32 4, %v7942_v57  ;;  %v1916_v27 = vand.u32 8388607, %v10795_v18  ;;  %v8087_v61 = vadd.f32 %v7717_v44, %v10958_v62  ;;  %10960 = vst [vmem:[#allocation47_spill] sm:$0xff] %v8089_v19 }
 0x217   : > { %v8079_v53 = vsel %vm1495_vm2, %v10957_v52, %v7848_v11  ;;  %v1871_v59 = vsub.s32 0, %v8057_v7  ;;  %v2172_v14 = vmul.u32 %v2165_v1, %v2156_v5  ;;  %vm2174_vm13 = vc.u32 %v8060_v8, %v8050_v60 }
 0x218   : > { %10959 = vst [vmem:[#allocation27_spill] sm:$0xff] %v8087_v61  ;;  %vm1920_vm9 = vcmp.gt.s32.totalorder %v1919_v38, 0  ;;  %v2085_v11 = vsub.s32 32, %v8022_v48  ;;  %v2091_v23 = vshll.u32 %v2090_v41, 23  ;;  %v2176_v36 = vsel %vm2174_vm13, %v2175_v54, %v8051_v9 }
 0x219   : > { %v1921_v51 = vsel %vm1920_vm9, %v1919_v38, 0  ;;  %v2177_v58 = vadd.s32 %v2176_v36, %v2172_v14  ;;  %v8105_v42 = vsel %vm8033_vm8, %v7564_v15, %v1786_v24  ;;  %v8109_v25 = vsel %vm1495_vm2, %v1577_v35, %v1576_v50 }
 0x21a   : > { %v1923_v1 = vand.u32 31, %v1921_v51  ;;  %v2069_v9 = vadd.s32 %v7881_v0, %v7886_v45  ;;  %v8116_v41 = vsel %vm2015_vm12, %v2099_v26, %v7942_v57  ;;  %v5888_v5 = vmin.u32 %v1871_v59, %v8057_v7 }
 0x21b   : > { %v2178_v52 = vadd.s32 536870912, %v2177_v58  ;;  %v1917_v54 = vor.u32 8388608, %v1916_v27  ;;  %v2086_v24 = vshll.u32 %v7955_v13, %v8022_v48  ;;  %v8123_v35 = vor.u32 4788187, %v2091_v23 }
 0x21c   : > { %v1924_v38 = vsub.s32 32, %v1923_v1  ;;  %v8119_v62 = vpop.eup %6731  ;;  %v2087_v50 = vshrl.u32 %v2069_v9, %v2085_v11  ;;  %v2432_v0 = vand.u32 2139095040, %v8087_v61  ;;  %v1926_v57 = vshll.u32 %v10902_v28, %v1923_v1 }
 0x21d   : > { %10961 = vst [vmem:[#allocation48_spill] sm:$0xff] %v8119_v62  ;;  %v8126_v45 = vshrl.u32 %v2178_v52, 30  ;;  %v1929_v14 = vshll.u32 %v10904_v37, %v1923_v1  ;;  %v1932_v36 = vshll.u32 %v10905_v22, %v1923_v1  ;;  %v1873_v11 = vclz %v5888_v5 }
 0x21e   : > { %v1927_v26 = vshrl.u32 %v10904_v37, %v1924_v38  ;;  %v1930_v59 = vshrl.u32 %v10905_v22, %v1924_v38  ;;  %v8131_v27 = vpop.eup %6733  ;;  %v1933_v13 = vshrl.u32 %v10911_v12, %v1924_v38  ;;  %v1936_v48 = vshrl.u32 %v10907_v34, %v1924_v38 }
 0x21f   : > { %10962 = vst [vmem:[#allocation49_spill] sm:$0xff] %v8131_v27  ;;  %v2180_v23 = vshll.u32 %v8126_v45, 30  ;;  %v1922_v9 = vshrl.u32 %v1921_v51, 5  ;;  %v1935_v52 = vshll.u32 %v10911_v12, %v1923_v1  ;;  %v2088_v18 = vor.u32 %v2087_v50, %v2086_v24 }
 0x220   : > { %v1928_v29 = vor.u32 %v1927_v26, %v1926_v57  ;;  %v1931_v10 = vor.u32 %v1930_v59, %v1929_v14  ;;  %v1934_v15 = vor.u32 %v1933_v13, %v1932_v36  ;;  %v1938_v6 = vshll.u32 %v10907_v34, %v1923_v1 }
 0x221   : > { %v8139_v3 = vsub.s32 %v2177_v58, %v2180_v23  ;;  %v1937_v62 = vor.u32 %v1936_v48, %v1935_v52  ;;  %v1939_v27 = vshrl.u32 %v10906_v49, %v1924_v38  ;;  %v10963_v43 = vand.u32 2147483647, %v7721_v55 }
 0x222   : > { %v2093_v51 = vand.u32 2147483647, %v8123_v35  ;;  %v1957_v21 = vshll.u32 %v1917_v54, 8  ;;  %v2433_v50 = vshrl.u32 %v2432_v0, 23  ;;  %v5889_v57 = vadd.s32 4294967294, %v1873_v11 }
 0x223   : > { %vm8145_vm11 = vcmp.le.f32.partialorder %v10963_v43, 0.7853982  ;;  %v2183_v58 = vsub.s32 0, %v8139_v3  ;;  %v1940_v26 = vor.u32 %v1939_v27, %v1938_v6  ;;  %vm1941_vm14 = vcmp.lt.s32.totalorder %v1922_v9, 1 }
 0x224   : > { %v1925_v1 = vshrl.u32 %v10902_v28, %v1924_v38  ;;  %vm1943_vm2 = vcmp.lt.s32.totalorder %v1922_v9, 3  ;;  %vm1944_vm15 = vcmp.lt.s32.totalorder %v1922_v9, 4  ;;  %v1949_v59 = vsel %vm1941_vm14, %v1928_v29, %v1931_v10 }
 0x225   : > { %v5900_v43 = vmin.u32 %v2183_v58, %v8139_v3  ;;  %v1946_v14 = vsel %vm1944_vm15, %v1934_v15, 2102212464  ;;  %v1950_v36 = vsel %vm1944_vm15, %v1937_v62, 920167782  ;;  %v1953_v13 = vsel %vm1941_vm14, %v1931_v10, %v1934_v15 }
 0x226   : > { %vm1942_vm5 = vcmp.lt.s32.totalorder %v1922_v9, 2  ;;  %v1951_v54 = vsel %vm1943_vm2, %v1934_v15, %v1950_v36  ;;  %v1954_v35 = vsel %vm1944_vm15, %v1940_v26, 1326507024  ;;  %v5911_v48 = vadd.s32 4294967169, %v2433_v50 }
 0x227   : > { %v2185_v0 = vclz %v5900_v43  ;;  %v1945_v11 = vsel %vm1941_vm14, %v1925_v1, %v1928_v29  ;;  %v1952_v23 = vsel %vm1942_vm5, %v1949_v59, %v1951_v54  ;;  %v1955_v6 = vsel %vm1943_vm2, %v1937_v62, %v1954_v35  ;;  %v8209_v54 = vpop.f32.mrb[19].mxu0 }
 0x228   : > { %v1947_v27 = vsel %vm1943_vm2, %v1931_v10, %v1946_v14  ;;  %v1956_v38 = vsel %vm1942_vm5, %v1953_v13, %v1955_v6  ;;  %v8156_v52 = vmul.u32.u64.low %v1957_v21, %v1952_v23  ;;  %v8157_v24 = vmul.u32.u64.high %v1957_v21, %v1952_v23, %v8156_v52 }
 0x229   : > { %vm5890_vm6 = vcmp.lt.s32.totalorder %v5889_v57, 0  ;;  %v5901_v58 = vadd.s32 4294967294, %v2185_v0  ;;  %v8160_v19 = vmul.u32.u64.low %v1957_v21, %v1956_v38  ;;  %v8161_v39 = vmul.u32.u64.high %v1957_v21, %v1956_v38, %v8160_v19 }
 0x22a   : > { %v10966_v15 = vsel %vm8033_vm8, 0, %v8068_v33  ;;  %v10968_v10 = vsel %vm8039_vm10, 0, %v8079_v53  ;;  %vm1807_vm7 = vcmp.lt.s32.totalorder %v7809_v32, 0  ;;  %v2439_v50 = vadd.s32 1, %v5911_v48 }
 0x22b   : > { %v8167_v29 = vadd.s32 3, %v10966_v15  ;;  %v8173_v62 = vadd.s32 3, %v10968_v10  ;;  %6735 = vcosq.f32 %v8105_v42  ;;  %v2095_v26 = vcvt.s32.f32 %v2088_v18 }
 0x22c   : > { %v2102_v47 = vsel %vm8145_vm11, 0, %v8116_v41  ;;  %v1948_v33 = vsel %vm1942_vm5, %v1945_v11, %v1947_v27  ;;  %v8185_v19 = vsel %vm8039_vm10, %v7635_v63, %v8109_v25  ;;  %v8187_v53 = vsel %vm5890_vm6, 0, %v5889_v57 }
 0x22d   : > { %10967 = vst [vmem:[#allocation50_spill] sm:$0xff] %v8167_v29  ;;  %10969 = vst [vmem:[#allocation51_spill] sm:$0xff] %v8173_v62  ;;  %v1967_v1 = vadd.s32 1, %v8157_v24  ;;  %vm2440_vm8 = vcmp.gt.s32.totalorder %v2439_v50, 0  ;;  %v8190_v59 = vmul.f32 %v2095_v26, %v2093_v51  ;;  %v1891_v18 = vsub.s32 4, %v8015_v31 }
 0x22e   : > { %vm5902_vm13 = vcmp.lt.s32.totalorder %v5901_v58, 0  ;;  %v10970_v41 = vand.u32 2147483647, %v8087_v61  ;;  %v1964_v43 = vmul.u32 %v1957_v21, %v1948_v33  ;;  %vm1966_vm9 = vc.u32 %v8161_v39, %v8156_v52 }
 0x22f   : > { %v2441_v20 = vsel %vm2440_vm8, %v2439_v50, 0  ;;  %v8199_v25 = vadd.f32 %v7717_v44, %v7631_v46  ;;  %6737 = vsinq.f32 %v8105_v42  ;;  %v8202_v57 = vadd.s32 3, %v2102_v47 }
 0x230   : > { %v2436_v9 = vand.u32 8388607, %v10970_v41  ;;  %v1881_v51 = vsub.s32 4294967266, %v8187_v53  ;;  %v1968_v14 = vsel %vm1966_vm9, %v1967_v1, %v8157_v24  ;;  %6739 = vcosq.f32 %v8185_v19 }
 0x231   : > { %10971 = vst [vmem:[#allocation52_spill] sm:$0xff] %v8199_v25  ;;  %10972 = vst [vmem:[#allocation53_spill] sm:$0xff] %v8202_v57  ;;  %v8207_v36 = vsel %vm5902_vm13, 0, %v5901_v58  ;;  %v1969_v21 = vadd.s32 %v1968_v14, %v1964_v43  ;;  %v2443_v13 = vand.u32 31, %v2441_v20  ;;  %v1861_v46 = vadd.s32 %v7969_v56, %v7976_v2 }
 0x232   : > { %v8217_v44 = vsel %vm1807_vm7, %v1891_v18, %v8015_v31  ;;  %v2437_v42 = vor.u32 8388608, %v2436_v9  ;;  %v1877_v24 = vsub.s32 32, %v8187_v53  ;;  %v2224_v11 = vand.u32 2139095040, %v8199_v25 }
 0x233   : > { %v1970_v48 = vadd.s32 536870912, %v1969_v21  ;;  %v2444_v0 = vsub.s32 32, %v2443_v13  ;;  %v1882_v23 = vadd.s32 127, %v1881_v51  ;;  %v2193_v6 = vsub.s32 4294967266, %v8207_v36 }
 0x234   : > { %v8222_v27 = vshrl.u32 %v2441_v20, 5  ;;  %v2446_v38 = vshll.u32 %v10902_v28, %v2443_v13  ;;  %v2449_v31 = vshll.u32 %v10904_v37, %v2443_v13  ;;  %v2452_v10 = vshll.u32 %v10905_v22, %v2443_v13 }
 0x235   : > { %v8225_v56 = vshrl.u32 %v1970_v48, 30  ;;  %v2447_v2 = vshrl.u32 %v10904_v37, %v2444_v0  ;;  %v2450_v58 = vshrl.u32 %v10905_v22, %v2444_v0  ;;  %v8230_v15 = vpop.eup %6735  ;;  %v2453_v50 = vshrl.u32 %v10911_v12, %v2444_v0 }
 0x236   : > { %10973 = vst [vmem:[#allocation54_spill] sm:$0xff] %v8230_v15  ;;  %v2455_v26 = vshll.u32 %v10911_v12, %v2443_v13  ;;  %v2456_v47 = vshrl.u32 %v10907_v34, %v2444_v0  ;;  %v2225_v41 = vshrl.u32 %v2224_v11, 23  ;;  %v2458_v20 = vshll.u32 %v10907_v34, %v2443_v13 }
 0x237   : > { %v1972_v33 = vshll.u32 %v8225_v56, 30  ;;  %v2448_v1 = vor.u32 %v2447_v2, %v2446_v38  ;;  %v2451_v18 = vor.u32 %v2450_v58, %v2449_v31  ;;  %v2454_v9 = vor.u32 %v2453_v50, %v2452_v10 }
 0x238   : > { %v2457_v43 = vor.u32 %v2456_v47, %v2455_v26  ;;  %v2459_v51 = vshrl.u32 %v10906_v49, %v2444_v0  ;;  %v10974_v14 = vand.u32 2147483647, %v7809_v32  ;;  %v1878_v35 = vshll.u32 %v8057_v7, %v8187_v53 }
 0x239   : > { %v1879_v57 = vshrl.u32 %v1861_v46, %v1877_v24  ;;  %v1883_v15 = vshll.u32 %v1882_v23, 23  ;;  %v8247_v38 = vsub.s32 %v1969_v21, %v1972_v33  ;;  %v8249_v11 = vpop.eup %6737  ;;  %v2194_v2 = vadd.s32 127, %v2193_v6 }
 0x23a   : > { %vm8241_vm10 = vcmp.le.f32.partialorder %v10974_v14, 0.7853982  ;;  %10977 = vst [vmem:[#allocation55_spill] sm:$0xff] %v8249_v11  ;;  %v2460_v31 = vor.u32 %v2459_v51, %v2458_v20  ;;  %vm2461_vm14 = vcmp.lt.s32.totalorder %v8222_v27, 1  ;;  %v2477_v13 = vshll.u32 %v2437_v42, 8  ;;  %v8252_v58 = vpop.eup %6739 }
 0x23b   : > { %10978 = vst [vmem:[#allocation56_spill] sm:$0xff] %v8252_v58  ;;  %v1975_v10 = vsub.s32 0, %v8247_v38  ;;  %vm2464_vm2 = vcmp.lt.s32.totalorder %v8222_v27, 4  ;;  %v2469_v7 = vsel %vm2461_vm14, %v2448_v1, %v2451_v18  ;;  %v5903_v53 = vadd.s32 4294967169, %v2225_v41 }
 0x23c   : > { %vm2462_vm15 = vcmp.lt.s32.totalorder %v8222_v27, 2  ;;  %vm2463_vm5 = vcmp.lt.s32.totalorder %v8222_v27, 3  ;;  %v2466_v21 = vsel %vm2464_vm2, %v2454_v9, 2102212464  ;;  %v2470_v46 = vsel %vm2464_vm2, %v2457_v43, 920167782 }
 0x23d   : > { %v5892_v24 = vmin.u32 %v1975_v10, %v8247_v38  ;;  %v2445_v42 = vshrl.u32 %v10902_v28, %v2444_v0  ;;  %v2471_v23 = vsel %vm2463_vm5, %v2454_v9, %v2470_v46  ;;  %v2473_v6 = vsel %vm2461_vm14, %v2451_v18, %v2454_v9 }
 0x23e   : > { %v2189_v50 = vsub.s32 32, %v8207_v36  ;;  %v2195_v26 = vshll.u32 %v2194_v2, 23  ;;  %v2472_v47 = vsel %vm2462_vm15, %v2469_v7, %v2471_v23  ;;  %v2474_v33 = vsel %vm2464_vm2, %v2460_v31, 1326507024 }
 0x23f   : > { %v1977_v41 = vclz %v5892_v24  ;;  %v2465_v20 = vsel %vm2461_vm14, %v2445_v42, %v2448_v1  ;;  %v2467_v51 = vsel %vm2463_vm5, %v2451_v18, %v2466_v21  ;;  %v2475_v14 = vsel %vm2463_vm5, %v2457_v43, %v2474_v33 }
 0x240   : > { %v2476_v0 = vsel %vm2462_vm15, %v2473_v6, %v2475_v14  ;;  %v8271_v10 = vmul.u32.u64.low %v2477_v13, %v2472_v47  ;;  %v8272_v46 = vmul.u32.u64.high %v2477_v13, %v2472_v47, %v8271_v10  ;;  %v2231_v9 = vadd.s32 1, %v5903_v53 }
 0x241   : > { %v1880_v11 = vor.u32 %v1879_v57, %v1878_v35  ;;  %v2173_v2 = vadd.s32 %v8050_v60, %v8060_v8  ;;  %v8277_v7 = vmul.u32.u64.low %v2477_v13, %v2476_v0  ;;  %v8278_v31 = vmul.u32.u64.high %v2477_v13, %v2476_v0, %v8277_v7 }
 0x242   : > { %v1884_v24 = vor.u32 4788187, %v1883_v15  ;;  %v1894_v1 = vsel %vm8241_vm10, 0, %v8217_v44  ;;  %v10807_v18 = vand.u32 2147483647, %v8199_v25  ;;  %vm2232_vm6 = vcmp.gt.s32.totalorder %v2231_v9, 0 }
 0x243   : > { %v2191_v43 = vshrl.u32 %v2173_v2, %v2189_v50  ;;  %v2196_v21 = vor.u32 4788187, %v2195_v26  ;;  %v2468_v53 = vsel %vm2462_vm15, %v2465_v20, %v2467_v51  ;;  %v2233_v57 = vsel %vm2232_vm6, %v2231_v9, 0 }
 0x244   : > { %6741 = vsinq.f32 %v8185_v19  ;;  %v5893_v60 = vadd.s32 4294967294, %v1977_v41  ;;  %v2487_v8 = vadd.s32 1, %v8272_v46  ;;  %v2235_v35 = vand.u32 31, %v2233_v57 }
 0x245   : > { %v10979_v15 = vxor.u32 2147483648, %v8190_v59  ;;  %v1887_v42 = vcvt.s32.f32 %v1880_v11  ;;  %v8295_v23 = vadd.s32 3, %v1894_v1  ;;  %v2190_v27 = vshll.u32 %v8139_v3, %v8207_v36 }
 0x246   : > { %v1885_v6 = vand.u32 2147483647, %v1884_v24  ;;  %v2484_v50 = vmul.u32 %v2477_v13, %v2468_v53  ;;  %vm2486_vm8 = vc.u32 %v8278_v31, %v8271_v10  ;;  %v2236_v19 = vsub.s32 32, %v2235_v35 }
 0x247   : > { %v8293_v44 = vsel %vm2015_vm12, %v10979_v15, %v8190_v59  ;;  %10980 = vst [vmem:[#allocation57_spill] sm:$0xff] %v8295_v23  ;;  %v2192_v26 = vor.u32 %v2191_v43, %v2190_v27  ;;  %v2197_v47 = vand.u32 2147483647, %v2196_v21  ;;  %v2488_v33 = vsel %vm2486_vm8, %v2487_v8, %v8272_v46  ;;  %v8312_v43 = vpop.f32.mrb[20].mxu0 }
 0x248   : > { %v2228_v59 = vand.u32 8388607, %v10807_v18  ;;  %vm5894_vm12 = vcmp.lt.s32.totalorder %v5893_v60, 0  ;;  %v2489_v11 = vadd.s32 %v2488_v33, %v2484_v50  ;;  %v2239_v41 = vshrl.u32 %v10904_v37, %v2236_v19 }
 0x249   : > { %v2242_v20 = vshrl.u32 %v10905_v22, %v2236_v19  ;;  %v2238_v3 = vshll.u32 %v10902_v28, %v2235_v35  ;;  %v2241_v36 = vshll.u32 %v10904_v37, %v2235_v35  ;;  %v2244_v13 = vshll.u32 %v10905_v22, %v2235_v35 }
 0x24a   : > { %v2245_v51 = vshrl.u32 %v10911_v12, %v2236_v19  ;;  %v2490_v14 = vadd.s32 536870912, %v2489_v11  ;;  %v2234_v0 = vshrl.u32 %v2233_v57, 5  ;;  %v2247_v46 = vshll.u32 %v10911_v12, %v2235_v35 }
 0x24b   : > { %v2248_v9 = vshrl.u32 %v10907_v34, %v2236_v19  ;;  %v2199_v2 = vcvt.s32.f32 %v2192_v26  ;;  %v2240_v7 = vor.u32 %v2239_v41, %v2238_v3  ;;  %v2243_v24 = vor.u32 %v2242_v20, %v2241_v36 }
 0x24c   : > { %v2246_v1 = vor.u32 %v2245_v51, %v2244_v13  ;;  %v8314_v21 = vshrl.u32 %v2490_v14, 30  ;;  %v2250_v8 = vshll.u32 %v10907_v34, %v2235_v35  ;;  %v2251_v15 = vshrl.u32 %v10906_v49, %v2236_v19 }
 0x24d   : > { %v2249_v53 = vor.u32 %v2248_v9, %v2247_v46  ;;  %v1888_v27 = vmul.f32 %v1887_v42, %v1885_v6  ;;  %v2200_v50 = vmul.f32 %v2199_v2, %v2197_v47  ;;  %v8319_v57 = vsel %vm5894_vm12, 0, %v5893_v60 }
 0x24e   : > { %v2229_v33 = vor.u32 8388608, %v2228_v59  ;;  %v8321_v18 = vpop.eup %6741  ;;  %v2492_v26 = vshll.u32 %v8314_v21, 30  ;;  %v2252_v41 = vor.u32 %v2251_v15, %v2250_v8  ;;  %vm2253_vm13 = vcmp.lt.s32.totalorder %v2234_v0, 1 }
 0x24f   : > { %10981 = vst [vmem:[#allocation58_spill] sm:$0xff] %v8321_v18  ;;  %vm2256_vm9 = vcmp.lt.s32.totalorder %v2234_v0, 4  ;;  %vm2119_vm14 = vcmp.lt.s32.totalorder %v7909_v4, 0  ;;  %v2237_v20 = vshrl.u32 %v10902_v28, %v2236_v19  ;;  %vm2255_vm2 = vcmp.lt.s32.totalorder %v2234_v0, 3  ;;  %v8338_v19 = vld [vmem:[%s10732_s2] ss:$0 sm:$0xff] }
 0x250   : > { %v2261_v35 = vsel %vm2253_vm13, %v2240_v7, %v2243_v24  ;;  %v2262_v42 = vsel %vm2256_vm9, %v2249_v53, 920167782  ;;  %v8328_v6 = vsub.s32 %v2489_v11, %v2492_v26  ;;  %vm2254_vm15 = vcmp.lt.s32.totalorder %v2234_v0, 2 }
 0x251   : > { %v2258_v60 = vsel %vm2256_vm9, %v2246_v1, 2102212464  ;;  %v2263_v47 = vsel %vm2255_vm2, %v2246_v1, %v2262_v42  ;;  %vm1911_vm5 = vcmp.lt.s32.totalorder %v7914_v16, 0  ;;  %v1985_v59 = vsub.s32 4294967266, %v8319_v57 }
 0x252   : > { %v2264_v3 = vsel %vm2254_vm15, %v2261_v35, %v2263_v47  ;;  %v2269_v36 = vshll.u32 %v2229_v33, 8  ;;  %v8342_v11 = vadd.f32 %v8338_v19, %v7723_v30  ;;  %v2495_v13 = vsub.s32 0, %v8328_v6 }
 0x253   : > { %v2257_v51 = vsel %vm2253_vm13, %v2237_v20, %v2240_v7  ;;  %v2265_v14 = vsel %vm2253_vm13, %v2243_v24, %v2246_v1  ;;  %v2266_v46 = vsel %vm2256_vm9, %v2252_v41, 1326507024  ;;  %v2259_v9 = vsel %vm2255_vm2, %v2243_v24, %v2258_v60 }
 0x254   : > { %10982 = vst [vmem:[#allocation59_spill] sm:$0xff] %v8342_v11  ;;  %v2267_v2 = vsel %vm2255_vm2, %v2249_v53, %v2266_v46  ;;  %v8350_v8 = vmul.u32.u64.low %v2269_v36, %v2264_v3  ;;  %v8351_v15 = vmul.u32.u64.high %v2269_v36, %v2264_v3, %v8350_v8  ;;  %v2101_v30 = vsel %vm8145_vm11, %v7721_v55, %v8293_v44 }
 0x255   : > { %v10983_v33 = vand.u32 2147483647, %v7909_v4  ;;  %v2203_v1 = vsub.s32 4, %v8126_v45  ;;  %v5912_v24 = vmin.u32 %v2495_v13, %v8328_v6  ;;  %v2268_v53 = vsel %vm2254_vm15, %v2265_v14, %v2267_v2 }
 0x256   : > { %v1889_v26 = vxor.u32 2147483648, %v1888_v27  ;;  %v10986_v41 = vand.u32 2147483647, %v7914_v16  ;;  %v1995_v5 = vsub.s32 4, %v8225_v56  ;;  %v1981_v42 = vsub.s32 32, %v8319_v57 }
 0x257   : > { %vm8360_vm6 = vcmp.le.f32.partialorder %v10983_v33, 0.7853982  ;;  %v8374_v44 = vmul.u32.u64.low %v2269_v36, %v2268_v53  ;;  %v8375_v35 = vmul.u32.u64.high %v2269_v36, %v2268_v53, %v8374_v44  ;;  %v2497_v60 = vclz %v5912_v24 }
 0x258   : > { %vm8369_vm8 = vcmp.le.f32.partialorder %v10986_v41, 0.7853982  ;;  %v2260_v47 = vsel %vm2254_vm15, %v2257_v51, %v2259_v9  ;;  %v2536_v3 = vand.u32 2139095040, %v8342_v11  ;;  %6743 = vcosq.f32 %v2101_v30 }
 0x259   : > { %v2201_v13 = vxor.u32 2147483648, %v2200_v50  ;;  %v1986_v14 = vadd.s32 127, %v1985_v59  ;;  %v2279_v46 = vadd.s32 1, %v8351_v15  ;;  %v2204_v2 = vsel %vm2119_vm14, %v2203_v1, %v8126_v45 }
 0x25a   : > { %v1965_v33 = vadd.s32 %v8156_v52, %v8161_v39  ;;  %v2537_v53 = vshrl.u32 %v2536_v3, 23  ;;  %v8388_v24 = vadd.f32 %v8338_v19, %v7845_v17  ;;  %v1890_v0 = vsel %vm1807_vm7, %v1889_v26, %v1888_v27  ;;  %v8401_v26 = vpop.f32.mrb[21].mxu0 }
 0x25b   : > { %v5913_v51 = vadd.s32 4294967294, %v2497_v60  ;;  %v2276_v9 = vmul.u32 %v2269_v36, %v2260_v47  ;;  %vm2278_vm11 = vc.u32 %v8375_v35, %v8350_v8  ;;  %v1996_v45 = vsel %vm1911_vm5, %v1995_v5, %v8225_v56 }
 0x25c   : > { %10989 = vst [vmem:[#allocation60_spill] sm:$0xff] %v8388_v24  ;;  %v1983_v59 = vshrl.u32 %v1965_v33, %v1981_v42  ;;  %v2280_v39 = vsel %vm2278_vm11, %v2279_v46, %v8351_v15  ;;  %v5915_v52 = vadd.s32 4294967169, %v2537_v53  ;;  %v2202_v17 = vsel %vm2119_vm14, %v2201_v13, %v2200_v50 }
 0x25d   : > { %v1987_v1 = vshll.u32 %v1986_v14, 23  ;;  %v2281_v41 = vadd.s32 %v2280_v39, %v2276_v9  ;;  %v10808_v27 = vand.u32 2147483647, %v8342_v11  ;;  %6745 = vsinq.f32 %v2101_v30 }
 0x25e   : > { %v1982_v36 = vshll.u32 %v8247_v38, %v8319_v57  ;;  %v2543_v44 = vadd.s32 1, %v5915_v52  ;;  %v2328_v42 = vand.u32 2139095040, %v8388_v24  ;;  %v1893_v56 = vsel %vm8241_vm10, %v7809_v32, %v1890_v0 }
 0x25f   : > { %v2206_v50 = vsel %vm8360_vm6, 0, %v2204_v2  ;;  %vm5914_vm7 = vcmp.lt.s32.totalorder %v5913_v51, 0  ;;  %v2282_v15 = vadd.s32 536870912, %v2281_v41  ;;  %v8414_v5 = vsel %vm8360_vm6, %v7909_v4, %v2202_v17 }
 0x260   : > { %v1984_v30 = vor.u32 %v1983_v59, %v1982_v36  ;;  %v1998_v38 = vsel %vm8369_vm8, 0, %v1996_v45  ;;  %vm2544_vm12 = vcmp.gt.s32.totalorder %v2543_v44, 0  ;;  %v1988_v57 = vor.u32 4788187, %v1987_v1 }
 0x261   : > { %v8418_v60 = vshrl.u32 %v2282_v15, 30  ;;  %v2540_v48 = vand.u32 8388607, %v10808_v27  ;;  %v2545_v47 = vsel %vm2544_vm12, %v2543_v44, 0  ;;  %6747 = vcosq.f32 %v1893_v56 }
 0x262   : > { %v8422_v3 = vsel %vm5914_vm7, 0, %v5913_v51  ;;  %v2547_v13 = vand.u32 31, %v2545_v47  ;;  %v2329_v14 = vshrl.u32 %v2328_v42, 23  ;;  %v8424_v7 = vpop.eup %6743  ;;  %6749 = vsinq.f32 %v1893_v56 }
 0x263   : > { %10990 = vst [vmem:[#allocation61_spill] sm:$0xff] %v8424_v7  ;;  %v8426_v46 = vadd.s32 3, %v2206_v50  ;;  %v8428_v2 = vadd.s32 3, %v1998_v38  ;;  %v2284_v33 = vshll.u32 %v8418_v60, 30  ;;  %6751 = vcosq.f32 %v8414_v5 }
 0x264   : > { %v1991_v53 = vcvt.s32.f32 %v1984_v30  ;;  %v2485_v0 = vadd.s32 %v8271_v10, %v8278_v31  ;;  %v2548_v9 = vsub.s32 32, %v2547_v13  ;;  %v1989_v51 = vand.u32 2147483647, %v1988_v57 }
 0x265   : > { %10991 = vst [vmem:[#allocation62_spill] sm:$0xff] %v8426_v46  ;;  %10992 = vst [vmem:[#allocation63_spill] sm:$0xff] %v8428_v2  ;;  %v2505_v59 = vsub.s32 4294967266, %v8422_v3  ;;  %v8435_v45 = vsub.s32 %v2281_v41, %v2284_v33  ;;  %v2541_v39 = vor.u32 8388608, %v2540_v48  ;;  %v2501_v52 = vsub.s32 32, %v8422_v3 }
 0x266   : > { %v2550_v17 = vshll.u32 %v10902_v28, %v2547_v13  ;;  %v2551_v1 = vshrl.u32 %v10904_v37, %v2548_v9  ;;  %v5907_v36 = vadd.s32 4294967169, %v2329_v14  ;;  %v2553_v42 = vshll.u32 %v10904_v37, %v2547_v13 }
 0x267   : > { %v2287_v44 = vsub.s32 0, %v8435_v45  ;;  %v2554_v10 = vshrl.u32 %v10905_v22, %v2548_v9  ;;  %v2557_v31 = vshrl.u32 %v10911_v12, %v2548_v9  ;;  %v8444_v56 = vpop.eup %6745  ;;  %v2546_v41 = vshrl.u32 %v2545_v47, 5 }
 0x268   : > { %10993 = vst [vmem:[#allocation64_spill] sm:$0xff] %v8444_v56  ;;  %v2556_v50 = vshll.u32 %v10905_v22, %v2547_v13  ;;  %v2559_v15 = vshll.u32 %v10911_v12, %v2547_v13  ;;  %v2560_v30 = vshrl.u32 %v10907_v34, %v2548_v9  ;;  %v2506_v38 = vadd.s32 127, %v2505_v59 }
 0x269   : > { %v5904_v57 = vmin.u32 %v2287_v44, %v8435_v45  ;;  %v2552_v48 = vor.u32 %v2551_v1, %v2550_v17  ;;  %v2555_v14 = vor.u32 %v2554_v10, %v2553_v42  ;;  %v2562_v4 = vshll.u32 %v10907_v34, %v2547_v13 }
 0x26a   : > { %v2558_v33 = vor.u32 %v2557_v31, %v2556_v50  ;;  %v2561_v27 = vor.u32 %v2560_v30, %v2559_v15  ;;  %v2563_v55 = vshrl.u32 %v10906_v49, %v2548_v9  ;;  %v8452_v46 = vmul.f32 %v1991_v53, %v1989_v51 }
 0x26b   : > { %v2515_v47 = vsub.s32 4, %v8314_v21  ;;  %v2581_v7 = vshll.u32 %v2541_v39, 8  ;;  %v8456_v32 = vpop.eup %6747  ;;  %vm2431_vm10 = vcmp.lt.s32.totalorder %v8087_v61, 0  ;;  %v2503_v59 = vshrl.u32 %v2485_v0, %v2501_v52 }
 0x26c   : > { %10994 = vst [vmem:[#allocation65_spill] sm:$0xff] %v8456_v32  ;;  %v2564_v17 = vor.u32 %v2563_v55, %v2562_v4  ;;  %vm2565_vm13 = vcmp.lt.s32.totalorder %v2546_v41, 1  ;;  %v2335_v1 = vadd.s32 1, %v5907_v36  ;;  %v8459_v44 = vpop.eup %6749  ;;  %v2507_v13 = vshll.u32 %v2506_v38, 23 }
 0x26d   : > { %10995 = vst [vmem:[#allocation66_spill] sm:$0xff] %v8459_v44  ;;  %v2289_v42 = vclz %v5904_v57  ;;  %vm2568_vm9 = vcmp.lt.s32.totalorder %v2546_v41, 4  ;;  %v2573_v53 = vsel %vm2565_vm13, %v2552_v48, %v2555_v14  ;;  %v8462_v51 = vpop.eup %6751  ;;  %vm2567_vm14 = vcmp.lt.s32.totalorder %v2546_v41, 3 }
 0x26e   : > { %10996 = vst [vmem:[#allocation67_spill] sm:$0xff] %v8462_v51  ;;  %v2570_v39 = vsel %vm2568_vm9, %v2558_v33, 2102212464  ;;  %v2574_v10 = vsel %vm2568_vm9, %v2561_v27, 920167782  ;;  %v2577_v31 = vsel %vm2565_vm13, %v2555_v14, %v2558_v33  ;;  %v2549_v50 = vshrl.u32 %v10902_v28, %v2548_v9 }
 0x26f   : > { %vm2566_vm2 = vcmp.lt.s32.totalorder %v2546_v41, 2  ;;  %v2575_v55 = vsel %vm2567_vm14, %v2558_v33, %v2574_v10  ;;  %v2578_v4 = vsel %vm2568_vm9, %v2564_v17, 1326507024  ;;  %v2502_v0 = vshll.u32 %v8328_v6, %v8422_v3 }
 0x270   : > { %v2576_v52 = vsel %vm2566_vm2, %v2573_v53, %v2575_v55  ;;  %v2579_v36 = vsel %vm2567_vm14, %v2561_v27, %v2578_v4  ;;  %vm2336_vm15 = vcmp.gt.s32.totalorder %v2335_v1, 0  ;;  %v5905_v15 = vadd.s32 4294967294, %v2289_v42 }
 0x271   : > { %v2569_v30 = vsel %vm2565_vm13, %v2549_v50, %v2552_v48  ;;  %v2571_v38 = vsel %vm2567_vm14, %v2555_v14, %v2570_v39  ;;  %v2580_v57 = vsel %vm2566_vm2, %v2577_v31, %v2579_v36  ;;  %v2504_v33 = vor.u32 %v2503_v59, %v2502_v0  ;;  %v10999_v59 = vld [vmem:[#allocation45_spill] sm:$0xff]  ;;  %v8503_v39 = vpop.f32.mrb[22].mxu0 }
 0x272   : > { %v8471_v56 = vmul.u32.u64.low %v2581_v7, %v2580_v57  ;;  %v8472_v51 = vmul.u32.u64.high %v2581_v7, %v2580_v57, %v8471_v56  ;;  %v8474_v9 = vmul.u32.u64.low %v2581_v7, %v2576_v52  ;;  %v8475_v2 = vmul.u32.u64.high %v2581_v7, %v2576_v52, %v8474_v9 }
 0x273   : > { %v2508_v17 = vor.u32 4788187, %v2507_v13  ;;  %v10997_v6 = vand.u32 2147483647, %v8388_v24  ;;  %v2337_v27 = vsel %vm2336_vm15, %v2335_v1, 0  ;;  %6753 = vsinq.f32 %v8414_v5  ;;  %v11001_v1 = vld [vmem:[#allocation47_spill] sm:$0xff] }
 0x274   : > { %v2572_v48 = vsel %vm2566_vm2, %v2569_v30, %v2571_v38  ;;  %v2339_v14 = vand.u32 31, %v2337_v27  ;;  %v8484_v42 = vadd.f32 %v8338_v19, %v7936_v40  ;;  %v8489_v56 = vsel %vm2431_vm10, %v2515_v47, %v8314_v21 }
 0x275   : > { %v2332_v3 = vand.u32 8388607, %v10997_v6  ;;  %vm5906_vm6 = vcmp.lt.s32.totalorder %v5905_v15, 0  ;;  %v8493_v13 = vadd.f32 %v8338_v19, %v10999_v59  ;;  %v8497_v5 = vadd.f32 %v8338_v19, %v11001_v1 }
 0x276   : > { %10998 = vst [vmem:[#allocation68_spill] sm:$0xff] %v8484_v42  ;;  %v1993_v41 = vxor.u32 2147483648, %v8452_v46  ;;  %vm2590_vm11 = vc.u32 %v8472_v51, %v8474_v9  ;;  %v2591_v40 = vadd.s32 1, %v8475_v2  ;;  %v2340_v53 = vsub.s32 32, %v2339_v14 }
 0x277   : > { %11000 = vst [vmem:[#allocation45_spill] sm:$0xff] %v8493_v13  ;;  %11002 = vst [vmem:[#allocation47_spill] sm:$0xff] %v8497_v5  ;;  %v2509_v21 = vand.u32 2147483647, %v2508_v17  ;;  %v2511_v47 = vcvt.s32.f32 %v2504_v33  ;;  %v2588_v10 = vmul.u32 %v2581_v7, %v2572_v48  ;;  %v2333_v31 = vor.u32 8388608, %v2332_v3 }
 0x278   : > { %v8505_v50 = vsel %vm5906_vm6, 0, %v5905_v15  ;;  %v2592_v55 = vsel %vm2590_vm11, %v2591_v40, %v8475_v2  ;;  %v2343_v4 = vshrl.u32 %v10904_v37, %v2340_v53  ;;  %v2346_v0 = vshrl.u32 %v10905_v22, %v2340_v53 }
 0x279   : > { %v2593_v52 = vadd.s32 %v2592_v55, %v2588_v10  ;;  %v2342_v36 = vshll.u32 %v10902_v28, %v2339_v14  ;;  %v2345_v30 = vshll.u32 %v10904_v37, %v2339_v14  ;;  %v2349_v38 = vshrl.u32 %v10911_v12, %v2340_v53 }
 0x27a   : > { %v2338_v57 = vshrl.u32 %v2337_v27, 5  ;;  %v2348_v33 = vshll.u32 %v10905_v22, %v2339_v14  ;;  %v2351_v7 = vshll.u32 %v10911_v12, %v2339_v14  ;;  %v2352_v15 = vshrl.u32 %v10907_v34, %v2340_v53 }
 0x27b   : > { %v2594_v17 = vadd.s32 536870912, %v2593_v52  ;;  %v2344_v2 = vor.u32 %v2343_v4, %v2342_v36  ;;  %v2347_v6 = vor.u32 %v2346_v0, %v2345_v30  ;;  %v2848_v3 = vand.u32 2139095040, %v8484_v42 }
 0x27c   : > { %v2350_v48 = vor.u32 %v2349_v38, %v2348_v33  ;;  %v2353_v59 = vor.u32 %v2352_v15, %v2351_v7  ;;  %v2354_v1 = vshll.u32 %v10907_v34, %v2339_v14  ;;  %v2355_v40 = vshrl.u32 %v10906_v49, %v2340_v53 }
 0x27d   : > { %v1994_v27 = vsel %vm1911_vm5, %v1993_v41, %v8452_v46  ;;  %v11003_v10 = vand.u32 2147483647, %v8087_v61  ;;  %v2277_v4 = vadd.s32 %v8350_v8, %v8375_v35  ;;  %v8530_v0 = vshrl.u32 %v2594_v17, 30  ;;  %v8532_v30 = vpop.eup %6753 }
 0x27e   : > { %v2373_v36 = vshll.u32 %v2333_v31, 8  ;;  %11006 = vst [vmem:[#allocation69_spill] sm:$0xff] %v8532_v30  ;;  %v2512_v14 = vmul.f32 %v2511_v47, %v2509_v21  ;;  %v2297_v38 = vsub.s32 4294967266, %v8505_v50  ;;  %v2356_v33 = vor.u32 %v2355_v40, %v2354_v1 }
 0x27f   : > { %vm8524_vm7 = vcmp.le.f32.partialorder %v11003_v10, 0.7853982  ;;  %vm2357_vm12 = vcmp.lt.s32.totalorder %v2338_v57, 1  ;;  %v2596_v46 = vshll.u32 %v8530_v0, 30  ;;  %vm2360_vm5 = vcmp.lt.s32.totalorder %v2338_v57, 4 }
 0x280   : > { %v2365_v41 = vsel %vm2357_vm12, %v2344_v2, %v2347_v6  ;;  %v2849_v7 = vshrl.u32 %v2848_v3, 23  ;;  %v2341_v15 = vshrl.u32 %v10902_v28, %v2340_v53  ;;  %vm2359_vm13 = vcmp.lt.s32.totalorder %v2338_v57, 3 }
 0x281   : > { %v2362_v8 = vsel %vm2360_vm5, %v2350_v48, 2102212464  ;;  %v2366_v35 = vsel %vm2360_vm5, %v2353_v59, 920167782  ;;  %v8538_v17 = vsub.s32 %v2593_v52, %v2596_v46  ;;  %vm2358_vm9 = vcmp.lt.s32.totalorder %v2338_v57, 2 }
 0x282   : > { %v2367_v31 = vsel %vm2359_vm13, %v2350_v48, %v2366_v35  ;;  %v2369_v21 = vsel %vm2357_vm12, %v2347_v6, %v2350_v48  ;;  %v2513_v47 = vxor.u32 2147483648, %v2512_v14  ;;  %v2293_v1 = vsub.s32 32, %v8505_v50 }
 0x283   : > { %v2368_v40 = vsel %vm2358_vm9, %v2365_v41, %v2367_v31  ;;  %v2370_v10 = vsel %vm2360_vm5, %v2356_v33, 1326507024  ;;  %vm2223_vm14 = vcmp.lt.s32.totalorder %v8199_v25, 0  ;;  %v2599_v3 = vsub.s32 0, %v8538_v17 }
 0x284   : > { %v2361_v53 = vsel %vm2357_vm12, %v2341_v15, %v2344_v2  ;;  %v2363_v30 = vsel %vm2359_vm13, %v2347_v6, %v2362_v8  ;;  %v2371_v32 = vsel %vm2359_vm13, %v2353_v59, %v2370_v10  ;;  %v5927_v48 = vadd.s32 4294967169, %v2849_v7  ;;  %v8566_v8 = vpop.f32.mrb[23].mxu0 }
 0x285   : > { %v2372_v52 = vsel %vm2358_vm9, %v2369_v21, %v2371_v32  ;;  %v8547_v46 = vmul.u32.u64.low %v2373_v36, %v2368_v40  ;;  %v8548_v35 = vmul.u32.u64.high %v2373_v36, %v2368_v40, %v8547_v46  ;;  %v2298_v44 = vadd.s32 127, %v2297_v38 }
 0x286   : > { %v5916_v23 = vmin.u32 %v2599_v3, %v8538_v17  ;;  %v8552_v41 = vmul.u32.u64.low %v2373_v36, %v2372_v52  ;;  %v8553_v33 = vmul.u32.u64.high %v2373_v36, %v2372_v52, %v8552_v41  ;;  %v2518_v31 = vsel %vm8524_vm7, 0, %v8489_v56 }
 0x287   : > { %v2295_v2 = vshrl.u32 %v2277_v4, %v2293_v1  ;;  %v2364_v6 = vsel %vm2358_vm9, %v2361_v53, %v2363_v30  ;;  %v2855_v59 = vadd.s32 1, %v5927_v48  ;;  %v8562_v32 = vsel %vm8369_vm8, %v7914_v16, %v1994_v27 }
 0x288   : > { %v2307_v38 = vsub.s32 4, %v8418_v60  ;;  %v2601_v7 = vclz %v5916_v23  ;;  %v10821_v15 = vand.u32 2147483647, %v8484_v42  ;;  %v2514_v21 = vsel %vm2431_vm10, %v2513_v47, %v2512_v14 }
 0x289   : > { %v2294_v56 = vshll.u32 %v8435_v45, %v8505_v50  ;;  %v2383_v57 = vadd.s32 1, %v8548_v35  ;;  %vm2856_vm2 = vcmp.gt.s32.totalorder %v2855_v59, 0  ;;  %v2299_v4 = vshll.u32 %v2298_v44, 23 }
 0x28a   : > { %v2380_v20 = vmul.u32 %v2373_v36, %v2364_v6  ;;  %vm2382_vm8 = vc.u32 %v8553_v33, %v8547_v46  ;;  %v2857_v27 = vsel %vm2856_vm2, %v2855_v59, 0  ;;  %v5917_v30 = vadd.s32 4294967294, %v2601_v7 }
 0x28b   : > { %v8575_v23 = vor.u32 %v2295_v2, %v2294_v56  ;;  %v2384_v1 = vsel %vm2382_vm8, %v2383_v57, %v8548_v35  ;;  %v2859_v40 = vand.u32 31, %v2857_v27  ;;  %v8578_v10 = vadd.s32 3, %v2518_v31 }
 0x28c   : > { %v2385_v14 = vadd.s32 %v2384_v1, %v2380_v20  ;;  %v2852_v45 = vand.u32 8388607, %v10821_v15  ;;  %v2640_v50 = vand.u32 2139095040, %v8493_v13  ;;  %6755 = vcosq.f32 %v8562_v32 }
 0x28d   : > { %11007 = vst [vmem:[#allocation70_spill] sm:$0xff] %v8578_v10  ;;  %v8587_v44 = vsel %vm8524_vm7, %v8087_v61, %v2514_v21  ;;  %v8592_v36 = vsel %vm2223_vm14, %v2307_v38, %v8418_v60  ;;  %v2860_v47 = vsub.s32 32, %v2859_v40  ;;  %v2300_v3 = vor.u32 4788187, %v2299_v4 }
 0x28e   : > { %v8596_v53 = vadd.s32 %v8474_v9, %v8472_v51  ;;  %v2386_v52 = vadd.s32 536870912, %v2385_v14  ;;  %v2303_v48 = vcvt.s32.f32 %v8575_v23  ;;  %vm5918_vm10 = vcmp.lt.s32.totalorder %v5917_v30, 0 }
 0x28f   : > { %v2863_v55 = vshrl.u32 %v10904_v37, %v2860_v47  ;;  %v2866_v41 = vshrl.u32 %v10905_v22, %v2860_v47  ;;  %v2853_v60 = vor.u32 8388608, %v2852_v45  ;;  %v2869_v2 = vshrl.u32 %v10911_v12, %v2860_v47 }
 0x290   : > { %v8602_v31 = vshrl.u32 %v2386_v52, 30  ;;  %v2641_v6 = vshrl.u32 %v2640_v50, 23  ;;  %v2858_v59 = vshrl.u32 %v2857_v27, 5  ;;  %v2862_v51 = vshll.u32 %v10902_v28, %v2859_v40 }
 0x291   : > { %v2865_v9 = vshll.u32 %v10904_v37, %v2859_v40  ;;  %v2872_v38 = vshrl.u32 %v10907_v34, %v2860_v47  ;;  %v8608_v7 = vsel %vm5918_vm10, 0, %v5917_v30  ;;  %v2868_v56 = vshll.u32 %v10905_v22, %v2859_v40 }
 0x292   : > { %v2388_v21 = vshll.u32 %v8602_v31, 30  ;;  %v2871_v57 = vshll.u32 %v10911_v12, %v2859_v40  ;;  %v2864_v4 = vor.u32 %v2863_v55, %v2862_v51  ;;  %v2874_v23 = vshll.u32 %v10907_v34, %v2859_v40 }
 0x293   : > { %v2867_v20 = vor.u32 %v2866_v41, %v2865_v9  ;;  %v2875_v27 = vshrl.u32 %v10906_v49, %v2860_v47  ;;  %v2301_v1 = vand.u32 2147483647, %v2300_v3  ;;  %v2870_v50 = vor.u32 %v2869_v2, %v2868_v56 }
 0x294   : > { %v8615_v45 = vsub.s32 %v2385_v14, %v2388_v21  ;;  %v2873_v52 = vor.u32 %v2872_v38, %v2871_v57  ;;  %v2893_v30 = vshll.u32 %v2853_v60, 8  ;;  %v5919_v35 = vadd.s32 4294967169, %v2641_v6 }
 0x295   : > { %v2876_v15 = vor.u32 %v2875_v27, %v2874_v23  ;;  %v11008_v61 = vand.u32 2147483647, %v8493_v13  ;;  %v2605_v16 = vsub.s32 32, %v8608_v7  ;;  %v2609_v55 = vsub.s32 4294967266, %v8608_v7 }
 0x296   : > { %v2391_v41 = vsub.s32 0, %v8615_v45  ;;  %vm2877_vm15 = vcmp.lt.s32.totalorder %v2858_v59, 1  ;;  %v8622_v40 = vpop.eup %6755  ;;  %v11010_v14 = vand.u32 2147483647, %v8199_v25  ;;  %v2861_v60 = vshrl.u32 %v10902_v28, %v2860_v47 }
 0x297   : > { %v2644_v10 = vand.u32 8388607, %v11008_v61  ;;  %11009 = vst [vmem:[#allocation71_spill] sm:$0xff] %v8622_v40  ;;  %vm2878_vm11 = vcmp.lt.s32.totalorder %v2858_v59, 2  ;;  %vm2880_vm7 = vcmp.lt.s32.totalorder %v2858_v59, 4  ;;  %v2885_v61 = vsel %vm2877_vm15, %v2864_v4, %v2867_v20 }
 0x298   : > { %vm8626_vm6 = vcmp.le.f32.partialorder %v11010_v14, 0.7853982  ;;  %v5908_v2 = vmin.u32 %v2391_v41, %v8615_v45  ;;  %vm2879_vm12 = vcmp.lt.s32.totalorder %v2858_v59, 3  ;;  %v2882_v6 = vsel %vm2880_vm7, %v2870_v50, 2102212464 }
 0x299   : > { %v2886_v51 = vsel %vm2880_vm7, %v2873_v52, 920167782  ;;  %v2889_v38 = vsel %vm2877_vm15, %v2867_v20, %v2870_v50  ;;  %v2890_v21 = vsel %vm2880_vm7, %v2876_v15, 1326507024  ;;  %v2647_v56 = vadd.s32 1, %v5919_v35 }
 0x29a   : > { %v2887_v9 = vsel %vm2879_vm12, %v2870_v50, %v2886_v51  ;;  %v2610_v57 = vadd.s32 127, %v2609_v55  ;;  %v2393_v23 = vclz %v5908_v2  ;;  %v2881_v27 = vsel %vm2877_vm15, %v2861_v60, %v2864_v4 }
 0x29b   : > { %v2888_v47 = vsel %vm2878_vm11, %v2885_v61, %v2887_v9  ;;  %v2883_v14 = vsel %vm2879_vm12, %v2867_v20, %v2882_v6  ;;  %v2891_v40 = vsel %vm2879_vm12, %v2873_v52, %v2890_v21  ;;  %v8640_v41 = vmul.f32 %v2303_v48, %v2301_v1 }
 0x29c   : > { %v8636_v29 = vmul.u32.u64.low %v2893_v30, %v2888_v47  ;;  %v8637_v63 = vmul.u32.u64.high %v2893_v30, %v2888_v47, %v8636_v29  ;;  %v5909_v58 = vadd.s32 4294967294, %v2393_v23  ;;  %v2892_v51 = vsel %vm2878_vm11, %v2889_v38, %v2891_v40 }
 0x29d   : > { %vm2648_vm5 = vcmp.gt.s32.totalorder %v2647_v56, 0  ;;  %v8643_v15 = vmul.u32.u64.low %v2893_v30, %v2892_v51  ;;  %v8644_v35 = vmul.u32.u64.high %v2893_v30, %v2892_v51, %v8643_v15  ;;  %v2645_v50 = vor.u32 8388608, %v2644_v10 }
 0x29e   : > { %v2649_v55 = vsel %vm2648_vm5, %v2647_v56, 0  ;;  %v2607_v4 = vshrl.u32 %v8596_v53, %v2605_v16  ;;  %vm5910_vm13 = vcmp.lt.s32.totalorder %v5909_v58, 0  ;;  %v2884_v20 = vsel %vm2878_vm11, %v2881_v27, %v2883_v14 }
 0x29f   : > { %v2651_v52 = vand.u32 31, %v2649_v55  ;;  %6757 = vsinq.f32 %v8562_v32  ;;  %v2611_v60 = vshll.u32 %v2610_v57, 23  ;;  %v8649_v48 = vsel %vm5910_vm13, 0, %v5909_v58 }
 0x2a0   : > { %v2903_v1 = vadd.s32 1, %v8637_v63  ;;  %6759 = vcosq.f32 %v8587_v44  ;;  %v2310_v10 = vsel %vm8626_vm6, 0, %v8592_v36  ;;  %v2606_v16 = vshll.u32 %v8538_v17, %v8608_v7 }
 0x2a1   : > { %v2652_v53 = vsub.s32 32, %v2651_v52  ;;  %v2305_v59 = vxor.u32 2147483648, %v8640_v41  ;;  %v2381_v32 = vadd.s32 %v8547_v46, %v8553_v33  ;;  %v2900_v40 = vmul.u32 %v2893_v30, %v2884_v20 }
 0x2a2   : > { %vm2902_vm9 = vc.u32 %v8644_v35, %v8636_v29  ;;  %v2608_v58 = vor.u32 %v2607_v4, %v2606_v16  ;;  %v2401_v61 = vsub.s32 4294967266, %v8649_v48  ;;  %v8665_v6 = vshll.u32 %v2645_v50, 8 }
 0x2a3   : > { %v2904_v2 = vsel %vm2902_vm9, %v2903_v1, %v8637_v63  ;;  %v2612_v9 = vor.u32 4788187, %v2611_v60  ;;  %v2655_v17 = vshrl.u32 %v10904_v37, %v2652_v53  ;;  %v2658_v7 = vshrl.u32 %v10905_v22, %v2652_v53 }
 0x2a4   : > { %v2905_v38 = vadd.s32 %v2904_v2, %v2900_v40  ;;  %v2654_v21 = vshll.u32 %v10902_v28, %v2651_v52  ;;  %v2657_v46 = vshll.u32 %v10904_v37, %v2651_v52  ;;  %v2660_v33 = vshll.u32 %v10905_v22, %v2651_v52  ;;  %v8681_v40 = vpop.f32.mrb[24].mxu0 }
 0x2a5   : > { %v2661_v30 = vshrl.u32 %v10911_v12, %v2652_v53  ;;  %v2650_v57 = vshrl.u32 %v2649_v55, 5  ;;  %v2663_v63 = vshll.u32 %v10911_v12, %v2651_v52  ;;  %v2664_v23 = vshrl.u32 %v10907_v34, %v2652_v53 }
 0x2a6   : > { %v2906_v56 = vadd.s32 536870912, %v2905_v38  ;;  %v2402_v27 = vadd.s32 127, %v2401_v61  ;;  %v2656_v47 = vor.u32 %v2655_v17, %v2654_v21  ;;  %v2659_v14 = vor.u32 %v2658_v7, %v2657_v46 }
 0x2a7   : > { %v2662_v51 = vor.u32 %v2661_v30, %v2660_v33  ;;  %v2665_v50 = vor.u32 %v2664_v23, %v2663_v63  ;;  %v2666_v4 = vshll.u32 %v10907_v34, %v2651_v52  ;;  %v2667_v20 = vshrl.u32 %v10906_v49, %v2652_v53 }
 0x2a8   : > { %v8675_v15 = vshrl.u32 %v2906_v56, 30  ;;  %v2613_v60 = vand.u32 2147483647, %v2612_v9  ;;  %v2615_v1 = vcvt.s32.f32 %v2608_v58  ;;  %v2397_v16 = vsub.s32 32, %v8649_v48 }
 0x2a9   : > { %v2653_v55 = vshrl.u32 %v10902_v28, %v2652_v53  ;;  %v8683_v2 = vpop.eup %6757  ;;  %v2668_v17 = vor.u32 %v2667_v20, %v2666_v4  ;;  %vm2669_vm2 = vcmp.lt.s32.totalorder %v2650_v57, 1  ;;  %vm2672_vm8 = vcmp.lt.s32.totalorder %v2650_v57, 4 }
 0x2aa   : > { %11013 = vst [vmem:[#allocation72_spill] sm:$0xff] %v8683_v2  ;;  %v2908_v61 = vshll.u32 %v8675_v15, 30  ;;  %v8686_v7 = vpop.eup %6759  ;;  %v2403_v52 = vshll.u32 %v2402_v27, 23  ;;  %vm2671_vm10 = vcmp.lt.s32.totalorder %v2650_v57, 3  ;;  %v2677_v9 = vsel %vm2669_vm2, %v2656_v47, %v2659_v14 }
 0x2ab   : > { %11014 = vst [vmem:[#allocation73_spill] sm:$0xff] %v8686_v7  ;;  %v2678_v58 = vsel %vm2672_vm8, %v2665_v50, 920167782  ;;  %vm2670_vm15 = vcmp.lt.s32.totalorder %v2650_v57, 2  ;;  %v2674_v53 = vsel %vm2672_vm8, %v2662_v51, 2102212464  ;;  %v2616_v33 = vmul.f32 %v2615_v1, %v2613_v60 }
 0x2ac   : > { %v8690_v21 = vsub.s32 %v2905_v38, %v2908_v61  ;;  %v2679_v46 = vsel %vm2671_vm10, %v2662_v51, %v2678_v58  ;;  %vm2535_vm11 = vcmp.lt.s32.totalorder %v8342_v11, 0  ;;  %v2399_v30 = vshrl.u32 %v2381_v32, %v2397_v16 }
 0x2ad   : > { %v2680_v56 = vsel %vm2670_vm15, %v2677_v9, %v2679_v46  ;;  %v2952_v63 = vand.u32 2139095040, %v8497_v5  ;;  %v2673_v27 = vsel %vm2669_vm2, %v2653_v55, %v2656_v47  ;;  %v2681_v38 = vsel %vm2669_vm2, %v2659_v14, %v2662_v51 }
 0x2ae   : > { %v2911_v23 = vsub.s32 0, %v8690_v21  ;;  %v2682_v4 = vsel %vm2672_vm8, %v2668_v17, 1326507024  ;;  %v2675_v20 = vsel %vm2671_vm10, %v2659_v14, %v2674_v53  ;;  %v2398_v32 = vshll.u32 %v8615_v45, %v8649_v48 }
 0x2af   : > { %v2683_v61 = vsel %vm2671_vm10, %v2665_v50, %v2682_v4  ;;  %v8704_v58 = vmul.u32.u64.low %v8665_v6, %v2680_v56  ;;  %v8705_v60 = vmul.u32.u64.high %v8665_v6, %v2680_v56, %v8704_v58  ;;  %v2404_v1 = vor.u32 4788187, %v2403_v52 }
 0x2b0   : > { %v5928_v16 = vmin.u32 %v2911_v23, %v8690_v21  ;;  %v2684_v47 = vsel %vm2670_vm15, %v2681_v38, %v2683_v61  ;;  %v2306_v14 = vsel %vm2223_vm14, %v2305_v59, %v8640_v41  ;;  %v11015_v51 = vand.u32 2147483647, %v8342_v11 }
 0x2b1   : > { %vm2327_vm12 = vcmp.lt.s32.totalorder %v8388_v24, 0  ;;  %v8725_v45 = vmul.u32.u64.low %v8665_v6, %v2684_v47  ;;  %v8726_v48 = vmul.u32.u64.high %v8665_v6, %v2684_v47, %v8725_v45  ;;  %v2953_v55 = vshrl.u32 %v2952_v63, 23  ;;  %v8756_v47 = vpop.f32.mrb[25].mxu0 }
 0x2b2   : > { %vm8719_vm7 = vcmp.le.f32.partialorder %v11015_v51, 0.7853982  ;;  %v2619_v17 = vsub.s32 4, %v8530_v0  ;;  %v2400_v52 = vor.u32 %v2399_v30, %v2398_v32  ;;  %v2913_v9 = vclz %v5928_v16 }
 0x2b3   : > { %v2676_v53 = vsel %vm2670_vm15, %v2673_v27, %v2675_v20  ;;  %6761 = vsinq.f32 %v8587_v44  ;;  %v2617_v41 = vxor.u32 2147483648, %v2616_v33  ;;  %v2695_v59 = vadd.s32 1, %v8705_v60 }
 0x2b4   : > { %v5931_v46 = vadd.s32 4294967169, %v2953_v55  ;;  %v2405_v56 = vand.u32 2147483647, %v2404_v1  ;;  %v5929_v23 = vadd.s32 4294967294, %v2913_v9  ;;  %v10829_v38 = vand.u32 2147483647, %v8497_v5 }
 0x2b5   : > { %v8735_v4 = vadd.f32 %v8338_v19, %v8209_v54  ;;  %v2309_v30 = vsel %vm8626_vm6, %v8199_v25, %v2306_v14  ;;  %v2692_v57 = vmul.u32 %v8665_v6, %v2676_v53  ;;  %vm2694_vm14 = vc.u32 %v8726_v48, %v8704_v58 }
 0x2b6   : > { %v2959_v44 = vadd.s32 1, %v5931_v46  ;;  %v8746_v63 = vsel %vm2535_vm11, %v2619_v17, %v8530_v0  ;;  %v2407_v27 = vcvt.s32.f32 %v2400_v52  ;;  %v2411_v20 = vsub.s32 4, %v8602_v31 }
 0x2b7   : > { %v2696_v54 = vsel %vm2694_vm14, %v2695_v59, %v8705_v60  ;;  %v2618_v61 = vsel %vm2535_vm11, %v2617_v41, %v2616_v33  ;;  %vm2847_vm5 = vcmp.lt.s32.totalorder %v8484_v42, 0  ;;  %vm5930_vm13 = vcmp.lt.s32.totalorder %v5929_v23, 0 }
 0x2b8   : > { %v2697_v6 = vadd.s32 %v2696_v54, %v2692_v57  ;;  %vm2960_vm9 = vcmp.gt.s32.totalorder %v2959_v44, 0  ;;  %v2408_v32 = vmul.f32 %v2407_v27, %v2405_v56  ;;  %v2956_v1 = vand.u32 8388607, %v10829_v38 }
 0x2b9   : > { %v2961_v16 = vsel %vm2960_vm9, %v2959_v44, 0  ;;  %v2744_v0 = vand.u32 2139095040, %v8735_v4  ;;  %6763 = vcosq.f32 %v2309_v30  ;;  %v8762_v33 = vadd.s32 3, %v2310_v10 }
 0x2ba   : > { %v2698_v60 = vadd.s32 536870912, %v2697_v6  ;;  %v2963_v14 = vand.u32 31, %v2961_v16  ;;  %6765 = vsinq.f32 %v2309_v30  ;;  %v8770_v45 = vsel %vm2327_vm12, %v2411_v20, %v8602_v31 }
 0x2bb   : > { %11018 = vst [vmem:[#allocation74_spill] sm:$0xff] %v8762_v33  ;;  %v8772_v55 = vsel %vm5930_vm13, 0, %v5929_v23  ;;  %v8777_v36 = vsel %vm8719_vm7, %v8342_v11, %v2618_v61  ;;  %v2901_v3 = vadd.s32 %v8636_v29, %v8644_v35  ;;  %v2409_v52 = vxor.u32 2147483648, %v2408_v32 }
 0x2bc   : > { %v8781_v10 = vshrl.u32 %v2698_v60, 30  ;;  %v2964_v17 = vsub.s32 32, %v2963_v14  ;;  %v2931_v9 = vsub.s32 4, %v8675_v15  ;;  %v2957_v53 = vor.u32 8388608, %v2956_v1 }
 0x2bd   : > { %v2745_v41 = vshrl.u32 %v2744_v0, 23  ;;  %v8784_v31 = vpop.eup %6761  ;;  %v2921_v59 = vsub.s32 4294967266, %v8772_v55  ;;  %v2966_v56 = vshll.u32 %v10902_v28, %v2963_v14  ;;  %v2969_v29 = vshll.u32 %v10904_v37, %v2963_v14 }
 0x2be   : > { %11019 = vst [vmem:[#allocation75_spill] sm:$0xff] %v8784_v31  ;;  %v2700_v46 = vshll.u32 %v8781_v10, 30  ;;  %v2967_v23 = vshrl.u32 %v10904_v37, %v2964_v17  ;;  %v2970_v35 = vshrl.u32 %v10905_v22, %v2964_v17  ;;  %v2972_v30 = vshll.u32 %v10905_v22, %v2963_v14 }
 0x2bf   : > { %v2973_v57 = vshrl.u32 %v10911_v12, %v2964_v17  ;;  %v2962_v27 = vshrl.u32 %v2961_v16, 5  ;;  %v2975_v20 = vshll.u32 %v10911_v12, %v2963_v14  ;;  %v2976_v54 = vshrl.u32 %v10907_v34, %v2964_v17 }
 0x2c0   : > { %v8794_v44 = vsub.s32 %v2697_v6, %v2700_v46  ;;  %v8801_v61 = vsel %vm2847_vm5, %v2931_v9, %v8675_v15  ;;  %v2968_v1 = vor.u32 %v2967_v23, %v2966_v56  ;;  %v2971_v0 = vor.u32 %v2970_v35, %v2969_v29 }
 0x2c1   : > { %v2974_v60 = vor.u32 %v2973_v57, %v2972_v30  ;;  %v11020_v38 = vand.u32 2147483647, %v8388_v24  ;;  %v2410_v6 = vsel %vm2327_vm12, %v2409_v52, %v2408_v32  ;;  %v2977_v46 = vor.u32 %v2976_v54, %v2975_v20 }
 0x2c2   : > { %v2703_v16 = vsub.s32 0, %v8794_v44  ;;  %v2997_v11 = vshll.u32 %v2957_v53, 8  ;;  %v11023_v7 = vand.u32 2147483647, %v8484_v42  ;;  %v2917_v9 = vsub.s32 32, %v8772_v55 }
 0x2c3   : > { %vm8805_vm6 = vcmp.le.f32.partialorder %v11020_v38, 0.7853982  ;;  %v2978_v38 = vshll.u32 %v10907_v34, %v2963_v14  ;;  %v2979_v56 = vshrl.u32 %v10906_v49, %v2964_v17  ;;  %v5923_v23 = vadd.s32 4294967169, %v2745_v41  ;;  %v8821_v29 = vpop.eup %6763 }
 0x2c4   : > { %vm8814_vm2 = vcmp.le.f32.partialorder %v11023_v7, 0.7853982  ;;  %11026 = vst [vmem:[#allocation76_spill] sm:$0xff] %v8821_v29  ;;  %v2922_v32 = vadd.s32 127, %v2921_v59  ;;  %v5920_v52 = vmin.u32 %v2703_v16, %v8794_v44  ;;  %vm2981_vm8 = vcmp.lt.s32.totalorder %v2962_v27, 1  ;;  %v8824_v53 = vpop.eup %6765 }
 0x2c5   : > { %vm2984_vm10 = vcmp.lt.s32.totalorder %v2962_v27, 4  ;;  %11027 = vst [vmem:[#allocation77_spill] sm:$0xff] %v8824_v53  ;;  %v2965_v7 = vshrl.u32 %v10902_v28, %v2964_v17  ;;  %v2980_v35 = vor.u32 %v2979_v56, %v2978_v38  ;;  %v2989_v57 = vsel %vm2981_vm8, %v2968_v1, %v2971_v0 }
 0x2c6   : > { %v2986_v30 = vsel %vm2984_vm10, %v2974_v60, 2102212464  ;;  %v2705_v20 = vclz %v5920_v52  ;;  %vm2983_vm15 = vcmp.lt.s32.totalorder %v2962_v27, 3  ;;  %v2990_v14 = vsel %vm2984_vm10, %v2977_v46, 920167782 }
 0x2c7   : > { %v2993_v54 = vsel %vm2981_vm8, %v2971_v0, %v2974_v60  ;;  %vm2982_vm11 = vcmp.lt.s32.totalorder %v2962_v27, 2  ;;  %v2985_v41 = vsel %vm2981_vm8, %v2965_v7, %v2968_v1  ;;  %v2991_v31 = vsel %vm2983_vm15, %v2974_v60, %v2990_v14 }
 0x2c8   : > { %v2994_v25 = vsel %vm2984_vm10, %v2980_v35, 1326507024  ;;  %v5921_v59 = vadd.s32 4294967294, %v2705_v20  ;;  %v2987_v29 = vsel %vm2983_vm15, %v2971_v0, %v2986_v30  ;;  %v2992_v16 = vsel %vm2982_vm11, %v2989_v57, %v2991_v31 }
 0x2c9   : > { %v2995_v33 = vsel %vm2983_vm15, %v2977_v46, %v2994_v25  ;;  %v2919_v2 = vshrl.u32 %v2901_v3, %v2917_v9  ;;  %v8827_v53 = vmul.u32.u64.low %v2997_v11, %v2992_v16  ;;  %v8828_v62 = vmul.u32.u64.high %v2997_v11, %v2992_v16, %v8827_v53 }
 0x2ca   : > { %v2996_v18 = vsel %vm2982_vm11, %v2993_v54, %v2995_v33  ;;  %v2923_v17 = vshll.u32 %v2922_v32, 23  ;;  %vm5922_vm12 = vcmp.lt.s32.totalorder %v5921_v59, 0  ;;  %v2414_v27 = vsel %vm8805_vm6, 0, %v8770_v45  ;;  %v8876_v32 = vpop.f32.mrb[26].mxu0 }
 0x2cb   : > { %v8831_v38 = vmul.u32.u64.low %v2997_v11, %v2996_v18  ;;  %v8832_v56 = vmul.u32.u64.high %v2997_v11, %v2996_v18, %v8831_v38  ;;  %v2988_v1 = vsel %vm2982_vm11, %v2985_v41, %v2987_v29  ;;  %v10839_v0 = vand.u32 2147483647, %v8735_v4 }
 0x2cc   : > { %v2751_v31 = vadd.s32 1, %v5923_v23  ;;  %6767 = vcosq.f32 %v8777_v36  ;;  %v2918_v25 = vshll.u32 %v8690_v21, %v8772_v55  ;;  %v2934_v33 = vsel %vm8814_vm2, 0, %v8801_v61 }
 0x2cd   : > { %v8844_v3 = vsel %vm5922_vm12, 0, %v5921_v59  ;;  %v8849_v18 = vsel %vm8805_vm6, %v8388_v24, %v2410_v6  ;;  %v3007_v45 = vadd.s32 1, %v8828_v62  ;;  %v8854_v60 = vadd.f32 %v8338_v19, %v8312_v43 }
 0x2ce   : > { %vm2752_vm14 = vcmp.gt.s32.totalorder %v2751_v31, 0  ;;  %v2920_v46 = vor.u32 %v2919_v2, %v2918_v25  ;;  %v2924_v21 = vor.u32 4788187, %v2923_v17  ;;  %v3004_v55 = vmul.u32 %v2997_v11, %v2988_v1 }
 0x2cf   : > { %11028 = vst [vmem:[#allocation78_spill] sm:$0xff] %v8854_v60  ;;  %vm3006_vm13 = vc.u32 %v8832_v56, %v8827_v53  ;;  %v2713_v61 = vsub.s32 4294967266, %v8844_v3  ;;  %v2748_v51 = vand.u32 8388607, %v10839_v0  ;;  %v2753_v6 = vsel %vm2752_vm14, %v2751_v31, 0 }
 0x2d0   : > { %v3008_v9 = vsel %vm3006_vm13, %v3007_v45, %v8828_v62  ;;  %6769 = vsinq.f32 %v8777_v36  ;;  %v11029_v43 = vsel %vm8719_vm7, 0, %v8746_v63  ;;  %v8869_v11 = vadd.s32 3, %v2414_v27 }
 0x2d1   : > { %v8867_v19 = vadd.s32 3, %v11029_v43  ;;  %v3009_v2 = vadd.s32 %v3008_v9, %v3004_v55  ;;  %6771 = vcosq.f32 %v8849_v18  ;;  %v8872_v23 = vadd.s32 3, %v2934_v33 }
 0x2d2   : > { %v2693_v62 = vadd.s32 %v8704_v58, %v8726_v48  ;;  %v2755_v29 = vand.u32 31, %v2753_v6  ;;  %v2925_v36 = vand.u32 2147483647, %v2924_v21  ;;  %v2927_v52 = vcvt.s32.f32 %v2920_v46 }
 0x2d3   : > { %11030 = vst [vmem:[#allocation79_spill] sm:$0xff] %v8867_v19  ;;  %11031 = vst [vmem:[#allocation80_spill] sm:$0xff] %v8872_v23  ;;  %v3010_v50 = vadd.s32 536870912, %v3009_v2  ;;  %v10840_v63 = vand.u32 2147483647, %v8854_v60  ;;  %v2709_v7 = vsub.s32 32, %v8844_v3  ;;  %v2710_v43 = vshll.u32 %v8794_v44, %v8844_v3 }
 0x2d4   : > { %v2714_v35 = vadd.s32 127, %v2713_v61  ;;  %v2749_v30 = vor.u32 8388608, %v2748_v51  ;;  %v2756_v57 = vsub.s32 32, %v2755_v29  ;;  %v2758_v14 = vshll.u32 %v10902_v28, %v2755_v29 }
 0x2d5   : > { %v8880_v20 = vshrl.u32 %v3010_v50, 30  ;;  %v2761_v54 = vshll.u32 %v10904_v37, %v2755_v29  ;;  %v3264_v58 = vand.u32 2139095040, %v8854_v60  ;;  %v2764_v59 = vshll.u32 %v10905_v22, %v2755_v29 }
 0x2d6   : > { %v2759_v48 = vshrl.u32 %v10904_v37, %v2756_v57  ;;  %v2762_v41 = vshrl.u32 %v10905_v22, %v2756_v57  ;;  %v2765_v16 = vshrl.u32 %v10911_v12, %v2756_v57  ;;  %v8889_v17 = vpop.eup %6767  ;;  %v2754_v27 = vshrl.u32 %v2753_v6, 5 }
 0x2d7   : > { %11032 = vst [vmem:[#allocation81_spill] sm:$0xff] %v8889_v17  ;;  %v3012_v38 = vshll.u32 %v8880_v20, 30  ;;  %v2767_v1 = vshll.u32 %v10911_v12, %v2755_v29  ;;  %v2768_v31 = vshrl.u32 %v10907_v34, %v2756_v57  ;;  %v2771_v46 = vshrl.u32 %v10906_v49, %v2756_v57 }
 0x2d8   : > { %v2760_v25 = vor.u32 %v2759_v48, %v2758_v14  ;;  %v2763_v33 = vor.u32 %v2762_v41, %v2761_v54  ;;  %v2766_v45 = vor.u32 %v2765_v16, %v2764_v59  ;;  %v2715_v21 = vshll.u32 %v2714_v35, 23 }
 0x2d9   : > { %v8895_v55 = vsub.s32 %v3009_v2, %v3012_v38  ;;  %v2769_v61 = vor.u32 %v2768_v31, %v2767_v1  ;;  %v2770_v9 = vshll.u32 %v10907_v34, %v2755_v29  ;;  %v2928_v51 = vmul.f32 %v2927_v52, %v2925_v36 }
 0x2da   : > { %v2711_v6 = vshrl.u32 %v2693_v62, %v2709_v7  ;;  %v2789_v50 = vshll.u32 %v2749_v30, 8  ;;  %v8900_v0 = vpop.eup %6769  ;;  %vm2773_vm7 = vcmp.lt.s32.totalorder %v2754_v27, 1  ;;  %vm2776_vm9 = vcmp.lt.s32.totalorder %v2754_v27, 4 }
 0x2db   : > { %11033 = vst [vmem:[#allocation82_spill] sm:$0xff] %v8900_v0  ;;  %v3015_v14 = vsub.s32 0, %v8895_v55  ;;  %v2772_v54 = vor.u32 %v2771_v46, %v2770_v9  ;;  %v8903_v48 = vpop.eup %6771  ;;  %vm2639_vm6 = vcmp.lt.s32.totalorder %v8493_v13, 0  ;;  %v2757_v2 = vshrl.u32 %v10902_v28, %v2756_v57 }
 0x2dc   : > { %11034 = vst [vmem:[#allocation83_spill] sm:$0xff] %v8903_v48  ;;  %v2778_v29 = vsel %vm2776_vm9, %v2766_v45, 2102212464  ;;  %v2781_v36 = vsel %vm2773_vm7, %v2760_v25, %v2763_v33  ;;  %v3265_v52 = vshrl.u32 %v3264_v58, 23  ;;  %v2716_v44 = vor.u32 4788187, %v2715_v21 }
 0x2dd   : > { %v5932_v3 = vmin.u32 %v3015_v14, %v8895_v55  ;;  %vm2775_vm8 = vcmp.lt.s32.totalorder %v2754_v27, 3  ;;  %v2782_v62 = vsel %vm2776_vm9, %v2769_v61, 920167782  ;;  %vm2774_vm10 = vcmp.lt.s32.totalorder %v2754_v27, 2 }
 0x2de   : > { %v2777_v7 = vsel %vm2773_vm7, %v2757_v2, %v2760_v25  ;;  %v2783_v35 = vsel %vm2775_vm8, %v2766_v45, %v2782_v62  ;;  %v2785_v30 = vsel %vm2773_vm7, %v2763_v33, %v2766_v45  ;;  %v2779_v59 = vsel %vm2775_vm8, %v2763_v33, %v2778_v29  ;;  %v8927_v29 = vld [vmem:[%s10732_s2] ss:$0 sm:$0xff] }
 0x2df   : > { %v3017_v41 = vclz %v5932_v3  ;;  %v2784_v16 = vsel %vm2774_vm10, %v2781_v36, %v2783_v35  ;;  %v2786_v57 = vsel %vm2776_vm9, %v2772_v54, 1326507024  ;;  %v5943_v58 = vadd.s32 4294967169, %v3265_v52 }
 0x2e0   : > { %v2787_v38 = vsel %vm2775_vm8, %v2769_v61, %v2786_v57  ;;  %v8912_v1 = vmul.u32.u64.low %v2789_v50, %v2784_v16  ;;  %v8913_v31 = vmul.u32.u64.high %v2789_v50, %v2784_v16, %v8912_v1  ;;  %v2929_v46 = vxor.u32 2147483648, %v2928_v51 }
 0x2e1   : > { %v2723_v21 = vsub.s32 4, %v8781_v10  ;;  %v5933_v9 = vadd.s32 4294967294, %v3017_v41  ;;  %v2788_v25 = vsel %vm2774_vm10, %v2785_v30, %v2787_v38  ;;  %v2712_v14 = vor.u32 %v2711_v6, %v2710_v43  ;;  %v8933_v43 = vpop.f32.mrb[27].mxu0 }
 0x2e2   : > { %v8918_v45 = vmul.u32.u64.low %v2789_v50, %v2788_v25  ;;  %v8919_v2 = vmul.u32.u64.high %v2789_v50, %v2788_v25, %v8918_v45  ;;  %v3271_v33 = vadd.s32 1, %v5943_v58  ;;  %v2780_v54 = vsel %vm2774_vm10, %v2777_v7, %v2779_v59 }
 0x2e3   : > { %vm5934_vm15 = vcmp.lt.s32.totalorder %v5933_v9, 0  ;;  %v3268_v61 = vand.u32 8388607, %v10840_v63  ;;  %v8931_v36 = vadd.f32 %v8927_v29, %v8401_v26  ;;  %6773 = vsinq.f32 %v8849_v18 }
 0x2e4   : > { %v2717_v6 = vand.u32 2147483647, %v2716_v44  ;;  %v2799_v27 = vadd.s32 1, %v8913_v31  ;;  %vm3272_vm11 = vcmp.gt.s32.totalorder %v3271_v33, 0  ;;  %v8939_v52 = vsel %vm2847_vm5, %v2929_v46, %v2928_v51 }
 0x2e5   : > { %11035 = vst [vmem:[#allocation84_spill] sm:$0xff] %v8931_v36  ;;  %v8944_v3 = vsel %vm2639_vm6, %v2723_v21, %v8781_v10  ;;  %vm2951_vm12 = vcmp.lt.s32.totalorder %v8497_v5, 0  ;;  %v8947_v26 = vsel %vm5934_vm15, 0, %v5933_v9  ;;  %v3273_v62 = vsel %vm3272_vm11, %v3271_v33, 0 }
 0x2e6   : > { %v2719_v7 = vcvt.s32.f32 %v2712_v14  ;;  %v2796_v18 = vmul.u32 %v2789_v50, %v2780_v54  ;;  %vm2798_vm14 = vc.u32 %v8919_v2, %v8912_v1  ;;  %v3275_v44 = vand.u32 31, %v3273_v62 }
 0x2e7   : > { %v3005_v51 = vadd.s32 %v8827_v53, %v8832_v56  ;;  %v2800_v35 = vsel %vm2798_vm14, %v2799_v27, %v8913_v31  ;;  %v3269_v30 = vor.u32 8388608, %v3268_v61  ;;  %v3025_v59 = vsub.s32 4294967266, %v8947_v26 }
 0x2e8   : > { %v8955_v41 = vmul.f32 %v2719_v7, %v2717_v6  ;;  %v2801_v16 = vadd.s32 %v2800_v35, %v2796_v18  ;;  %v3276_v57 = vsub.s32 32, %v3275_v44  ;;  %v3021_v50 = vsub.s32 32, %v8947_v26 }
 0x2e9   : > { %v3035_v38 = vsub.s32 4, %v8880_v20  ;;  %v3274_v58 = vshrl.u32 %v3273_v62, 5  ;;  %v3056_v46 = vand.u32 2139095040, %v8931_v36  ;;  %v3278_v53 = vshll.u32 %v10902_v28, %v3275_v44 }
 0x2ea   : > { %v2802_v21 = vadd.s32 536870912, %v2801_v16  ;;  %v3279_v56 = vshrl.u32 %v10904_v37, %v3276_v57  ;;  %v3282_v31 = vshrl.u32 %v10905_v22, %v3276_v57  ;;  %v3281_v9 = vshll.u32 %v10904_v37, %v3275_v44 }
 0x2eb   : > { %v3284_v25 = vshll.u32 %v10905_v22, %v3275_v44  ;;  %v3285_v14 = vshrl.u32 %v10911_v12, %v3276_v57  ;;  %v3288_v45 = vshrl.u32 %v10907_v34, %v3276_v57  ;;  %v3026_v33 = vadd.s32 127, %v3025_v59 }
 0x2ec   : > { %v8968_v54 = vshrl.u32 %v2802_v21, 30  ;;  %v3280_v61 = vor.u32 %v3279_v56, %v3278_v53  ;;  %v3287_v6 = vshll.u32 %v10911_v12, %v3275_v44  ;;  %v3283_v27 = vor.u32 %v3282_v31, %v3281_v9 }
 0x2ed   : > { %v3286_v62 = vor.u32 %v3285_v14, %v3284_v25  ;;  %v3290_v7 = vshll.u32 %v10907_v34, %v3275_v44  ;;  %v3291_v18 = vshrl.u32 %v10906_v49, %v3276_v57  ;;  %v8973_v35 = vpop.eup %6773  ;;  %v11036_v63 = vand.u32 2147483647, %v8493_v13 }
 0x2ee   : > { %v2721_v59 = vxor.u32 2147483648, %v8955_v41  ;;  %v8985_v21 = vsel %vm2951_vm12, %v3035_v38, %v8880_v20  ;;  %v2804_v53 = vshll.u32 %v8968_v54, 30  ;;  %v3289_v44 = vor.u32 %v3288_v45, %v3287_v6 }
 0x2ef   : > { %vm8977_vm5 = vcmp.le.f32.partialorder %v11036_v63, 0.7853982  ;;  %v11039_v56 = vand.u32 2147483647, %v8497_v5  ;;  %v3022_v63 = vshll.u32 %v8895_v55, %v8947_v26  ;;  %v3023_v9 = vshrl.u32 %v3005_v51, %v3021_v50 }
 0x2f0   : > { %v3292_v25 = vor.u32 %v3291_v18, %v3290_v7  ;;  %v3309_v14 = vshll.u32 %v3269_v30, 8  ;;  %v8996_v23 = vsub.s32 %v2801_v16, %v2804_v53  ;;  %vm3293_vm7 = vcmp.lt.s32.totalorder %v3274_v58, 1 }
 0x2f1   : > { %vm8990_vm13 = vcmp.le.f32.partialorder %v11039_v56, 0.7853982  ;;  %vm3296_vm9 = vcmp.lt.s32.totalorder %v3274_v58, 4  ;;  %v3057_v20 = vshrl.u32 %v3056_v46, 23  ;;  %v3027_v38 = vshll.u32 %v3026_v33, 23 }
 0x2f2   : > { %v3277_v45 = vshrl.u32 %v10902_v28, %v3276_v57  ;;  %v3298_v6 = vsel %vm3296_vm9, %v3286_v62, 2102212464  ;;  %v3301_v17 = vsel %vm3293_vm7, %v3280_v61, %v3283_v27  ;;  %v2807_v56 = vsub.s32 0, %v8996_v23 }
 0x2f3   : > { %vm3294_vm8 = vcmp.lt.s32.totalorder %v3274_v58, 2  ;;  %vm3295_vm10 = vcmp.lt.s32.totalorder %v3274_v58, 3  ;;  %v3302_v0 = vsel %vm3296_vm9, %v3289_v44, 920167782  ;;  %v3305_v26 = vsel %vm3293_vm7, %v3283_v27, %v3286_v62 }
 0x2f4   : > { %v3297_v19 = vsel %vm3293_vm7, %v3277_v45, %v3280_v61  ;;  %v3303_v55 = vsel %vm3295_vm10, %v3286_v62, %v3302_v0  ;;  %v3306_v51 = vsel %vm3296_vm9, %v3292_v25, 1326507024  ;;  %v5924_v30 = vmin.u32 %v2807_v56, %v8996_v23 }
 0x2f5   : > { %v3299_v16 = vsel %vm3295_vm10, %v3283_v27, %v3298_v6  ;;  %v3304_v50 = vsel %vm3294_vm8, %v3301_v17, %v3303_v55  ;;  %v3307_v46 = vsel %vm3295_vm10, %v3289_v44, %v3306_v51  ;;  %v3028_v33 = vor.u32 4788187, %v3027_v38 }
 0x2f6   : > { %v3308_v57 = vsel %vm3294_vm8, %v3305_v26, %v3307_v46  ;;  %v9003_v7 = vmul.u32.u64.low %v3309_v14, %v3304_v50  ;;  %v9004_v18 = vmul.u32.u64.high %v3309_v14, %v3304_v50, %v9003_v7  ;;  %v2809_v53 = vclz %v5924_v30 }
 0x2f7   : > { %v9007_v24 = vmul.u32.u64.low %v3309_v14, %v3308_v57  ;;  %v9008_v48 = vmul.u32.u64.high %v3309_v14, %v3308_v57, %v9007_v24  ;;  %v9012_v0 = vadd.f32 %v8927_v29, %v8503_v39  ;;  %v2726_v17 = vsel %vm8977_vm5, 0, %v8944_v3 }
 0x2f8   : > { %v3024_v61 = vor.u32 %v3023_v9, %v3022_v63  ;;  %v3300_v27 = vsel %vm3294_vm8, %v3297_v19, %v3299_v16  ;;  %v5935_v62 = vadd.s32 4294967169, %v3057_v20  ;;  %v2933_v44 = vsel %vm8814_vm2, %v8484_v42, %v8939_v52 }
 0x2f9   : > { %11042 = vst [vmem:[#allocation85_spill] sm:$0xff] %v9012_v0  ;;  %v2722_v24 = vsel %vm2639_vm6, %v2721_v59, %v8955_v41  ;;  %v3038_v39 = vsel %vm8990_vm13, 0, %v8985_v21  ;;  %v5925_v25 = vadd.s32 4294967294, %v2809_v53  ;;  %v3029_v38 = vand.u32 2147483647, %v3028_v33 }
 0x2fa   : > { %v3319_v3 = vadd.s32 1, %v9004_v18  ;;  %v11043_v19 = vand.u32 2147483647, %v8931_v36  ;;  %v3063_v63 = vadd.s32 1, %v5935_v62  ;;  %v3316_v9 = vmul.u32 %v3309_v14, %v3300_v27  ;;  %v9065_v27 = vpop.f32.mrb[28].mxu0 }
 0x2fb   : > { %vm5926_vm15 = vcmp.lt.s32.totalorder %v5925_v25, 0  ;;  %vm3318_vm2 = vc.u32 %v9008_v48, %v9003_v7  ;;  %v3368_v15 = vand.u32 2139095040, %v9012_v0  ;;  %v3031_v52 = vcvt.s32.f32 %v3024_v61 }
 0x2fc   : > { %v3060_v58 = vand.u32 8388607, %v11043_v19  ;;  %v9034_v41 = vsel %vm5926_vm15, 0, %v5925_v25  ;;  %v3320_v59 = vsel %vm3318_vm2, %v3319_v3, %v9004_v18  ;;  %vm3064_vm6 = vcmp.gt.s32.totalorder %v3063_v63, 0 }
 0x2fd   : > { %v9040_v21 = vsel %vm8977_vm5, %v8493_v13, %v2722_v24  ;;  %v2817_v20 = vsub.s32 4294967266, %v9034_v41  ;;  %v2827_v14 = vsub.s32 4, %v8968_v54  ;;  %v3321_v45 = vadd.s32 %v3320_v59, %v3316_v9 }
 0x2fe   : > { %6775 = vcosq.f32 %v2933_v44  ;;  %v9044_v6 = vmul.f32 %v3031_v52, %v3029_v38  ;;  %v3061_v56 = vor.u32 8388608, %v3060_v58  ;;  %v3065_v55 = vsel %vm3064_vm6, %v3063_v63, 0 }
 0x2ff   : > { %6777 = vsinq.f32 %v2933_v44  ;;  %vm2743_vm11 = vcmp.lt.s32.totalorder %v8735_v4, 0  ;;  %v3322_v26 = vadd.s32 536870912, %v3321_v45  ;;  %v3369_v51 = vshrl.u32 %v3368_v15, 23 }
 0x300   : > { %6779 = vcosq.f32 %v9040_v21  ;;  %v9048_v10 = vadd.s32 3, %v2726_v17  ;;  %v9050_v30 = vadd.s32 3, %v3038_v39  ;;  %v3067_v16 = vand.u32 31, %v3065_v55 }
 0x301   : > { %v2797_v50 = vadd.s32 %v8912_v1, %v8919_v2  ;;  %v2818_v46 = vadd.s32 127, %v2817_v20  ;;  %v9057_v33 = vsel %vm2743_vm11, %v2827_v14, %v8968_v54  ;;  %v9059_v57 = vshrl.u32 %v3322_v26, 30 }
 0x302   : > { %11044 = vst [vmem:[#allocation86_spill] sm:$0xff] %v9050_v30  ;;  %v3068_v53 = vsub.s32 32, %v3067_v16  ;;  %v9062_v61 = vshll.u32 %v3061_v56, 8  ;;  %v10845_v17 = vand.u32 2147483647, %v9012_v0  ;;  %v2813_v62 = vsub.s32 32, %v9034_v41 }
 0x303   : > { %v3324_v1 = vshll.u32 %v9059_v57, 30  ;;  %v3070_v2 = vshll.u32 %v10902_v28, %v3067_v16  ;;  %v5947_v44 = vadd.s32 4294967169, %v3369_v51  ;;  %v3073_v24 = vshll.u32 %v10904_v37, %v3067_v16 }
 0x304   : > { %v3071_v54 = vshrl.u32 %v10904_v37, %v3068_v53  ;;  %v3074_v39 = vshrl.u32 %v10905_v22, %v3068_v53  ;;  %v3077_v25 = vshrl.u32 %v10911_v12, %v3068_v53  ;;  %v2819_v38 = vshll.u32 %v2818_v46, 23 }
 0x305   : > { %v9074_v3 = vsub.s32 %v3321_v45, %v3324_v1  ;;  %v3066_v19 = vshrl.u32 %v3065_v55, 5  ;;  %v3076_v58 = vshll.u32 %v10905_v22, %v3067_v16  ;;  %v2814_v63 = vshll.u32 %v8996_v23, %v9034_v41 }
 0x306   : > { %v3072_v9 = vor.u32 %v3071_v54, %v3070_v2  ;;  %v3075_v15 = vor.u32 %v3074_v39, %v3073_v24  ;;  %v9081_v52 = vand.u32 8388607, %v10845_v17  ;;  %v3079_v14 = vshll.u32 %v10911_v12, %v3067_v16 }
 0x307   : > { %v3327_v59 = vsub.s32 0, %v9074_v3  ;;  %v3078_v20 = vor.u32 %v3077_v25, %v3076_v58  ;;  %v3080_v45 = vshrl.u32 %v10907_v34, %v3068_v53  ;;  %v2815_v55 = vshrl.u32 %v2797_v50, %v2813_v62 }
 0x308   : > { %v9086_v56 = vpop.eup %6775  ;;  %v3082_v26 = vshll.u32 %v10907_v34, %v3067_v16  ;;  %v3083_v23 = vshrl.u32 %v10906_v49, %v3068_v53  ;;  %v3375_v41 = vadd.s32 1, %v5947_v44  ;;  %v2820_v46 = vor.u32 4788187, %v2819_v38 }
 0x309   : > { %11045 = vst [vmem:[#allocation87_spill] sm:$0xff] %v9086_v56  ;;  %v9090_v51 = vpop.eup %6777  ;;  %v5944_v1 = vmin.u32 %v3327_v59, %v9074_v3  ;;  %v3081_v2 = vor.u32 %v3080_v45, %v3079_v14  ;;  %vm3085_vm14 = vcmp.lt.s32.totalorder %v3066_v19, 1  ;;  %v11048_v24 = vand.u32 2147483647, %v8735_v4 }
 0x30a   : > { %11046 = vst [vmem:[#allocation88_spill] sm:$0xff] %v9090_v51  ;;  %v9093_v54 = vpop.eup %6779  ;;  %v3069_v16 = vshrl.u32 %v10902_v28, %v3068_v53  ;;  %v3084_v50 = vor.u32 %v3083_v23, %v3082_v26  ;;  %vm3088_vm7 = vcmp.lt.s32.totalorder %v3066_v19, 4  ;;  %v3093_v62 = vsel %vm3085_vm14, %v3072_v9, %v3075_v15 }
 0x30b   : > { %11047 = vst [vmem:[#allocation89_spill] sm:$0xff] %v9093_v54  ;;  %vm9097_vm5 = vcmp.le.f32.partialorder %v11048_v24, 0.7853982  ;;  %v3329_v44 = vclz %v5944_v1  ;;  %vm3087_vm9 = vcmp.lt.s32.totalorder %v3066_v19, 3  ;;  %v3090_v25 = vsel %vm3088_vm7, %v3078_v20, 2102212464 }
 0x30c   : > { %v3094_v38 = vsel %vm3088_vm7, %v3081_v2, 920167782  ;;  %v2816_v58 = vor.u32 %v2815_v55, %v2814_v63  ;;  %vm3086_vm8 = vcmp.lt.s32.totalorder %v3066_v19, 2  ;;  %v3097_v14 = vsel %vm3085_vm14, %v3075_v15, %v3078_v20 }
 0x30d   : > { %v3095_v59 = vsel %vm3087_vm9, %v3078_v20, %v3094_v38  ;;  %v5945_v45 = vadd.s32 4294967294, %v3329_v44  ;;  %v3089_v24 = vsel %vm3085_vm14, %v3069_v16, %v3072_v9  ;;  %v3098_v18 = vsel %vm3088_vm7, %v3084_v50, 1326507024 }
 0x30e   : > { %v3096_v17 = vsel %vm3086_vm8, %v3093_v62, %v3095_v59  ;;  %v3091_v53 = vsel %vm3087_vm9, %v3075_v15, %v3090_v25  ;;  %v3099_v26 = vsel %vm3087_vm9, %v3081_v2, %v3098_v18  ;;  %v2821_v1 = vand.u32 2147483647, %v2820_v46 }
 0x30f   : > { %v9107_v23 = vmul.u32.u64.low %v9062_v61, %v3096_v17  ;;  %v9108_v42 = vmul.u32.u64.high %v9062_v61, %v3096_v17, %v9107_v23  ;;  %vm5946_vm10 = vcmp.lt.s32.totalorder %v5945_v45, 0  ;;  %v3100_v63 = vsel %vm3086_vm8, %v3097_v14, %v3099_v26 }
 0x310   : > { %vm3376_vm15 = vcmp.gt.s32.totalorder %v3375_v41, 0  ;;  %v9112_v55 = vsel %vm5946_vm10, 0, %v5945_v45  ;;  %v9115_v20 = vmul.u32.u64.low %v9062_v61, %v3100_v63  ;;  %v9116_v9 = vmul.u32.u64.high %v9062_v61, %v3100_v63, %v9115_v20 }
 0x311   : > { %v3377_v16 = vsel %vm3376_vm15, %v3375_v41, 0  ;;  %v2823_v50 = vcvt.s32.f32 %v2816_v58  ;;  %v3337_v18 = vsub.s32 4294967266, %v9112_v55  ;;  %v3092_v15 = vsel %vm3086_vm8, %v3089_v24, %v3091_v53  ;;  %v9144_v58 = vpop.f32.mrb[29].mxu0 }
 0x312   : > { %v3373_v17 = vor.u32 8388608, %v9081_v52  ;;  %6781 = vsinq.f32 %v9040_v21  ;;  %v3111_v46 = vadd.s32 1, %v9108_v42  ;;  %v3379_v2 = vand.u32 31, %v3377_v16 }
 0x313   : > { %v9125_v62 = vadd.f32 %v8927_v29, %v8566_v8  ;;  %v11052_v44 = vxor.u32 2147483648, %v9044_v6  ;;  %v9134_v19 = vmul.f32 %v2823_v50, %v2821_v1  ;;  %v3317_v52 = vadd.s32 %v9003_v7, %v9008_v48 }
 0x314   : > { %v3338_v25 = vadd.s32 127, %v3337_v18  ;;  %v3108_v8 = vmul.u32 %v9062_v61, %v3092_v15  ;;  %vm3110_vm2 = vc.u32 %v9116_v9, %v9107_v23  ;;  %v3380_v38 = vsub.s32 32, %v3379_v2 }
 0x315   : > { %11051 = vst [vmem:[#allocation90_spill] sm:$0xff] %v9125_v62  ;;  %v9132_v41 = vsel %vm2951_vm12, %v11052_v44, %v9044_v6  ;;  %v3333_v6 = vsub.s32 32, %v9112_v55  ;;  %v3347_v59 = vsub.s32 4, %v9059_v57  ;;  %v3112_v14 = vsel %vm3110_vm2, %v3111_v46, %v9108_v42 }
 0x316   : > { %v9149_v45 = vshll.u32 %v3373_v17, 8  ;;  %v3113_v24 = vadd.s32 %v3112_v14, %v3108_v8  ;;  %v3382_v48 = vshll.u32 %v10902_v28, %v3379_v2  ;;  %v3383_v7 = vshrl.u32 %v10904_v37, %v3380_v38 }
 0x317   : > { %v3386_v61 = vshrl.u32 %v10905_v22, %v3380_v38  ;;  %v3378_v53 = vshrl.u32 %v3377_v16, 5  ;;  %v3385_v26 = vshll.u32 %v10904_v37, %v3379_v2  ;;  %v3388_v1 = vshll.u32 %v10905_v22, %v3379_v2 }
 0x318   : > { %v3389_v63 = vshrl.u32 %v10911_v12, %v3380_v38  ;;  %v2825_v20 = vxor.u32 2147483648, %v9134_v19  ;;  %v3339_v50 = vshll.u32 %v3338_v25, 23  ;;  %v3114_v42 = vadd.s32 536870912, %v3113_v24 }
 0x319   : > { %v3384_v18 = vor.u32 %v3383_v7, %v3382_v48  ;;  %v3387_v15 = vor.u32 %v3386_v61, %v3385_v26  ;;  %v3391_v46 = vshll.u32 %v10911_v12, %v3379_v2  ;;  %v3392_v44 = vshrl.u32 %v10907_v34, %v3380_v38 }
 0x31a   : > { %v3390_v17 = vor.u32 %v3389_v63, %v3388_v1  ;;  %vm3263_vm12 = vcmp.lt.s32.totalorder %v8854_v60, 0  ;;  %v3334_v16 = vshll.u32 %v9074_v3, %v9112_v55  ;;  %v9163_v8 = vshrl.u32 %v3114_v42, 30 }
 0x31b   : > { %v3394_v14 = vshll.u32 %v10907_v34, %v3379_v2  ;;  %v3395_v21 = vshrl.u32 %v10906_v49, %v3380_v38  ;;  %v3335_v25 = vshrl.u32 %v3317_v52, %v3333_v6  ;;  %v3393_v30 = vor.u32 %v3392_v44, %v3391_v46 }
 0x31c   : > { %vm3397_vm6 = vcmp.lt.s32.totalorder %v3378_v53, 1  ;;  %vm3398_vm14 = vcmp.lt.s32.totalorder %v3378_v53, 2  ;;  %v9167_v48 = vpop.eup %6781  ;;  %v3340_v7 = vor.u32 4788187, %v3339_v50  ;;  %v3116_v61 = vshll.u32 %v9163_v8, 30 }
 0x31d   : > { %v3396_v26 = vor.u32 %v3395_v21, %v3394_v14  ;;  %vm3400_vm7 = vcmp.lt.s32.totalorder %v3378_v53, 4  ;;  %v11053_v1 = vand.u32 2147483647, %v8854_v60  ;;  %vm3399_vm8 = vcmp.lt.s32.totalorder %v3378_v53, 3 }
 0x31e   : > { %v3402_v55 = vsel %vm3400_vm7, %v3390_v17, 2102212464  ;;  %v3405_v2 = vsel %vm3397_vm6, %v3384_v18, %v3387_v15  ;;  %v3406_v52 = vsel %vm3400_vm7, %v3393_v30, 920167782  ;;  %v9177_v6 = vsub.s32 %v3113_v24, %v3116_v61 }
 0x31f   : > { %vm9172_vm9 = vcmp.le.f32.partialorder %v11053_v1, 0.7853982  ;;  %v3381_v63 = vshrl.u32 %v10902_v28, %v3380_v38  ;;  %v3407_v50 = vsel %vm3399_vm8, %v3390_v17, %v3406_v52  ;;  %v3409_v42 = vsel %vm3397_vm6, %v3387_v15, %v3390_v17 }
 0x320   : > { %v3336_v21 = vor.u32 %v3335_v25, %v3334_v16  ;;  %v3408_v46 = vsel %vm3398_vm14, %v3405_v2, %v3407_v50  ;;  %v3410_v44 = vsel %vm3400_vm7, %v3396_v26, 1326507024  ;;  %v3160_v14 = vand.u32 2139095040, %v9125_v62 }
 0x321   : > { %v3119_v1 = vsub.s32 0, %v9177_v6  ;;  %v3401_v56 = vsel %vm3397_vm6, %v3381_v63, %v3384_v18  ;;  %v3403_v51 = vsel %vm3399_vm8, %v3387_v15, %v3402_v55  ;;  %v3411_v13 = vsel %vm3399_vm8, %v3393_v30, %v3410_v44  ;;  %v9237_v44 = vpop.f32.mrb[30].mxu0 }
 0x322   : > { %v3341_v54 = vand.u32 2147483647, %v3340_v7  ;;  %v3412_v24 = vsel %vm3398_vm14, %v3409_v42, %v3411_v13  ;;  %v9187_v38 = vmul.u32.u64.low %v9149_v45, %v3408_v46  ;;  %v9188_v61 = vmul.u32.u64.high %v9149_v45, %v3408_v46, %v9187_v38 }
 0x323   : > { %vm3055_vm10 = vcmp.lt.s32.totalorder %v8931_v36, 0  ;;  %v5936_v17 = vmin.u32 %v3119_v1, %v9177_v6  ;;  %v9193_v16 = vmul.u32.u64.low %v9149_v45, %v3412_v24  ;;  %v9194_v25 = vmul.u32.u64.high %v9149_v45, %v3412_v24, %v9193_v16 }
 0x324   : > { %v10851_v26 = vand.u32 2147483647, %v9125_v62  ;;  %v3343_v18 = vcvt.s32.f32 %v3336_v21  ;;  %v3348_v30 = vsel %vm3263_vm12, %v3347_v59, %v9059_v57  ;;  %v3404_v13 = vsel %vm3398_vm14, %v3401_v56, %v3403_v51 }
 0x325   : > { %v3161_v15 = vshrl.u32 %v3160_v14, 23  ;;  %v3037_v7 = vsel %vm8990_vm13, %v8497_v5, %v9132_v41  ;;  %v11056_v55 = vsel %vm9097_vm5, 0, %v9057_v33  ;;  %v3121_v52 = vclz %v5936_v17 }
 0x326   : > { %v9209_v2 = vadd.s32 3, %v11056_v55  ;;  %v9213_v63 = vadd.f32 %v8927_v29, %v8681_v40  ;;  %v2826_v57 = vsel %vm2743_vm11, %v2825_v20, %v9134_v19  ;;  %v3344_v56 = vmul.f32 %v3343_v18, %v3341_v54 }
 0x327   : > { %v11058_v51 = vand.u32 2147483647, %v8931_v36  ;;  %v3423_v33 = vadd.s32 1, %v9188_v61  ;;  %v5939_v41 = vadd.s32 4294967169, %v3161_v15  ;;  %v3350_v59 = vsel %vm9172_vm9, 0, %v3348_v30 }
 0x328   : > { %11057 = vst [vmem:[#allocation91_spill] sm:$0xff] %v9213_v63  ;;  %v5937_v53 = vadd.s32 4294967294, %v3121_v52  ;;  %v3420_v40 = vmul.u32 %v9149_v45, %v3404_v13  ;;  %vm3422_vm13 = vc.u32 %v9194_v25, %v9187_v38  ;;  %v3139_v19 = vsub.s32 4, %v9163_v8 }
 0x329   : > { %vm9220_vm15 = vcmp.le.f32.partialorder %v11058_v51, 0.7853982  ;;  %v3424_v54 = vsel %vm3422_vm13, %v3423_v33, %v9188_v61  ;;  %v3164_v20 = vand.u32 8388607, %v10851_v26  ;;  %v3167_v50 = vadd.s32 1, %v5939_v41 }
 0x32a   : > { %v2829_v42 = vsel %vm9097_vm5, %v8735_v4, %v2826_v57  ;;  %vm5938_vm11 = vcmp.lt.s32.totalorder %v5937_v53, 0  ;;  %v3425_v21 = vadd.s32 %v3424_v54, %v3420_v40  ;;  %v3680_v46 = vand.u32 2139095040, %v9213_v63 }
 0x32b   : > { %6783 = vcosq.f32 %v3037_v7  ;;  %v3345_v45 = vxor.u32 2147483648, %v3344_v56  ;;  %v3124_v14 = vsel %vm5938_vm11, 0, %v5937_v53  ;;  %vm3168_vm2 = vcmp.gt.s32.totalorder %v3167_v50, 0 }
 0x32c   : > { %6785 = vsinq.f32 %v3037_v7  ;;  %v9239_v1 = vadd.s32 3, %v3350_v59  ;;  %v3129_v24 = vsub.s32 4294967266, %v3124_v14  ;;  %v3426_v61 = vadd.s32 536870912, %v3425_v21 }
 0x32d   : > { %6787 = vcosq.f32 %v2829_v42  ;;  %v9244_v39 = vsel %vm3055_vm10, %v3139_v19, %v9163_v8  ;;  %v3165_v17 = vor.u32 8388608, %v3164_v20  ;;  %v3169_v16 = vsel %vm3168_vm2, %v3167_v50, 0 }
 0x32e   : > { %11061 = vst [vmem:[#allocation92_spill] sm:$0xff] %v9239_v1  ;;  %v3125_v18 = vsub.s32 32, %v3124_v14  ;;  %v3130_v30 = vadd.s32 127, %v3129_v24  ;;  %v9246_v13 = vshrl.u32 %v3426_v61, 30  ;;  %v3681_v15 = vshrl.u32 %v3680_v46, 23 }
 0x32f   : > { %6789 = vsinq.f32 %v2829_v42  ;;  %v9250_v7 = vsel %vm3263_vm12, %v3345_v45, %v3344_v56  ;;  %v3109_v55 = vadd.s32 %v9107_v23, %v9116_v9  ;;  %v3171_v52 = vand.u32 31, %v3169_v16 }
 0x330   : > { %v3131_v57 = vshll.u32 %v3130_v30, 23  ;;  %v3428_v51 = vshll.u32 %v9246_v13, 30  ;;  %v9260_v33 = vadd.f32 %v8927_v29, %v8756_v47  ;;  %v3421_v41 = vadd.s32 %v9187_v38, %v9194_v25 }
 0x331   : > { %v3172_v59 = vsub.s32 32, %v3171_v52  ;;  %v9263_v56 = vshll.u32 %v3165_v17, 8  ;;  %v10852_v53 = vand.u32 2147483647, %v9213_v63  ;;  %v3127_v23 = vshrl.u32 %v3109_v55, %v3125_v18 }
 0x332   : > { %11062 = vst [vmem:[#allocation93_spill] sm:$0xff] %v9260_v33  ;;  %v9266_v9 = vsub.s32 %v3425_v21, %v3428_v51  ;;  %v3170_v40 = vshrl.u32 %v3169_v16, 5  ;;  %v5959_v19 = vadd.s32 4294967169, %v3681_v15  ;;  %v3174_v54 = vshll.u32 %v10902_v28, %v3171_v52 }
 0x333   : > { %v3175_v20 = vshrl.u32 %v10904_v37, %v3172_v59  ;;  %v3177_v50 = vshll.u32 %v10904_v37, %v3171_v52  ;;  %v3178_v47 = vshrl.u32 %v10905_v22, %v3172_v59  ;;  %v3132_v42 = vor.u32 4788187, %v3131_v57 }
 0x334   : > { %v3431_v38 = vsub.s32 0, %v9266_v9  ;;  %v3180_v25 = vshll.u32 %v10905_v22, %v3171_v52  ;;  %v3181_v46 = vshrl.u32 %v10911_v12, %v3172_v59  ;;  %v3183_v61 = vshll.u32 %v10911_v12, %v3171_v52 }
 0x335   : > { %v9275_v45 = vpop.eup %6783  ;;  %v3176_v21 = vor.u32 %v3175_v20, %v3174_v54  ;;  %v3179_v24 = vor.u32 %v3178_v47, %v3177_v50  ;;  %v3184_v17 = vshrl.u32 %v10907_v34, %v3172_v59  ;;  %v3126_v18 = vshll.u32 %v9177_v6, %v3124_v14 }
 0x336   : > { %11063 = vst [vmem:[#allocation94_spill] sm:$0xff] %v9275_v45  ;;  %v9279_v16 = vpop.eup %6785  ;;  %v5948_v30 = vmin.u32 %v3431_v38, %v9266_v9  ;;  %v3182_v15 = vor.u32 %v3181_v46, %v3180_v25  ;;  %v9285_v55 = vand.u32 8388607, %v10852_v53  ;;  %v3186_v54 = vshll.u32 %v10907_v34, %v3171_v52 }
 0x337   : > { %11064 = vst [vmem:[#allocation95_spill] sm:$0xff] %v9279_v16  ;;  %v9287_v57 = vpop.eup %6787  ;;  %v3185_v51 = vor.u32 %v3184_v17, %v3183_v61  ;;  %v3187_v20 = vshrl.u32 %v10906_v49, %v3172_v59  ;;  %v3687_v50 = vadd.s32 1, %v5959_v19  ;;  %v3128_v47 = vor.u32 %v3127_v23, %v3126_v18 }
 0x338   : > { %v3433_v26 = vclz %v5948_v30  ;;  %vm3189_vm5 = vcmp.lt.s32.totalorder %v3170_v40, 1  ;;  %v3472_v6 = vand.u32 2139095040, %v9260_v33  ;;  %v3133_v38 = vand.u32 2147483647, %v3132_v42 }
 0x339   : > { %v9292_v14 = vpop.eup %6789  ;;  %v3188_v25 = vor.u32 %v3187_v20, %v3186_v54  ;;  %vm3192_vm12 = vcmp.lt.s32.totalorder %v3170_v40, 4  ;;  %v3197_v46 = vsel %vm3189_vm5, %v3176_v21, %v3179_v24  ;;  %vm3191_vm6 = vcmp.lt.s32.totalorder %v3170_v40, 3 }
 0x33a   : > { %v5949_v53 = vadd.s32 4294967294, %v3433_v26  ;;  %v3194_v61 = vsel %vm3192_vm12, %v3182_v15, 2102212464  ;;  %v3198_v17 = vsel %vm3192_vm12, %v3185_v51, 920167782  ;;  %v3173_v52 = vshrl.u32 %v10902_v28, %v3172_v59 }
 0x33b   : > { %vm3190_vm14 = vcmp.lt.s32.totalorder %v3170_v40, 2  ;;  %v3199_v19 = vsel %vm3191_vm6, %v3182_v15, %v3198_v17  ;;  %v3201_v23 = vsel %vm3189_vm5, %v3179_v24, %v3182_v15  ;;  %v3135_v18 = vcvt.s32.f32 %v3128_v47 }
 0x33c   : > { %vm5950_vm7 = vcmp.lt.s32.totalorder %v5949_v53, 0  ;;  %v3200_v30 = vsel %vm3190_vm14, %v3197_v46, %v3199_v19  ;;  %v3202_v8 = vsel %vm3192_vm12, %v3188_v25, 1326507024  ;;  %v3193_v54 = vsel %vm3189_vm5, %v3173_v52, %v3176_v21 }
 0x33d   : > { %v3436_v42 = vsel %vm5950_vm7, 0, %v5949_v53  ;;  %v3195_v20 = vsel %vm3191_vm6, %v3179_v24, %v3194_v61  ;;  %v3203_v1 = vsel %vm3191_vm6, %v3185_v51, %v3202_v8  ;;  %v3136_v26 = vmul.f32 %v3135_v18, %v3133_v38  ;;  %v9330_v38 = vpop.f32.mrb[31].mxu0 }
 0x33e   : > { %v3437_v5 = vsub.s32 32, %v3436_v42  ;;  %v3441_v45 = vsub.s32 4294967266, %v3436_v42  ;;  %v3204_v16 = vsel %vm3190_vm14, %v3201_v23, %v3203_v1  ;;  %v3196_v21 = vsel %vm3190_vm14, %v3193_v54, %v3195_v20 }
 0x33f   : > { %v9301_v59 = vmul.u32.u64.low %v9263_v56, %v3204_v16  ;;  %v9302_v17 = vmul.u32.u64.high %v9263_v56, %v3204_v16, %v9301_v59  ;;  %v9305_v15 = vmul.u32.u64.low %v9263_v56, %v3200_v30  ;;  %v9306_v47 = vmul.u32.u64.high %v9263_v56, %v3200_v30, %v9305_v15 }
 0x340   : > { %v3439_v25 = vshrl.u32 %v3421_v41, %v3437_v5  ;;  %v3442_v53 = vadd.s32 127, %v3441_v45  ;;  %vm3688_vm8 = vcmp.gt.s32.totalorder %v3687_v50, 0  ;;  %v9314_v8 = vsel %vm9172_vm9, %v8854_v60, %v9250_v7 }
 0x341   : > { %v11065_v1 = vsel %vm9220_vm15, 0, %v9244_v39  ;;  %v3685_v16 = vor.u32 8388608, %v9285_v55  ;;  %v3689_v51 = vsel %vm3688_vm8, %v3687_v50, 0  ;;  %vm3367_vm13 = vcmp.lt.s32.totalorder %v9012_v0, 0 }
 0x342   : > { %v9320_v24 = vadd.s32 3, %v11065_v1  ;;  %v3438_v5 = vshll.u32 %v9266_v9, %v3436_v42  ;;  %v3443_v41 = vshll.u32 %v3442_v53, 23  ;;  %v3451_v40 = vsub.s32 4, %v9246_v13 }
 0x343   : > { %v3691_v45 = vand.u32 31, %v3689_v51  ;;  %v3137_v3 = vxor.u32 2147483648, %v3136_v26  ;;  %v3212_v7 = vmul.u32 %v9263_v56, %v3196_v21  ;;  %vm3214_vm9 = vc.u32 %v9302_v17, %v9305_v15 }
 0x344   : > { %v3215_v39 = vadd.s32 1, %v9306_v47  ;;  %v3440_v55 = vor.u32 %v3439_v25, %v3438_v5  ;;  %v3444_v50 = vor.u32 4788187, %v3443_v41  ;;  %v3473_v61 = vshrl.u32 %v3472_v6, 23 }
 0x345   : > { %v3692_v46 = vsub.s32 32, %v3691_v45  ;;  %v3690_v52 = vshrl.u32 %v3689_v51, 5  ;;  %v3694_v19 = vshll.u32 %v10902_v28, %v3691_v45  ;;  %v3697_v23 = vshll.u32 %v10904_v37, %v3691_v45 }
 0x346   : > { %v3216_v9 = vsel %vm3214_vm9, %v3215_v39, %v9306_v47  ;;  %v3445_v18 = vand.u32 2147483647, %v3444_v50  ;;  %v3700_v42 = vshll.u32 %v10905_v22, %v3691_v45  ;;  %v3703_v59 = vshll.u32 %v10911_v12, %v3691_v45 }
 0x347   : > { %v3217_v56 = vadd.s32 %v3216_v9, %v3212_v7  ;;  %v3695_v30 = vshrl.u32 %v10904_v37, %v3692_v46  ;;  %v3698_v54 = vshrl.u32 %v10905_v22, %v3692_v46  ;;  %v3701_v20 = vshrl.u32 %v10911_v12, %v3692_v46 }
 0x348   : > { %v3704_v6 = vshrl.u32 %v10907_v34, %v3692_v46  ;;  %v3447_v47 = vcvt.s32.f32 %v3440_v55  ;;  %v3706_v53 = vshll.u32 %v10907_v34, %v3691_v45  ;;  %v3707_v21 = vshrl.u32 %v10906_v49, %v3692_v46 }
 0x349   : > { %v3218_v25 = vadd.s32 536870912, %v3217_v56  ;;  %v3696_v1 = vor.u32 %v3695_v30, %v3694_v19  ;;  %v3699_v51 = vor.u32 %v3698_v54, %v3697_v23  ;;  %v3702_v5 = vor.u32 %v3701_v20, %v3700_v42 }
 0x34a   : > { %v3705_v41 = vor.u32 %v3704_v6, %v3703_v59  ;;  %6791 = vcosq.f32 %v9314_v8  ;;  %v3448_v7 = vmul.f32 %v3447_v47, %v3445_v18  ;;  %v10856_v50 = vand.u32 2147483647, %v9260_v33 }
 0x34b   : > { %v9344_v39 = vshrl.u32 %v3218_v25, 30  ;;  %v3138_v9 = vsel %vm3055_vm10, %v3137_v3, %v3136_v26  ;;  %v11066_v55 = vand.u32 2147483647, %v9012_v0  ;;  %v3452_v19 = vsel %vm3367_vm13, %v3451_v40, %v9246_v13 }
 0x34c   : > { %v3708_v23 = vor.u32 %v3707_v21, %v3706_v53  ;;  %v3725_v30 = vshll.u32 %v3685_v16, 8  ;;  %vm3709_vm2 = vcmp.lt.s32.totalorder %v3690_v52, 1  ;;  %vm3712_vm5 = vcmp.lt.s32.totalorder %v3690_v52, 4 }
 0x34d   : > { %vm9351_vm11 = vcmp.le.f32.partialorder %v11066_v55, 0.7853982  ;;  %v3220_v18 = vshll.u32 %v9344_v39, 30  ;;  %v5951_v42 = vadd.s32 4294967169, %v3473_v61  ;;  %v3693_v54 = vshrl.u32 %v10902_v28, %v3692_v46 }
 0x34e   : > { %v3714_v26 = vsel %vm3712_vm5, %v3702_v5, 2102212464  ;;  %v3717_v3 = vsel %vm3709_vm2, %v3696_v1, %v3699_v51  ;;  %v3718_v20 = vsel %vm3712_vm5, %v3705_v41, 920167782  ;;  %v3449_v59 = vxor.u32 2147483648, %v3448_v7 }
 0x34f   : > { %v9360_v6 = vsub.s32 %v3217_v56, %v3220_v18  ;;  %vm3711_vm10 = vcmp.lt.s32.totalorder %v3690_v52, 3  ;;  %v3721_v47 = vsel %vm3709_vm2, %v3699_v51, %v3702_v5  ;;  %vm3710_vm12 = vcmp.lt.s32.totalorder %v3690_v52, 2 }
 0x350   : > { %v3713_v25 = vsel %vm3709_vm2, %v3693_v54, %v3696_v1  ;;  %v3719_v13 = vsel %vm3711_vm10, %v3702_v5, %v3718_v20  ;;  %v3722_v40 = vsel %vm3712_vm5, %v3708_v23, 1326507024  ;;  %v3715_v53 = vsel %vm3711_vm10, %v3699_v51, %v3714_v26 }
 0x351   : > { %v3223_v16 = vsub.s32 0, %v9360_v6  ;;  %v3720_v21 = vsel %vm3710_vm12, %v3717_v3, %v3719_v13  ;;  %v3723_v55 = vsel %vm3711_vm10, %v3705_v41, %v3722_v40  ;;  %v3141_v46 = vsel %vm9220_vm15, %v8931_v36, %v3138_v9 }
 0x352   : > { %vm3159_vm6 = vcmp.lt.s32.totalorder %v9125_v62, 0  ;;  %v3724_v61 = vsel %vm3710_vm12, %v3721_v47, %v3723_v55  ;;  %v9367_v56 = vmul.u32.u64.low %v3725_v30, %v3720_v21  ;;  %v9368_v18 = vmul.u32.u64.high %v3725_v30, %v3720_v21, %v9367_v56 }
 0x353   : > { %6793 = vsinq.f32 %v9314_v8  ;;  %v5940_v52 = vmin.u32 %v3223_v16, %v9360_v6  ;;  %v9373_v1 = vmul.u32.u64.low %v3725_v30, %v3724_v61  ;;  %v9374_v5 = vmul.u32.u64.high %v3725_v30, %v3724_v61, %v9373_v1 }
 0x354   : > { %v3716_v51 = vsel %vm3710_vm12, %v3713_v25, %v3715_v53  ;;  %v3479_v41 = vadd.s32 1, %v5951_v42  ;;  %v9378_v31 = vadd.f32 %v8927_v29, %v8876_v32  ;;  %v9382_v9 = vadd.f32 %v8927_v29, %v8933_v43  ;;  %v9384_v23 = vpop.eup %6791 }
 0x355   : > { %11070 = vst [vmem:[#allocation97_spill] sm:$0xff] %v9384_v23  ;;  %6795 = vcosq.f32 %v3141_v46  ;;  %v3450_v8 = vsel %vm3367_vm13, %v3449_v59, %v3448_v7  ;;  %v3454_v54 = vsel %vm9351_vm11, 0, %v3452_v19  ;;  %v3225_v26 = vclz %v5940_v52 }
 0x356   : > { %11069 = vst [vmem:[#allocation96_spill] sm:$0xff] %v9378_v31  ;;  %v3243_v42 = vsub.s32 4, %v9344_v39  ;;  %v3735_v3 = vadd.s32 1, %v9368_v18  ;;  %v3476_v32 = vand.u32 8388607, %v10856_v50  ;;  %vm3480_vm15 = vcmp.gt.s32.totalorder %v3479_v41, 0 }
 0x357   : > { %v5941_v29 = vadd.s32 4294967294, %v3225_v26  ;;  %v3732_v43 = vmul.u32 %v3725_v30, %v3716_v51  ;;  %vm3734_vm14 = vc.u32 %v9374_v5, %v9367_v56  ;;  %v3481_v20 = vsel %vm3480_vm15, %v3479_v41, 0 }
 0x358   : > { %v9399_v7 = vsel %vm9351_vm11, %v9012_v0, %v3450_v8  ;;  %v3736_v19 = vsel %vm3734_vm14, %v3735_v3, %v9368_v18  ;;  %v3483_v59 = vand.u32 31, %v3481_v20  ;;  %v3784_v47 = vand.u32 2139095040, %v9378_v31 }
 0x359   : > { %6797 = vsinq.f32 %v3141_v46  ;;  %v9403_v25 = vadd.s32 3, %v3454_v54  ;;  %vm5942_vm7 = vcmp.lt.s32.totalorder %v5941_v29, 0  ;;  %v3737_v13 = vadd.s32 %v3736_v19, %v3732_v43 }
 0x35a   : > { %v3213_v30 = vadd.s32 %v9305_v15, %v9302_v17  ;;  %v3228_v40 = vsel %vm5942_vm7, 0, %v5941_v29  ;;  %v3484_v16 = vsub.s32 32, %v3483_v59  ;;  %6799 = vcosq.f32 %v9399_v7 }
 0x35b   : > { %11071 = vst [vmem:[#allocation98_spill] sm:$0xff] %v9403_v25  ;;  %v3233_v45 = vsub.s32 4294967266, %v3228_v40  ;;  %v9412_v21 = vsel %vm3159_vm6, %v3243_v42, %v9344_v39  ;;  %v3738_v55 = vadd.s32 536870912, %v3737_v13  ;;  %v3477_v46 = vor.u32 8388608, %v3476_v32 }
 0x35c   : > { %v3487_v61 = vshrl.u32 %v10904_v37, %v3484_v16  ;;  %v3490_v18 = vshrl.u32 %v10905_v22, %v3484_v16  ;;  %v3785_v52 = vshrl.u32 %v3784_v47, 23  ;;  %v3486_v51 = vshll.u32 %v10902_v28, %v3483_v59 }
 0x35d   : > { %v9416_v17 = vpop.eup %6793  ;;  %v3234_v15 = vadd.s32 127, %v3233_v45  ;;  %v9418_v1 = vshrl.u32 %v3738_v55, 30  ;;  %v3493_v41 = vshrl.u32 %v10911_v12, %v3484_v16  ;;  %v3229_v8 = vsub.s32 32, %v3228_v40 }
 0x35e   : > { %11072 = vst [vmem:[#allocation99_spill] sm:$0xff] %v9416_v17  ;;  %v3482_v54 = vshrl.u32 %v3481_v20, 5  ;;  %v3489_v39 = vshll.u32 %v10904_v37, %v3483_v59  ;;  %v3496_v26 = vshrl.u32 %v10907_v34, %v3484_v16  ;;  %v3488_v32 = vor.u32 %v3487_v61, %v3486_v51 }
 0x35f   : > { %v9424_v42 = vpop.eup %6795  ;;  %v3740_v3 = vshll.u32 %v9418_v1, 30  ;;  %v3492_v29 = vshll.u32 %v10905_v22, %v3483_v59  ;;  %v3495_v43 = vshll.u32 %v10911_v12, %v3483_v59  ;;  %v3235_v19 = vshll.u32 %v3234_v15, 23 }
 0x360   : > { %v3491_v47 = vor.u32 %v3490_v18, %v3489_v39  ;;  %v3498_v45 = vshll.u32 %v10907_v34, %v3483_v59  ;;  %v3499_v55 = vshrl.u32 %v10906_v49, %v3484_v16  ;;  %v11073_v0 = vand.u32 2147483647, %v9378_v31 }
 0x361   : > { %v9431_v20 = vsub.s32 %v3737_v13, %v3740_v3  ;;  %v3494_v50 = vor.u32 %v3493_v41, %v3492_v29  ;;  %v3497_v53 = vor.u32 %v3496_v26, %v3495_v43  ;;  %v3230_v25 = vshll.u32 %v9360_v6, %v3228_v40 }
 0x362   : > { %v3788_v60 = vand.u32 8388607, %v11073_v0  ;;  %v3500_v61 = vor.u32 %v3499_v55, %v3498_v45  ;;  %v9436_v51 = vshll.u32 %v3477_v46, 8  ;;  %v5963_v23 = vadd.s32 4294967169, %v3785_v52  ;;  %v6700_v0 = vld [vmem:[%s10734_s4] sm:$0xff]  }
 0x363   : > { %v9438_v17 = vpop.eup %6797  ;;  %v3231_v18 = vshrl.u32 %v3213_v30, %v3229_v8  ;;  %v3743_v59 = vsub.s32 0, %v9431_v20  ;;  %v3485_v15 = vshrl.u32 %v10902_v28, %v3484_v16  ;;  %vm3501_vm8 = vcmp.lt.s32.totalorder %v3482_v54, 1  ;;  %6243 = vmatprep.subr.bf16.mxu1 %v6700_v0 }
 0x364   : > { %v3236_v13 = vor.u32 4788187, %v3235_v19  ;;  %vm3502_vm13 = vcmp.lt.s32.totalorder %v3482_v54, 2  ;;  %vm3504_vm9 = vcmp.lt.s32.totalorder %v3482_v54, 4  ;;  %v3509_v41 = vsel %vm3501_vm8, %v3488_v32, %v3491_v47  ;;  %v9446_v6 = vpop.eup %6799  ;;  %6244 = vmatpush3.bf16.msra.mxu1 %v6700_v0 }
 0x365   : > { %11074 = vst [vmem:[#allocation100_spill] sm:$0xff] %v9446_v6  ;;  %v5960_v40 = vmin.u32 %v3743_v59, %v9431_v20  ;;  %vm3503_vm11 = vcmp.lt.s32.totalorder %v3482_v54, 3  ;;  %v3506_v30 = vsel %vm3504_vm9, %v3494_v50, 2102212464  ;;  %v3510_v46 = vsel %vm3504_vm9, %v3497_v53, 920167782 }
 0x366   : > { %v3511_v52 = vsel %vm3503_vm11, %v3494_v50, %v3510_v46  ;;  %v3513_v16 = vsel %vm3501_vm8, %v3491_v47, %v3494_v50  ;;  %v3514_v8 = vsel %vm3504_vm9, %v3500_v61, 1326507024  ;;  %v3791_v39 = vadd.s32 1, %v5963_v23  ;;  %v6701_v50 = vld [vmem:[%s10734_s4 + $0x8] sm:$0xff]  }
 0x367   : > { %v3232_v26 = vor.u32 %v3231_v18, %v3230_v25  ;;  %v3745_v3 = vclz %v5960_v40  ;;  %v3505_v29 = vsel %vm3501_vm8, %v3485_v15, %v3488_v32  ;;  %v3512_v43 = vsel %vm3502_vm13, %v3509_v41, %v3511_v52  ;;  %6245 = vmatprep.subr.bf16.mxu1 %v6701_v50 }
 0x368   : > { %v3507_v19 = vsel %vm3503_vm11, %v3491_v47, %v3506_v30  ;;  %v3515_v45 = vsel %vm3503_vm11, %v3497_v53, %v3514_v8  ;;  %v9453_v55 = vmul.u32.u64.low %v9436_v51, %v3512_v43  ;;  %v9454_v59 = vmul.u32.u64.high %v9436_v51, %v3512_v43, %v9453_v55  ;;  %6246 = vmatpush3.bf16.msra.mxu1 %v6701_v50  ;;  %v6702_v30 = vld [vmem:[%s10734_s4 + $0x10] sm:$0xff]  }
 0x369   : > { %v5961_v23 = vadd.s32 4294967294, %v3745_v3  ;;  %v3516_v25 = vsel %vm3502_vm13, %v3513_v16, %v3515_v45  ;;  %v3789_v61 = vor.u32 8388608, %v3788_v60  ;;  %vm3792_vm2 = vcmp.gt.s32.totalorder %v3791_v39, 0  ;;  %6247 = vmatprep.subr.bf16.mxu1 %v6702_v30 }
 0x36a   : > { %v3237_v32 = vand.u32 2147483647, %v3236_v13  ;;  %v9462_v18 = vmul.u32.u64.low %v9436_v51, %v3516_v25  ;;  %v9463_v15 = vmul.u32.u64.high %v9436_v51, %v3516_v25, %v9462_v18  ;;  %v3793_v53 = vsel %vm3792_vm2, %v3791_v39, 0 }
 0x36b   : > { %6801 = vsinq.f32 %v9399_v7  ;;  %vm5962_vm5 = vcmp.lt.s32.totalorder %v5961_v23, 0  ;;  %v3508_v47 = vsel %vm3502_vm13, %v3505_v29, %v3507_v19  ;;  %v3795_v41 = vand.u32 31, %v3793_v53 }
 0x36c   : > { %v3239_v0 = vcvt.s32.f32 %v3232_v26  ;;  %v3733_v40 = vadd.s32 %v9367_v56, %v9374_v5  ;;  %v3748_v60 = vsel %vm5962_vm5, 0, %v5961_v23  ;;  %v3527_v13 = vadd.s32 1, %v9454_v59  ;;  %6248 = vmatpush3.bf16.msra.mxu1 %v6702_v30 }
 0x36d   : > { %v3749_v46 = vsub.s32 32, %v3748_v60  ;;  %v3753_v52 = vsub.s32 4294967266, %v3748_v60  ;;  %v3796_v16 = vsub.s32 32, %v3795_v41  ;;  %v9473_v7 = vshll.u32 %v3789_v61, 8 }
 0x36e   : > { %v3240_v54 = vmul.f32 %v3239_v0, %v3237_v32  ;;  %v3524_v8 = vmul.u32 %v9436_v51, %v3508_v47  ;;  %vm3526_vm10 = vc.u32 %v9463_v15, %v9453_v55  ;;  %v9478_v39 = vshrl.u32 %v3793_v53, 5 }
 0x36f   : > { %v3750_v56 = vshll.u32 %v9431_v20, %v3748_v60  ;;  %v3751_v5 = vshrl.u32 %v3733_v40, %v3749_v46  ;;  %v3754_v26 = vadd.s32 127, %v3753_v52  ;;  %v3528_v3 = vsel %vm3526_vm10, %v3527_v13, %v9454_v59 }
 0x370   : > { %v3529_v29 = vadd.s32 %v3528_v3, %v3524_v8  ;;  %v3798_v43 = vshll.u32 %v10902_v28, %v3795_v41  ;;  %v3799_v19 = vshrl.u32 %v10904_v37, %v3796_v16  ;;  %v3802_v51 = vshrl.u32 %v10905_v22, %v3796_v16 }
 0x371   : > { %v3755_v45 = vshll.u32 %v3754_v26, 23  ;;  %v3801_v50 = vshll.u32 %v10904_v37, %v3795_v41  ;;  %v3804_v23 = vshll.u32 %v10905_v22, %v3795_v41  ;;  %v3805_v25 = vshrl.u32 %v10911_v12, %v3796_v16 }
 0x372   : > { %v3752_v20 = vor.u32 %v3751_v5, %v3750_v56  ;;  %v3530_v61 = vadd.s32 536870912, %v3529_v29  ;;  %v3807_v32 = vshll.u32 %v10911_v12, %v3795_v41  ;;  %v3808_v59 = vshrl.u32 %v10907_v34, %v3796_v16 }
 0x373   : > { %v11075_v18 = vand.u32 2147483647, %v9125_v62  ;;  %vm3679_vm15 = vcmp.lt.s32.totalorder %v9213_v63, 0  ;;  %v3756_v47 = vor.u32 4788187, %v3755_v45  ;;  %v3800_v0 = vor.u32 %v3799_v19, %v3798_v43 }
 0x374   : > { %v3803_v40 = vor.u32 %v3802_v51, %v3801_v50  ;;  %v3806_v60 = vor.u32 %v3805_v25, %v3804_v23  ;;  %v9497_v13 = vshrl.u32 %v3530_v61, 30  ;;  %v3809_v30 = vor.u32 %v3808_v59, %v3807_v32 }
 0x375   : > { %vm9492_vm12 = vcmp.le.f32.partialorder %v11075_v18, 0.7853982  ;;  %v3810_v46 = vshll.u32 %v10907_v34, %v3795_v41  ;;  %v3811_v52 = vshrl.u32 %v10906_v49, %v3796_v16  ;;  %v9501_v8 = vpop.eup %6801  ;;  %v3241_v56 = vxor.u32 2147483648, %v3240_v54 }
 0x376   : > { %11078 = vst [vmem:[#allocation101_spill] sm:$0xff] %v9501_v8  ;;  %v3763_v5 = vsub.s32 4, %v9418_v1  ;;  %v3797_v26 = vshrl.u32 %v10902_v28, %v3796_v16  ;;  %vm3813_vm14 = vcmp.lt.s32.totalorder %v9478_v39, 1  ;;  %v3757_v3 = vand.u32 2147483647, %v3756_v47 }
 0x377   : > { %v3532_v43 = vshll.u32 %v9497_v13, 30  ;;  %v3812_v19 = vor.u32 %v3811_v52, %v3810_v46  ;;  %vm3816_vm7 = vcmp.lt.s32.totalorder %v9478_v39, 4  ;;  %v11079_v51 = vand.u32 2147483647, %v9213_v63 }
 0x378   : > { %v3759_v45 = vcvt.s32.f32 %v3752_v20  ;;  %vm3815_vm13 = vcmp.lt.s32.totalorder %v9478_v39, 3  ;;  %v3821_v16 = vsel %vm3813_vm14, %v3800_v0, %v3803_v40  ;;  %v3822_v50 = vsel %vm3816_vm7, %v3809_v30, 920167782 }
 0x379   : > { %vm9510_vm8 = vcmp.le.f32.partialorder %v11079_v51, 0.7853982  ;;  %v9519_v23 = vsub.s32 %v3529_v29, %v3532_v43  ;;  %vm3814_vm9 = vcmp.lt.s32.totalorder %v9478_v39, 2  ;;  %v3818_v25 = vsel %vm3816_vm7, %v3806_v60, 2102212464 }
 0x37a   : > { %v3823_v61 = vsel %vm3815_vm13, %v3806_v60, %v3822_v50  ;;  %v3242_v20 = vsel %vm3159_vm6, %v3241_v56, %v3240_v54  ;;  %vm3471_vm11 = vcmp.lt.s32.totalorder %v9260_v33, 0  ;;  %v3817_v32 = vsel %vm3813_vm14, %v3797_v26, %v3800_v0 }
 0x37b   : > { %v3824_v29 = vsel %vm3814_vm9, %v3821_v16, %v3823_v61  ;;  %v3576_v59 = vand.u32 2139095040, %v9382_v9  ;;  %v3760_v18 = vmul.f32 %v3759_v45, %v3757_v3  ;;  %v3535_v47 = vsub.s32 0, %v9519_v23 }
 0x37c   : > { %v3825_v46 = vsel %vm3813_vm14, %v3803_v40, %v3806_v60  ;;  %v3826_v52 = vsel %vm3816_vm7, %v3812_v19, 1326507024  ;;  %v3819_v54 = vsel %vm3815_vm13, %v3803_v40, %v3818_v25  ;;  %v3246_v3 = vsel %vm9492_vm12, 0, %v9412_v21 }
 0x37d   : > { %v3827_v0 = vsel %vm3815_vm13, %v3809_v30, %v3826_v52  ;;  %v9544_v56 = vmul.u32.u64.low %v9473_v7, %v3824_v29  ;;  %v9545_v26 = vmul.u32.u64.high %v9473_v7, %v3824_v29, %v9544_v56  ;;  %v3764_v60 = vsel %vm3679_vm15, %v3763_v5, %v9418_v1 }
 0x37e   : > { %v5952_v43 = vmin.u32 %v3535_v47, %v9519_v23  ;;  %v3828_v40 = vsel %vm3814_vm9, %v3825_v46, %v3827_v0  ;;  %v3245_v30 = vsel %vm9492_vm12, %v9125_v62, %v3242_v20  ;;  %v11082_v19 = vand.u32 2147483647, %v9260_v33 }
 0x37f   : > { %v9567_v21 = vmul.u32.u64.low %v9473_v7, %v3828_v40  ;;  %v9568_v45 = vmul.u32.u64.high %v9473_v7, %v3828_v40, %v9567_v21  ;;  %v3577_v1 = vshrl.u32 %v3576_v59, 23  ;;  %v3761_v5 = vxor.u32 2147483648, %v3760_v18  ;;  %v9582_v59 = vld [vmem:[%s10732_s2] ss:$0 sm:$0xff] }
 0x380   : > { %vm9562_vm6 = vcmp.le.f32.partialorder %v11082_v19, 0.7853982  ;;  %v3537_v16 = vclz %v5952_v43  ;;  %v3555_v50 = vsub.s32 4, %v9497_v13  ;;  %v3820_v25 = vsel %vm3814_vm9, %v3817_v32, %v3819_v54 }
 0x381   : > { %v9573_v53 = vadd.s32 3, %v3246_v3  ;;  %v3839_v61 = vadd.s32 1, %v9545_v26  ;;  %v10862_v20 = vand.u32 2147483647, %v9382_v9  ;;  %v5955_v29 = vadd.s32 4294967169, %v3577_v1 }
 0x382   : > { %6803 = vcosq.f32 %v3245_v30  ;;  %v3766_v47 = vsel %vm9510_vm8, 0, %v3764_v60  ;;  %v5953_v46 = vadd.s32 4294967294, %v3537_v16  ;;  %v9586_v39 = vadd.f32 %v9582_v59, %v9065_v27 }
 0x383   : > { %v3525_v32 = vadd.s32 %v9453_v55, %v9463_v15  ;;  %v3836_v52 = vmul.u32 %v9473_v7, %v3820_v25  ;;  %vm3838_vm2 = vc.u32 %v9568_v45, %v9544_v56  ;;  %v3583_v54 = vadd.s32 1, %v5955_v29 }
 0x384   : > { %11085 = vst [vmem:[#allocation102_spill] sm:$0xff] %v9586_v39  ;;  %v3762_v0 = vsel %vm3679_vm15, %v3761_v5, %v3760_v18  ;;  %vm5954_vm5 = vcmp.lt.s32.totalorder %v5953_v46, 0  ;;  %v9598_v3 = vsel %vm3471_vm11, %v3555_v50, %v9497_v13  ;;  %v3840_v27 = vsel %vm3838_vm2, %v3839_v61, %v9545_v26 }
 0x385   : > { %v3540_v60 = vsel %vm5954_vm5, 0, %v5953_v46  ;;  %v3841_v43 = vadd.s32 %v3840_v27, %v3836_v52  ;;  %v3580_v55 = vand.u32 8388607, %v10862_v20  ;;  %vm3584_vm10 = vcmp.gt.s32.totalorder %v3583_v54, 0 }
 0x386   : > { %v3541_v15 = vsub.s32 32, %v3540_v60  ;;  %v3545_v7 = vsub.s32 4294967266, %v3540_v60  ;;  %v3585_v40 = vsel %vm3584_vm10, %v3583_v54, 0  ;;  %v4096_v19 = vand.u32 2139095040, %v9586_v39 }
 0x387   : > { %6805 = vsinq.f32 %v3245_v30  ;;  %v9604_v18 = vadd.s32 3, %v3766_v47  ;;  %v3842_v21 = vadd.s32 536870912, %v3841_v43  ;;  %v3587_v1 = vand.u32 31, %v3585_v40 }
 0x388   : > { %v3542_v13 = vshll.u32 %v9519_v23, %v3540_v60  ;;  %v3543_v5 = vshrl.u32 %v3525_v32, %v3541_v15  ;;  %v3546_v26 = vadd.s32 127, %v3545_v7  ;;  %v9613_v50 = vsel %vm9510_vm8, %v9213_v63, %v3762_v0 }
 0x389   : > { %11086 = vst [vmem:[#allocation103_spill] sm:$0xff] %v9604_v18  ;;  %v9615_v25 = vshrl.u32 %v3842_v21, 30  ;;  %v3581_v30 = vor.u32 8388608, %v3580_v55  ;;  %v3588_v61 = vsub.s32 32, %v3587_v1  ;;  %v3586_v46 = vshrl.u32 %v3585_v40, 5 }
 0x38a   : > { %v3544_v29 = vor.u32 %v3543_v5, %v3542_v13  ;;  %v3547_v47 = vshll.u32 %v3546_v26, 23  ;;  %v4097_v52 = vshrl.u32 %v4096_v19, 23  ;;  %v3590_v32 = vshll.u32 %v10902_v28, %v3587_v1 }
 0x38b   : > { %v3844_v23 = vshll.u32 %v9615_v25, 30  ;;  %v3591_v54 = vshrl.u32 %v10904_v37, %v3588_v61  ;;  %v3593_v27 = vshll.u32 %v10904_v37, %v3587_v1  ;;  %v3594_v0 = vshrl.u32 %v10905_v22, %v3588_v61 }
 0x38c   : > { %v9621_v60 = vpop.eup %6803  ;;  %v3548_v41 = vor.u32 4788187, %v3547_v47  ;;  %v3596_v55 = vshll.u32 %v10905_v22, %v3587_v1  ;;  %v3597_v15 = vshrl.u32 %v10911_v12, %v3588_v61  ;;  %v3551_v7 = vcvt.s32.f32 %v3544_v29 }
 0x38d   : > { %11087 = vst [vmem:[#allocation104_spill] sm:$0xff] %v9621_v60  ;;  %v9626_v40 = vsub.s32 %v3841_v43, %v3844_v23  ;;  %v3599_v19 = vshll.u32 %v10911_v12, %v3587_v1  ;;  %v3600_v21 = vshrl.u32 %v10907_v34, %v3588_v61  ;;  %v3592_v5 = vor.u32 %v3591_v54, %v3590_v32 }
 0x38e   : > { %v3549_v13 = vand.u32 2147483647, %v3548_v41  ;;  %v3595_v26 = vor.u32 %v3594_v0, %v3593_v27  ;;  %v3598_v20 = vor.u32 %v3597_v15, %v3596_v55  ;;  %vm3783_vm12 = vcmp.lt.s32.totalorder %v9378_v31, 0 }
 0x38f   : > { %v3847_v47 = vsub.s32 0, %v9626_v40  ;;  %v3601_v16 = vor.u32 %v3600_v21, %v3599_v19  ;;  %v3621_v63 = vshll.u32 %v3581_v30, 8  ;;  %v5975_v18 = vadd.s32 4294967169, %v4097_v52 }
 0x390   : > { %v3552_v6 = vmul.f32 %v3551_v7, %v3549_v13  ;;  %v3867_v29 = vsub.s32 4, %v9615_v25  ;;  %v3602_v43 = vshll.u32 %v10907_v34, %v3587_v1  ;;  %v3603_v23 = vshrl.u32 %v10906_v49, %v3588_v61 }
 0x391   : > { %v9635_v8 = vpop.eup %6805  ;;  %v5964_v32 = vmin.u32 %v3847_v47, %v9626_v40  ;;  %v3589_v54 = vshrl.u32 %v10902_v28, %v3588_v61  ;;  %vm3605_vm15 = vcmp.lt.s32.totalorder %v3586_v46, 1  ;;  %vm3608_vm14 = vcmp.lt.s32.totalorder %v3586_v46, 4 }
 0x392   : > { %v11088_v27 = vand.u32 2147483647, %v9378_v31  ;;  %v3604_v52 = vor.u32 %v3603_v23, %v3602_v43  ;;  %vm3606_vm8 = vcmp.lt.s32.totalorder %v3586_v46, 2  ;;  %v3610_v41 = vsel %vm3608_vm14, %v3598_v20, 2102212464 }
 0x393   : > { %v3613_v1 = vsel %vm3605_vm15, %v3592_v5, %v3595_v26  ;;  %v3849_v0 = vclz %v5964_v32  ;;  %vm3607_vm13 = vcmp.lt.s32.totalorder %v3586_v46, 3  ;;  %v3614_v55 = vsel %vm3608_vm14, %v3601_v16, 920167782 }
 0x394   : > { %vm9641_vm7 = vcmp.le.f32.partialorder %v11088_v27, 0.7853982  ;;  %v3617_v15 = vsel %vm3605_vm15, %v3595_v26, %v3598_v20  ;;  %v3553_v7 = vxor.u32 2147483648, %v3552_v6  ;;  %v3609_v19 = vsel %vm3605_vm15, %v3589_v54, %v3592_v5 }
 0x395   : > { %v3615_v21 = vsel %vm3607_vm13, %v3598_v20, %v3614_v55  ;;  %v3618_v61 = vsel %vm3608_vm14, %v3604_v52, 1326507024  ;;  %v5965_v13 = vadd.s32 4294967294, %v3849_v0  ;;  %v3611_v47 = vsel %vm3607_vm13, %v3595_v26, %v3610_v41 }
 0x396   : > { %v3616_v62 = vsel %vm3606_vm8, %v3613_v1, %v3615_v21  ;;  %v3619_v27 = vsel %vm3607_vm13, %v3601_v16, %v3618_v61  ;;  %v10869_v23 = vand.u32 2147483647, %v9586_v39  ;;  %6807 = vcosq.f32 %v9613_v50 }
 0x397   : > { %v3620_v36 = vsel %vm3606_vm8, %v3617_v15, %v3619_v27  ;;  %v9647_v60 = vmul.u32.u64.low %v3621_v63, %v3616_v62  ;;  %v9648_v43 = vmul.u32.u64.high %v3621_v63, %v3616_v62, %v9647_v60  ;;  %vm5966_vm9 = vcmp.lt.s32.totalorder %v5965_v13, 0  ;;  %v9663_v62 = vld [vmem:[%s10733_s3] sm:$0x3] }
 0x398   : > { %v9653_v32 = vmul.u32.u64.low %v3621_v63, %v3620_v36  ;;  %v9654_v5 = vmul.u32.u64.high %v3621_v63, %v3620_v36, %v9653_v32  ;;  %v3852_v20 = vsel %vm5966_vm9, 0, %v5965_v13  ;;  %v3868_v26 = vsel %vm3783_vm12, %v3867_v29, %v9615_v25  ;;  %6477 = vmatprep.subr.msk.bf16.mxu1 %vm10879_vm0, %v9663_v62 }
 0x399   : > { %v3612_v16 = vsel %vm3606_vm8, %v3609_v19, %v3611_v47  ;;  %v4103_v54 = vadd.s32 1, %v5975_v18  ;;  %v3554_v52 = vsel %vm3471_vm11, %v3553_v7, %v3552_v6  ;;  %v3853_v41 = vsub.s32 32, %v3852_v20 }
 0x39a   : > { %v3857_v1 = vsub.s32 4294967266, %v3852_v20  ;;  %v9669_v36 = vadd.f32 %v9582_v59, %v9144_v58  ;;  %v3837_v18 = vadd.s32 %v9544_v56, %v9568_v45  ;;  %v3631_v25 = vadd.s32 1, %v9648_v43 }
 0x39b   : > { %v4100_v46 = vand.u32 8388607, %v10869_v23  ;;  %vm4104_vm2 = vcmp.gt.s32.totalorder %v4103_v54, 0  ;;  %v3870_v6 = vsel %vm9641_vm7, 0, %v3868_v26  ;;  %v3628_v0 = vmul.u32 %v3621_v63, %v3612_v16 }
 0x39c   : > { %v3858_v29 = vadd.s32 127, %v3857_v1  ;;  %vm3630_vm11 = vc.u32 %v9654_v5, %v9647_v60  ;;  %v9685_v58 = vsel %vm9562_vm6, %v9260_v33, %v3554_v52  ;;  %v3855_v56 = vshrl.u32 %v3837_v18, %v3853_v41 }
 0x39d   : > { %v3632_v45 = vsel %vm3630_vm11, %v3631_v25, %v9648_v43  ;;  %v4105_v55 = vsel %vm4104_vm2, %v4103_v54, 0  ;;  %6809 = vsinq.f32 %v9613_v50  ;;  %v11091_v15 = vsel %vm9562_vm6, 0, %v9598_v3 }
 0x39e   : > { %v9693_v7 = vadd.s32 3, %v11091_v15  ;;  %v3859_v63 = vshll.u32 %v3858_v29, 23  ;;  %v3633_v19 = vadd.s32 %v3632_v45, %v3628_v0  ;;  %v3854_v21 = vshll.u32 %v9626_v40, %v3852_v20 }
 0x39f   : > { %v4107_v61 = vand.u32 31, %v4105_v55  ;;  %v9699_v47 = vadd.f32 %v9582_v59, %v9237_v44  ;;  %6811 = vcosq.f32 %v9685_v58  ;;  %v9702_v27 = vadd.s32 3, %v3870_v6 }
 0x3a0   : > { %v3860_v50 = vor.u32 4788187, %v3859_v63  ;;  %v3634_v51 = vadd.s32 536870912, %v3633_v19  ;;  %v3856_v3 = vor.u32 %v3855_v56, %v3854_v21  ;;  %vm3575_vm6 = vcmp.lt.s32.totalorder %v9382_v9, 0  ;;  %v9706_v20 = vpop.eup %6807 }
 0x3a1   : > { %11092 = vst [vmem:[#allocation105_spill] sm:$0xff] %v9702_v27  ;;  %v4101_v43 = vor.u32 8388608, %v4100_v46  ;;  %v4108_v32 = vsub.s32 32, %v4107_v61  ;;  %v3888_v40 = vand.u32 2139095040, %v9669_v36  ;;  %11093 = vst [vmem:[#allocation106_spill] sm:$0xff] %v9706_v20  ;;  %v4106_v16 = vshrl.u32 %v4105_v55, 5 }
 0x3a2   : > { %v3635_v26 = vshrl.u32 %v3634_v51, 30  ;;  %v4110_v44 = vshll.u32 %v10902_v28, %v4107_v61  ;;  %v4113_v54 = vshll.u32 %v10904_v37, %v4107_v61  ;;  %v4116_v1 = vshll.u32 %v10905_v22, %v4107_v61 }
 0x3a3   : > { %v4111_v52 = vshrl.u32 %v10904_v37, %v4108_v32  ;;  %v4114_v41 = vshrl.u32 %v10905_v22, %v4108_v32  ;;  %v4117_v18 = vshrl.u32 %v10911_v12, %v4108_v32  ;;  %v3861_v25 = vand.u32 2147483647, %v3860_v50 }
 0x3a4   : > { %v3636_v46 = vshll.u32 %v3635_v26, 30  ;;  %v4119_v29 = vshll.u32 %v10911_v12, %v4107_v61  ;;  %v4120_v6 = vshrl.u32 %v10907_v34, %v4108_v32  ;;  %v4123_v55 = vshrl.u32 %v10906_v49, %v4108_v32 }
 0x3a5   : > { %v4112_v0 = vor.u32 %v4111_v52, %v4110_v44  ;;  %v4115_v56 = vor.u32 %v4114_v41, %v4113_v54  ;;  %v4118_v45 = vor.u32 %v4117_v18, %v4116_v1  ;;  %v3659_v63 = vsub.s32 4, %v3635_v26 }
 0x3a6   : > { %v9717_v15 = vsub.s32 %v3633_v19, %v3636_v46  ;;  %v4121_v21 = vor.u32 %v4120_v6, %v4119_v29  ;;  %v4122_v51 = vshll.u32 %v10907_v34, %v4107_v61  ;;  %v3863_v23 = vcvt.s32.f32 %v3856_v3 }
 0x3a7   : > { %v11094_v13 = vand.u32 2147483647, %v9382_v9  ;;  %v4141_v27 = vshll.u32 %v4101_v43, 8  ;;  %v3889_v20 = vshrl.u32 %v3888_v40, 23  ;;  %v11097_v44 = vand.u32 2147483647, %v9669_v36  ;;  %v9730_v52 = vpop.eup %6809 }
 0x3a8   : > { %11098 = vst [vmem:[#allocation107_spill] sm:$0xff] %v9730_v52  ;;  %v3639_v19 = vsub.s32 0, %v9717_v15  ;;  %v4124_v41 = vor.u32 %v4123_v55, %v4122_v51  ;;  %vm4125_vm10 = vcmp.lt.s32.totalorder %v4106_v16, 1  ;;  %vm4128_vm15 = vcmp.lt.s32.totalorder %v4106_v16, 4 }
 0x3a9   : > { %vm9722_vm5 = vcmp.le.f32.partialorder %v11094_v13, 0.7853982  ;;  %v9728_v54 = vand.u32 8388607, %v11097_v44  ;;  %v3864_v61 = vmul.f32 %v3863_v23, %v3861_v25  ;;  %v4109_v3 = vshrl.u32 %v10902_v28, %v4108_v32  ;;  %v9735_v18 = vpop.eup %6811 }
 0x3aa   : > { %v4130_v13 = vsel %vm4128_vm15, %v4118_v45, 2102212464  ;;  %v4133_v1 = vsel %vm4125_vm10, %v4112_v0, %v4115_v56  ;;  %11099 = vst [vmem:[#allocation108_spill] sm:$0xff] %v9735_v18  ;;  %v5956_v43 = vmin.u32 %v3639_v19, %v9717_v15  ;;  %v3660_v40 = vsel %vm3575_vm6, %v3659_v63, %v3635_v26 }
 0x3ab   : > { %vm4127_vm14 = vcmp.lt.s32.totalorder %v4106_v16, 3  ;;  %v4134_v46 = vsel %vm4128_vm15, %v4121_v21, 920167782  ;;  %vm4126_vm8 = vcmp.lt.s32.totalorder %v4106_v16, 2  ;;  %v4129_v29 = vsel %vm4125_vm10, %v4109_v3, %v4112_v0 }
 0x3ac   : > { %v4135_v6 = vsel %vm4127_vm14, %v4118_v45, %v4134_v46  ;;  %v4137_v55 = vsel %vm4125_vm10, %v4115_v56, %v4118_v45  ;;  %v3641_v23 = vclz %v5956_v43  ;;  %v4131_v25 = vsel %vm4127_vm14, %v4115_v56, %v4130_v13 }
 0x3ad   : > { %v4136_v32 = vsel %vm4126_vm8, %v4133_v1, %v4135_v6  ;;  %v4138_v51 = vsel %vm4128_vm15, %v4124_v41, 1326507024  ;;  %v5967_v19 = vadd.s32 4294967169, %v3889_v20  ;;  %6813 = vsinq.f32 %v9685_v58 }
 0x3ae   : > { %v4139_v44 = vsel %vm4127_vm14, %v4121_v21, %v4138_v51  ;;  %v9743_v52 = vmul.u32.u64.low %v4141_v27, %v4136_v32  ;;  %v9744_v33 = vmul.u32.u64.high %v4141_v27, %v4136_v32, %v9743_v52  ;;  %v3865_v26 = vxor.u32 2147483648, %v3864_v61 }
 0x3af   : > { %v5957_v63 = vadd.s32 4294967294, %v3641_v23  ;;  %v4140_v0 = vsel %vm4126_vm8, %v4137_v55, %v4139_v44  ;;  %v3629_v45 = vadd.s32 %v9647_v60, %v9654_v5  ;;  %v3895_v13 = vadd.s32 1, %v5967_v19 }
 0x3b0   : > { %v9751_v56 = vmul.u32.u64.low %v4141_v27, %v4140_v0  ;;  %v9752_v3 = vmul.u32.u64.high %v4141_v27, %v4140_v0, %v9751_v56  ;;  %v3662_v21 = vsel %vm9722_vm5, 0, %v3660_v40  ;;  %v4132_v41 = vsel %vm4126_vm8, %v4129_v29, %v4131_v25 }
 0x3b1   : > { %vm5958_vm13 = vcmp.lt.s32.totalorder %v5957_v63, 0  ;;  %v3893_v20 = vor.u32 8388608, %v9728_v54  ;;  %v4151_v1 = vadd.s32 1, %v9744_v33  ;;  %vm3896_vm9 = vcmp.gt.s32.totalorder %v3895_v13, 0 }
 0x3b2   : > { %v3644_v58 = vsel %vm5958_vm13, 0, %v5957_v63  ;;  %v3866_v60 = vsel %vm3783_vm12, %v3865_v26, %v3864_v61  ;;  %v3897_v6 = vsel %vm3896_vm9, %v3895_v13, 0  ;;  %v9762_v55 = vadd.s32 3, %v3662_v21 }
 0x3b3   : > { %v3645_v5 = vsub.s32 32, %v3644_v58  ;;  %v3649_v46 = vsub.s32 4294967266, %v3644_v58  ;;  %v4148_v23 = vmul.u32 %v4141_v27, %v4132_v41  ;;  %vm4150_vm2 = vc.u32 %v9752_v3, %v9743_v52 }
 0x3b4   : > { %11100 = vst [vmem:[#allocation109_spill] sm:$0xff] %v9762_v55  ;;  %v3899_v16 = vand.u32 31, %v3897_v6  ;;  %v3646_v54 = vshll.u32 %v9717_v15, %v3644_v58  ;;  %v4152_v25 = vsel %vm4150_vm2, %v4151_v1, %v9744_v33  ;;  %v9768_v51 = vshrl.u32 %v3897_v6, 5 }
 0x3b5   : > { %v3647_v40 = vshrl.u32 %v3629_v45, %v3645_v5  ;;  %v3650_v29 = vadd.s32 127, %v3649_v46  ;;  %v4153_v32 = vadd.s32 %v4152_v25, %v4148_v23  ;;  %v4200_v44 = vand.u32 2139095040, %v9699_v47 }
 0x3b6   : > { %v3900_v61 = vsub.s32 32, %v3899_v16  ;;  %v3902_v27 = vshll.u32 %v10902_v28, %v3899_v16  ;;  %v3905_v63 = vshll.u32 %v10904_v37, %v3899_v16  ;;  %v3908_v45 = vshll.u32 %v10905_v22, %v3899_v16 }
 0x3b7   : > { %v3648_v19 = vor.u32 %v3647_v40, %v3646_v54  ;;  %v3651_v26 = vshll.u32 %v3650_v29, 23  ;;  %v4154_v0 = vadd.s32 536870912, %v4153_v32  ;;  %v9776_v33 = vpop.eup %6813  ;;  %v3911_v41 = vshll.u32 %v10911_v12, %v3899_v16 }
 0x3b8   : > { %v3903_v56 = vshrl.u32 %v10904_v37, %v3900_v61  ;;  %v3906_v15 = vshrl.u32 %v10905_v22, %v3900_v61  ;;  %v3909_v21 = vshrl.u32 %v10911_v12, %v3900_v61  ;;  %v3912_v58 = vshrl.u32 %v10907_v34, %v3900_v61 }
 0x3b9   : > { %v3652_v13 = vor.u32 4788187, %v3651_v26  ;;  %v3655_v1 = vcvt.s32.f32 %v3648_v19  ;;  %v4155_v5 = vshrl.u32 %v4154_v0, 30  ;;  %v3914_v40 = vshll.u32 %v10907_v34, %v3899_v16 }
 0x3ba   : > { %v3904_v46 = vor.u32 %v3903_v56, %v3902_v27  ;;  %v3907_v6 = vor.u32 %v3906_v15, %v3905_v63  ;;  %v3910_v54 = vor.u32 %v3909_v21, %v3908_v45  ;;  %v3915_v29 = vshrl.u32 %v10906_v49, %v3900_v61 }
 0x3bb   : > { %v3653_v23 = vand.u32 2147483647, %v3652_v13  ;;  %v3869_v25 = vsel %vm9641_vm7, %v9378_v31, %v3866_v60  ;;  %vm4095_vm12 = vcmp.lt.s32.totalorder %v9586_v39, 0  ;;  %v4156_v26 = vshll.u32 %v4155_v5, 30 }
 0x3bc   : > { %v3913_v43 = vor.u32 %v3912_v58, %v3911_v41  ;;  %v3933_v55 = vshll.u32 %v3893_v20, 8  ;;  %v3916_v19 = vor.u32 %v3915_v29, %v3914_v40  ;;  %v4201_v0 = vshrl.u32 %v4200_v44, 23 }
 0x3bd   : > { %v3656_v18 = vmul.f32 %v3655_v1, %v3653_v23  ;;  %v9789_v27 = vadd.f32 %v9582_v59, %v9330_v38  ;;  %v9791_v63 = vsub.s32 %v4153_v32, %v4156_v26  ;;  %v3901_v16 = vshrl.u32 %v10902_v28, %v3900_v61 }
 0x3be   : > { %vm3917_vm11 = vcmp.lt.s32.totalorder %v9768_v51, 1  ;;  %vm3920_vm7 = vcmp.lt.s32.totalorder %v9768_v51, 4  ;;  %v11101_v60 = vand.u32 2147483647, %v9586_v39  ;;  %v4179_v44 = vsub.s32 4, %v4155_v5 }
 0x3bf   : > { %v3657_v30 = vxor.u32 2147483648, %v3656_v18  ;;  %v3922_v56 = vsel %vm3920_vm7, %v3910_v54, 2102212464  ;;  %v3925_v15 = vsel %vm3917_vm11, %v3904_v46, %v3907_v6  ;;  %v4159_v38 = vsub.s32 0, %v9791_v63 }
 0x3c0   : > { %vm9798_vm10 = vcmp.le.f32.partialorder %v11101_v60, 0.7853982  ;;  %vm3918_vm15 = vcmp.lt.s32.totalorder %v9768_v51, 2  ;;  %vm3919_vm14 = vcmp.lt.s32.totalorder %v9768_v51, 3  ;;  %v3926_v59 = vsel %vm3920_vm7, %v3913_v43, 920167782 }
 0x3c1   : > { %v3921_v32 = vsel %vm3917_vm11, %v3901_v16, %v3904_v46  ;;  %v3927_v61 = vsel %vm3919_vm14, %v3910_v54, %v3926_v59  ;;  %v3929_v45 = vsel %vm3917_vm11, %v3907_v6, %v3910_v54  ;;  %v3930_v13 = vsel %vm3920_vm7, %v3916_v19, 1326507024 }
 0x3c2   : > { %v5976_v21 = vmin.u32 %v4159_v38, %v9791_v63  ;;  %v3923_v41 = vsel %vm3919_vm14, %v3907_v6, %v3922_v56  ;;  %v3928_v58 = vsel %vm3918_vm15, %v3925_v15, %v3927_v61  ;;  %v3931_v1 = vsel %vm3919_vm14, %v3913_v43, %v3930_v13 }
 0x3c3   : > { %v3658_v23 = vsel %vm3575_vm6, %v3657_v30, %v3656_v18  ;;  %v3932_v40 = vsel %vm3918_vm15, %v3929_v45, %v3931_v1  ;;  %v9812_v29 = vmul.u32.u64.low %v3933_v55, %v3928_v58  ;;  %v9813_v26 = vmul.u32.u64.high %v3933_v55, %v3928_v58, %v9812_v29 }
 0x3c4   : > { %6815 = vcosq.f32 %v3869_v25  ;;  %v4161_v46 = vclz %v5976_v21  ;;  %v9815_v54 = vmul.u32.u64.low %v3933_v55, %v3932_v40  ;;  %v9816_v19 = vmul.u32.u64.high %v3933_v55, %v3932_v40, %v9815_v54 }
 0x3c5   : > { %v4180_v6 = vsel %vm4095_vm12, %v4179_v44, %v4155_v5  ;;  %v3924_v43 = vsel %vm3918_vm15, %v3921_v32, %v3923_v41  ;;  %v5979_v16 = vadd.s32 4294967169, %v4201_v0  ;;  %v11104_v18 = vand.u32 2147483647, %v9699_v47  ;;  %v11105_v41 = vld [vmem:[#allocation23_spill] sm:$0xff] }
 0x3c6   : > { %6817 = vsinq.f32 %v3869_v25  ;;  %v3661_v60 = vsel %vm9722_vm5, %v9382_v9, %v3658_v23  ;;  %v4149_v56 = vadd.s32 %v9743_v52, %v9752_v3  ;;  %v5977_v15 = vadd.s32 4294967294, %v4161_v46 }
 0x3c7   : > { %v4204_v30 = vand.u32 8388607, %v11104_v18  ;;  %v3943_v38 = vadd.s32 1, %v9813_v26  ;;  %v4207_v59 = vadd.s32 1, %v5979_v16  ;;  %v10874_v5 = vand.u32 2147483647, %v9789_v27 }
 0x3c8   : > { %v3992_v51 = vand.u32 2139095040, %v9789_v27  ;;  %vm5978_vm6 = vcmp.lt.s32.totalorder %v5977_v15, 0  ;;  %v4182_v0 = vsel %vm9798_vm10, 0, %v4180_v6  ;;  %v3940_v25 = vmul.u32 %v3933_v55, %v3924_v43 }
 0x3c9   : > { %vm3942_vm8 = vc.u32 %v9816_v19, %v9812_v29  ;;  %v4164_v50 = vsel %vm5978_vm6, 0, %v5977_v15  ;;  %v4205_v32 = vor.u32 8388608, %v4204_v30  ;;  %vm4208_vm5 = vcmp.gt.s32.totalorder %v4207_v59, 0 }
 0x3ca   : > { %v3944_v44 = vsel %vm3942_vm8, %v3943_v38, %v9813_v26  ;;  %6819 = vcosq.f32 %v3661_v60  ;;  %v4165_v52 = vsub.s32 32, %v4164_v50  ;;  %v4169_v3 = vsub.s32 4294967266, %v4164_v50 }
 0x3cb   : > { %v3945_v61 = vadd.s32 %v3944_v44, %v3940_v25  ;;  %v4209_v45 = vsel %vm4208_vm5, %v4207_v59, 0  ;;  %v3993_v13 = vshrl.u32 %v3992_v51, 23  ;;  %v9838_v21 = vand.u32 8388607, %v10874_v5 }
 0x3cc   : > { %v1059_v58 = vsub.s32 4, %v11105_v41  ;;  %v4166_v55 = vshll.u32 %v9791_v63, %v4164_v50  ;;  %v4167_v1 = vshrl.u32 %v4149_v56, %v4165_v52  ;;  %v4170_v23 = vadd.s32 127, %v4169_v3 }
 0x3cd   : > { %v3946_v40 = vadd.s32 536870912, %v3945_v61  ;;  %6821 = vsinq.f32 %v3661_v60  ;;  %v9842_v26 = vadd.s32 3, %v4182_v0  ;;  %v4211_v46 = vand.u32 31, %v4209_v45  ;;  %v11108_v60 = vld [vmem:[#allocation20_spill] sm:$0xff] }
 0x3ce   : > { %v9844_v54 = vshll.u32 %v4205_v32, 8  ;;  %v9846_v6 = vpop.eup %6815  ;;  %v4168_v43 = vor.u32 %v4167_v1, %v4166_v55  ;;  %v4171_v16 = vshll.u32 %v4170_v23, 23  ;;  %vm3887_vm13 = vcmp.lt.s32.totalorder %v9669_v36, 0 }
 0x3cf   : > { %11106 = vst [vmem:[#allocation23_spill] sm:$0xff] %v9842_v26  ;;  %11107 = vst [vmem:[#allocation110_spill] sm:$0xff] %v9846_v6  ;;  %v9850_v18 = vadd.s32 %v9812_v29, %v9816_v19  ;;  %v3947_v30 = vshrl.u32 %v3946_v40, 30  ;;  %v4212_v63 = vsub.s32 32, %v4211_v46  ;;  %v5971_v56 = vadd.s32 4294967169, %v3993_v13 }
 0x3d0   : > { %v9856_v38 = vsel %vm975_vm3, %v1059_v58, %v11105_v41  ;;  %v9858_v59 = vpop.eup %6817  ;;  %v4172_v51 = vor.u32 4788187, %v4171_v16  ;;  %v4210_v25 = vshrl.u32 %v4209_v45, 5  ;;  %v4214_v50 = vshll.u32 %v10902_v28, %v4211_v46 }
 0x3d1   : > { %11109 = vst [vmem:[#allocation20_spill] sm:$0xff] %v9858_v59  ;;  %v3948_v0 = vshll.u32 %v3947_v30, 30  ;;  %v4215_v29 = vshrl.u32 %v10904_v37, %v4212_v63  ;;  %v4217_v19 = vshll.u32 %v10904_v37, %v4211_v46  ;;  %v4218_v44 = vshrl.u32 %v10905_v22, %v4212_v63 }
 0x3d2   : > { %v4221_v32 = vshrl.u32 %v10911_v12, %v4212_v63  ;;  %v4173_v52 = vand.u32 2147483647, %v4172_v51  ;;  %v4175_v3 = vcvt.s32.f32 %v4168_v43  ;;  %v4220_v41 = vshll.u32 %v10905_v22, %v4211_v46 }
 0x3d3   : > { %v9865_v13 = vsub.s32 %v3945_v61, %v3948_v0  ;;  %v3971_v58 = vsub.s32 4, %v3947_v30  ;;  %v4216_v55 = vor.u32 %v4215_v29, %v4214_v50  ;;  %v4219_v1 = vor.u32 %v4218_v44, %v4217_v19  ;;  %v11125_v29 = vld [vmem:[#allocation26_spill] sm:$0xff] }
 0x3d4   : > { %v4223_v45 = vshll.u32 %v10911_v12, %v4211_v46  ;;  %v9869_v23 = vpop.eup %6819  ;;  %v4176_v40 = vmul.f32 %v4175_v3, %v4173_v52  ;;  %v4222_v5 = vor.u32 %v4221_v32, %v4220_v41  ;;  %v4224_v15 = vshrl.u32 %v10907_v34, %v4212_v63 }
 0x3d5   : > { %v3951_v16 = vsub.s32 0, %v9865_v13  ;;  %v4226_v51 = vshll.u32 %v10907_v34, %v4211_v46  ;;  %v4227_v61 = vshrl.u32 %v10906_v49, %v4212_v63  ;;  %vm4229_vm3 = vcmp.lt.s32.totalorder %v4210_v25, 1 }
 0x3d6   : > { %v3999_v43 = vadd.s32 1, %v5971_v56  ;;  %v4177_v0 = vxor.u32 2147483648, %v4176_v40  ;;  %v11110_v50 = vand.u32 2147483647, %v9669_v36  ;;  %v4213_v44 = vshrl.u32 %v10902_v28, %v4212_v63 }
 0x3d7   : > { %v5968_v19 = vmin.u32 %v3951_v16, %v9865_v13  ;;  %v4225_v32 = vor.u32 %v4224_v15, %v4223_v45  ;;  %v11113_v52 = vand.u32 2147483647, %v11108_v60  ;;  %v9889_v3 = vpop.eup %6821  ;;  %v9893_v56 = vsel %vm3887_vm13, %v3971_v58, %v3947_v30 }
 0x3d8   : > { %vm9877_vm9 = vcmp.le.f32.partialorder %v11110_v50, 0.7853982  ;;  %v4228_v41 = vor.u32 %v4227_v61, %v4226_v51  ;;  %vm4232_vm11 = vcmp.lt.s32.totalorder %v4210_v25, 4  ;;  %v4237_v50 = vsel %vm4229_vm3, %v4216_v55, %v4219_v1 }
 0x3d9   : > { %vm9885_vm2 = vcmp.le.f32.partialorder %v11113_v52, 0.7853982  ;;  %v3953_v16 = vclz %v5968_v19  ;;  %vm4231_vm7 = vcmp.lt.s32.totalorder %v4210_v25, 3  ;;  %v4234_v63 = vsel %vm4232_vm11, %v4222_v5, 2102212464 }
 0x3da   : > { %v4238_v15 = vsel %vm4232_vm11, %v4225_v32, 920167782  ;;  %v4178_v45 = vsel %vm4095_vm12, %v4177_v0, %v4176_v40  ;;  %vm4230_vm15 = vcmp.lt.s32.totalorder %v4210_v25, 2  ;;  %v4241_v26 = vsel %vm4229_vm3, %v4219_v1, %v4222_v5 }
 0x3db   : > { %v4239_v52 = vsel %vm4231_vm7, %v4222_v5, %v4238_v15  ;;  %v5969_v31 = vadd.s32 4294967294, %v3953_v16  ;;  %v4233_v6 = vsel %vm4229_vm3, %v4213_v44, %v4216_v55  ;;  %v4242_v58 = vsel %vm4232_vm11, %v4228_v41, 1326507024  ;;  %v11117_v15 = vld [vmem:[#allocation36_spill] sm:$0xff] }
 0x3dc   : > { %v4240_v30 = vsel %vm4230_vm15, %v4237_v50, %v4239_v52  ;;  %v4235_v51 = vsel %vm4231_vm7, %v4219_v1, %v4234_v63  ;;  %v4243_v61 = vsel %vm4231_vm7, %v4225_v32, %v4242_v58  ;;  %v9909_v40 = vsel %vm9798_vm10, %v9586_v39, %v4178_v45 }
 0x3dd   : > { %v9902_v19 = vmul.u32.u64.low %v9844_v54, %v4240_v30  ;;  %v9903_v59 = vmul.u32.u64.high %v9844_v54, %v4240_v30, %v9902_v19  ;;  %vm5970_vm12 = vcmp.lt.s32.totalorder %v5969_v31, 0  ;;  %v4244_v5 = vsel %vm4230_vm15, %v4241_v26, %v4243_v61 }
 0x3de   : > { %vm4000_vm14 = vcmp.gt.s32.totalorder %v3999_v43, 0  ;;  %v3956_v55 = vsel %vm5970_vm12, 0, %v5969_v31  ;;  %v9913_v0 = vmul.u32.u64.low %v9844_v54, %v4244_v5  ;;  %v9914_v44 = vmul.u32.u64.high %v9844_v54, %v4244_v5, %v9913_v0 }
 0x3df   : > { %v4001_v1 = vsel %vm4000_vm14, %v3999_v43, 0  ;;  %v3957_v32 = vsub.s32 32, %v3956_v55  ;;  %v3961_v41 = vsub.s32 4294967266, %v3956_v55  ;;  %v4236_v50 = vsel %vm4230_vm15, %v4233_v6, %v4235_v51 }
 0x3e0   : > { %v11116_v16 = vor.u32 8388608, %v9838_v21  ;;  %v3974_v20 = vsel %vm9877_vm9, 0, %v9893_v56  ;;  %v4255_v26 = vadd.s32 1, %v9903_v59  ;;  %v4003_v31 = vand.u32 31, %v4001_v1 }
 0x3e1   : > { %v9929_v43 = vsel %vm9885_vm2, %v11108_v60, %v11117_v15  ;;  %6823 = vcosq.f32 %v9909_v40  ;;  %v3958_v6 = vshll.u32 %v9865_v13, %v3956_v55  ;;  %v3959_v21 = vshrl.u32 %v9850_v18, %v3957_v32 }
 0x3e2   : > { %v9919_v63 = vshll.u32 %v11116_v16, 8  ;;  %v3962_v25 = vadd.s32 127, %v3961_v41  ;;  %v4252_v45 = vmul.u32 %v9844_v54, %v4236_v50  ;;  %vm4254_vm10 = vc.u32 %v9914_v44, %v9902_v19 }
 0x3e3   : > { %v9937_v52 = vshrl.u32 %v4001_v1, 5  ;;  %v4004_v30 = vsub.s32 32, %v4003_v31  ;;  %v3960_v58 = vor.u32 %v3959_v21, %v3958_v6  ;;  %v4256_v61 = vsel %vm4254_vm10, %v4255_v26, %v9903_v59 }
 0x3e4   : > { %v3963_v51 = vshll.u32 %v3962_v25, 23  ;;  %v4006_v5 = vshll.u32 %v10902_v28, %v4003_v31  ;;  %v4257_v0 = vadd.s32 %v4256_v61, %v4252_v45  ;;  %v4009_v18 = vshll.u32 %v10904_v37, %v4003_v31 }
 0x3e5   : > { %v4007_v13 = vshrl.u32 %v10904_v37, %v4004_v30  ;;  %v4010_v55 = vshrl.u32 %v10905_v22, %v4004_v30  ;;  %v4012_v32 = vshll.u32 %v10905_v22, %v4003_v31  ;;  %v4013_v1 = vshrl.u32 %v10911_v12, %v4004_v30 }
 0x3e6   : > { %v3964_v54 = vor.u32 4788187, %v3963_v51  ;;  %6825 = vcosq.f32 %v9929_v43  ;;  %v3967_v41 = vcvt.s32.f32 %v3960_v58  ;;  %vm4199_vm6 = vcmp.lt.s32.totalorder %v9699_v47, 0 }
 0x3e7   : > { %v4258_v59 = vadd.s32 536870912, %v4257_v0  ;;  %v4008_v50 = vor.u32 %v4007_v13, %v4006_v5  ;;  %v4011_v16 = vor.u32 %v4010_v55, %v4009_v18  ;;  %v4014_v15 = vor.u32 %v4013_v1, %v4012_v32 }
 0x3e8   : > { %v3965_v26 = vand.u32 2147483647, %v3964_v54  ;;  %v4015_v6 = vshll.u32 %v10911_v12, %v4003_v31  ;;  %v4016_v37 = vshrl.u32 %v10907_v34, %v4004_v30  ;;  %v4018_v25 = vshll.u32 %v10907_v34, %v4003_v31 }
 0x3e9   : > { %v4259_v21 = vshrl.u32 %v4258_v59, 30  ;;  %v4019_v22 = vshrl.u32 %v10906_v49, %v4004_v30  ;;  %vm4021_vm8 = vcmp.lt.s32.totalorder %v9937_v52, 1  ;;  %vm4022_vm5 = vcmp.lt.s32.totalorder %v9937_v52, 2 }
 0x3ea   : > { %v3968_v45 = vmul.f32 %v3967_v41, %v3965_v26  ;;  %v4017_v58 = vor.u32 %v4016_v37, %v4015_v6  ;;  %vm4024_vm3 = vcmp.lt.s32.totalorder %v9937_v52, 4  ;;  %v11118_v51 = vand.u32 2147483647, %v9699_v47 }
 0x3eb   : > { %v4260_v12 = vshll.u32 %v4259_v21, 30  ;;  %v4020_v5 = vor.u32 %v4019_v22, %v4018_v25  ;;  %vm4023_vm7 = vcmp.lt.s32.totalorder %v9937_v52, 3  ;;  %v4026_v34 = vsel %vm4024_vm3, %v4014_v15, 2102212464  ;;  %v9964_v49 = vpop.eup %6823  ;;  %v11126_v52 = vld [vmem:[#allocation37_spill] sm:$0xff] }
 0x3ec   : > { %vm9957_vm11 = vcmp.le.f32.partialorder %v11118_v51, 0.7853982  ;;  %v3969_v31 = vxor.u32 2147483648, %v3968_v45  ;;  %v4283_v13 = vsub.s32 4, %v4259_v21  ;;  %v4029_v18 = vsel %vm4021_vm8, %v4008_v50, %v4011_v16 }
 0x3ed   : > { %v4030_v55 = vsel %vm4024_vm3, %v4017_v58, 920167782  ;;  %v9970_v54 = vsub.s32 %v4257_v0, %v4260_v12  ;;  %v4005_v32 = vshrl.u32 %v10902_v28, %v4004_v30  ;;  %v4033_v41 = vsel %vm4021_vm8, %v4011_v16, %v4014_v15 }
 0x3ee   : > { %v4031_v1 = vsel %vm4023_vm7, %v4014_v15, %v4030_v55  ;;  %v3970_v59 = vsel %vm3887_vm13, %v3969_v31, %v3968_v45  ;;  %v4034_v6 = vsel %vm4024_vm3, %v4020_v5, 1326507024  ;;  %v1062_v0 = vsel %vm9885_vm2, 0, %v9856_v38  ;;  %v11121_v31 = vld [vmem:[#allocation22_spill] sm:$0xff] }
 0x3ef   : > { %v4032_v26 = vsel %vm4022_vm5, %v4029_v18, %v4031_v1  ;;  %v4263_v28 = vsub.s32 0, %v9970_v54  ;;  %v4025_v30 = vsel %vm4021_vm8, %v4005_v32, %v4008_v50  ;;  %v4027_v15 = vsel %vm4023_vm7, %v4011_v16, %v4026_v34 }
 0x3f0   : > { %v4035_v37 = vsel %vm4023_vm7, %v4017_v58, %v4034_v6  ;;  %v9993_v25 = vpop.eup %6825  ;;  %v4284_v22 = vsel %vm4199_vm6, %v4283_v13, %v4259_v21  ;;  %v10000_v38 = vmul.u32.u64.low %v9919_v63, %v4032_v26  ;;  %v10001_v45 = vmul.u32.u64.high %v9919_v63, %v4032_v26, %v10000_v38 }
 0x3f1   : > { %v4036_v46 = vsel %vm4022_vm5, %v4033_v41, %v4035_v37  ;;  %v3973_v50 = vsel %vm9877_vm9, %v9669_v36, %v3970_v59  ;;  %v5980_v16 = vmin.u32 %v4263_v28, %v9970_v54  ;;  %v10015_v21 = vadd.s32 3, %v3974_v20 }
 0x3f2   : > { %v10008_v58 = vmul.u32.u64.low %v9919_v63, %v4036_v46  ;;  %v10009_v51 = vmul.u32.u64.high %v9919_v63, %v4036_v46, %v10008_v58  ;;  %v4028_v12 = vsel %vm4022_vm5, %v4025_v30, %v4027_v15  ;;  %6827 = vsinq.f32 %v9929_v43 }
 0x3f3   : > { %v1066_v5 = vadd.s32 3, %v1062_v0  ;;  %6829 = vsinq.f32 %v9909_v40  ;;  %v4265_v34 = vclz %v5980_v16  ;;  %v11122_v13 = vand.u32 2147483647, %v11121_v31 }
 0x3f4   : > { %v1163_v55 = vsub.s32 4, %v11125_v29  ;;  %6831 = vcosq.f32 %v3973_v50  ;;  %v4286_v56 = vsel %vm9957_vm11, 0, %v4284_v22  ;;  %v4047_v20 = vadd.s32 1, %v10001_v45 }
 0x3f5   : > { %vm10023_vm13 = vcmp.le.f32.partialorder %v11122_v13, 0.7853982  ;;  %v5981_v43 = vadd.s32 4294967294, %v4265_v34  ;;  %v4044_v32 = vmul.u32 %v9919_v63, %v4028_v12  ;;  %vm4046_vm9 = vc.u32 %v10009_v51, %v10000_v38  ;;  %v11130_v34 = vld [vmem:[#allocation30_spill] sm:$0xff] }
 0x3f6   : > { %v1165_v40 = vsel %vm10023_vm13, %v11121_v31, %v11126_v52  ;;  %v1164_v1 = vsel %vm1079_vm4, %v1163_v55, %v11125_v29  ;;  %6833 = vsinq.f32 %v3973_v50  ;;  %v4253_v41 = vadd.s32 %v9902_v19, %v9914_v44  ;;  %v11131_v29 = vld [vmem:[#allocation33_spill] sm:$0xff] }
 0x3f7   : > { %vm3991_vm2 = vcmp.lt.s32.totalorder %v9789_v27, 0  ;;  %v4048_v59 = vsel %vm4046_vm9, %v4047_v20, %v10001_v45  ;;  %v1067_v26 = vand.u32 3, %v1066_v5  ;;  %vm5982_vm15 = vcmp.lt.s32.totalorder %v5981_v43, 0 }
 0x3f8   : > { %v11127_v6 = vand.u32 2147483647, %v9789_v27  ;;  %v4049_v0 = vadd.s32 %v4048_v59, %v4044_v32  ;;  %v1166_v28 = vsel %vm10023_vm13, 0, %v1164_v1  ;;  %6835 = vcosq.f32 %v1165_v40 }
 0x3f9   : > { %v4268_v30 = vsel %vm5982_vm15, 0, %v5981_v43  ;;  %v10052_v15 = vadd.s32 3, %v4286_v56  ;;  %6837 = vsinq.f32 %v1165_v40  ;;  %v1170_v19 = vadd.s32 3, %v1166_v28  ;;  %v11132_v56 = vld [vmem:[#allocation32_spill] sm:$0xff]  ;;  %v11133_v28 = vld [vmem:[#allocation19_spill] sm:$0xff] }
 0x3fa   : > { %vm10046_vm12 = vcmp.le.f32.partialorder %v11127_v6, 0.7853982  ;;  %v4269_v44 = vsub.s32 32, %v4268_v30  ;;  %v4273_v37 = vsub.s32 4294967266, %v4268_v30  ;;  %v4050_v22 = vadd.s32 536870912, %v4049_v0 }
 0x3fb   : > { %v1073_v46 = vxor.u32 2147483648, %v9993_v25  ;;  %v4270_v45 = vshll.u32 %v9970_v54, %v4268_v30  ;;  %v10057_v50 = vadd.s32 %v10000_v38, %v10009_v51  ;;  %vm1065_vm4 = vweird.f32 %v11108_v60 }
 0x3fc   : > { %vm1068_vm14 = vcmp.lt.s32.totalorder %v1067_v26, 2  ;;  %v1171_v16 = vand.u32 3, %v1170_v19  ;;  %v4271_v58 = vshrl.u32 %v4253_v41, %v4269_v44  ;;  %v4274_v12 = vadd.s32 127, %v4273_v37  ;;  %v6828_v18 = vpop.eup %6827 }
 0x3fd   : > { %v4051_v5 = vshrl.u32 %v4050_v22, 30  ;;  %v1275_v13 = vand.u32 3, %v11130_v34  ;;  %vm1069_vm10 = vcmp.eq.s32.totalorder %v1067_v26, 0  ;;  %vm1072_vm8 = vcmp.eq.s32.totalorder %v1067_v26, 2  ;;  %v10063_v54 = vpop.eup %6829 }
 0x3fe   : > { %v1278_v55 = vxor.u32 2147483648, %v11131_v29  ;;  %v1281_v20 = vxor.u32 2147483648, %v11132_v56  ;;  %v4272_v38 = vor.u32 %v4271_v58, %v4270_v45  ;;  %v4275_v51 = vshll.u32 %v4274_v12, 23  ;;  %v10065_v43 = vpop.eup %6831 }
 0x3ff   : > { %v4052_v52 = vshll.u32 %v4051_v5, 30  ;;  %v4075_v40 = vsub.s32 4, %v4051_v5  ;;  %vm1172_vm5 = vcmp.lt.s32.totalorder %v1171_v16, 2  ;;  %v1070_v32 = vxor.u32 2147483648, %v6828_v18 }
 0x400   : > { %v1074_v1 = vsel %vm1072_vm8, %v1073_v46, %v6828_v18  ;;  %vm1169_vm3 = vweird.f32 %v11121_v31  ;;  %vm1173_vm7 = vcmp.eq.s32.totalorder %v1171_v16, 0  ;;  %vm1176_vm13 = vcmp.eq.s32.totalorder %v1171_v16, 2  ;;  %v10073_v30 = vpop.eup %6833 }
 0x401   : > { %v4276_v41 = vor.u32 4788187, %v4275_v51  ;;  %v10068_v59 = vsub.s32 %v4049_v0, %v4052_v52  ;;  %v4076_v6 = vsel %vm3991_vm2, %v4075_v40, %v4051_v5  ;;  %vm4342_vm9 = vcmask 392192  }
 0x402   : > { %vm1273_vm15 = vweird.f32 %v11133_v28  ;;  %vm1276_vm1 = vcmp.lt.s32.totalorder %v1275_v13, 2  ;;  %v4078_v19 = vsel %vm10046_vm12, 0, %v4076_v6  ;;  %v1071_v44 = vsel %vm1069_vm10, %v9993_v25, %v1070_v32  ;;  %v6836_v37 = vpop.eup %6835  ;;  %v11134_v32 = vld [vmem:[#allocation31_spill] sm:$0xff]  ;;  %v11136_v6 = vld [vmem:[#allocation38_spill] sm:$0xff] }
 0x403   : > { %vm1277_vm8 = vcmp.eq.s32.totalorder %v1275_v13, 0  ;;  %vm1280_vm0 = vcmp.eq.s32.totalorder %v1275_v13, 2  ;;  %v4277_v0 = vand.u32 2147483647, %v4276_v41  ;;  %v4279_v22 = vcvt.s32.f32 %v4272_v38  ;;  %v6838_v58 = vpop.eup %6837 }
 0x404   : > { %v4055_v46 = vsub.s32 0, %v10068_v59  ;;  %v1075_v45 = vsel %vm1068_vm14, %v1071_v44, %v1074_v1  ;;  %v10081_v12 = vadd.s32 3, %v4078_v19  ;;  %v1177_v5 = vxor.u32 2147483648, %v6836_v37  ;;  %v11135_v1 = vld [vmem:[#allocation39_spill] sm:$0xff] }
 0x405   : > { %v1279_v34 = vsel %vm1277_vm8, %v11132_v56, %v1278_v55  ;;  %v1282_v18 = vsel %vm1280_vm0, %v1281_v20, %v11131_v29  ;;  %v4280_v51 = vmul.f32 %v4279_v22, %v4277_v0  ;;  %v1076_v52 = vsel %vm1065_vm4, nan, %v1075_v45  ;;  %v11137_v20 = vld [vmem:[#allocation21_spill] sm:$0xff] }
 0x406   : > { %v5972_v25 = vmin.u32 %v4055_v46, %v10068_v59  ;;  %v1174_v40 = vxor.u32 2147483648, %v6838_v58  ;;  %v1178_v38 = vsel %vm1176_vm13, %v1177_v5, %v6838_v58  ;;  %v1379_v26 = vand.u32 3, %v11134_v32  ;;  %v11139_v5 = vld [vmem:[#allocation43_spill] sm:$0xff]  ;;  %v11142_v32 = vld [vmem:[#allocation48_spill] sm:$0xff] }
 0x407   : > { %v1382_v41 = vxor.u32 2147483648, %v11135_v1  ;;  %v1385_v19 = vxor.u32 2147483648, %v11136_v6  ;;  %v4281_v44 = vxor.u32 2147483648, %v4280_v51  ;;  %v1283_v29 = vsel %vm1276_vm1, %v1279_v34, %v1282_v18  ;;  %v11140_v18 = vld [vmem:[#allocation49_spill] sm:$0xff] }
 0x408   : > { %v4057_v39 = vclz %v5972_v25  ;;  %v1175_v55 = vsel %vm1173_vm7, %v6836_v37, %v1174_v40  ;;  %vm1377_vm0 = vweird.f32 %v11137_v20  ;;  %vm1381_vm4 = vcmp.eq.s32.totalorder %v1379_v26, 0 }
 0x409   : > { %v1179_v56 = vsel %vm1172_vm5, %v1175_v55, %v1178_v38  ;;  %vm1384_vm14 = vcmp.eq.s32.totalorder %v1379_v26, 2  ;;  %v4282_v60 = vsel %vm4199_vm6, %v4281_v44, %v4280_v51  ;;  %v1383_v46 = vsel %vm1381_vm4, %v11136_v6, %v1382_v41  ;;  %v11141_v38 = vld [vmem:[#allocation25_spill] sm:$0xff]  ;;  %v11144_v55 = vld [vmem:[#allocation58_spill] sm:$0xff] }
 0x40a   : > { %v5973_v0 = vadd.s32 4294967294, %v4057_v39  ;;  %v1180_v22 = vsel %vm1169_vm3, nan, %v1179_v56  ;;  %v1284_v13 = vsel %vm1273_vm15, nan, %v1283_v29  ;;  %vm1380_vm1 = vcmp.lt.s32.totalorder %v1379_v26, 2 }
 0x40b   : > { %v4302_v45 = vpack.c.bf16 %v1180_v22, %v1076_v52  ;;  %v1386_v16 = vsel %vm1384_vm14, %v1385_v19, %v11135_v1  ;;  %vm11138_vm5 = vcmask 1041408   ;;  %v1483_v34 = vand.u32 3, %v11139_v5  ;;  %v11143_v19 = vld [vmem:[#allocation51_spill] sm:$0xff]  ;;  %v11146_v22 = vld [vmem:[#allocation29_spill] sm:$0xff]  ;;  %v11148_v5 = vld [vmem:[#allocation46_spill] sm:$0xff] }
 0x40c   : > { %vm5974_vm10 = vcmp.lt.s32.totalorder %v5973_v0, 0  ;;  %v1387_v37 = vsel %vm1380_vm1, %v1383_v46, %v1386_v16  ;;  %v4553_v58 = vsel %vm11138_vm5, %v9663_v62, 0  ;;  %v4285_v39 = vsel %vm9957_vm11, %v9699_v47, %v4282_v60 }
 0x40d   : > { %v4060_v31 = vsel %vm5974_vm10, 0, %v5973_v0  ;;  %6249 = vmatprep.mubr.msk.bf16.mxu1 %vm4342_vm9, %v4302_v45  ;;  %v1388_v28 = vsel %vm1377_vm0, nan, %v1387_v37  ;;  %v1486_v51 = vxor.u32 2147483648, %v11140_v18  ;;  %vm1481_vm6 = vweird.f32 %v11141_v38  ;;  %v11147_v37 = vld [vmem:[#allocation40_spill] sm:$0xff] }
 0x40e   : > { %v4061_v25 = vsub.s32 32, %v4060_v31  ;;  %v4065_v52 = vsub.s32 4294967266, %v4060_v31  ;;  %v4303_v40 = vpack.c.bf16 %v1388_v28, %v1284_v13  ;;  %v4062_v62 = vshll.u32 %v10068_v59, %v4060_v31  ;;  %v11145_v59 = vld [vmem:[#allocation56_spill] sm:$0xff] }
 0x40f   : > { %vm1484_vm3 = vcmp.lt.s32.totalorder %v1483_v34, 2  ;;  %vm1485_vm7 = vcmp.eq.s32.totalorder %v1483_v34, 0  ;;  %v1489_v61 = vxor.u32 2147483648, %v11142_v32  ;;  %vm1488_vm11 = vcmp.eq.s32.totalorder %v1483_v34, 2  ;;  %v11149_v34 = vld [vmem:[#allocation44_spill] sm:$0xff] }
 0x410   : > { %v4063_v26 = vshrl.u32 %v10057_v50, %v4061_v25  ;;  %v4066_v1 = vadd.s32 127, %v4065_v52  ;;  %6250 = vmatmul.mubr.msk.bf16.vlgmr.msra.gmra.mrb[0].mxu1 %vm4342_vm9, %v4303_v40  ;;  %v1487_v41 = vsel %vm1485_vm7, %v11142_v32, %v1486_v51  ;;  %v1587_v44 = vand.u32 3, %v11143_v19  ;;  %v11150_v52 = vld [vmem:[#allocation50_spill] sm:$0xff] }
 0x411   : > { %6282 = vmatpush3.bf16.msra.mxu1 %v4553_v58  ;;  %v1490_v6 = vsel %vm1488_vm11, %v1489_v61, %v11140_v18  ;;  %v1590_v29 = vxor.u32 2147483648, %v11144_v55  ;;  %v1593_v56 = vxor.u32 2147483648, %v11145_v59  ;;  %6839 = vcosq.f32 %v4285_v39 }
 0x412   : > { %v4064_v20 = vor.u32 %v4063_v26, %v4062_v62  ;;  %v4067_v60 = vshll.u32 %v4066_v1, 23  ;;  %v1491_v50 = vsel %vm1484_vm3, %v1487_v41, %v1490_v6  ;;  %vm1585_vm13 = vweird.f32 %v11146_v22  ;;  %v11151_v26 = vld [vmem:[#allocation24_spill] sm:$0xff]  ;;  %v11153_v6 = vld [vmem:[#allocation55_spill] sm:$0xff] }
 0x413   : > { %v1492_v0 = vsel %vm1481_vm6, nan, %v1491_v50  ;;  %vm1589_vm15 = vcmp.eq.s32.totalorder %v1587_v44, 0  ;;  %vm1592_vm8 = vcmp.eq.s32.totalorder %v1587_v44, 2  ;;  %vm1588_vm0 = vcmp.lt.s32.totalorder %v1587_v44, 2  ;;  %v11152_v41 = vld [vmem:[#allocation28_spill] sm:$0xff]  ;;  %v11157_v50 = vld [vmem:[#allocation65_spill] sm:$0xff] }
 0x414   : > { %v4068_v46 = vor.u32 4788187, %v4067_v60  ;;  %v1591_v45 = vsel %vm1589_vm15, %v11145_v59, %v1590_v29  ;;  %v1594_v13 = vsel %vm1592_vm8, %v1593_v56, %v11144_v55  ;;  %v1691_v58 = vand.u32 3, %v11147_v37  ;;  %v11155_v59 = vld [vmem:[#allocation57_spill] sm:$0xff] }
 0x415   : > { %v1595_v16 = vsel %vm1588_vm0, %v1591_v45, %v1594_v13  ;;  %v1694_v31 = vxor.u32 2147483648, %v11148_v5  ;;  %v1697_v28 = vxor.u32 2147483648, %v11149_v34  ;;  %v4071_v51 = vcvt.s32.f32 %v4064_v20  ;;  %v11156_v20 = vld [vmem:[#allocation66_spill] sm:$0xff] }
 0x416   : > { %v4069_v18 = vand.u32 2147483647, %v4068_v46  ;;  %v1596_v25 = vsel %vm1585_vm13, nan, %v1595_v16  ;;  %v1795_v40 = vand.u32 3, %v11150_v52  ;;  %6841 = vsinq.f32 %v4285_v39  ;;  %v11154_v39 = vld [vmem:[#allocation54_spill] sm:$0xff]  ;;  %v11161_v52 = vld [vmem:[#allocation72_spill] sm:$0xff] }
 0x417   : > { %v4304_v38 = vpack.c.bf16 %v1596_v25, %v1492_v0  ;;  %vm1693_vm4 = vcmp.eq.s32.totalorder %v1691_v58, 0  ;;  %vm1696_vm14 = vcmp.eq.s32.totalorder %v1691_v58, 2  ;;  %vm1692_vm1 = vcmp.lt.s32.totalorder %v1691_v58, 2  ;;  %v11158_v58 = vld [vmem:[#allocation63_spill] sm:$0xff]  ;;  %v11160_v25 = vld [vmem:[#allocation42_spill] sm:$0xff] }
 0x418   : > { %v4072_v62 = vmul.f32 %v4071_v51, %v4069_v18  ;;  %v1695_v32 = vsel %vm1693_vm4, %v11149_v34, %v1694_v31  ;;  %v1698_v61 = vsel %vm1696_vm14, %v1697_v28, %v11148_v5  ;;  %vm1689_vm10 = vweird.f32 %v11151_v26  ;;  %v11159_v34 = vld [vmem:[#allocation35_spill] sm:$0xff] }
 0x419   : > { %6253 = vmatprep.mubr.msk.bf16.mxu1 %vm4342_vm9, %v4304_v38  ;;  %v1699_v1 = vsel %vm1692_vm1, %v1695_v32, %v1698_v61  ;;  %vm1793_vm5 = vweird.f32 %v11152_v41  ;;  %v1798_v19 = vxor.u32 2147483648, %v11153_v6  ;;  %vm1797_vm6 = vcmp.eq.s32.totalorder %v1795_v40, 0  ;;  %v11163_v61 = vld [vmem:[#allocation53_spill] sm:$0xff]  ;;  %v11164_v41 = vld [vmem:[#allocation64_spill] sm:$0xff] }
 0x41a   : > { %v4073_v44 = vxor.u32 2147483648, %v4072_v62  ;;  %vm1800_vm3 = vcmp.eq.s32.totalorder %v1795_v40, 2  ;;  %v1801_v55 = vxor.u32 2147483648, %v11154_v39  ;;  %v1899_v56 = vand.u32 3, %v11155_v59 }
 0x41b   : > { %v1799_v29 = vsel %vm1797_vm6, %v11154_v39, %v1798_v19  ;;  %v1902_v60 = vxor.u32 2147483648, %v11156_v20  ;;  %v1905_v0 = vxor.u32 2147483648, %v11157_v50  ;;  %v10145_v22 = vpop.eup %6839  ;;  %v1700_v45 = vsel %vm1689_vm10, nan, %v1699_v1  ;;  %v11165_v19 = vld [vmem:[#allocation61_spill] sm:$0xff] }
 0x41c   : > { %v4074_v46 = vsel %vm3991_vm2, %v4073_v44, %v4072_v62  ;;  %vm1796_vm7 = vcmp.lt.s32.totalorder %v1795_v40, 2  ;;  %v1802_v13 = vsel %vm1800_vm3, %v1801_v55, %v11153_v6  ;;  %vm1901_vm11 = vcmp.eq.s32.totalorder %v1899_v56, 0  ;;  %v11162_v62 = vld [vmem:[#allocation71_spill] sm:$0xff] }
 0x41d   : > { %v4077_v16 = vsel %vm10046_vm12, %v9789_v27, %v4074_v46  ;;  %v1803_v37 = vsel %vm1796_vm7, %v1799_v29, %v1802_v13  ;;  %v2003_v5 = vand.u32 3, %v11158_v58  ;;  %vm1897_vm13 = vweird.f32 %v11159_v34  ;;  %v11170_v34 = vld [vmem:[#allocation41_spill] sm:$0xff] }
 0x41e   : > { %v1804_v31 = vsel %vm1793_vm5, nan, %v1803_v37  ;;  %v1903_v28 = vsel %vm1901_vm11, %v11157_v50, %v1902_v60  ;;  %vm1904_vm2 = vcmp.eq.s32.totalorder %v1899_v56, 2  ;;  %6843 = vcosq.f32 %v4077_v16  ;;  %v11169_v37 = vld [vmem:[#allocation34_spill] sm:$0xff] }
 0x41f   : > { %v4305_v18 = vpack.c.bf16 %v1804_v31, %v1700_v45  ;;  %vm1900_vm15 = vcmp.lt.s32.totalorder %v1899_v56, 2  ;;  %v1906_v51 = vsel %vm1904_vm2, %v1905_v0, %v11156_v20  ;;  %6845 = vsinq.f32 %v4077_v16  ;;  %v11166_v20 = vld [vmem:[#allocation62_spill] sm:$0xff]  ;;  %v11167_v0 = vld [vmem:[#allocation69_spill] sm:$0xff]  ;;  %v11168_v45 = vld [vmem:[#allocation67_spill] sm:$0xff] }
 0x420   : > { %v1907_v63 = vsel %vm1900_vm15, %v1903_v28, %v1906_v51  ;;  %vm2001_vm12 = vweird.f32 %v11160_v25  ;;  %v2006_v40 = vxor.u32 2147483648, %v11161_v52  ;;  %v10161_v38 = vpop.eup %6841  ;;  %vm2004_vm8 = vcmp.lt.s32.totalorder %v2003_v5, 2  ;;  %v6704_v31 = vld [vmem:[%s10736_s6 + $0x8] sm:$0xff]   ;;  %v11172_v25 = vld [vmem:[#allocation77_spill] sm:$0xff] }
 0x421   : > { %6254 = vmatmul.mubr.msk.bf16.gmra.mrb[4].mxu1 %vm4342_vm9, %v4305_v18  ;;  %vm2005_vm0 = vcmp.eq.s32.totalorder %v2003_v5, 0  ;;  %v2009_v32 = vxor.u32 2147483648, %v11162_v62  ;;  %v2107_v26 = vand.u32 3, %v11163_v61  ;;  %vm2008_vm4 = vcmp.eq.s32.totalorder %v2003_v5, 2  ;;  %v6703_v5 = vld [vmem:[%s10736_s6] sm:$0xff]   ;;  %v11171_v18 = vld [vmem:[#allocation74_spill] sm:$0xff] }
 0x422   : > { %v2007_v1 = vsel %vm2005_vm0, %v11162_v62, %v2006_v40  ;;  %v2110_v6 = vxor.u32 2147483648, %v11164_v41  ;;  %v2113_v44 = vxor.u32 2147483648, %v11165_v19  ;;  %v1908_v39 = vsel %vm1897_vm13, nan, %v1907_v63  ;;  %v11173_v40 = vld [vmem:[#allocation76_spill] sm:$0xff]  ;;  %6315 = vmatprep.subr.bf16.mxu0 %v6703_v5 }
 0x423   : > { %v2010_v55 = vsel %vm2008_vm4, %v2009_v32, %v11161_v52  ;;  %vm2109_vm14 = vcmp.eq.s32.totalorder %v2107_v26, 0  ;;  %vm2112_vm1 = vcmp.eq.s32.totalorder %v2107_v26, 2  ;;  %v2211_v60 = vand.u32 3, %v11166_v20  ;;  %6316 = vmatpush3.bf16.msra.mxu0 %v6703_v5  ;;  %v11175_v20 = vld [vmem:[#allocation52_spill] sm:$0xff] }
 0x424   : > { %v2011_v29 = vsel %vm2004_vm8, %v2007_v1, %v2010_v55  ;;  %v2111_v59 = vsel %vm2109_vm14, %v11165_v19, %v2110_v6  ;;  %v2114_v56 = vsel %vm2112_vm1, %v2113_v44, %v11164_v41  ;;  %vm2108_vm10 = vcmp.lt.s32.totalorder %v2107_v26, 2  ;;  %6317 = vmatprep.subr.bf16.mxu0 %v6704_v31 }
 0x425   : > { %v2012_v50 = vsel %vm2001_vm12, nan, %v2011_v29  ;;  %v2214_v46 = vxor.u32 2147483648, %v11167_v0  ;;  %v2217_v13 = vxor.u32 2147483648, %v11168_v45  ;;  %vm2105_vm5 = vweird.f32 %v11169_v37 }
 0x426   : > { %v4306_v16 = vpack.c.bf16 %v2012_v50, %v1908_v39  ;;  %v2115_v58 = vsel %vm2108_vm10, %v2111_v59, %v2114_v56  ;;  %vm2213_vm6 = vcmp.eq.s32.totalorder %v2211_v60, 0  ;;  %vm2209_vm3 = vweird.f32 %v11170_v34  ;;  %v6705_v39 = vld [vmem:[%s10736_s6 + $0x10] sm:$0xff]   ;;  %v11174_v59 = vld [vmem:[#allocation83_spill] sm:$0xff]  ;;  %v6706_v34 = vld [vmem:[%s10736_s6 + $0x18] sm:$0xff]  }
 0x427   : > { %v2215_v28 = vsel %vm2213_vm6, %v11168_v45, %v2214_v46  ;;  %vm2216_vm7 = vcmp.eq.s32.totalorder %v2211_v60, 2  ;;  %v2315_v51 = vand.u32 3, %v11171_v18  ;;  %vm2212_vm11 = vcmp.lt.s32.totalorder %v2211_v60, 2  ;;  %6318 = vmatpush3.bf16.msra.mxu0 %v6704_v31  ;;  %v11177_v45 = vld [vmem:[#allocation60_spill] sm:$0xff] }
 0x428   : > { %6257 = vmatprep.mubr.msk.bf16.mxu1 %vm4342_vm9, %v4306_v16  ;;  %v2218_v63 = vsel %vm2216_vm7, %v2217_v13, %v11167_v0  ;;  %v2318_v52 = vxor.u32 2147483648, %v11172_v25  ;;  %v2321_v62 = vxor.u32 2147483648, %v11173_v40  ;;  %v10193_v32 = vpop.eup %6843  ;;  %v2116_v61 = vsel %vm2105_vm5, nan, %v2115_v58  ;;  %v11176_v0 = vld [vmem:[#allocation70_spill] sm:$0xff]  ;;  %v11178_v16 = vld [vmem:[#allocation75_spill] sm:$0xff]  ;;  %v11179_v58 = vld [vmem:[#allocation73_spill] sm:$0xff]  ;;  %6319 = vmatprep.subr.bf16.mxu0 %v6705_v39 }
 0x429   : > { %v2219_v26 = vsel %vm2212_vm11, %v2215_v28, %v2218_v63  ;;  %vm2317_vm13 = vcmp.eq.s32.totalorder %v2315_v51, 0  ;;  %vm2320_vm2 = vcmp.eq.s32.totalorder %v2315_v51, 2  ;;  %v10197_v1 = vpop.eup %6845  ;;  %v2419_v44 = vand.u32 3, %v8869_v11  ;;  %v11180_v63 = vld [vmem:[#allocation79_spill] sm:$0xff] }
 0x42a   : > { %v2220_v41 = vsel %vm2209_vm3, nan, %v2219_v26  ;;  %v2319_v6 = vsel %vm2317_vm13, %v11173_v40, %v2318_v52  ;;  %v2322_v19 = vsel %vm2320_vm2, %v2321_v62, %v11172_v25  ;;  %vm2316_vm15 = vcmp.lt.s32.totalorder %v2315_v51, 2  ;;  %v11181_v52 = vld [vmem:[#allocation27_spill] sm:$0xff]  ;;  %v11182_v40 = vld [vmem:[#allocation82_spill] sm:$0xff] }
 0x42b   : > { %v4307_v55 = vpack.c.bf16 %v2220_v41, %v2116_v61  ;;  %v2422_v29 = vxor.u32 2147483648, %v8973_v35  ;;  %v2425_v56 = vxor.u32 2147483648, %v11174_v59  ;;  %vm2313_vm12 = vweird.f32 %v11175_v20  ;;  %v11183_v61 = vld [vmem:[#allocation81_spill] sm:$0xff]  ;;  %6320 = vmatpush3.bf16.msra.mxu0 %v6705_v39  ;;  %v11184_v39 = vld [vmem:[#allocation59_spill] sm:$0xff] }
 0x42c   : > { %v2323_v60 = vsel %vm2316_vm15, %v2319_v6, %v2322_v19  ;;  %vm2421_vm8 = vcmp.eq.s32.totalorder %v2419_v44, 0  ;;  %vm2424_vm0 = vcmp.eq.s32.totalorder %v2419_v44, 2  ;;  %vm2420_vm4 = vcmp.lt.s32.totalorder %v2419_v44, 2  ;;  %6321 = vmatprep.subr.bf16.mxu0 %v6706_v34  ;;  %v6707_v6 = vld [vmem:[%s10736_s6 + $0x20] sm:$0xff]  }
 0x42d   : > { %6258 = vmatmul.mubr.msk.bf16.gmra.mrb[8].mxu1 %vm4342_vm9, %v4307_v55  ;;  %v2423_v11 = vsel %vm2421_vm8, %v11174_v59, %v2422_v29  ;;  %v2426_v50 = vsel %vm2424_vm0, %v2425_v56, %v8973_v35  ;;  %v2523_v46 = vand.u32 3, %v11176_v0  ;;  %vm2417_vm14 = vweird.f32 %v11177_v45  ;;  %v11185_v56 = vld [vmem:[#allocation89_spill] sm:$0xff]  ;;  %v6708_v45 = vld [vmem:[%s10736_s6 + $0x28] sm:$0xff]  }
 0x42e   : > { %v2427_v13 = vsel %vm2420_vm4, %v2423_v11, %v2426_v50  ;;  %v2526_v37 = vxor.u32 2147483648, %v11178_v16  ;;  %v2529_v5 = vxor.u32 2147483648, %v11179_v58  ;;  %v2324_v28 = vsel %vm2313_vm12, nan, %v2323_v60 }
 0x42f   : > { %v2428_v18 = vsel %vm2417_vm14, nan, %v2427_v13  ;;  %vm2525_vm1 = vcmp.eq.s32.totalorder %v2523_v46, 0  ;;  %vm2528_vm10 = vcmp.eq.s32.totalorder %v2523_v46, 2  ;;  %v2627_v25 = vand.u32 3, %v11180_v63  ;;  %6322 = vmatpush3.bf16.msra.mxu0 %v6706_v34  ;;  %v11186_v13 = vld [vmem:[#allocation45_spill] sm:$0xff]  ;;  %v11188_v34 = vld [vmem:[#allocation88_spill] sm:$0xff] }
 0x430   : > { %v4308_v35 = vpack.c.bf16 %v2428_v18, %v2324_v28  ;;  %v2527_v31 = vsel %vm2525_vm1, %v11179_v58, %v2526_v37  ;;  %v2530_v51 = vsel %vm2528_vm10, %v2529_v5, %v11178_v16  ;;  %vm2521_vm5 = vweird.f32 %v11181_v52  ;;  %6323 = vmatprep.subr.bf16.mxu0 %v6707_v6  ;;  %v11187_v58 = vld [vmem:[#allocation80_spill] sm:$0xff]  ;;  %v11189_v18 = vld [vmem:[#allocation87_spill] sm:$0xff]  ;;  %v6709_v63 = vld [vmem:[%s10736_s6 + $0x30] sm:$0xff]  }
 0x431   : > { %vm2524_vm6 = vcmp.lt.s32.totalorder %v2523_v46, 2  ;;  %v2630_v62 = vxor.u32 2147483648, %v11182_v40  ;;  %v2633_v26 = vxor.u32 2147483648, %v11183_v61  ;;  %vm2628_vm3 = vcmp.lt.s32.totalorder %v2627_v25, 2 }
 0x432   : > { %6261 = vmatprep.mubr.msk.bf16.mxu1 %vm4342_vm9, %v4308_v35  ;;  %v2531_v41 = vsel %vm2524_vm6, %v2527_v31, %v2530_v51  ;;  %vm2629_vm7 = vcmp.eq.s32.totalorder %v2627_v25, 0  ;;  %vm2632_vm11 = vcmp.eq.s32.totalorder %v2627_v25, 2  ;;  %v2731_v55 = vand.u32 3, %v9048_v10 }
 0x433   : > { %v2631_v19 = vsel %vm2629_vm7, %v11183_v61, %v2630_v62  ;;  %v2634_v44 = vsel %vm2632_vm11, %v2633_v26, %v11182_v40  ;;  %v2734_v29 = vxor.u32 2147483648, %v9167_v48  ;;  %vm2625_vm13 = vweird.f32 %v11184_v39  ;;  %6324 = vmatpush3.bf16.msra.mxu0 %v6707_v6  ;;  %v11190_v40 = vld [vmem:[#allocation86_spill] sm:$0xff]  ;;  %v11191_v26 = vld [vmem:[#allocation95_spill] sm:$0xff] }
 0x434   : > { %v2635_v59 = vsel %vm2628_vm3, %v2631_v19, %v2634_v44  ;;  %v2737_v20 = vxor.u32 2147483648, %v11185_v56  ;;  %v2835_v60 = vand.u32 3, %v9209_v2  ;;  %v2532_v11 = vsel %vm2521_vm5, nan, %v2531_v41  ;;  %6325 = vmatprep.subr.bf16.mxu0 %v6708_v45  ;;  %v11192_v41 = vld [vmem:[#allocation94_spill] sm:$0xff]  ;;  %v11193_v44 = vld [vmem:[#allocation68_spill] sm:$0xff] }
 0x435   : > { %v2636_v50 = vsel %vm2625_vm13, nan, %v2635_v59  ;;  %vm2733_vm2 = vcmp.eq.s32.totalorder %v2731_v55, 0  ;;  %vm2736_vm15 = vcmp.eq.s32.totalorder %v2731_v55, 2  ;;  %vm2732_vm12 = vcmp.lt.s32.totalorder %v2731_v55, 2 }
 0x436   : > { %v4309_v0 = vpack.c.bf16 %v2636_v50, %v2532_v11  ;;  %v2735_v10 = vsel %vm2733_vm2, %v11185_v56, %v2734_v29  ;;  %v2738_v46 = vsel %vm2736_vm15, %v2737_v20, %v9167_v48  ;;  %vm2729_vm8 = vweird.f32 %v11186_v13  ;;  %v11194_v29 = vld [vmem:[#allocation47_spill] sm:$0xff]  ;;  %v11195_v13 = vld [vmem:[#allocation104_spill] sm:$0xff] }
 0x437   : > { %v2739_v2 = vsel %vm2732_vm12, %v2735_v10, %v2738_v46  ;;  %vm2833_vm0 = vweird.f32 %v8735_v4  ;;  %v2838_v16 = vxor.u32 2147483648, %v9292_v14  ;;  %vm2836_vm4 = vcmp.lt.s32.totalorder %v2835_v60, 2  ;;  %6326 = vmatpush3.bf16.msra.mxu0 %v6708_v45 }
 0x438   : > { %6262 = vmatmul.mubr.msk.bf16.gmra.mrb[12].mxu1 %vm4342_vm9, %v4309_v0  ;;  %vm2837_vm14 = vcmp.eq.s32.totalorder %v2835_v60, 0  ;;  %v2841_v37 = vxor.u32 2147483648, %v9287_v57  ;;  %v2939_v48 = vand.u32 3, %v11187_v58  ;;  %vm2840_vm1 = vcmp.eq.s32.totalorder %v2835_v60, 2  ;;  %6327 = vmatprep.subr.bf16.mxu0 %v6709_v63 }
 0x439   : > { %v2839_v5 = vsel %vm2837_vm14, %v9287_v57, %v2838_v16  ;;  %v2942_v28 = vxor.u32 2147483648, %v11188_v34  ;;  %v2945_v35 = vxor.u32 2147483648, %v11189_v18  ;;  %v2740_v31 = vsel %vm2729_vm8, nan, %v2739_v2  ;;  %v11196_v16 = vld [vmem:[#allocation84_spill] sm:$0xff] }
 0x43a   : > { %v2842_v51 = vsel %vm2840_vm1, %v2841_v37, %v9292_v14  ;;  %vm2941_vm10 = vcmp.eq.s32.totalorder %v2939_v48, 0  ;;  %vm2944_vm5 = vcmp.eq.s32.totalorder %v2939_v48, 2  ;;  %v3043_v62 = vand.u32 3, %v11190_v40  ;;  %v11202_v40 = vld [vmem:[#allocation78_spill] sm:$0xff] }
 0x43b   : > { %v2843_v25 = vsel %vm2836_vm4, %v2839_v5, %v2842_v51  ;;  %v2943_v52 = vsel %vm2941_vm10, %v11189_v18, %v2942_v28  ;;  %v2946_v57 = vsel %vm2944_vm5, %v2945_v35, %v11188_v34  ;;  %vm2940_vm6 = vcmp.lt.s32.totalorder %v2939_v48, 2  ;;  %6328 = vmatpush3.bf16.msra.mxu0 %v6709_v63  ;;  %v11198_v48 = vld [vmem:[#allocation90_spill] sm:$0xff]  ;;  %v11199_v34 = vld [vmem:[#allocation99_spill] sm:$0xff]  ;;  %v11200_v18 = vld [vmem:[#allocation97_spill] sm:$0xff] }
 0x43c   : > { %v2844_v61 = vsel %vm2833_vm0, nan, %v2843_v25  ;;  %v3046_v14 = vxor.u32 2147483648, %v11191_v26  ;;  %v3049_v6 = vxor.u32 2147483648, %v11192_v41  ;;  %vm2937_vm3 = vweird.f32 %v11193_v44 }
 0x43d   : > { %v4310_v19 = vpack.c.bf16 %v2844_v61, %v2740_v31  ;;  %v2947_v55 = vsel %vm2940_vm6, %v2943_v52, %v2946_v57  ;;  %vm3045_vm7 = vcmp.eq.s32.totalorder %v3043_v62, 0  ;;  %vm3041_vm11 = vweird.f32 %v11194_v29  ;;  %v11201_v57 = vld [vmem:[#allocation98_spill] sm:$0xff]  ;;  %v11205_v29 = vld [vmem:[#allocation85_spill] sm:$0xff] }
 0x43e   : > { %v3047_v39 = vsel %vm3045_vm7, %v11192_v41, %v3046_v14  ;;  %vm3048_vm13 = vcmp.eq.s32.totalorder %v3043_v62, 2  ;;  %v3147_v59 = vand.u32 3, %v9320_v24  ;;  %vm3044_vm2 = vcmp.lt.s32.totalorder %v3043_v62, 2  ;;  %v11203_v62 = vld [vmem:[#allocation101_spill] sm:$0xff] }
 0x43f   : > { %6265 = vmatprep.mubr.msk.bf16.mxu1 %vm4342_vm9, %v4310_v19  ;;  %v3050_v4 = vsel %vm3048_vm13, %v3049_v6, %v11191_v26  ;;  %v3150_v56 = vxor.u32 2147483648, %v9438_v17  ;;  %v3153_v20 = vxor.u32 2147483648, %v9424_v42  ;;  %v2948_v60 = vsel %vm2937_vm3, nan, %v2947_v55  ;;  %v11204_v26 = vld [vmem:[#allocation100_spill] sm:$0xff] }
 0x440   : > { %v3051_v11 = vsel %vm3044_vm2, %v3047_v39, %v3050_v4  ;;  %vm3149_vm15 = vcmp.eq.s32.totalorder %v3147_v59, 0  ;;  %vm3152_vm12 = vcmp.eq.s32.totalorder %v3147_v59, 2  ;;  %v3251_v24 = vand.u32 3, %v9573_v53  ;;  %v11197_v53 = vld [vmem:[#allocation92_spill] sm:$0xff] }
 0x441   : > { %v3052_v50 = vsel %vm3041_vm11, nan, %v3051_v11  ;;  %v3151_v0 = vsel %vm3149_vm15, %v9424_v42, %v3150_v56  ;;  %v3154_v10 = vsel %vm3152_vm12, %v3153_v20, %v9438_v17  ;;  %vm3148_vm8 = vcmp.lt.s32.totalorder %v3147_v59, 2  ;;  %v11206_v59 = vld [vmem:[#allocation108_spill] sm:$0xff]  ;;  %v11207_v56 = vld [vmem:[#allocation109_spill] sm:$0xff] }
 0x442   : > { %v4311_v46 = vpack.c.bf16 %v3052_v50, %v2948_v60  ;;  %v3254_v45 = vxor.u32 2147483648, %v9635_v8  ;;  %v3257_v2 = vxor.u32 2147483648, %v11195_v13  ;;  %vm3145_vm0 = vweird.f32 %v11196_v16 }
 0x443   : > { %v3155_v37 = vsel %vm3148_vm8, %v3151_v0, %v3154_v10  ;;  %vm3253_vm4 = vcmp.eq.s32.totalorder %v3251_v24, 0  ;;  %vm3256_vm14 = vcmp.eq.s32.totalorder %v3251_v24, 2  ;;  %vm3252_vm1 = vcmp.lt.s32.totalorder %v3251_v24, 2  ;;  %v11208_v10 = vld [vmem:[#allocation93_spill] sm:$0xff] }
 0x444   : > { %6266 = vmatmul.mubr.msk.bf16.gmra.mrb[16].mxu1 %vm4342_vm9, %v4311_v46  ;;  %v3255_v42 = vsel %vm3253_vm4, %v11195_v13, %v3254_v45  ;;  %v3258_v17 = vsel %vm3256_vm14, %v3257_v2, %v9635_v8  ;;  %v3355_v58 = vand.u32 3, %v11197_v53  ;;  %vm3249_vm10 = vweird.f32 %v11198_v48  ;;  %v11209_v13 = vld [vmem:[#allocation103_spill] sm:$0xff] }
 0x445   : > { %v3259_v5 = vsel %vm3252_vm1, %v3255_v42, %v3258_v17  ;;  %v3358_v28 = vxor.u32 2147483648, %v11199_v34  ;;  %v3361_v35 = vxor.u32 2147483648, %v11200_v18  ;;  %v3156_v31 = vsel %vm3145_vm0, nan, %v3155_v37  ;;  %v11210_v37 = vld [vmem:[#allocation107_spill] sm:$0xff]  ;;  %v11211_v42 = vld [vmem:[#allocation106_spill] sm:$0xff] }
 0x446   : > { %v3260_v51 = vsel %vm3249_vm10, nan, %v3259_v5  ;;  %vm3357_vm5 = vcmp.eq.s32.totalorder %v3355_v58, 0  ;;  %vm3360_vm6 = vcmp.eq.s32.totalorder %v3355_v58, 2  ;;  %v3459_v8 = vand.u32 3, %v11201_v57  ;;  %v11216_v57 = vld [vmem:[#allocation96_spill] sm:$0xff] }
 0x447   : > { %v4312_v63 = vpack.c.bf16 %v3260_v51, %v3156_v31  ;;  %v3359_v25 = vsel %vm3357_vm5, %v11200_v18, %v3358_v28  ;;  %v3362_v52 = vsel %vm3360_vm6, %v3361_v35, %v11199_v34  ;;  %vm3353_vm3 = vweird.f32 %v11202_v40  ;;  %v11212_v28 = vld [vmem:[#allocation105_spill] sm:$0xff]  ;;  %v11213_v35 = vld [vmem:[#allocation20_spill] sm:$0xff]  ;;  %v11214_v51 = vld [vmem:[#allocation110_spill] sm:$0xff] }
 0x448   : > { %vm3356_vm7 = vcmp.lt.s32.totalorder %v3355_v58, 2  ;;  %v3462_v61 = vxor.u32 2147483648, %v11203_v62  ;;  %v3465_v14 = vxor.u32 2147483648, %v11204_v26  ;;  %vm3460_vm11 = vcmp.lt.s32.totalorder %v3459_v8, 2 }
 0x449   : > { %6269 = vmatprep.mubr.msk.bf16.mxu1 %vm4342_vm9, %v4312_v63  ;;  %v3363_v41 = vsel %vm3356_vm7, %v3359_v25, %v3362_v52  ;;  %vm3461_vm13 = vcmp.eq.s32.totalorder %v3459_v8, 0  ;;  %vm3464_vm2 = vcmp.eq.s32.totalorder %v3459_v8, 2  ;;  %v3563_v44 = vand.u32 3, %v9693_v7  ;;  %v11215_v52 = vld [vmem:[#allocation91_spill] sm:$0xff] }
 0x44a   : > { %v3463_v6 = vsel %vm3461_vm13, %v11204_v26, %v3462_v61  ;;  %v3466_v19 = vsel %vm3464_vm2, %v3465_v14, %v11203_v62  ;;  %v3566_v55 = vxor.u32 2147483648, %v9776_v33  ;;  %vm3457_vm15 = vweird.f32 %v11205_v29 }
 0x44b   : > { %v3467_v39 = vsel %vm3460_vm11, %v3463_v6, %v3466_v19  ;;  %v3569_v4 = vxor.u32 2147483648, %v11206_v59  ;;  %v3667_v20 = vand.u32 3, %v11207_v56  ;;  %v3364_v60 = vsel %vm3353_vm3, nan, %v3363_v41 }
 0x44c   : > { %v3468_v11 = vsel %vm3457_vm15, nan, %v3467_v39  ;;  %vm3565_vm12 = vcmp.eq.s32.totalorder %v3563_v44, 0  ;;  %vm3568_vm8 = vcmp.eq.s32.totalorder %v3563_v44, 2  ;;  %vm3564_vm0 = vcmp.lt.s32.totalorder %v3563_v44, 2 }
 0x44d   : > { %v4313_v50 = vpack.c.bf16 %v3468_v11, %v3364_v60  ;;  %v3567_v0 = vsel %vm3565_vm12, %v11206_v59, %v3566_v55  ;;  %v3570_v7 = vsel %vm3568_vm8, %v3569_v4, %v9776_v33  ;;  %vm3561_vm4 = vweird.f32 %v11208_v10  ;;  %v11217_v59 = vld [vmem:[#allocation23_spill] sm:$0xff] }
 0x44e   : > { %v3571_v24 = vsel %vm3564_vm0, %v3567_v0, %v3570_v7  ;;  %vm3665_vm14 = vweird.f32 %v9382_v9  ;;  %v3670_v46 = vxor.u32 2147483648, %v9889_v3  ;;  %vm3668_vm1 = vcmp.lt.s32.totalorder %v3667_v20, 2 }
 0x44f   : > { %6270 = vmatmul.mubr.msk.bf16.gmra.mrb[20].mxu1 %vm4342_vm9, %v4313_v50  ;;  %vm3669_vm10 = vcmp.eq.s32.totalorder %v3667_v20, 0  ;;  %v3673_v45 = vxor.u32 2147483648, %v9869_v23  ;;  %v3771_v2 = vand.u32 3, %v11209_v13  ;;  %vm3672_vm5 = vcmp.eq.s32.totalorder %v3667_v20, 2  ;;  %v11219_v13 = vld [vmem:[#allocation3_spill] sm:$0xff] }
 0x450   : > { %v3671_v16 = vsel %vm3669_vm10, %v9869_v23, %v3670_v46  ;;  %v3774_v33 = vxor.u32 2147483648, %v11210_v37  ;;  %v3777_v17 = vxor.u32 2147483648, %v11211_v42  ;;  %v3572_v53 = vsel %vm3561_vm4, nan, %v3571_v24 }
 0x451   : > { %v3674_v58 = vsel %vm3672_vm5, %v3673_v45, %v9889_v3  ;;  %vm3773_vm6 = vcmp.eq.s32.totalorder %v3771_v2, 0  ;;  %vm3776_vm3 = vcmp.eq.s32.totalorder %v3771_v2, 2  ;;  %v3875_v18 = vand.u32 3, %v11212_v28  ;;  %v11249_v28 = vld [vmem:[#allocation18_spill] sm:$0xff] }
 0x452   : > { %v3675_v48 = vsel %vm3668_vm1, %v3671_v16, %v3674_v58  ;;  %v3775_v5 = vsel %vm3773_vm6, %v11211_v42, %v3774_v33  ;;  %v3778_v34 = vsel %vm3776_vm3, %v3777_v17, %v11210_v37  ;;  %vm3772_vm7 = vcmp.lt.s32.totalorder %v3771_v2, 2  ;;  %v11221_v2 = vld [vmem:[#allocation4_spill] sm:$0xff]  ;;  %v11223_v16 = vld [vmem:[#allocation5_spill] sm:$0xff]  ;;  %v11233_v33 = vld [vmem:[#allocation10_spill] sm:$0xff] }
 0x453   : > { %v3676_v23 = vsel %vm3665_vm14, nan, %v3675_v48  ;;  %v3878_v31 = vxor.u32 2147483648, %v11213_v35  ;;  %v3881_v63 = vxor.u32 2147483648, %v11214_v51  ;;  %vm3769_vm11 = vweird.f32 %v11215_v52  ;;  %v11231_v37 = vld [vmem:[#allocation9_spill] sm:$0xff]  ;;  %v11235_v42 = vld [vmem:[#allocation11_spill] sm:$0xff]  ;;  %v11237_v17 = vld [vmem:[#allocation12_spill] sm:$0xff] }
 0x454   : > { %v4314_v25 = vpack.c.bf16 %v3676_v23, %v3572_v53  ;;  %v3779_v3 = vsel %vm3772_vm7, %v3775_v5, %v3778_v34  ;;  %vm3877_vm13 = vcmp.eq.s32.totalorder %v3875_v18, 0  ;;  %vm3873_vm2 = vweird.f32 %v11216_v57  ;;  %v11239_v53 = vld [vmem:[#allocation13_spill] sm:$0xff]  ;;  %v11241_v58 = vld [vmem:[#allocation14_spill] sm:$0xff]  ;;  %v11243_v48 = vld [vmem:[#allocation15_spill] sm:$0xff] }
 0x455   : > { %v3879_v8 = vsel %vm3877_vm13, %v11214_v51, %v3878_v31  ;;  %vm3880_vm15 = vcmp.eq.s32.totalorder %v3875_v18, 2  ;;  %v3979_v40 = vand.u32 3, %v10015_v21  ;;  %vm3876_vm12 = vcmp.lt.s32.totalorder %v3875_v18, 2  ;;  %v11245_v5 = vld [vmem:[#allocation16_spill] sm:$0xff]  ;;  %v11247_v34 = vld [vmem:[#allocation17_spill] sm:$0xff]  ;;  %v6710_v18 = vld [vmem:[%s10736_s6 + $0x38] sm:$0xff]  }
 0x456   : > { %6273 = vmatprep.mubr.msk.bf16.mxu1 %vm4342_vm9, %v4314_v25  ;;  %v3882_v9 = vsel %vm3880_vm15, %v3881_v63, %v11213_v35  ;;  %v3982_v62 = vxor.u32 2147483648, %v10073_v30  ;;  %v3985_v61 = vxor.u32 2147483648, %v10065_v43  ;;  %v3780_v26 = vsel %vm3769_vm11, nan, %v3779_v3  ;;  %6329 = vmatprep.subr.bf16.mxu0 %v6710_v18  ;;  %v6711_v23 = vld [vmem:[%s10738_s8] sm:$0xff]   ;;  %v6712_v35 = vld [vmem:[%s10738_s8 + $0x8] sm:$0xff]   ;;  %v6713_v31 = vld [vmem:[%s10738_s8 + $0x10] sm:$0xff]  }
 0x457   : > { %v3883_v14 = vsel %vm3876_vm12, %v3879_v8, %v3882_v9  ;;  %vm3981_vm8 = vcmp.eq.s32.totalorder %v3979_v40, 0  ;;  %vm3984_vm0 = vcmp.eq.s32.totalorder %v3979_v40, 2  ;;  %v4083_v21 = vand.u32 3, %v10081_v12  ;;  %6330 = vmatpush3.bf16.msra.mxu0 %v6710_v18  ;;  %6363 = vmatprep.subr.bf16.mxu1 %v6711_v23  ;;  %v6714_v51 = vld [vmem:[%s10738_s8 + $0x18] sm:$0xff]   ;;  %v6715_v63 = vld [vmem:[%s10738_s8 + $0x20] sm:$0xff]   ;;  %v6716_v25 = vld [vmem:[%s10738_s8 + $0x28] sm:$0xff]  }
 0x458   : > { %v3884_v41 = vsel %vm3873_vm2, nan, %v3883_v14  ;;  %v3983_v6 = vsel %vm3981_vm8, %v10065_v43, %v3982_v62  ;;  %v3986_v19 = vsel %vm3984_vm0, %v3985_v61, %v10073_v30  ;;  %vm3980_vm4 = vcmp.lt.s32.totalorder %v3979_v40, 2  ;;  %v6717_v52 = vld [vmem:[%s10738_s8 + $0x30] sm:$0xff]   ;;  %v10413_v3 = vld [vmem:[%s10735_s5] ss:$0 sm:$0xff] }
 0x459   : > { %v4315_v44 = vpack.c.bf16 %v3884_v41, %v3780_v26  ;;  %v4086_v55 = vxor.u32 2147483648, %v10197_v1  ;;  %v4089_v29 = vxor.u32 2147483648, %v10193_v32  ;;  %vm3977_vm14 = vweird.f32 %v9669_v36 }
 0x45a   : > { %v3987_v39 = vsel %vm3980_vm4, %v3983_v6, %v3986_v19  ;;  %vm4085_vm1 = vcmp.eq.s32.totalorder %v4083_v21, 0  ;;  %vm4088_vm10 = vcmp.eq.s32.totalorder %v4083_v21, 2  ;;  %vm4084_vm5 = vcmp.lt.s32.totalorder %v4083_v21, 2 }
 0x45b   : > { %6274 = vmatmul.mubr.msk.bf16.gmra.mrb[24].mxu1 %vm4342_vm9, %v4315_v44  ;;  %v4087_v43 = vsel %vm4085_vm1, %v10193_v32, %v4086_v55  ;;  %v4090_v30 = vsel %vm4088_vm10, %v4089_v29, %v10197_v1  ;;  %v4187_v12 = vand.u32 3, %v11217_v59  ;;  %vm4081_vm6 = vweird.f32 %v9789_v27 }
 0x45c   : > { %v4091_v4 = vsel %vm4084_vm5, %v4087_v43, %v4090_v30  ;;  %v4190_v56 = vxor.u32 2147483648, %v10063_v54  ;;  %v4193_v20 = vxor.u32 2147483648, %v9964_v49  ;;  %v3988_v36 = vsel %vm3977_vm14, nan, %v3987_v39 }
 0x45d   : > { %v4092_v60 = vsel %vm4081_vm6, nan, %v4091_v4  ;;  %vm4189_vm3 = vcmp.eq.s32.totalorder %v4187_v12, 0  ;;  %vm4192_vm7 = vcmp.eq.s32.totalorder %v4187_v12, 2  ;;  %v4291_v1 = vand.u32 3, %v10052_v15 }
 0x45e   : > { %v4316_v11 = vpack.c.bf16 %v4092_v60, %v3988_v36  ;;  %v4191_v50 = vsel %vm4189_vm3, %v9964_v49, %v4190_v56  ;;  %v4194_v32 = vsel %vm4192_vm7, %v4193_v20, %v10063_v54  ;;  %vm4188_vm11 = vcmp.lt.s32.totalorder %v4187_v12, 2  ;;  %v11218_v49 = vld [vmem:[#allocation102_spill] sm:$0xff] }
 0x45f   : > { %v4294_v0 = vxor.u32 2147483648, %v10161_v38  ;;  %v4297_v27 = vxor.u32 2147483648, %v10145_v22  ;;  %v4195_v7 = vsel %vm4188_vm11, %v4191_v50, %v4194_v32  ;;  %vm4293_vm13 = vcmp.eq.s32.totalorder %v4291_v1, 0 }
 0x460   : > { %6277 = vmatprep.mubr.msk.bf16.mxu1 %vm4342_vm9, %v4316_v11  ;;  %vm4296_vm2 = vcmp.eq.s32.totalorder %v4291_v1, 2  ;;  %vm4292_vm15 = vcmp.lt.s32.totalorder %v4291_v1, 2  ;;  %vm4185_vm12 = vweird.f32 %v11218_v49  ;;  %vm4289_vm8 = vweird.f32 %v9699_v47  ;;  %v11229_v47 = vld [vmem:[#allocation8_spill] sm:$0xff] }
 0x461   : > { %v4295_v10 = vsel %vm4293_vm13, %v10145_v22, %v4294_v0  ;;  %v4298_v24 = vsel %vm4296_vm2, %v4297_v27, %v10161_v38  ;;  %v4196_v54 = vsel %vm4185_vm12, nan, %v4195_v7  ;;  %vm11220_vm0 = vcmask 31744   ;;  %v11225_v22 = vld [vmem:[#allocation6_spill] sm:$0xff]  ;;  %v11227_v38 = vld [vmem:[#allocation7_spill] sm:$0xff] }
 0x462   : > { %v4299_v15 = vsel %vm4292_vm15, %v4295_v10, %v4298_v24  ;;  %vm11222_vm4 = vmmov %vm11220_vm0 }
 0x463   : > { %v4300_v46 = vsel %vm4289_vm8, nan, %v4299_v15  ;;  %vm11224_vm14 = vmmov %vm11220_vm0 }
 0x464   : > { %v4317_v45 = vpack.c.bf16 %v4300_v46, %v4196_v54  ;;  %vm11226_vm1 = vmmov %vm11220_vm0 }
 0x465   : > { %vm11228_vm10 = vmmov %vm11220_vm0 }
 0x466   : > { %6278 = vmatmul.mubr.msk.bf16.gmra.mrb[28].mxu1 %vm4342_vm9, %v4317_v45  ;;  %vm11230_vm5 = vmmov %vm11220_vm0 }
 0x467   : > { %6283 = vmatprep.mubr.msk.bf16.mxu1 %vm11220_vm0, %v11219_v13  ;;  %vm11232_vm9 = vmmov %vm11220_vm0 }
 0x468   : > { %vm11234_vm6 = vmmov %vm11220_vm0 }
 0x469   : > { %vm11236_vm3 = vmmov %vm11220_vm0 }
 0x46a   : > { %vm11238_vm7 = vmmov %vm11220_vm0 }
 0x46b   : > { %vm11240_vm11 = vmmov %vm11220_vm0 }
 0x46c   : > { %vm11242_vm13 = vmmov %vm11220_vm0 }
 0x46d   : > { %vm11244_vm2 = vmmov %vm11220_vm0 }
 0x46e   : > { %6284 = vmatmul.mubr.msk.bf16.vlgmr.msra.gmra.mrb[0].mxu1 %vm11222_vm4, %v11221_v2  ;;  %vm11246_vm15 = vmmov %vm11220_vm0 }
 0x46f   : > { %6287 = vmatprep.mubr.msk.bf16.mxu1 %vm11224_vm14, %v11223_v16  ;;  %vm11248_vm12 = vmmov %vm11220_vm0  ;;  %6364 = vmatpush3.bf16.msra.mxu1 %v6711_v23 }
 0x470   : > { %vm11250_vm8 = vmmov %vm11220_vm0  ;;  %6365 = vmatprep.subr.bf16.mxu1 %v6712_v35  ;;  %vm5443_vm0 = vcmask 23552  }
 0x473   : > { %6366 = vmatpush3.bf16.msra.mxu1 %v6712_v35 }
 0x474   : > { %6367 = vmatprep.subr.bf16.mxu1 %v6713_v31 }
 0x476   : > { %6288 = vmatmul.mubr.msk.bf16.gmra.mrb[4].mxu1 %vm11226_vm1, %v11225_v22 }
 0x477   : > { %6291 = vmatprep.mubr.msk.bf16.mxu1 %vm11228_vm10, %v11227_v38  ;;  %6368 = vmatpush3.bf16.msra.mxu1 %v6713_v31 }
 0x478   : > { %6369 = vmatprep.subr.bf16.mxu1 %v6714_v51 }
 0x47b   : > { %6370 = vmatpush3.bf16.msra.mxu1 %v6714_v51 }
 0x47c   : > { %6371 = vmatprep.subr.bf16.mxu1 %v6715_v63 }
 0x47e   : > { %6292 = vmatmul.mubr.msk.bf16.gmra.mrb[8].mxu1 %vm11230_vm5, %v11229_v47 }
 0x47f   : > { %6295 = vmatprep.mubr.msk.bf16.mxu1 %vm11232_vm9, %v11231_v37  ;;  %6372 = vmatpush3.bf16.msra.mxu1 %v6715_v63 }
 0x480   : > { %6373 = vmatprep.subr.bf16.mxu1 %v6716_v25 }
 0x483   : > { %6374 = vmatpush3.bf16.msra.mxu1 %v6716_v25 }
 0x484   : > { %6375 = vmatprep.subr.bf16.mxu1 %v6717_v52 }
 0x486   : > { %6296 = vmatmul.mubr.msk.bf16.gmra.mrb[12].mxu1 %vm11234_vm6, %v11233_v33 }
 0x487   : > { %6299 = vmatprep.mubr.msk.bf16.mxu1 %vm11236_vm3, %v11235_v42  ;;  %6376 = vmatpush3.bf16.msra.mxu1 %v6717_v52 }
 0x48e   : > { %6300 = vmatmul.mubr.msk.bf16.gmra.mrb[16].mxu1 %vm11238_vm7, %v11237_v17 }
 0x48f   : > { %6303 = vmatprep.mubr.msk.bf16.mxu1 %vm11240_vm11, %v11239_v53 }
 0x496   : > { %6304 = vmatmul.mubr.msk.bf16.gmra.mrb[20].mxu1 %vm11242_vm13, %v11241_v58 }
 0x497   : > { %6307 = vmatprep.mubr.msk.bf16.mxu1 %vm11244_vm2, %v11243_v48 }
 0x49e   : > { %6308 = vmatmul.mubr.msk.bf16.gmra.mrb[24].mxu1 %vm11246_vm15, %v11245_v5 }
 0x49f   : > { %6311 = vmatprep.mubr.msk.bf16.mxu1 %vm11248_vm12, %v11247_v34 }
 0x4a6   : > { %6312 = vmatmul.mubr.msk.bf16.gmra.mrb[28].mxu1 %vm11250_vm8, %v11249_v28 }
 0x541   : > { %v6285_v57 = vpop.f32.mrb[0].mxu1 }
 0x542   : > { %v4725_v8 = vadd.f32 %v6285_v57, %v10413_v3  ;;  %v4589_v40 = vpop.f32.mrb[1].mxu1 }
 0x543   : > { %v4723_v9 = vadd.f32 %v10413_v3, %v4589_v40  ;;  %v6286_v62 = vpop.f32.mrb[2].mxu1 }
 0x544   : > { %v4726_v61 = vadd.f32 %v6286_v62, %v10413_v3  ;;  %v4592_v26 = vpop.f32.mrb[3].mxu1  ;;  %v4757_v41 = vmax.f32 %v4725_v8, 0.0 }
 0x545   : > { %v4724_v14 = vadd.f32 %v10413_v3, %v4592_v26  ;;  %v4755_v19 = vmax.f32 %v4723_v9, 0.0 }
 0x546   : > { %v4758_v6 = vmax.f32 %v4726_v61, 0.0 }
 0x547   : > { %v4756_v21 = vmax.f32 %v4724_v14, 0.0 }
 0x548   : > { %v4788_v44 = vpack.c.bf16 %v4758_v6, %v4757_v41 }
 0x549   : > { %v4787_v55 = vpack.c.bf16 %v4756_v21, %v4755_v19  ;;  %v6289_v29 = vpop.f32.mrb[4].mxu1 }
 0x54a   : > { %v4729_v39 = vadd.f32 %v6289_v29, %v10413_v3  ;;  %v4605_v43 = vpop.f32.mrb[5].mxu1 }
 0x54b   : > { %v4727_v30 = vadd.f32 %v10413_v3, %v4605_v43  ;;  %v6290_v59 = vpop.f32.mrb[6].mxu1  ;;  %6331 = vmatprep.mubr.bf16.mxu0 %v4787_v55 }
 0x54c   : > { %v4730_v12 = vadd.f32 %v6290_v59, %v10413_v3  ;;  %v4608_v4 = vpop.f32.mrb[7].mxu1  ;;  %6332 = vmatmul.mubr.bf16.vlgmr.msra.gmra.mrb[32].mxu0 %v4788_v44  ;;  %v4761_v20 = vmax.f32 %v4729_v39, 0.0 }
 0x54d   : > { %v4728_v56 = vadd.f32 %v10413_v3, %v4608_v4  ;;  %v4759_v60 = vmax.f32 %v4727_v30, 0.0 }
 0x54e   : > { %v4762_v36 = vmax.f32 %v4730_v12, 0.0 }
 0x54f   : > { %v4760_v11 = vmax.f32 %v4728_v56, 0.0 }
 0x550   : > { %v4790_v50 = vpack.c.bf16 %v4762_v36, %v4761_v20 }
 0x551   : > { %v4789_v32 = vpack.c.bf16 %v4760_v11, %v4759_v60  ;;  %v6293_v1 = vpop.f32.mrb[8].mxu1 }
 0x552   : > { %v4733_v0 = vadd.f32 %v6293_v1, %v10413_v3  ;;  %v4621_v27 = vpop.f32.mrb[9].mxu1 }
 0x553   : > { %v4731_v7 = vadd.f32 %v10413_v3, %v4621_v27  ;;  %v6294_v10 = vpop.f32.mrb[10].mxu1  ;;  %6335 = vmatprep.mubr.bf16.mxu0 %v4789_v32 }
 0x554   : > { %v4734_v24 = vadd.f32 %v6294_v10, %v10413_v3  ;;  %v4624_v49 = vpop.f32.mrb[11].mxu1  ;;  %6336 = vmatmul.mubr.bf16.gmra.mrb[36].mxu0 %v4790_v50  ;;  %v4765_v54 = vmax.f32 %v4733_v0, 0.0 }
 0x555   : > { %v4732_v15 = vadd.f32 %v10413_v3, %v4624_v49  ;;  %v4763_v45 = vmax.f32 %v4731_v7, 0.0 }
 0x556   : > { %v4766_v46 = vmax.f32 %v4734_v24, 0.0 }
 0x557   : > { %v4764_v13 = vmax.f32 %v4732_v15, 0.0 }
 0x558   : > { %v4792_v2 = vpack.c.bf16 %v4766_v46, %v4765_v54 }
 0x559   : > { %v4791_v16 = vpack.c.bf16 %v4764_v13, %v4763_v45  ;;  %v6297_v22 = vpop.f32.mrb[12].mxu1 }
 0x55a   : > { %v4737_v38 = vadd.f32 %v6297_v22, %v10413_v3  ;;  %v4637_v47 = vpop.f32.mrb[13].mxu1 }
 0x55b   : > { %v4735_v37 = vadd.f32 %v10413_v3, %v4637_v47  ;;  %v6298_v33 = vpop.f32.mrb[14].mxu1  ;;  %6339 = vmatprep.mubr.bf16.mxu0 %v4791_v16 }
 0x55c   : > { %v4738_v42 = vadd.f32 %v6298_v33, %v10413_v3  ;;  %v4640_v17 = vpop.f32.mrb[15].mxu1  ;;  %6340 = vmatmul.mubr.bf16.gmra.mrb[40].mxu0 %v4792_v2  ;;  %v4769_v58 = vmax.f32 %v4737_v38, 0.0 }
 0x55d   : > { %v4736_v53 = vadd.f32 %v10413_v3, %v4640_v17  ;;  %v4767_v5 = vmax.f32 %v4735_v37, 0.0 }
 0x55e   : > { %v4770_v48 = vmax.f32 %v4738_v42, 0.0 }
 0x55f   : > { %v4768_v34 = vmax.f32 %v4736_v53, 0.0  ;;  %v6718_v53 = vld [vmem:[%s10738_s8 + $0x38] sm:$0xff]  }
 0x560   : > { %v4794_v28 = vpack.c.bf16 %v4770_v48, %v4769_v58  ;;  %6377 = vmatprep.subr.bf16.mxu1 %v6718_v53  ;;  %v10453_v58 = vld [vmem:[%s10737_s7] ss:$0 sm:$0xff] }
 0x561   : > { %v4793_v18 = vpack.c.bf16 %v4768_v34, %v4767_v5  ;;  %v6301_v23 = vpop.f32.mrb[16].mxu1  ;;  %6378 = vmatpush3.bf16.msra.mxu1 %v6718_v53 }
 0x562   : > { %v4741_v35 = vadd.f32 %v6301_v23, %v10413_v3  ;;  %v4653_v31 = vpop.f32.mrb[17].mxu1 }
 0x563   : > { %v4739_v51 = vadd.f32 %v10413_v3, %v4653_v31  ;;  %v6302_v63 = vpop.f32.mrb[18].mxu1  ;;  %6343 = vmatprep.mubr.bf16.mxu0 %v4793_v18 }
 0x564   : > { %v4742_v25 = vadd.f32 %v6302_v63, %v10413_v3  ;;  %v4656_v52 = vpop.f32.mrb[19].mxu1  ;;  %6344 = vmatmul.mubr.bf16.gmra.mrb[44].mxu0 %v4794_v28  ;;  %v4773_v8 = vmax.f32 %v4741_v35, 0.0 }
 0x565   : > { %v4740_v57 = vadd.f32 %v10413_v3, %v4656_v52  ;;  %v4771_v9 = vmax.f32 %v4739_v51, 0.0 }
 0x566   : > { %v4774_v40 = vmax.f32 %v4742_v25, 0.0 }
 0x567   : > { %v4772_v62 = vmax.f32 %v4740_v57, 0.0 }
 0x568   : > { %v4796_v61 = vpack.c.bf16 %v4774_v40, %v4773_v8 }
 0x569   : > { %v4795_v26 = vpack.c.bf16 %v4772_v62, %v4771_v9  ;;  %v6305_v14 = vpop.f32.mrb[20].mxu1 }
 0x56a   : > { %v4745_v41 = vadd.f32 %v6305_v14, %v10413_v3  ;;  %v4669_v6 = vpop.f32.mrb[21].mxu1 }
 0x56b   : > { %v4743_v19 = vadd.f32 %v10413_v3, %v4669_v6  ;;  %v6306_v21 = vpop.f32.mrb[22].mxu1  ;;  %6347 = vmatprep.mubr.bf16.mxu0 %v4795_v26 }
 0x56c   : > { %v4746_v44 = vadd.f32 %v6306_v21, %v10413_v3  ;;  %v4672_v55 = vpop.f32.mrb[23].mxu1  ;;  %6348 = vmatmul.mubr.bf16.gmra.mrb[48].mxu0 %v4796_v61  ;;  %v4777_v39 = vmax.f32 %v4745_v41, 0.0 }
 0x56d   : > { %v4744_v29 = vadd.f32 %v10413_v3, %v4672_v55  ;;  %v4775_v30 = vmax.f32 %v4743_v19, 0.0 }
 0x56e   : > { %v4778_v43 = vmax.f32 %v4746_v44, 0.0 }
 0x56f   : > { %v4776_v59 = vmax.f32 %v4744_v29, 0.0 }
 0x570   : > { %v4798_v12 = vpack.c.bf16 %v4778_v43, %v4777_v39 }
 0x571   : > { %v4797_v4 = vpack.c.bf16 %v4776_v59, %v4775_v30  ;;  %v6309_v56 = vpop.f32.mrb[24].mxu1 }
 0x572   : > { %v4749_v20 = vadd.f32 %v6309_v56, %v10413_v3  ;;  %v4685_v36 = vpop.f32.mrb[25].mxu1 }
 0x573   : > { %v4747_v60 = vadd.f32 %v10413_v3, %v4685_v36  ;;  %v6310_v11 = vpop.f32.mrb[26].mxu1  ;;  %6351 = vmatprep.mubr.bf16.mxu0 %v4797_v4 }
 0x574   : > { %v4750_v50 = vadd.f32 %v6310_v11, %v10413_v3  ;;  %v4688_v32 = vpop.f32.mrb[27].mxu1  ;;  %6352 = vmatmul.mubr.bf16.gmra.mrb[52].mxu0 %v4798_v12  ;;  %v4781_v0 = vmax.f32 %v4749_v20, 0.0 }
 0x575   : > { %v4748_v1 = vadd.f32 %v10413_v3, %v4688_v32  ;;  %v4779_v7 = vmax.f32 %v4747_v60, 0.0 }
 0x576   : > { %v4782_v27 = vmax.f32 %v4750_v50, 0.0 }
 0x577   : > { %v4780_v10 = vmax.f32 %v4748_v1, 0.0 }
 0x578   : > { %v4800_v24 = vpack.c.bf16 %v4782_v27, %v4781_v0 }
 0x579   : > { %v4799_v49 = vpack.c.bf16 %v4780_v10, %v4779_v7  ;;  %v6313_v15 = vpop.f32.mrb[28].mxu1 }
 0x57a   : > { %v4753_v54 = vadd.f32 %v6313_v15, %v10413_v3  ;;  %v4701_v46 = vpop.f32.mrb[29].mxu1 }
 0x57b   : > { %v4751_v45 = vadd.f32 %v10413_v3, %v4701_v46  ;;  %v6314_v13 = vpop.f32.mrb[30].mxu1  ;;  %6355 = vmatprep.mubr.bf16.mxu0 %v4799_v49 }
 0x57c   : > { %v4754_v2 = vadd.f32 %v6314_v13, %v10413_v3  ;;  %v4704_v16 = vpop.f32.mrb[31].mxu1  ;;  %6356 = vmatmul.mubr.bf16.gmra.mrb[56].mxu0 %v4800_v24  ;;  %v4785_v38 = vmax.f32 %v4753_v54, 0.0 }
 0x57d   : > { %v4752_v22 = vadd.f32 %v10413_v3, %v4704_v16  ;;  %v4783_v37 = vmax.f32 %v4751_v45, 0.0 }
 0x57e   : > { %v4786_v47 = vmax.f32 %v4754_v2, 0.0 }
 0x57f   : > { %v4784_v33 = vmax.f32 %v4752_v22, 0.0 }
 0x580   : > { %v4802_v42 = vpack.c.bf16 %v4786_v47, %v4785_v38 }
 0x581   : > { %v4801_v17 = vpack.c.bf16 %v4784_v33, %v4783_v37 }
 0x583   : > { %6359 = vmatprep.mubr.bf16.mxu0 %v4801_v17 }
 0x584   : > { %6360 = vmatmul.mubr.bf16.gmra.mrb[60].mxu0 %v4802_v42 }
 0x61f   : > { %v6333_v3 = vpop.f32.mrb[32].mxu0 }
 0x620   : > { %v4917_v48 = vadd.f32 %v6333_v3, %v10453_v58  ;;  %v4908_v5 = vpop.f32.mrb[33].mxu0 }
 0x621   : > { %v4909_v34 = vadd.f32 %v10453_v58, %v4908_v5  ;;  %v6334_v28 = vpop.f32.mrb[34].mxu0 }
 0x622   : > { %v4920_v18 = vadd.f32 %v6334_v28, %v10453_v58  ;;  %v4911_v23 = vpop.f32.mrb[35].mxu0  ;;  %v5037_v31 = vmax.f32 %v4917_v48, 0.0 }
 0x623   : > { %v4912_v35 = vadd.f32 %v10453_v58, %v4911_v23  ;;  %v5035_v63 = vmax.f32 %v4909_v34, 0.0 }
 0x624   : > { %v5038_v51 = vmax.f32 %v4920_v18, 0.0 }
 0x625   : > { %v5036_v25 = vmax.f32 %v4912_v35, 0.0 }
 0x626   : > { %v5068_v52 = vpack.c.bf16 %v5038_v51, %v5037_v31 }
 0x627   : > { %v5067_v57 = vpack.c.bf16 %v5036_v25, %v5035_v63  ;;  %v6337_v8 = vpop.f32.mrb[36].mxu0 }
 0x628   : > { %v4933_v40 = vadd.f32 %v6337_v8, %v10453_v58  ;;  %v4924_v9 = vpop.f32.mrb[37].mxu0 }
 0x629   : > { %v4925_v62 = vadd.f32 %v10453_v58, %v4924_v9  ;;  %v6338_v61 = vpop.f32.mrb[38].mxu0  ;;  %6379 = vmatprep.mubr.bf16.mxu1 %v5067_v57 }
 0x62a   : > { %v4936_v26 = vadd.f32 %v6338_v61, %v10453_v58  ;;  %v4927_v14 = vpop.f32.mrb[39].mxu0  ;;  %6380 = vmatmul.mubr.bf16.vlgmr.msra.gmra.mrb[32].mxu1 %v5068_v52  ;;  %v5041_v6 = vmax.f32 %v4933_v40, 0.0 }
 0x62b   : > { %v4928_v41 = vadd.f32 %v10453_v58, %v4927_v14  ;;  %v5039_v21 = vmax.f32 %v4925_v62, 0.0 }
 0x62c   : > { %v5042_v19 = vmax.f32 %v4936_v26, 0.0 }
 0x62d   : > { %v5040_v44 = vmax.f32 %v4928_v41, 0.0 }
 0x62e   : > { %v5070_v55 = vpack.c.bf16 %v5042_v19, %v5041_v6 }
 0x62f   : > { %v5069_v29 = vpack.c.bf16 %v5040_v44, %v5039_v21  ;;  %v6341_v39 = vpop.f32.mrb[40].mxu0 }
 0x630   : > { %v4949_v43 = vadd.f32 %v6341_v39, %v10453_v58  ;;  %v4940_v30 = vpop.f32.mrb[41].mxu0 }
 0x631   : > { %v4941_v59 = vadd.f32 %v10453_v58, %v4940_v30  ;;  %v6342_v12 = vpop.f32.mrb[42].mxu0  ;;  %6383 = vmatprep.mubr.bf16.mxu1 %v5069_v29 }
 0x632   : > { %v4952_v4 = vadd.f32 %v6342_v12, %v10453_v58  ;;  %v4943_v56 = vpop.f32.mrb[43].mxu0  ;;  %6384 = vmatmul.mubr.bf16.gmra.mrb[36].mxu1 %v5070_v55  ;;  %v5045_v36 = vmax.f32 %v4949_v43, 0.0 }
 0x633   : > { %v4944_v20 = vadd.f32 %v10453_v58, %v4943_v56  ;;  %v5043_v11 = vmax.f32 %v4941_v59, 0.0 }
 0x634   : > { %v5046_v60 = vmax.f32 %v4952_v4, 0.0 }
 0x635   : > { %v5044_v50 = vmax.f32 %v4944_v20, 0.0 }
 0x636   : > { %v5072_v32 = vpack.c.bf16 %v5046_v60, %v5045_v36 }
 0x637   : > { %v5071_v1 = vpack.c.bf16 %v5044_v50, %v5043_v11  ;;  %v6345_v0 = vpop.f32.mrb[44].mxu0 }
 0x638   : > { %v4965_v27 = vadd.f32 %v6345_v0, %v10453_v58  ;;  %v4956_v7 = vpop.f32.mrb[45].mxu0 }
 0x639   : > { %v4957_v10 = vadd.f32 %v10453_v58, %v4956_v7  ;;  %v6346_v24 = vpop.f32.mrb[46].mxu0  ;;  %6387 = vmatprep.mubr.bf16.mxu1 %v5071_v1 }
 0x63a   : > { %v4968_v49 = vadd.f32 %v6346_v24, %v10453_v58  ;;  %v4959_v15 = vpop.f32.mrb[47].mxu0  ;;  %6388 = vmatmul.mubr.bf16.gmra.mrb[40].mxu1 %v5072_v32  ;;  %v5049_v46 = vmax.f32 %v4965_v27, 0.0 }
 0x63b   : > { %v4960_v54 = vadd.f32 %v10453_v58, %v4959_v15  ;;  %v5047_v13 = vmax.f32 %v4957_v10, 0.0 }
 0x63c   : > { %v5050_v45 = vmax.f32 %v4968_v49, 0.0 }
 0x63d   : > { %v5048_v2 = vmax.f32 %v4960_v54, 0.0  ;;  %v10490_v54 = vld [vmem:[%s10739_s9] ss:$0 sm:$0xff] }
 0x63e   : > { %v5074_v16 = vpack.c.bf16 %v5050_v45, %v5049_v46 }
 0x63f   : > { %v5073_v22 = vpack.c.bf16 %v5048_v2, %v5047_v13  ;;  %v6349_v38 = vpop.f32.mrb[48].mxu0 }
 0x640   : > { %v4981_v47 = vadd.f32 %v6349_v38, %v10453_v58  ;;  %v4972_v37 = vpop.f32.mrb[49].mxu0 }
 0x641   : > { %v4973_v33 = vadd.f32 %v10453_v58, %v4972_v37  ;;  %v6350_v42 = vpop.f32.mrb[50].mxu0  ;;  %6391 = vmatprep.mubr.bf16.mxu1 %v5073_v22 }
 0x642   : > { %v4984_v17 = vadd.f32 %v6350_v42, %v10453_v58  ;;  %v4975_v53 = vpop.f32.mrb[51].mxu0  ;;  %6392 = vmatmul.mubr.bf16.gmra.mrb[44].mxu1 %v5074_v16  ;;  %v5053_v48 = vmax.f32 %v4981_v47, 0.0 }
 0x643   : > { %v4976_v3 = vadd.f32 %v10453_v58, %v4975_v53  ;;  %v5051_v34 = vmax.f32 %v4973_v33, 0.0 }
 0x644   : > { %v5054_v5 = vmax.f32 %v4984_v17, 0.0 }
 0x645   : > { %v5052_v28 = vmax.f32 %v4976_v3, 0.0 }
 0x646   : > { %v5076_v18 = vpack.c.bf16 %v5054_v5, %v5053_v48 }
 0x647   : > { %v5075_v23 = vpack.c.bf16 %v5052_v28, %v5051_v34  ;;  %v6353_v35 = vpop.f32.mrb[52].mxu0 }
 0x648   : > { %v4997_v31 = vadd.f32 %v6353_v35, %v10453_v58  ;;  %v4988_v51 = vpop.f32.mrb[53].mxu0 }
 0x649   : > { %v4989_v63 = vadd.f32 %v10453_v58, %v4988_v51  ;;  %v6354_v25 = vpop.f32.mrb[54].mxu0  ;;  %6395 = vmatprep.mubr.bf16.mxu1 %v5075_v23 }
 0x64a   : > { %v5000_v52 = vadd.f32 %v6354_v25, %v10453_v58  ;;  %v4991_v57 = vpop.f32.mrb[55].mxu0  ;;  %6396 = vmatmul.mubr.bf16.gmra.mrb[48].mxu1 %v5076_v18  ;;  %v5057_v40 = vmax.f32 %v4997_v31, 0.0 }
 0x64b   : > { %v4992_v8 = vadd.f32 %v10453_v58, %v4991_v57  ;;  %v5055_v62 = vmax.f32 %v4989_v63, 0.0 }
 0x64c   : > { %v5058_v9 = vmax.f32 %v5000_v52, 0.0 }
 0x64d   : > { %v5056_v61 = vmax.f32 %v4992_v8, 0.0 }
 0x64e   : > { %v5078_v26 = vpack.c.bf16 %v5058_v9, %v5057_v40 }
 0x64f   : > { %v5077_v14 = vpack.c.bf16 %v5056_v61, %v5055_v62  ;;  %v6357_v41 = vpop.f32.mrb[56].mxu0 }
 0x650   : > { %v5013_v6 = vadd.f32 %v6357_v41, %v10453_v58  ;;  %v5004_v19 = vpop.f32.mrb[57].mxu0 }
 0x651   : > { %v5005_v21 = vadd.f32 %v10453_v58, %v5004_v19  ;;  %v6358_v44 = vpop.f32.mrb[58].mxu0  ;;  %6399 = vmatprep.mubr.bf16.mxu1 %v5077_v14 }
 0x652   : > { %v5016_v55 = vadd.f32 %v6358_v44, %v10453_v58  ;;  %v5007_v29 = vpop.f32.mrb[59].mxu0  ;;  %6400 = vmatmul.mubr.bf16.gmra.mrb[52].mxu1 %v5078_v26  ;;  %v5061_v43 = vmax.f32 %v5013_v6, 0.0 }
 0x653   : > { %v5008_v39 = vadd.f32 %v10453_v58, %v5007_v29  ;;  %v5059_v59 = vmax.f32 %v5005_v21, 0.0 }
 0x654   : > { %v5062_v30 = vmax.f32 %v5016_v55, 0.0 }
 0x655   : > { %v5060_v12 = vmax.f32 %v5008_v39, 0.0 }
 0x656   : > { %v5080_v4 = vpack.c.bf16 %v5062_v30, %v5061_v43 }
 0x657   : > { %v5079_v56 = vpack.c.bf16 %v5060_v12, %v5059_v59  ;;  %v6361_v20 = vpop.f32.mrb[60].mxu0 }
 0x658   : > { %v5029_v36 = vadd.f32 %v6361_v20, %v10453_v58  ;;  %v5020_v60 = vpop.f32.mrb[61].mxu0 }
 0x659   : > { %v5021_v11 = vadd.f32 %v10453_v58, %v5020_v60  ;;  %v6362_v50 = vpop.f32.mrb[62].mxu0  ;;  %6403 = vmatprep.mubr.bf16.mxu1 %v5079_v56 }
 0x65a   : > { %v5032_v32 = vadd.f32 %v6362_v50, %v10453_v58  ;;  %v5023_v1 = vpop.f32.mrb[63].mxu0  ;;  %6404 = vmatmul.mubr.bf16.gmra.mrb[56].mxu1 %v5080_v4  ;;  %v5065_v27 = vmax.f32 %v5029_v36, 0.0 }
 0x65b   : > { %v5024_v0 = vadd.f32 %v10453_v58, %v5023_v1  ;;  %v5063_v10 = vmax.f32 %v5021_v11, 0.0 }
 0x65c   : > { %v5066_v7 = vmax.f32 %v5032_v32, 0.0 }
 0x65d   : > { %v5064_v24 = vmax.f32 %v5024_v0, 0.0 }
 0x65e   : > { %v5082_v49 = vpack.c.bf16 %v5066_v7, %v5065_v27 }
 0x65f   : > { %v5081_v15 = vpack.c.bf16 %v5064_v24, %v5063_v10 }
 0x661   : > { %6407 = vmatprep.mubr.bf16.mxu1 %v5081_v15 }
 0x662   : > { %6408 = vmatmul.mubr.bf16.gmra.mrb[60].mxu1 %v5082_v49 }
 0x6fd   : > { %v6381_v46 = vpop.f32.mrb[32].mxu1 }
 0x6fe   : > { %v5197_v45 = vadd.f32 %v6381_v46, %v10490_v54  ;;  %v5188_v13 = vpop.f32.mrb[33].mxu1 }
 0x6ff   : > { %v5189_v2 = vadd.f32 %v10490_v54, %v5188_v13  ;;  %v6382_v58 = vpop.f32.mrb[34].mxu1 }
 0x700   : > { %v5317_v16 = vmul.f32 0.5, %v5197_v45  ;;  %v5200_v22 = vadd.f32 %v6382_v58, %v10490_v54  ;;  %v5191_v38 = vpop.f32.mrb[35].mxu1 }
 0x701   : > { %v5315_v47 = vmul.f32 0.5, %v5189_v2  ;;  %v5192_v37 = vadd.f32 %v10490_v54, %v5191_v38 }
 0x702   : > { %6847 = vtanh.f32 %v5317_v16  ;;  %v5318_v33 = vmul.f32 0.5, %v5200_v22 }
 0x703   : > { %6849 = vtanh.f32 %v5315_v47  ;;  %v5316_v42 = vmul.f32 0.5, %v5192_v37 }
 0x704   : > { %6851 = vtanh.f32 %v5318_v33 }
 0x705   : > { %6853 = vtanh.f32 %v5316_v42  ;;  %v6385_v17 = vpop.f32.mrb[36].mxu1 }
 0x706   : > { %v5213_v53 = vadd.f32 %v6385_v17, %v10490_v54  ;;  %v5204_v3 = vpop.f32.mrb[37].mxu1 }
 0x707   : > { %v5205_v48 = vadd.f32 %v10490_v54, %v5204_v3  ;;  %v6386_v5 = vpop.f32.mrb[38].mxu1 }
 0x708   : > { %v5321_v34 = vmul.f32 0.5, %v5213_v53  ;;  %v5216_v28 = vadd.f32 %v6386_v5, %v10490_v54  ;;  %v5207_v18 = vpop.f32.mrb[39].mxu1 }
 0x709   : > { %v5319_v23 = vmul.f32 0.5, %v5205_v48  ;;  %v5208_v35 = vadd.f32 %v10490_v54, %v5207_v18 }
 0x70a   : > { %6855 = vtanh.f32 %v5321_v34  ;;  %v5322_v31 = vmul.f32 0.5, %v5216_v28 }
 0x70b   : > { %6857 = vtanh.f32 %v5319_v23  ;;  %v5320_v51 = vmul.f32 0.5, %v5208_v35 }
 0x70c   : > { %v6848_v63 = vpop.eup %6847  ;;  %6859 = vtanh.f32 %v5322_v31 }
 0x70d   : > { %v6850_v25 = vpop.eup %6849  ;;  %v5381_v52 = vadd.f32 1.0, %v6848_v63  ;;  %6861 = vtanh.f32 %v5320_v51  ;;  %v6389_v57 = vpop.f32.mrb[40].mxu1 }
 0x70e   : > { %v6852_v8 = vpop.eup %6851  ;;  %v5379_v40 = vadd.f32 1.0, %v6850_v25  ;;  %v5229_v9 = vadd.f32 %v6389_v57, %v10490_v54  ;;  %v5220_v62 = vpop.f32.mrb[41].mxu1 }
 0x70f   : > { %v6854_v61 = vpop.eup %6853  ;;  %v5413_v26 = vmul.f32 0.5, %v5381_v52  ;;  %v5382_v14 = vadd.f32 1.0, %v6852_v8  ;;  %v5221_v41 = vadd.f32 %v10490_v54, %v5220_v62  ;;  %v6390_v6 = vpop.f32.mrb[42].mxu1 }
 0x710   : > { %v5411_v19 = vmul.f32 0.5, %v5379_v40  ;;  %v5380_v21 = vadd.f32 1.0, %v6854_v61  ;;  %v5325_v44 = vmul.f32 0.5, %v5229_v9  ;;  %v5232_v55 = vadd.f32 %v6390_v6, %v10490_v54  ;;  %v5223_v29 = vpop.f32.mrb[43].mxu1 }
 0x711   : > { %5446 = vst.msk [vmem:[%s10504_s13 + $0x10] sm:$0xff] %vm5443_vm0, %v5413_v26  ;;  %v5414_v39 = vmul.f32 0.5, %v5382_v14  ;;  %v5323_v43 = vmul.f32 0.5, %v5221_v41  ;;  %v5224_v30 = vadd.f32 %v10490_v54, %v5223_v29 }
 0x712   : > { %5444 = vst.msk [vmem:[%s10504_s13] sm:$0xff] %vm5443_vm0, %v5411_v19  ;;  %v5412_v59 = vmul.f32 0.5, %v5380_v21  ;;  %6863 = vtanh.f32 %v5325_v44  ;;  %v5326_v12 = vmul.f32 0.5, %v5232_v55 }
 0x713   : > { %5447 = vst.msk [vmem:[%s10504_s13 + $0x18] sm:$0xff] %vm5443_vm0, %v5414_v39  ;;  %6865 = vtanh.f32 %v5323_v43  ;;  %v5324_v4 = vmul.f32 0.5, %v5224_v30 }
 0x714   : > { %v6856_v56 = vpop.eup %6855  ;;  %5445 = vst.msk [vmem:[%s10504_s13 + $0x8] sm:$0xff] %vm5443_vm0, %v5412_v59  ;;  %6867 = vtanh.f32 %v5326_v12 }
 0x715   : > { %v6858_v20 = vpop.eup %6857  ;;  %v5385_v36 = vadd.f32 1.0, %v6856_v56  ;;  %6869 = vtanh.f32 %v5324_v4  ;;  %v6393_v60 = vpop.f32.mrb[44].mxu1 }
 0x716   : > { %v6860_v11 = vpop.eup %6859  ;;  %v5383_v50 = vadd.f32 1.0, %v6858_v20  ;;  %v5245_v32 = vadd.f32 %v6393_v60, %v10490_v54  ;;  %v5236_v1 = vpop.f32.mrb[45].mxu1 }
 0x717   : > { %v6862_v0 = vpop.eup %6861  ;;  %v5417_v27 = vmul.f32 0.5, %v5385_v36  ;;  %v5386_v7 = vadd.f32 1.0, %v6860_v11  ;;  %v5237_v10 = vadd.f32 %v10490_v54, %v5236_v1  ;;  %v6394_v24 = vpop.f32.mrb[46].mxu1 }
 0x718   : > { %v5415_v49 = vmul.f32 0.5, %v5383_v50  ;;  %v5384_v15 = vadd.f32 1.0, %v6862_v0  ;;  %v5329_v46 = vmul.f32 0.5, %v5245_v32  ;;  %v5248_v45 = vadd.f32 %v6394_v24, %v10490_v54  ;;  %v5239_v13 = vpop.f32.mrb[47].mxu1 }
 0x719   : > { %5450 = vst.msk [vmem:[%s10504_s13 + $0x30] sm:$0xff] %vm5443_vm0, %v5417_v27  ;;  %v5418_v2 = vmul.f32 0.5, %v5386_v7  ;;  %v5327_v58 = vmul.f32 0.5, %v5237_v10  ;;  %v5240_v16 = vadd.f32 %v10490_v54, %v5239_v13 }
 0x71a   : > { %5448 = vst.msk [vmem:[%s10504_s13 + $0x20] sm:$0xff] %vm5443_vm0, %v5415_v49  ;;  %v5416_v22 = vmul.f32 0.5, %v5384_v15  ;;  %6871 = vtanh.f32 %v5329_v46  ;;  %v5330_v38 = vmul.f32 0.5, %v5248_v45 }
 0x71b   : > { %5451 = vst.msk [vmem:[%s10504_s13 + $0x38] sm:$0xff] %vm5443_vm0, %v5418_v2  ;;  %6873 = vtanh.f32 %v5327_v58  ;;  %v5328_v47 = vmul.f32 0.5, %v5240_v16 }
 0x71c   : > { %v6864_v37 = vpop.eup %6863  ;;  %5449 = vst.msk [vmem:[%s10504_s13 + $0x28] sm:$0xff] %vm5443_vm0, %v5416_v22  ;;  %6875 = vtanh.f32 %v5330_v38 }
 0x71d   : > { %v6866_v33 = vpop.eup %6865  ;;  %v5389_v42 = vadd.f32 1.0, %v6864_v37  ;;  %6877 = vtanh.f32 %v5328_v47  ;;  %v6397_v17 = vpop.f32.mrb[48].mxu1 }
 0x71e   : > { %v6868_v53 = vpop.eup %6867  ;;  %v5387_v3 = vadd.f32 1.0, %v6866_v33  ;;  %v5261_v48 = vadd.f32 %v6397_v17, %v10490_v54  ;;  %v5252_v5 = vpop.f32.mrb[49].mxu1 }
 0x71f   : > { %v6870_v34 = vpop.eup %6869  ;;  %v5421_v28 = vmul.f32 0.5, %v5389_v42  ;;  %v5390_v18 = vadd.f32 1.0, %v6868_v53  ;;  %v5253_v23 = vadd.f32 %v10490_v54, %v5252_v5  ;;  %v6398_v35 = vpop.f32.mrb[50].mxu1 }
 0x720   : > { %v5419_v31 = vmul.f32 0.5, %v5387_v3  ;;  %v5388_v51 = vadd.f32 1.0, %v6870_v34  ;;  %v5333_v63 = vmul.f32 0.5, %v5261_v48  ;;  %v5264_v25 = vadd.f32 %v6398_v35, %v10490_v54  ;;  %v5255_v52 = vpop.f32.mrb[51].mxu1 }
 0x721   : > { %5454 = vst.msk [vmem:[%s10504_s13 + $0x50] sm:$0xff] %vm5443_vm0, %v5421_v28  ;;  %v5422_v57 = vmul.f32 0.5, %v5390_v18  ;;  %v5331_v8 = vmul.f32 0.5, %v5253_v23  ;;  %v5256_v40 = vadd.f32 %v10490_v54, %v5255_v52 }
 0x722   : > { %5452 = vst.msk [vmem:[%s10504_s13 + $0x40] sm:$0xff] %vm5443_vm0, %v5419_v31  ;;  %v5420_v9 = vmul.f32 0.5, %v5388_v51  ;;  %6879 = vtanh.f32 %v5333_v63  ;;  %v5334_v62 = vmul.f32 0.5, %v5264_v25 }
 0x723   : > { %5455 = vst.msk [vmem:[%s10504_s13 + $0x58] sm:$0xff] %vm5443_vm0, %v5422_v57  ;;  %6881 = vtanh.f32 %v5331_v8  ;;  %v5332_v61 = vmul.f32 0.5, %v5256_v40 }
 0x724   : > { %v6872_v26 = vpop.eup %6871  ;;  %5453 = vst.msk [vmem:[%s10504_s13 + $0x48] sm:$0xff] %vm5443_vm0, %v5420_v9  ;;  %6883 = vtanh.f32 %v5334_v62 }
 0x725   : > { %v6874_v14 = vpop.eup %6873  ;;  %v5393_v41 = vadd.f32 1.0, %v6872_v26  ;;  %6885 = vtanh.f32 %v5332_v61  ;;  %v6401_v6 = vpop.f32.mrb[52].mxu1 }
 0x726   : > { %v6876_v19 = vpop.eup %6875  ;;  %v5391_v21 = vadd.f32 1.0, %v6874_v14  ;;  %v5277_v44 = vadd.f32 %v6401_v6, %v10490_v54  ;;  %v5268_v55 = vpop.f32.mrb[53].mxu1 }
 0x727   : > { %v6878_v29 = vpop.eup %6877  ;;  %v5425_v39 = vmul.f32 0.5, %v5393_v41  ;;  %v5394_v43 = vadd.f32 1.0, %v6876_v19  ;;  %v5269_v30 = vadd.f32 %v10490_v54, %v5268_v55  ;;  %v6402_v59 = vpop.f32.mrb[54].mxu1 }
 0x728   : > { %v5423_v12 = vmul.f32 0.5, %v5391_v21  ;;  %v5392_v4 = vadd.f32 1.0, %v6878_v29  ;;  %v5337_v56 = vmul.f32 0.5, %v5277_v44  ;;  %v5280_v20 = vadd.f32 %v6402_v59, %v10490_v54  ;;  %v5271_v36 = vpop.f32.mrb[55].mxu1 }
 0x729   : > { %5458 = vst.msk [vmem:[%s10504_s13 + $0x70] sm:$0xff] %vm5443_vm0, %v5425_v39  ;;  %v5426_v60 = vmul.f32 0.5, %v5394_v43  ;;  %v5335_v11 = vmul.f32 0.5, %v5269_v30  ;;  %v5272_v50 = vadd.f32 %v10490_v54, %v5271_v36 }
 0x72a   : > { %5456 = vst.msk [vmem:[%s10504_s13 + $0x60] sm:$0xff] %vm5443_vm0, %v5423_v12  ;;  %v5424_v32 = vmul.f32 0.5, %v5392_v4  ;;  %6887 = vtanh.f32 %v5337_v56  ;;  %v5338_v1 = vmul.f32 0.5, %v5280_v20 }
 0x72b   : > { %5459 = vst.msk [vmem:[%s10504_s13 + $0x78] sm:$0xff] %vm5443_vm0, %v5426_v60  ;;  %6889 = vtanh.f32 %v5335_v11  ;;  %v5336_v0 = vmul.f32 0.5, %v5272_v50 }
 0x72c   : > { %v6880_v27 = vpop.eup %6879  ;;  %5457 = vst.msk [vmem:[%s10504_s13 + $0x68] sm:$0xff] %vm5443_vm0, %v5424_v32  ;;  %6891 = vtanh.f32 %v5338_v1 }
 0x72d   : > { %v6882_v7 = vpop.eup %6881  ;;  %v5397_v10 = vadd.f32 1.0, %v6880_v27  ;;  %6893 = vtanh.f32 %v5336_v0  ;;  %v6405_v24 = vpop.f32.mrb[56].mxu1 }
 0x72e   : > { %v6884_v49 = vpop.eup %6883  ;;  %v5395_v15 = vadd.f32 1.0, %v6882_v7  ;;  %v5293_v46 = vadd.f32 %v6405_v24, %v10490_v54  ;;  %v5284_v45 = vpop.f32.mrb[57].mxu1 }
 0x72f   : > { %v6886_v13 = vpop.eup %6885  ;;  %v5429_v2 = vmul.f32 0.5, %v5397_v10  ;;  %v5398_v58 = vadd.f32 1.0, %v6884_v49  ;;  %v5285_v16 = vadd.f32 %v10490_v54, %v5284_v45  ;;  %v6406_v22 = vpop.f32.mrb[58].mxu1 }
 0x730   : > { %v5427_v38 = vmul.f32 0.5, %v5395_v15  ;;  %v5396_v47 = vadd.f32 1.0, %v6886_v13  ;;  %v5341_v37 = vmul.f32 0.5, %v5293_v46  ;;  %v5296_v33 = vadd.f32 %v6406_v22, %v10490_v54  ;;  %v5287_v42 = vpop.f32.mrb[59].mxu1 }
 0x731   : > { %5462 = vst.msk [vmem:[%s10504_s13 + $0x90] sm:$0xff] %vm5443_vm0, %v5429_v2  ;;  %v5430_v17 = vmul.f32 0.5, %v5398_v58  ;;  %v5339_v53 = vmul.f32 0.5, %v5285_v16  ;;  %v5288_v3 = vadd.f32 %v10490_v54, %v5287_v42 }
 0x732   : > { %5460 = vst.msk [vmem:[%s10504_s13 + $0x80] sm:$0xff] %vm5443_vm0, %v5427_v38  ;;  %v5428_v48 = vmul.f32 0.5, %v5396_v47  ;;  %6895 = vtanh.f32 %v5341_v37  ;;  %v5342_v5 = vmul.f32 0.5, %v5296_v33 }
 0x733   : > { %5463 = vst.msk [vmem:[%s10504_s13 + $0x98] sm:$0xff] %vm5443_vm0, %v5430_v17  ;;  %6897 = vtanh.f32 %v5339_v53  ;;  %v5340_v34 = vmul.f32 0.5, %v5288_v3 }
 0x734   : > { %v6888_v28 = vpop.eup %6887  ;;  %5461 = vst.msk [vmem:[%s10504_s13 + $0x88] sm:$0xff] %vm5443_vm0, %v5428_v48  ;;  %6899 = vtanh.f32 %v5342_v5 }
 0x735   : > { %v6890_v18 = vpop.eup %6889  ;;  %v5401_v23 = vadd.f32 1.0, %v6888_v28  ;;  %6901 = vtanh.f32 %v5340_v34  ;;  %v6409_v35 = vpop.f32.mrb[60].mxu1 }
 0x736   : > { %v6892_v31 = vpop.eup %6891  ;;  %v5399_v51 = vadd.f32 1.0, %v6890_v18  ;;  %v5309_v63 = vadd.f32 %v6409_v35, %v10490_v54  ;;  %v5300_v25 = vpop.f32.mrb[61].mxu1 }
 0x737   : > { %v6894_v52 = vpop.eup %6893  ;;  %v5433_v57 = vmul.f32 0.5, %v5401_v23  ;;  %v5402_v8 = vadd.f32 1.0, %v6892_v31  ;;  %v5301_v40 = vadd.f32 %v10490_v54, %v5300_v25  ;;  %v6410_v9 = vpop.f32.mrb[62].mxu1 }
 0x738   : > { %v5431_v62 = vmul.f32 0.5, %v5399_v51  ;;  %v5400_v61 = vadd.f32 1.0, %v6894_v52  ;;  %v5345_v26 = vmul.f32 0.5, %v5309_v63  ;;  %v5312_v14 = vadd.f32 %v6410_v9, %v10490_v54  ;;  %v5303_v41 = vpop.f32.mrb[63].mxu1 }
 0x739   : > { %5466 = vst.msk [vmem:[%s10504_s13 + $0xb0] sm:$0xff] %vm5443_vm0, %v5433_v57  ;;  %v5434_v6 = vmul.f32 0.5, %v5402_v8  ;;  %v5343_v19 = vmul.f32 0.5, %v5301_v40  ;;  %v5304_v21 = vadd.f32 %v10490_v54, %v5303_v41 }
 0x73a   : > { %5464 = vst.msk [vmem:[%s10504_s13 + $0xa0] sm:$0xff] %vm5443_vm0, %v5431_v62  ;;  %v5432_v44 = vmul.f32 0.5, %v5400_v61  ;;  %6903 = vtanh.f32 %v5345_v26  ;;  %v5346_v55 = vmul.f32 0.5, %v5312_v14 }
 0x73b   : > { %5467 = vst.msk [vmem:[%s10504_s13 + $0xb8] sm:$0xff] %vm5443_vm0, %v5434_v6  ;;  %6905 = vtanh.f32 %v5343_v19  ;;  %v5344_v29 = vmul.f32 0.5, %v5304_v21 }
 0x73c   : > { %v6896_v39 = vpop.eup %6895  ;;  %5465 = vst.msk [vmem:[%s10504_s13 + $0xa8] sm:$0xff] %vm5443_vm0, %v5432_v44  ;;  %6907 = vtanh.f32 %v5346_v55 }
 0x73d   : > { %v6898_v43 = vpop.eup %6897  ;;  %v5405_v30 = vadd.f32 1.0, %v6896_v39  ;;  %6909 = vtanh.f32 %v5344_v29 }
 0x73e   : > { %v6900_v54 = vpop.eup %6899  ;;  %v5403_v59 = vadd.f32 1.0, %v6898_v43 }
 0x73f   : > { %v6902_v12 = vpop.eup %6901  ;;  %v5437_v4 = vmul.f32 0.5, %v5405_v30  ;;  %v5406_v56 = vadd.f32 1.0, %v6900_v54 }
 0x740   : > { %v5435_v20 = vmul.f32 0.5, %v5403_v59  ;;  %v5404_v36 = vadd.f32 1.0, %v6902_v12 }
 0x741   : > { %5470 = vst.msk [vmem:[%s10504_s13 + $0xd0] sm:$0xff] %vm5443_vm0, %v5437_v4  ;;  %v5438_v60 = vmul.f32 0.5, %v5406_v56 }
 0x742   : > { %5468 = vst.msk [vmem:[%s10504_s13 + $0xc0] sm:$0xff] %vm5443_vm0, %v5435_v20  ;;  %v5436_v11 = vmul.f32 0.5, %v5404_v36 }
 0x743   : > { %5471 = vst.msk [vmem:[%s10504_s13 + $0xd8] sm:$0xff] %vm5443_vm0, %v5438_v60 }
 0x744   : > { %v6904_v50 = vpop.eup %6903  ;;  %5469 = vst.msk [vmem:[%s10504_s13 + $0xc8] sm:$0xff] %vm5443_vm0, %v5436_v11 }
 0x745   : > { %v6906_v32 = vpop.eup %6905  ;;  %v5409_v1 = vadd.f32 1.0, %v6904_v50 }
 0x746   : > { %v6908_v0 = vpop.eup %6907  ;;  %v5407_v27 = vadd.f32 1.0, %v6906_v32  ;;  %5482 = sbr.rel (!%p7089_p4) target bundleno = 1925 (0x785), region = 64 }
 0x747   : > { %v6910_v7 = vpop.eup %6909  ;;  %v5441_v10 = vmul.f32 0.5, %v5409_v1  ;;  %v5410_v24 = vadd.f32 1.0, %v6908_v0 }
 0x748   : > { %v5439_v49 = vmul.f32 0.5, %v5407_v27  ;;  %v5408_v15 = vadd.f32 1.0, %v6910_v7 }
 0x749   : > { %5474 = vst.msk [vmem:[%s10504_s13 + $0xf0] sm:$0xff] %vm5443_vm0, %v5441_v10  ;;  %v5442_v46 = vmul.f32 0.5, %v5410_v24 }
 0x74a   : > { %5472 = vst.msk [vmem:[%s10504_s13 + $0xe0] sm:$0xff] %vm5443_vm0, %v5439_v49  ;;  %v5440_v45 = vmul.f32 0.5, %v5408_v15 }
 0x74b   : > { %5475 = vst.msk [vmem:[%s10504_s13 + $0xf8] sm:$0xff] %vm5443_vm0, %v5442_v46 }
 0x74c   : > { %5473 = vst.msk [vmem:[%s10504_s13 + $0xe8] sm:$0xff] %vm5443_vm0, %v5440_v45 }
 0x74d   : > { %s11260_s22 = smov (!%p5485_p8, %s5484_s22), 32 }
 0x74e   : > { %s6039_s28 = sshll.u32 %s11260_s22, 7 }
 0x74f   : > { %p6042_p9 = scmp.eq.s32.totalorder %s6039_s28, 0 }
 0x750   : > { %s10604_s29 = sshrl.u32 (!%p6042_p9), %s11260_s22, 5 }
 0x751   : > { %5493 = sbr.rel (%p6042_p9) target bundleno = 1925 (0x785), region = 68  ;;  %p6043_p10 = scmp.le.s32.totalorder (!%p6042_p9), %s10604_s29, 0 }
 0x758   : > { %5771 = sbr.rel (%p6043_p10) target bundleno = 1904 (0x770), region = 144  ;;  %s11251_s16 = smov (!%p6043_p10), %s10598_s27 }
 0x759   : > { %s11252_s21 = smov (!%p6043_p10), %s10504_s13  ;;  %s10613_s24 = smov (!%p6043_p10), 0  }
 0x75a   : > { %s10615_s30 = smov (!%p6043_p10), 0  }
 0x75f LB: >> { %v5617_v13 = vld [vmem:[%s6977_s21] sm:$0xff]  ;;  %v5619_v2 = vld [vmem:[%s6977_s21 + $0x8] sm:$0xff]  ;;  %v5621_v58 = vld [vmem:[%s6977_s21 + $0x10] sm:$0xff]  ;;  %s5681_s11 = sadd.s32 1, %s6981_s24  ;;  %s5611_s30 = sadd.s32 1, %s6985_s30   ;;  %s6985_s30 = sphi %s10615_s30, %s5611_s30   ;;  %s6981_s24 = sphi %s10613_s24, %s11255_s24   ;;  %s6977_s21 = sphi %s11252_s21, %s11254_s21   ;;  %s6973_s16 = sphi %s11251_s16, %s11253_s16  }
 0x760   : >> { %5618 = vst [vmem:[%s6973_s16] sm:$0xff] %v5617_v13  ;;  %5620 = vst [vmem:[%s6973_s16 + $0x8] sm:$0xff] %v5619_v2  ;;  %v5623_v16 = vld [vmem:[%s6977_s21 + $0x18] sm:$0xff]  ;;  %v5625_v22 = vld [vmem:[%s6977_s21 + $0x20] sm:$0xff]  ;;  %p5682_p11 = scmp.ge.s32.totalorder %s5681_s11, %s10604_s29  ;;  %p5610_p12 = scmp.ge.s32.totalorder %s5611_s30, %s10604_s29 }
 0x761   : >> { %5622 = vst [vmem:[%s6973_s16 + $0x10] sm:$0xff] %v5621_v58  ;;  %v5627_v38 = vld [vmem:[%s6977_s21 + $0x28] sm:$0xff]  ;;  %5624 = vst [vmem:[%s6973_s16 + $0x18] sm:$0xff] %v5623_v16  ;;  %v5629_v47 = vld [vmem:[%s6977_s21 + $0x30] sm:$0xff] }
 0x762   : >> { %5626 = vst [vmem:[%s6973_s16 + $0x20] sm:$0xff] %v5625_v22  ;;  %5628 = vst [vmem:[%s6973_s16 + $0x28] sm:$0xff] %v5627_v38  ;;  %v5631_v37 = vld [vmem:[%s6977_s21 + $0x38] sm:$0xff]  ;;  %v5633_v33 = vld [vmem:[%s6977_s21 + $0x40] sm:$0xff]  ;;  %s11262_s11 = smov (%p5682_p11, %s5681_s11), 0 }
 0x763   : >> { %5630 = vst [vmem:[%s6973_s16 + $0x30] sm:$0xff] %v5629_v47  ;;  %5632 = vst [vmem:[%s6973_s16 + $0x38] sm:$0xff] %v5631_v37  ;;  %v5635_v42 = vld [vmem:[%s6977_s21 + $0x48] sm:$0xff]  ;;  %v5637_v17 = vld [vmem:[%s6977_s21 + $0x50] sm:$0xff]  ;;  %s6044_s12 = sshll.u32 %s11262_s11, 8  ;;  %s11255_s24 = smov %s11262_s11 }
 0x764   : >> { %5634 = vst [vmem:[%s6973_s16 + $0x40] sm:$0xff] %v5633_v33  ;;  %v5639_v53 = vld [vmem:[%s6977_s21 + $0x58] sm:$0xff]  ;;  %5636 = vst [vmem:[%s6973_s16 + $0x48] sm:$0xff] %v5635_v42  ;;  %v5641_v3 = vld [vmem:[%s6977_s21 + $0x60] sm:$0xff]  ;;  %s10671_s15 = scalar_lea.vmem %s10504_s13, %s6044_s12 [#allocation2]   ;;  %s5687_s18 = scalar_lea.vmem %s10598_s27, %s6044_s12  }
 0x765   : >> { %5638 = vst [vmem:[%s6973_s16 + $0x50] sm:$0xff] %v5637_v17  ;;  %5640 = vst [vmem:[%s6973_s16 + $0x58] sm:$0xff] %v5639_v53  ;;  %v5643_v48 = vld [vmem:[%s6977_s21 + $0x68] sm:$0xff]  ;;  %v5645_v5 = vld [vmem:[%s6977_s21 + $0x70] sm:$0xff] }
 0x766   : >> { %5642 = vst [vmem:[%s6973_s16 + $0x60] sm:$0xff] %v5641_v3  ;;  %5644 = vst [vmem:[%s6973_s16 + $0x68] sm:$0xff] %v5643_v48  ;;  %v5647_v34 = vld [vmem:[%s6977_s21 + $0x78] sm:$0xff]  ;;  %v5649_v28 = vld [vmem:[%s6977_s21 + $0x80] sm:$0xff] }
 0x767   : >> { %5646 = vst [vmem:[%s6973_s16 + $0x70] sm:$0xff] %v5645_v5  ;;  %v5651_v18 = vld [vmem:[%s6977_s21 + $0x88] sm:$0xff]  ;;  %5648 = vst [vmem:[%s6973_s16 + $0x78] sm:$0xff] %v5647_v34  ;;  %v5653_v23 = vld [vmem:[%s6977_s21 + $0x90] sm:$0xff] }
 0x768   : >> { %5650 = vst [vmem:[%s6973_s16 + $0x80] sm:$0xff] %v5649_v28  ;;  %5652 = vst [vmem:[%s6973_s16 + $0x88] sm:$0xff] %v5651_v18  ;;  %v5655_v35 = vld [vmem:[%s6977_s21 + $0x98] sm:$0xff]  ;;  %v5657_v31 = vld [vmem:[%s6977_s21 + $0xa0] sm:$0xff] }
 0x769   : >> { %5654 = vst [vmem:[%s6973_s16 + $0x90] sm:$0xff] %v5653_v23  ;;  %5656 = vst [vmem:[%s6973_s16 + $0x98] sm:$0xff] %v5655_v35  ;;  %v5659_v51 = vld [vmem:[%s6977_s21 + $0xa8] sm:$0xff]  ;;  %v5661_v63 = vld [vmem:[%s6977_s21 + $0xb0] sm:$0xff]  ;;  %5613 = sbr.rel (!%p5610_p12) target bundleno = 1887 (0x75f), region = 150 }
 0x76a   : >> { %5658 = vst [vmem:[%s6973_s16 + $0xa0] sm:$0xff] %v5657_v31  ;;  %v5663_v25 = vld [vmem:[%s6977_s21 + $0xb8] sm:$0xff]  ;;  %5660 = vst [vmem:[%s6973_s16 + $0xa8] sm:$0xff] %v5659_v51  ;;  %v5665_v52 = vld [vmem:[%s6977_s21 + $0xc0] sm:$0xff] }
 0x76b   : >> { %5662 = vst [vmem:[%s6973_s16 + $0xb0] sm:$0xff] %v5661_v63  ;;  %5664 = vst [vmem:[%s6973_s16 + $0xb8] sm:$0xff] %v5663_v25  ;;  %v5667_v57 = vld [vmem:[%s6977_s21 + $0xc8] sm:$0xff]  ;;  %v5669_v8 = vld [vmem:[%s6977_s21 + $0xd0] sm:$0xff] }
 0x76c   : >> { %5666 = vst [vmem:[%s6973_s16 + $0xc0] sm:$0xff] %v5665_v52  ;;  %5668 = vst [vmem:[%s6973_s16 + $0xc8] sm:$0xff] %v5667_v57  ;;  %v5671_v40 = vld [vmem:[%s6977_s21 + $0xd8] sm:$0xff]  ;;  %v5673_v9 = vld [vmem:[%s6977_s21 + $0xe0] sm:$0xff] }
 0x76d   : >> { %5670 = vst [vmem:[%s6973_s16 + $0xd0] sm:$0xff] %v5669_v8  ;;  %v5675_v62 = vld [vmem:[%s6977_s21 + $0xe8] sm:$0xff]  ;;  %5672 = vst [vmem:[%s6973_s16 + $0xd8] sm:$0xff] %v5671_v40  ;;  %v5677_v61 = vld [vmem:[%s6977_s21 + $0xf0] sm:$0xff] }
 0x76e   : >> { %5674 = vst [vmem:[%s6973_s16 + $0xe0] sm:$0xff] %v5673_v9  ;;  %5676 = vst [vmem:[%s6973_s16 + $0xe8] sm:$0xff] %v5675_v62  ;;  %v5679_v26 = vld [vmem:[%s6977_s21 + $0xf8] sm:$0xff]  ;;  %s11254_s21 = smov %s10671_s15 }
 0x76f   : >> { %5678 = vst [vmem:[%s6973_s16 + $0xf0] sm:$0xff] %v5677_v61  ;;  %5680 = vst [vmem:[%s6973_s16 + $0xf8] sm:$0xff] %v5679_v26  ;;  %s11253_s16 = smov %s5687_s18 }
 0x770 PF: > { %s10712_s19 = sand.u32 31, %s11260_s22   ;;  %s6055_s23 = sshll.u32 %s10604_s29, 8 }
 0x771   : > { %s5692_s25 = scalar_lea.vmem %s10504_s13, %s6055_s23 [#allocation2]   ;;  %s5694_s26 = scalar_lea.vmem %s10598_s27, %s6055_s23  }
 0x772   : > { %p6049_p13 = scmp.le.s32.totalorder %s10712_s19, 0 }
 0x773   : > { %s6987_s28 = smov (!%p6049_p13), %s5694_s26   ;;  %s6991_s12 = smov (!%p6049_p13), %s5692_s25  }
 0x774   : > { %5785 = sbr.rel (%p6049_p13) target bundleno = 1925 (0x785), region = 155  ;;  %s6995_s15 = smov (!%p6049_p13), 0  }
 0x775   : > { %s6999_s11 = smov (!%p6049_p13), 0  }
 0x77b LB: >> { %v5704_v14 = vld [vmem:[%s6993_s12] sm:$0xff]  ;;  %s5706_s22 = sadd.s32 1, %s6997_s15  ;;  %s5698_s11 = sadd.s32 1, %s7001_s11   ;;  %s7001_s11 = sphi %s6999_s11, %s5698_s11   ;;  %s6997_s15 = sphi %s6995_s15, %s6996_s15   ;;  %s6993_s12 = sphi %s6991_s12, %s5711_s12   ;;  %s6989_s28 = sphi %s6987_s28, %s5712_s28  }
 0x77c   : >> { %5705 = vst [vmem:[%s6989_s28] sm:$0xff] %v5704_v14  ;;  %p5707_p0 = scmp.ge.s32.totalorder %s5706_s22, %s10712_s19  ;;  %p5697_p1 = scmp.ge.s32.totalorder %s5698_s11, %s10712_s19 }
 0x77e   : >> { %s11264_s22 = smov (%p5707_p0, %s5706_s22), 0  ;;  %5700 = sbr.rel (!%p5697_p1) target bundleno = 1915 (0x77b), region = 161 }
 0x77f   : >> { %s6050_s13 = sshll.u32 %s11264_s22, 3  ;;  %s6996_s15 = smov %s11264_s22  }
 0x780   : >> { %s5711_s12 = scalar_lea.vmem %s5692_s25, %s6050_s13 [#allocation2]   ;;  %s5712_s28 = scalar_lea.vmem %s5694_s26, %s6050_s13  }
 0x785 PF: > { %p17_p2 = scmp.ge.s32.totalorder %s7079_s17, 6   ;;  %s11256_s13 = smov %s6965_s14 }
 0x786   : > { %s11257_s14 = smov %s7087_s20  ;;  %s11258_s15 = smov %s7079_s17 }
 0x787   :  { %19 = sbr.rel (!%p17_p2) target bundleno = 2 (0x2), region = 172 }

</bundles_post_ra>
